<compile_context>
chip_gen: v7x
topology: tpu7x:2x2x1
jax: 0.10.0
libtpu: 0.0.40
codegen_flags: <defaults>
</compile_context>

<pallas_src>
import functools

import jax
import jax.numpy as jnp
from jax.experimental import pallas as pl


# ----------------------------------------------------------------------------
# Pallas kernels
# ----------------------------------------------------------------------------
def _fullblock(shape):
    """Single-block BlockSpec (grid=(1,)) covering the whole array."""
    zeros = (0,) * len(shape)
    return pl.BlockSpec(shape, lambda i, z=zeros: z)


def _conv_bn_kernel(wt_ref, at_ref, g_ref, b_ref, o_ref, *, relu):
    """out = BN( Wt @ At ) [+ReLU]; Wt:(Cout,K), At:(K,M), stats over M pixels."""
    acc = jnp.dot(wt_ref[...], at_ref[...], preferred_element_type=jnp.float32)
    m = jnp.mean(acc, axis=1, keepdims=True)
    d = acc - m
    v = jnp.mean(d * d, axis=1, keepdims=True)          # biased var (PyTorch train BN)
    y = d * (g_ref[...] * jax.lax.rsqrt(v + 1e-5)) + b_ref[...]
    if relu:
        y = jnp.maximum(y, 0.0)
    o_ref[...] = y


def _deconv_bn_core(bw, at, q, g4, b4, relu):
    """Stacked 4-parity ConvTranspose GEMM + BN(+ReLU).

    bw : (4*Cout, 4*Cin) sub-pixel weight matrix (row block p = output parity p)
    at : (4*Cin, M)      shared shifted-input matrix, M = N*H*W (input resolution)
    q  : (4*Cout, 4*Cout) = tile(eye(Cout),(4,4)) — pools stats across parities
    g4, b4 : (4*Cout, 1) gamma/beta tiled over the 4 parity blocks
    """
    acc = jnp.dot(bw, at, preferred_element_type=jnp.float32)          # (4C, M)
    inv_n = 1.0 / (4.0 * acc.shape[1])                                  # pixels/channel
    s1 = jnp.sum(acc, axis=1, keepdims=True)                            # (4C, 1)
    mean4 = jnp.dot(q, s1, preferred_element_type=jnp.float32) * inv_n  # per-channel mean
    d = acc - mean4
    sq = jnp.sum(d * d, axis=1, keepdims=True)
    var4 = jnp.dot(q, sq, preferred_element_type=jnp.float32) * inv_n
    y = d * (g4 * jax.lax.rsqrt(var4 + 1e-5)) + b4
    if relu:
        y = jnp.maximum(y, 0.0)
    return y


def _deconv_bn_kernel(bw_ref, at_ref, q_ref, g4_ref, b4_ref, o_ref, *, relu):
    o_ref[...] = _deconv_bn_core(bw_ref[...], at_ref[...], q_ref[...],
                                 g4_ref[...], b4_ref[...], relu)


def _deconv_bn_final_kernel(bw_ref, at_ref, q_ref, g4_ref, b4_ref, x_ref, o_ref):
    """up1: decoder block + fused  tanh*0.5+0.5 + x, clamp(0,1)  epilogue."""
    y = _deconv_bn_core(bw_ref[...], at_ref[...], q_ref[...],
                        g4_ref[...], b4_ref[...], True)
    y = jnp.tanh(y) * 0.5 + 0.5 + x_ref[...]
    o_ref[...] = jnp.clip(y, 0.0, 1.0)


def _mlp_kernel(h_ref, c_ref, z_ref, w1_ref, b1_ref,
                g1h_ref, g1c_ref, g1z_ref, be1h_ref, be1c_ref, be1z_ref,
                w2h_ref, w2c_ref, w2z_ref, g2_ref, be2_ref,
                w3_ref, g3_ref, be3_ref, w4_ref, g4_ref, be4_ref, o_ref):
    """linear1+sigmoid, Bn1+ReLU, linear2, Bn2+ReLU, linear3, Bn3+ReLU,
    linear4, Bn4+ReLU — one kernel.  The cat([h,c,noise]) is realized as a
    split matmul (per-segment BN stats are identical to BN on the concat)."""
    def bn_relu(x, g, b, relu=True):
        m = jnp.mean(x, axis=0, keepdims=True)           # stats over batch
        d = x - m
        v = jnp.mean(d * d, axis=0, keepdims=True)
        y = d * (g * jax.lax.rsqrt(v + 1e-5)) + b
        return jnp.maximum(y, 0.0) if relu else y

    h1 = jnp.dot(h_ref[...], w1_ref[...], preferred_element_type=jnp.float32) + b1_ref[...]
    h1 = jax.nn.sigmoid(h1)                               # (N,16)

    ah = bn_relu(h1, g1h_ref[...], be1h_ref[...])         # Bn1 (+ReLU before linear2)
    ac = bn_relu(c_ref[...], g1c_ref[...], be1c_ref[...])
    az = bn_relu(z_ref[...], g1z_ref[...], be1z_ref[...])
    h2 = (jnp.dot(ah, w2h_ref[...], preferred_element_type=jnp.float32)
          + jnp.dot(ac, w2c_ref[...], preferred_element_type=jnp.float32)
          + jnp.dot(az, w2z_ref[...], preferred_element_type=jnp.float32))
    h2 = bn_relu(h2, g2_ref[...], be2_ref[...])           # Bn2 (+ReLU before linear3)
    h3 = jnp.dot(h2, w3_ref[...], preferred_element_type=jnp.float32)
    h3 = bn_relu(h3, g3_ref[...], be3_ref[...])           # Bn3 (+ReLU before linear4)
    h4 = jnp.dot(h3, w4_ref[...], preferred_element_type=jnp.float32)
    o_ref[...] = bn_relu(h4, g4_ref[...], be4_ref[...])   # Bn4 (+ReLU before bottomB)


# ----------------------------------------------------------------------------
# pallas_call wrappers (single block, grid=(1,) — everything fits VMEM)
# ----------------------------------------------------------------------------
def conv_bn(wt, at, g, b, *, relu):
    cout = wt.shape[0]
    M = at.shape[1]
    return pl.pallas_call(
        functools.partial(_conv_bn_kernel, relu=relu),
        out_shape=jax.ShapeDtypeStruct((cout, M), jnp.float32),
        grid=(1,),
        in_specs=[_fullblock(wt.shape), _fullblock(at.shape),
                  _fullblock(g.shape), _fullblock(b.shape)],
        out_specs=_fullblock((cout, M)),
    )(wt, at, g, b)


def deconv_bn(bw, at, q, g4, b4, *, x_par=None, relu=True):
    c4 = bw.shape[0]
    M = at.shape[1]
    args = [bw, at, q, g4, b4]
    if x_par is None:
        kern = functools.partial(_deconv_bn_kernel, relu=relu)
    else:
        args.append(x_par)
        kern = _deconv_bn_final_kernel
    return pl.pallas_call(
        kern,
        out_shape=jax.ShapeDtypeStruct((c4, M), jnp.float32),
        grid=(1,),
        in_specs=[_fullblock(a.shape) for a in args],
        out_specs=_fullblock((c4, M)),
    )(*args)


def mlp_head(mp, h, c, noise):
    N = h.shape[0]
    args = [h, c, noise, mp["w1"], mp["b1"],
            mp["g1h"], mp["g1c"], mp["g1z"], mp["be1h"], mp["be1c"], mp["be1z"],
            mp["w2h"], mp["w2c"], mp["w2z"], mp["g2"], mp["be2"],
            mp["w3"], mp["g3"], mp["be3"], mp["w4"], mp["g4"], mp["be4"]]
    return pl.pallas_call(
        _mlp_kernel,
        out_shape=jax.ShapeDtypeStruct((N, 1024), jnp.float32),
        grid=(1,),
        in_specs=[_fullblock(a.shape) for a in args],
        out_specs=_fullblock((N, 1024)),
    )(*args)


# ----------------------------------------------------------------------------
# XLA glue: tap / parity packing on activations (layout: (C, N, H, W))
# ----------------------------------------------------------------------------
def conv3x3_taps(x, stride):
    """x: (C,N,H,W), 3x3 conv, padding=1 -> At (9C, N*Ho*Wo), tap-major K order."""
    C, N, H, W = x.shape
    Ho = (H + 2 - 3) // stride + 1
    Wo = (W + 2 - 3) // stride + 1
    xp = jnp.pad(x, ((0, 0), (0, 0), (1, 1), (1, 1)))
    taps = []
    for ki in range(3):
        for kj in range(3):
            taps.append(xp[:, :, ki:ki + (Ho - 1) * stride + 1:stride,
                              kj:kj + (Wo - 1) * stride + 1:stride])
    at = jnp.concatenate(taps, axis=0).reshape(9 * C, N * Ho * Wo)
    return at, (Ho, Wo)


def deconv_taps(x):
    """x: (C,N,H,W) -> (4C, N*H*W); blocks [x(h,w), x(h,w+1), x(h+1,w), x(h+1,w+1)]."""
    C, N, H, W = x.shape
    xp = jnp.pad(x, ((0, 0), (0, 0), (0, 1), (0, 1)))
    s00 = xp[:, :, 0:H, 0:W]
    s01 = xp[:, :, 0:H, 1:W + 1]
    s10 = xp[:, :, 1:H + 1, 0:W]
    s11 = xp[:, :, 1:H + 1, 1:W + 1]
    return jnp.concatenate([s00, s01, s10, s11], axis=0).reshape(4 * C, N * H * W)


def parity_merge(y, cout, N, H, W):
    """y: (4*Cout, N*H*W) parity-stacked -> (Cout, N, 2H, 2W)."""
    r = y.reshape(2, 2, cout, N, H, W)                 # (dy, dx, c, n, h, w)
    r = jnp.transpose(r, (2, 3, 4, 0, 5, 1))           # (c, n, h, dy, w, dx)
    return r.reshape(cout, N, 2 * H, 2 * W)


# ----------------------------------------------------------------------------
# Parameters (PyTorch layouts) + one-time repacking into kernel layouts
# ----------------------------------------------------------------------------
def init_params(key):
    ks = iter(jax.random.split(key, 16))

    def conv_w(cout, cin):       # nn.Conv2d weight: (Cout, Cin, 3, 3)
        return 0.1 * jax.random.normal(next(ks), (cout, cin, 3, 3), jnp.float32)

    def dconv_w(cin, cout):      # nn.ConvTranspose2d weight: (Cin, Cout, 3, 3)
        return 0.1 * jax.random.normal(next(ks), (cin, cout, 3, 3), jnp.float32)

    def lin_w(cin, cout):        # stored as (in, out)
        return 0.1 * jax.random.normal(next(ks), (cin, cout), jnp.float32)

    def bn(c):
        return {"gamma": jnp.ones((c,), jnp.float32), "beta": jnp.zeros((c,), jnp.float32)}

    # Conv / ConvTranspose biases (and linear2-4 biases) are omitted: every one of
    # them feeds a training-mode BatchNorm whose mean subtraction cancels the bias
    # exactly, so the forward output is identical.
    p = {}
    p["down1"] = {"w": conv_w(16, 1), **bn(16)}
    p["down2"] = {"w": conv_w(32, 16), **bn(32)}
    p["down3"] = {"w": conv_w(64, 32), **bn(64)}
    p["bottomA"] = {"w": conv_w(64, 64), **bn(64)}
    p["bottomB"] = {"w": conv_w(64, 64), **bn(64)}
    p["up3"] = {"w": dconv_w(128, 32), **bn(32)}
    p["up2"] = {"w": dconv_w(64, 16), **bn(16)}
    p["up1"] = {"w": dconv_w(32, 1), **bn(1)}
    p["linear1"] = {"w": lin_w(1024, 16),
                    "b": 0.01 * jax.random.normal(next(ks), (16,), jnp.float32)}
    p["linear2"] = {"w": lin_w(34, 32)}
    p["linear3"] = {"w": lin_w(32, 128)}
    p["linear4"] = {"w": lin_w(128, 1024)}
    p["Bn1"] = bn(34)
    p["Bn2"] = bn(32)
    p["Bn3"] = bn(128)
    p["Bn4"] = bn(1024)
    return p


def _deconv_weight_matrix(w):
    """PyTorch ConvTranspose2d weight (Cin,Cout,3,3) -> stacked sub-pixel matrix
    (4*Cout, 4*Cin) matching the tap order of deconv_taps (exact PyTorch
    stride=2, pad=1, output_padding=1 equivalence — no spatial flip needed)."""
    cin, cout = w.shape[0], w.shape[1]

    def blk(ky, kx):
        return jnp.transpose(w[:, :, ky, kx], (1, 0))   # (Cout, Cin)

    z = jnp.zeros((cout, cin), w.dtype)
    rows = [
        jnp.concatenate([blk(1, 1), z,         z,         z],         axis=1),  # (even,even)
        jnp.concatenate([blk(1, 2), blk(1, 0), z,         z],         axis=1),  # (even,odd)
        jnp.concatenate([blk(2, 1), z,         blk(0, 1), z],         axis=1),  # (odd,even)
        jnp.concatenate([blk(2, 2), blk(2, 0), blk(0, 2), blk(0, 0)], axis=1),  # (odd,odd)
    ]
    return jnp.concatenate(rows, axis=0)


def prepare_params(params):
    """One-time repack of PyTorch-layout params into the GEMM layouts."""
    prep = {}
    for name in ["down1", "down2", "down3", "bottomA", "bottomB"]:
        w = params[name]["w"]
        cout, cin = w.shape[0], w.shape[1]
        prep[name] = {
            "wt": jnp.transpose(w, (0, 2, 3, 1)).reshape(cout, 9 * cin),  # (Cout, 9Cin)
            "g": params[name]["gamma"].reshape(cout, 1),
            "b": params[name]["beta"].reshape(cout, 1),
        }
    for name in ["up3", "up2", "up1"]:
        w = params[name]["w"]
        cout = w.shape[1]
        prep[name] = {
            "bw": _deconv_weight_matrix(w),                               # (4Cout, 4Cin)
            "q": jnp.tile(jnp.eye(cout, dtype=jnp.float32), (4, 4)),      # parity pooling
            "g4": jnp.tile(params[name]["gamma"].reshape(cout, 1), (4, 1)),
            "b4": jnp.tile(params[name]["beta"].reshape(cout, 1), (4, 1)),
        }
    g1 = params["Bn1"]["gamma"]
    be1 = params["Bn1"]["beta"]
    w2 = params["linear2"]["w"]
    prep["mlp"] = {
        "w1": params["linear1"]["w"], "b1": params["linear1"]["b"].reshape(1, 16),
        "g1h": g1[0:16].reshape(1, 16), "g1c": g1[16:26].reshape(1, 10),
        "g1z": g1[26:34].reshape(1, 8),
        "be1h": be1[0:16].reshape(1, 16), "be1c": be1[16:26].reshape(1, 10),
        "be1z": be1[26:34].reshape(1, 8),
        "w2h": w2[0:16, :], "w2c": w2[16:26, :], "w2z": w2[26:34, :],
        "g2": params["Bn2"]["gamma"].reshape(1, 32), "be2": params["Bn2"]["beta"].reshape(1, 32),
        "w3": params["linear3"]["w"],
        "g3": params["Bn3"]["gamma"].reshape(1, 128), "be3": params["Bn3"]["beta"].reshape(1, 128),
        "w4": params["linear4"]["w"],
        "g4": params["Bn4"]["gamma"].reshape(1, 1024), "be4": params["Bn4"]["beta"].reshape(1, 1024),
    }
    return prep


# ----------------------------------------------------------------------------
# Generator forward (9 fused pallas_calls)
# ----------------------------------------------------------------------------
def generator_forward(prep, x_nchw, c, noise):
    N = x_nchw.shape[0]
    x = jnp.transpose(x_nchw, (1, 0, 2, 3)).astype(jnp.float32)      # (1, N, 32, 32)

    def enc(name, inp, stride, relu):                                # conv + BN (+ReLU)
        p = prep[name]
        cout = p["wt"].shape[0]
        at, (Ho, Wo) = conv3x3_taps(inp, stride)
        y = conv_bn(p["wt"], at, p["g"], p["b"], relu=relu)
        return y.reshape(cout, inp.shape[1], Ho, Wo)

    x1 = enc("down1", x, 2, True)          # (16, N, 16, 16)
    x2 = enc("down2", x1, 2, True)         # (32, N,  8,  8)
    x3 = enc("down3", x2, 2, True)         # (64, N,  4,  4)
    # bottomA = conv+BN; the F.relu before linear1 is fused into its epilogue.
    hA = enc("bottomA", x3, 1, True)       # (64, N,  4,  4)

    # PyTorch .view(-1, 64*4*4): channels-first flatten (c, h, w).
    h = jnp.transpose(hA, (1, 0, 2, 3)).reshape(N, 64 * 4 * 4)
    h = mlp_head(prep["mlp"], h, c, noise)                           # (N, 1024), Bn4+ReLU applied
    hB_in = jnp.transpose(h.reshape(N, 64, 4, 4), (1, 0, 2, 3))      # (64, N, 4, 4)

    hB = enc("bottomB", hB_in, 1, False)   # conv + BN, no ReLU      # (64, N, 4, 4)

    def dec(name, inp, skip, x_par=None):                            # cat + convT + BN + ReLU
        p = prep[name]
        cout = p["g4"].shape[0] // 4
        z = jnp.concatenate([inp, skip], axis=0)                     # channel concat
        _, Nn, H, W = z.shape
        at = deconv_taps(z)
        y = deconv_bn(p["bw"], at, p["q"], p["g4"], p["b4"], x_par=x_par)
        return parity_merge(y, cout, Nn, H, W)

    u3 = dec("up3", hB, x3)                # (32, N,  8,  8)
    u2 = dec("up2", u3, x2)                # (16, N, 16, 16)

    # up1 fuses the final tanh*0.5+0.5 + x, clamp(0,1); x is pre-packed into the
    # same parity layout as the kernel output.
    Hh = x.shape[2] // 2
    x_par = jnp.transpose(x.reshape(1, N, Hh, 2, Hh, 2),
                          (3, 5, 0, 1, 2, 4)).reshape(4, N * Hh * Hh)
    u1 = dec("up1", u2, x1, x_par=x_par)   # (1, N, 32, 32)

    return jnp.transpose(u1, (1, 0, 2, 3))                           # (N, 1, 32, 32)


# ----------------------------------------------------------------------------
if __name__ == "__main__":
    key = jax.random.PRNGKey(0)
    kp, kx, kc, kn = jax.random.split(key, 4)

    params = init_params(kp)
    prep = prepare_params(params)

    N = 2
    x = jax.random.uniform(kx, (N, 1, 32, 32), jnp.float32)   # image in [0, 1]
    c = jax.random.uniform(kc, (N, 10), jnp.float32)          # condition vector
    noise = jax.random.normal(kn, (N, 8), jnp.float32)        # latent noise

    fwd = jax.jit(generator_forward)
    out = jax.block_until_ready(fwd(prep, x, c, noise))

    assert out.shape == (N, 1, 32, 32)
    assert bool(jnp.all(jnp.isfinite(out)))
    assert bool(jnp.all((out >= 0.0) & (out <= 1.0)))
    print("KERNEL_OK")
</pallas_src>

<mosaic_0001>
module attributes {stable_mosaic.version = 11 : i64} {
  func.func @_conv_bn_kernel(%arg0: i32, %arg1: memref<16x9xf32, #tpu.memory_space<vmem>>, %arg2: memref<9x512xf32, #tpu.memory_space<vmem>>, %arg3: memref<16x1xf32, #tpu.memory_space<vmem>>, %arg4: memref<16x1xf32, #tpu.memory_space<vmem>>, %arg5: memref<16x512xf32, #tpu.memory_space<vmem>>) attributes {dimension_semantics = [#tpu.dimension_semantics<arbitrary>], iteration_bounds = array<i64: 1>, scalar_prefetch = 0 : i64, scratch_operands = 0 : i64, tpu.core_type = #tpu.core_type<tc>, window_params = [{pipeline_mode = #tpu.pipeline_mode<synchronous>, transform_indices = @transform_0, window_bounds = array<i64: 16, 9>}, {pipeline_mode = #tpu.pipeline_mode<synchronous>, transform_indices = @transform_1, window_bounds = array<i64: 9, 512>}, {pipeline_mode = #tpu.pipeline_mode<synchronous>, transform_indices = @transform_2, window_bounds = array<i64: 16, 1>}, {pipeline_mode = #tpu.pipeline_mode<synchronous>, transform_indices = @transform_3, window_bounds = array<i64: 16, 1>}, {pipeline_mode = #tpu.pipeline_mode<synchronous>, transform_indices = @transform_4, window_bounds = array<i64: 16, 512>}]} {
    %c0 = arith.constant 0 : index
    %c0_0 = arith.constant 0 : index
    %0 = vector.load %arg1[%c0, %c0_0] : memref<16x9xf32, #tpu.memory_space<vmem>>, vector<16x9xf32>
    %c0_1 = arith.constant 0 : index
    %c0_2 = arith.constant 0 : index
    %1 = vector.load %arg2[%c0_1, %c0_2] : memref<9x512xf32, #tpu.memory_space<vmem>>, vector<9x512xf32>
    %cst = arith.constant dense<0.000000e+00> : vector<16x512xf32>
    %2 = tpu.matmul %0, %1, %cst {dimension_numbers = #tpu.dot_dimension_numbers<[1], [0], [0], [1], [0, 0, 1, 1], [], []>} : vector<16x9xf32>, vector<9x512xf32>, vector<16x512xf32> -> vector<16x512xf32>
    %cst_3 = arith.constant dense<0.000000e+00> : vector<16xf32>
    %3 = vector.multi_reduction <add>, %2, %cst_3 [1] : vector<16x512xf32> to vector<16xf32>
    %4 = vector.shape_cast %3 : vector<16xf32> to vector<16x1xf32>
    %cst_4 = arith.constant 5.120000e+02 : f32
    %5 = vector.broadcast %cst_4 : f32 to vector<16x1xf32>
    %6 = arith.divf %4, %5 : vector<16x1xf32>
    %7 = vector.broadcast %6 : vector<16x1xf32> to vector<16x512xf32>
    %8 = arith.subf %2, %7 : vector<16x512xf32>
    %9 = arith.mulf %8, %8 : vector<16x512xf32>
    %cst_5 = arith.constant dense<0.000000e+00> : vector<16xf32>
    %10 = vector.multi_reduction <add>, %9, %cst_5 [1] : vector<16x512xf32> to vector<16xf32>
    %11 = vector.shape_cast %10 : vector<16xf32> to vector<16x1xf32>
    %cst_6 = arith.constant 5.120000e+02 : f32
    %12 = vector.broadcast %cst_6 : f32 to vector<16x1xf32>
    %13 = arith.divf %11, %12 : vector<16x1xf32>
    %c0_7 = arith.constant 0 : index
    %c0_8 = arith.constant 0 : index
    %14 = vector.load %arg3[%c0_7, %c0_8] : memref<16x1xf32, #tpu.memory_space<vmem>>, vector<16x1xf32>
    %cst_9 = arith.constant 9.99999974E-6 : f32
    %15 = vector.broadcast %cst_9 : f32 to vector<16x1xf32>
    %16 = arith.addf %13, %15 : vector<16x1xf32>
    %17 = math.rsqrt %16 : vector<16x1xf32>
    %18 = arith.mulf %14, %17 : vector<16x1xf32>
    %19 = vector.broadcast %18 : vector<16x1xf32> to vector<16x512xf32>
    %20 = arith.mulf %8, %19 : vector<16x512xf32>
    %c0_10 = arith.constant 0 : index
    %c0_11 = arith.constant 0 : index
    %21 = vector.load %arg4[%c0_10, %c0_11] : memref<16x1xf32, #tpu.memory_space<vmem>>, vector<16x1xf32>
    %22 = vector.broadcast %21 : vector<16x1xf32> to vector<16x512xf32>
    %23 = arith.addf %20, %22 : vector<16x512xf32>
    %cst_12 = arith.constant 0.000000e+00 : f32
    %24 = vector.broadcast %cst_12 : f32 to vector<16x512xf32>
    %25 = arith.maximumf %23, %24 : vector<16x512xf32>
    %c0_13 = arith.constant 0 : index
    %c0_14 = arith.constant 0 : index
    %26 = vector.load %arg5[%c0_13, %c0_14] : memref<16x512xf32, #tpu.memory_space<vmem>>, vector<16x512xf32>
    tpu.vector_store %arg5[%c0_13, %c0_14], %25 {strides = array<i32>} : memref<16x512xf32, #tpu.memory_space<vmem>>, vector<16x512xf32>,
    return
  }
  func.func @transform_0(%arg0: i32) -> (i32, i32) {
    %c0_i32 = arith.constant 0 : i32
    %c0_i32_0 = arith.constant 0 : i32
    %c0_i32_1 = arith.constant 0 : i32
    return %c0_i32, %c0_i32_0 : i32, i32
  }
  func.func @transform_1(%arg0: i32) -> (i32, i32) {
    %c0_i32 = arith.constant 0 : i32
    %c0_i32_0 = arith.constant 0 : i32
    %c0_i32_1 = arith.constant 0 : i32
    return %c0_i32, %c0_i32_0 : i32, i32
  }
  func.func @transform_2(%arg0: i32) -> (i32, i32) {
    %c0_i32 = arith.constant 0 : i32
    %c0_i32_0 = arith.constant 0 : i32
    %c0_i32_1 = arith.constant 0 : i32
    return %c0_i32, %c0_i32_0 : i32, i32
  }
  func.func @transform_3(%arg0: i32) -> (i32, i32) {
    %c0_i32 = arith.constant 0 : i32
    %c0_i32_0 = arith.constant 0 : i32
    %c0_i32_1 = arith.constant 0 : i32
    return %c0_i32, %c0_i32_0 : i32, i32
  }
  func.func @transform_4(%arg0: i32) -> (i32, i32) {
    %c0_i32 = arith.constant 0 : i32
    %c0_i32_0 = arith.constant 0 : i32
    %c0_i32_1 = arith.constant 0 : i32
    return %c0_i32, %c0_i32_0 : i32, i32
  }
}

module attributes {stable_mosaic.version = 11 : i64} {
  func.func @_conv_bn_kernel(%arg0: i32, %arg1: memref<32x144xf32, #tpu.memory_space<vmem>>, %arg2: memref<144x128xf32, #tpu.memory_space<vmem>>, %arg3: memref<32x1xf32, #tpu.memory_space<vmem>>, %arg4: memref<32x1xf32, #tpu.memory_space<vmem>>, %arg5: memref<32x128xf32, #tpu.memory_space<vmem>>) attributes {dimension_semantics = [#tpu.dimension_semantics<arbitrary>], iteration_bounds = array<i64: 1>, scalar_prefetch = 0 : i64, scratch_operands = 0 : i64, tpu.core_type = #tpu.core_type<tc>, window_params = [{pipeline_mode = #tpu.pipeline_mode<synchronous>, transform_indices = @transform_0, window_bounds = array<i64: 32, 144>}, {pipeline_mode = #tpu.pipeline_mode<synchronous>, transform_indices = @transform_1, window_bounds = array<i64: 144, 128>}, {pipeline_mode = #tpu.pipeline_mode<synchronous>, transform_indices = @transform_2, window_bounds = array<i64: 32, 1>}, {pipeline_mode = #tpu.pipeline_mode<synchronous>, transform_indices = @transform_3, window_bounds = array<i64: 32, 1>}, {pipeline_mode = #tpu.pipeline_mode<synchronous>, transform_indices = @transform_4, window_bounds = array<i64: 32, 128>}]} {
    %c0 = arith.constant 0 : index
    %c0_0 = arith.constant 0 : index
    %0 = vector.load %arg1[%c0, %c0_0] : memref<32x144xf32, #tpu.memory_space<vmem>>, vector<32x144xf32>
    %c0_1 = arith.constant 0 : index
    %c0_2 = arith.constant 0 : index
    %1 = vector.load %arg2[%c0_1, %c0_2] : memref<144x128xf32, #tpu.memory_space<vmem>>, vector<144x128xf32>
    %cst = arith.constant dense<0.000000e+00> : vector<32x128xf32>
    %2 = tpu.matmul %0, %1, %cst {dimension_numbers = #tpu.dot_dimension_numbers<[1], [0], [0], [1], [0, 0, 1, 1], [], []>} : vector<32x144xf32>, vector<144x128xf32>, vector<32x128xf32> -> vector<32x128xf32>
    %cst_3 = arith.constant dense<0.000000e+00> : vector<32xf32>
    %3 = vector.multi_reduction <add>, %2, %cst_3 [1] : vector<32x128xf32> to vector<32xf32>
    %4 = vector.shape_cast %3 : vector<32xf32> to vector<32x1xf32>
    %cst_4 = arith.constant 1.280000e+02 : f32
    %5 = vector.broadcast %cst_4 : f32 to vector<32x1xf32>
    %6 = arith.divf %4, %5 : vector<32x1xf32>
    %7 = vector.broadcast %6 : vector<32x1xf32> to vector<32x128xf32>
    %8 = arith.subf %2, %7 : vector<32x128xf32>
    %9 = arith.mulf %8, %8 : vector<32x128xf32>
    %cst_5 = arith.constant dense<0.000000e+00> : vector<32xf32>
    %10 = vector.multi_reduction <add>, %9, %cst_5 [1] : vector<32x128xf32> to vector<32xf32>
    %11 = vector.shape_cast %10 : vector<32xf32> to vector<32x1xf32>
    %cst_6 = arith.constant 1.280000e+02 : f32
    %12 = vector.broadcast %cst_6 : f32 to vector<32x1xf32>
    %13 = arith.divf %11, %12 : vector<32x1xf32>
    %c0_7 = arith.constant 0 : index
    %c0_8 = arith.constant 0 : index
    %14 = vector.load %arg3[%c0_7, %c0_8] : memref<32x1xf32, #tpu.memory_space<vmem>>, vector<32x1xf32>
    %cst_9 = arith.constant 9.99999974E-6 : f32
    %15 = vector.broadcast %cst_9 : f32 to vector<32x1xf32>
    %16 = arith.addf %13, %15 : vector<32x1xf32>
    %17 = math.rsqrt %16 : vector<32x1xf32>
    %18 = arith.mulf %14, %17 : vector<32x1xf32>
    %19 = vector.broadcast %18 : vector<32x1xf32> to vector<32x128xf32>
    %20 = arith.mulf %8, %19 : vector<32x128xf32>
    %c0_10 = arith.constant 0 : index
    %c0_11 = arith.constant 0 : index
    %21 = vector.load %arg4[%c0_10, %c0_11] : memref<32x1xf32, #tpu.memory_space<vmem>>, vector<32x1xf32>
    %22 = vector.broadcast %21 : vector<32x1xf32> to vector<32x128xf32>
    %23 = arith.addf %20, %22 : vector<32x128xf32>
    %cst_12 = arith.constant 0.000000e+00 : f32
    %24 = vector.broadcast %cst_12 : f32 to vector<32x128xf32>
    %25 = arith.maximumf %23, %24 : vector<32x128xf32>
    %c0_13 = arith.constant 0 : index
    %c0_14 = arith.constant 0 : index
    %26 = vector.load %arg5[%c0_13, %c0_14] : memref<32x128xf32, #tpu.memory_space<vmem>>, vector<32x128xf32>
    tpu.vector_store %arg5[%c0_13, %c0_14], %25 {strides = array<i32>} : memref<32x128xf32, #tpu.memory_space<vmem>>, vector<32x128xf32>,
    return
  }
  func.func @transform_0(%arg0: i32) -> (i32, i32) {
    %c0_i32 = arith.constant 0 : i32
    %c0_i32_0 = arith.constant 0 : i32
    %c0_i32_1 = arith.constant 0 : i32
    return %c0_i32, %c0_i32_0 : i32, i32
  }
  func.func @transform_1(%arg0: i32) -> (i32, i32) {
    %c0_i32 = arith.constant 0 : i32
    %c0_i32_0 = arith.constant 0 : i32
    %c0_i32_1 = arith.constant 0 : i32
    return %c0_i32, %c0_i32_0 : i32, i32
  }
  func.func @transform_2(%arg0: i32) -> (i32, i32) {
    %c0_i32 = arith.constant 0 : i32
    %c0_i32_0 = arith.constant 0 : i32
    %c0_i32_1 = arith.constant 0 : i32
    return %c0_i32, %c0_i32_0 : i32, i32
  }
  func.func @transform_3(%arg0: i32) -> (i32, i32) {
    %c0_i32 = arith.constant 0 : i32
    %c0_i32_0 = arith.constant 0 : i32
    %c0_i32_1 = arith.constant 0 : i32
    return %c0_i32, %c0_i32_0 : i32, i32
  }
  func.func @transform_4(%arg0: i32) -> (i32, i32) {
    %c0_i32 = arith.constant 0 : i32
    %c0_i32_0 = arith.constant 0 : i32
    %c0_i32_1 = arith.constant 0 : i32
    return %c0_i32, %c0_i32_0 : i32, i32
  }
}

module attributes {stable_mosaic.version = 11 : i64} {
  func.func @_conv_bn_kernel(%arg0: i32, %arg1: memref<64x288xf32, #tpu.memory_space<vmem>>, %arg2: memref<288x32xf32, #tpu.memory_space<vmem>>, %arg3: memref<64x1xf32, #tpu.memory_space<vmem>>, %arg4: memref<64x1xf32, #tpu.memory_space<vmem>>, %arg5: memref<64x32xf32, #tpu.memory_space<vmem>>) attributes {dimension_semantics = [#tpu.dimension_semantics<arbitrary>], iteration_bounds = array<i64: 1>, scalar_prefetch = 0 : i64, scratch_operands = 0 : i64, tpu.core_type = #tpu.core_type<tc>, window_params = [{pipeline_mode = #tpu.pipeline_mode<synchronous>, transform_indices = @transform_0, window_bounds = array<i64: 64, 288>}, {pipeline_mode = #tpu.pipeline_mode<synchronous>, transform_indices = @transform_1, window_bounds = array<i64: 288, 32>}, {pipeline_mode = #tpu.pipeline_mode<synchronous>, transform_indices = @transform_2, window_bounds = array<i64: 64, 1>}, {pipeline_mode = #tpu.pipeline_mode<synchronous>, transform_indices = @transform_3, window_bounds = array<i64: 64, 1>}, {pipeline_mode = #tpu.pipeline_mode<synchronous>, transform_indices = @transform_4, window_bounds = array<i64: 64, 32>}]} {
    %c0 = arith.constant 0 : index
    %c0_0 = arith.constant 0 : index
    %0 = vector.load %arg1[%c0, %c0_0] : memref<64x288xf32, #tpu.memory_space<vmem>>, vector<64x288xf32>
    %c0_1 = arith.constant 0 : index
    %c0_2 = arith.constant 0 : index
    %1 = vector.load %arg2[%c0_1, %c0_2] : memref<288x32xf32, #tpu.memory_space<vmem>>, vector<288x32xf32>
    %cst = arith.constant dense<0.000000e+00> : vector<64x32xf32>
    %2 = tpu.matmul %0, %1, %cst {dimension_numbers = #tpu.dot_dimension_numbers<[1], [0], [0], [1], [0, 0, 1, 1], [], []>} : vector<64x288xf32>, vector<288x32xf32>, vector<64x32xf32> -> vector<64x32xf32>
    %cst_3 = arith.constant dense<0.000000e+00> : vector<64xf32>
    %3 = vector.multi_reduction <add>, %2, %cst_3 [1] : vector<64x32xf32> to vector<64xf32>
    %4 = vector.shape_cast %3 : vector<64xf32> to vector<64x1xf32>
    %cst_4 = arith.constant 3.200000e+01 : f32
    %5 = vector.broadcast %cst_4 : f32 to vector<64x1xf32>
    %6 = arith.divf %4, %5 : vector<64x1xf32>
    %7 = vector.broadcast %6 : vector<64x1xf32> to vector<64x32xf32>
    %8 = arith.subf %2, %7 : vector<64x32xf32>
    %9 = arith.mulf %8, %8 : vector<64x32xf32>
    %cst_5 = arith.constant dense<0.000000e+00> : vector<64xf32>
    %10 = vector.multi_reduction <add>, %9, %cst_5 [1] : vector<64x32xf32> to vector<64xf32>
    %11 = vector.shape_cast %10 : vector<64xf32> to vector<64x1xf32>
    %cst_6 = arith.constant 3.200000e+01 : f32
    %12 = vector.broadcast %cst_6 : f32 to vector<64x1xf32>
    %13 = arith.divf %11, %12 : vector<64x1xf32>
    %c0_7 = arith.constant 0 : index
    %c0_8 = arith.constant 0 : index
    %14 = vector.load %arg3[%c0_7, %c0_8] : memref<64x1xf32, #tpu.memory_space<vmem>>, vector<64x1xf32>
    %cst_9 = arith.constant 9.99999974E-6 : f32
    %15 = vector.broadcast %cst_9 : f32 to vector<64x1xf32>
    %16 = arith.addf %13, %15 : vector<64x1xf32>
    %17 = math.rsqrt %16 : vector<64x1xf32>
    %18 = arith.mulf %14, %17 : vector<64x1xf32>
    %19 = vector.broadcast %18 : vector<64x1xf32> to vector<64x32xf32>
    %20 = arith.mulf %8, %19 : vector<64x32xf32>
    %c0_10 = arith.constant 0 : index
    %c0_11 = arith.constant 0 : index
    %21 = vector.load %arg4[%c0_10, %c0_11] : memref<64x1xf32, #tpu.memory_space<vmem>>, vector<64x1xf32>
    %22 = vector.broadcast %21 : vector<64x1xf32> to vector<64x32xf32>
    %23 = arith.addf %20, %22 : vector<64x32xf32>
    %cst_12 = arith.constant 0.000000e+00 : f32
    %24 = vector.broadcast %cst_12 : f32 to vector<64x32xf32>
    %25 = arith.maximumf %23, %24 : vector<64x32xf32>
    %c0_13 = arith.constant 0 : index
    %c0_14 = arith.constant 0 : index
    %26 = vector.load %arg5[%c0_13, %c0_14] : memref<64x32xf32, #tpu.memory_space<vmem>>, vector<64x32xf32>
    tpu.vector_store %arg5[%c0_13, %c0_14], %25 {strides = array<i32>} : memref<64x32xf32, #tpu.memory_space<vmem>>, vector<64x32xf32>,
    return
  }
  func.func @transform_0(%arg0: i32) -> (i32, i32) {
    %c0_i32 = arith.constant 0 : i32
    %c0_i32_0 = arith.constant 0 : i32
    %c0_i32_1 = arith.constant 0 : i32
    return %c0_i32, %c0_i32_0 : i32, i32
  }
  func.func @transform_1(%arg0: i32) -> (i32, i32) {
    %c0_i32 = arith.constant 0 : i32
    %c0_i32_0 = arith.constant 0 : i32
    %c0_i32_1 = arith.constant 0 : i32
    return %c0_i32, %c0_i32_0 : i32, i32
  }
  func.func @transform_2(%arg0: i32) -> (i32, i32) {
    %c0_i32 = arith.constant 0 : i32
    %c0_i32_0 = arith.constant 0 : i32
    %c0_i32_1 = arith.constant 0 : i32
    return %c0_i32, %c0_i32_0 : i32, i32
  }
  func.func @transform_3(%arg0: i32) -> (i32, i32) {
    %c0_i32 = arith.constant 0 : i32
    %c0_i32_0 = arith.constant 0 : i32
    %c0_i32_1 = arith.constant 0 : i32
    return %c0_i32, %c0_i32_0 : i32, i32
  }
  func.func @transform_4(%arg0: i32) -> (i32, i32) {
    %c0_i32 = arith.constant 0 : i32
    %c0_i32_0 = arith.constant 0 : i32
    %c0_i32_1 = arith.constant 0 : i32
    return %c0_i32, %c0_i32_0 : i32, i32
  }
}

module attributes {stable_mosaic.version = 11 : i64} {
  func.func @_conv_bn_kernel(%arg0: i32, %arg1: memref<64x576xf32, #tpu.memory_space<vmem>>, %arg2: memref<576x32xf32, #tpu.memory_space<vmem>>, %arg3: memref<64x1xf32, #tpu.memory_space<vmem>>, %arg4: memref<64x1xf32, #tpu.memory_space<vmem>>, %arg5: memref<64x32xf32, #tpu.memory_space<vmem>>) attributes {dimension_semantics = [#tpu.dimension_semantics<arbitrary>], iteration_bounds = array<i64: 1>, scalar_prefetch = 0 : i64, scratch_operands = 0 : i64, tpu.core_type = #tpu.core_type<tc>, window_params = [{pipeline_mode = #tpu.pipeline_mode<synchronous>, transform_indices = @transform_0, window_bounds = array<i64: 64, 576>}, {pipeline_mode = #tpu.pipeline_mode<synchronous>, transform_indices = @transform_1, window_bounds = array<i64: 576, 32>}, {pipeline_mode = #tpu.pipeline_mode<synchronous>, transform_indices = @transform_2, window_bounds = array<i64: 64, 1>}, {pipeline_mode = #tpu.pipeline_mode<synchronous>, transform_indices = @transform_3, window_bounds = array<i64: 64, 1>}, {pipeline_mode = #tpu.pipeline_mode<synchronous>, transform_indices = @transform_4, window_bounds = array<i64: 64, 32>}]} {
    %c0 = arith.constant 0 : index
    %c0_0 = arith.constant 0 : index
    %0 = vector.load %arg1[%c0, %c0_0] : memref<64x576xf32, #tpu.memory_space<vmem>>, vector<64x576xf32>
    %c0_1 = arith.constant 0 : index
    %c0_2 = arith.constant 0 : index
    %1 = vector.load %arg2[%c0_1, %c0_2] : memref<576x32xf32, #tpu.memory_space<vmem>>, vector<576x32xf32>
    %cst = arith.constant dense<0.000000e+00> : vector<64x32xf32>
    %2 = tpu.matmul %0, %1, %cst {dimension_numbers = #tpu.dot_dimension_numbers<[1], [0], [0], [1], [0, 0, 1, 1], [], []>} : vector<64x576xf32>, vector<576x32xf32>, vector<64x32xf32> -> vector<64x32xf32>
    %cst_3 = arith.constant dense<0.000000e+00> : vector<64xf32>
    %3 = vector.multi_reduction <add>, %2, %cst_3 [1] : vector<64x32xf32> to vector<64xf32>
    %4 = vector.shape_cast %3 : vector<64xf32> to vector<64x1xf32>
    %cst_4 = arith.constant 3.200000e+01 : f32
    %5 = vector.broadcast %cst_4 : f32 to vector<64x1xf32>
    %6 = arith.divf %4, %5 : vector<64x1xf32>
    %7 = vector.broadcast %6 : vector<64x1xf32> to vector<64x32xf32>
    %8 = arith.subf %2, %7 : vector<64x32xf32>
    %9 = arith.mulf %8, %8 : vector<64x32xf32>
    %cst_5 = arith.constant dense<0.000000e+00> : vector<64xf32>
    %10 = vector.multi_reduction <add>, %9, %cst_5 [1] : vector<64x32xf32> to vector<64xf32>
    %11 = vector.shape_cast %10 : vector<64xf32> to vector<64x1xf32>
    %cst_6 = arith.constant 3.200000e+01 : f32
    %12 = vector.broadcast %cst_6 : f32 to vector<64x1xf32>
    %13 = arith.divf %11, %12 : vector<64x1xf32>
    %c0_7 = arith.constant 0 : index
    %c0_8 = arith.constant 0 : index
    %14 = vector.load %arg3[%c0_7, %c0_8] : memref<64x1xf32, #tpu.memory_space<vmem>>, vector<64x1xf32>
    %cst_9 = arith.constant 9.99999974E-6 : f32
    %15 = vector.broadcast %cst_9 : f32 to vector<64x1xf32>
    %16 = arith.addf %13, %15 : vector<64x1xf32>
    %17 = math.rsqrt %16 : vector<64x1xf32>
    %18 = arith.mulf %14, %17 : vector<64x1xf32>
    %19 = vector.broadcast %18 : vector<64x1xf32> to vector<64x32xf32>
    %20 = arith.mulf %8, %19 : vector<64x32xf32>
    %c0_10 = arith.constant 0 : index
    %c0_11 = arith.constant 0 : index
    %21 = vector.load %arg4[%c0_10, %c0_11] : memref<64x1xf32, #tpu.memory_space<vmem>>, vector<64x1xf32>
    %22 = vector.broadcast %21 : vector<64x1xf32> to vector<64x32xf32>
    %23 = arith.addf %20, %22 : vector<64x32xf32>
    %cst_12 = arith.constant 0.000000e+00 : f32
    %24 = vector.broadcast %cst_12 : f32 to vector<64x32xf32>
    %25 = arith.maximumf %23, %24 : vector<64x32xf32>
    %c0_13 = arith.constant 0 : index
    %c0_14 = arith.constant 0 : index
    %26 = vector.load %arg5[%c0_13, %c0_14] : memref<64x32xf32, #tpu.memory_space<vmem>>, vector<64x32xf32>
    tpu.vector_store %arg5[%c0_13, %c0_14], %25 {strides = array<i32>} : memref<64x32xf32, #tpu.memory_space<vmem>>, vector<64x32xf32>,
    return
  }
  func.func @transform_0(%arg0: i32) -> (i32, i32) {
    %c0_i32 = arith.constant 0 : i32
    %c0_i32_0 = arith.constant 0 : i32
    %c0_i32_1 = arith.constant 0 : i32
    return %c0_i32, %c0_i32_0 : i32, i32
  }
  func.func @transform_1(%arg0: i32) -> (i32, i32) {
    %c0_i32 = arith.constant 0 : i32
    %c0_i32_0 = arith.constant 0 : i32
    %c0_i32_1 = arith.constant 0 : i32
    return %c0_i32, %c0_i32_0 : i32, i32
  }
  func.func @transform_2(%arg0: i32) -> (i32, i32) {
    %c0_i32 = arith.constant 0 : i32
    %c0_i32_0 = arith.constant 0 : i32
    %c0_i32_1 = arith.constant 0 : i32
    return %c0_i32, %c0_i32_0 : i32, i32
  }
  func.func @transform_3(%arg0: i32) -> (i32, i32) {
    %c0_i32 = arith.constant 0 : i32
    %c0_i32_0 = arith.constant 0 : i32
    %c0_i32_1 = arith.constant 0 : i32
    return %c0_i32, %c0_i32_0 : i32, i32
  }
  func.func @transform_4(%arg0: i32) -> (i32, i32) {
    %c0_i32 = arith.constant 0 : i32
    %c0_i32_0 = arith.constant 0 : i32
    %c0_i32_1 = arith.constant 0 : i32
    return %c0_i32, %c0_i32_0 : i32, i32
  }
}

module attributes {stable_mosaic.version = 11 : i64} {
  func.func @_mlp_kernel(%arg0: i32, %arg1: memref<2x1024xf32, #tpu.memory_space<vmem>>, %arg2: memref<2x10xf32, #tpu.memory_space<vmem>>, %arg3: memref<2x8xf32, #tpu.memory_space<vmem>>, %arg4: memref<1024x16xf32, #tpu.memory_space<vmem>>, %arg5: memref<1x16xf32, #tpu.memory_space<vmem>>, %arg6: memref<1x16xf32, #tpu.memory_space<vmem>>, %arg7: memref<1x10xf32, #tpu.memory_space<vmem>>, %arg8: memref<1x8xf32, #tpu.memory_space<vmem>>, %arg9: memref<1x16xf32, #tpu.memory_space<vmem>>, %arg10: memref<1x10xf32, #tpu.memory_space<vmem>>, %arg11: memref<1x8xf32, #tpu.memory_space<vmem>>, %arg12: memref<16x32xf32, #tpu.memory_space<vmem>>, %arg13: memref<10x32xf32, #tpu.memory_space<vmem>>, %arg14: memref<8x32xf32, #tpu.memory_space<vmem>>, %arg15: memref<1x32xf32, #tpu.memory_space<vmem>>, %arg16: memref<1x32xf32, #tpu.memory_space<vmem>>, %arg17: memref<32x128xf32, #tpu.memory_space<vmem>>, %arg18: memref<1x128xf32, #tpu.memory_space<vmem>>, %arg19: memref<1x128xf32, #tpu.memory_space<vmem>>, %arg20: memref<128x1024xf32, #tpu.memory_space<vmem>>, %arg21: memref<1x1024xf32, #tpu.memory_space<vmem>>, %arg22: memref<1x1024xf32, #tpu.memory_space<vmem>>, %arg23: memref<2x1024xf32, #tpu.memory_space<vmem>>) attributes {dimension_semantics = [#tpu.dimension_semantics<arbitrary>], iteration_bounds = array<i64: 1>, scalar_prefetch = 0 : i64, scratch_operands = 0 : i64, tpu.core_type = #tpu.core_type<tc>, window_params = [{pipeline_mode = #tpu.pipeline_mode<synchronous>, transform_indices = @transform_0, window_bounds = array<i64: 2, 1024>}, {pipeline_mode = #tpu.pipeline_mode<synchronous>, transform_indices = @transform_1, window_bounds = array<i64: 2, 10>}, {pipeline_mode = #tpu.pipeline_mode<synchronous>, transform_indices = @transform_2, window_bounds = array<i64: 2, 8>}, {pipeline_mode = #tpu.pipeline_mode<synchronous>, transform_indices = @transform_3, window_bounds = array<i64: 1024, 16>}, {pipeline_mode = #tpu.pipeline_mode<synchronous>, transform_indices = @transform_4, window_bounds = array<i64: 1, 16>}, {pipeline_mode = #tpu.pipeline_mode<synchronous>, transform_indices = @transform_5, window_bounds = array<i64: 1, 16>}, {pipeline_mode = #tpu.pipeline_mode<synchronous>, transform_indices = @transform_6, window_bounds = array<i64: 1, 10>}, {pipeline_mode = #tpu.pipeline_mode<synchronous>, transform_indices = @transform_7, window_bounds = array<i64: 1, 8>}, {pipeline_mode = #tpu.pipeline_mode<synchronous>, transform_indices = @transform_8, window_bounds = array<i64: 1, 16>}, {pipeline_mode = #tpu.pipeline_mode<synchronous>, transform_indices = @transform_9, window_bounds = array<i64: 1, 10>}, {pipeline_mode = #tpu.pipeline_mode<synchronous>, transform_indices = @transform_10, window_bounds = array<i64: 1, 8>}, {pipeline_mode = #tpu.pipeline_mode<synchronous>, transform_indices = @transform_11, window_bounds = array<i64: 16, 32>}, {pipeline_mode = #tpu.pipeline_mode<synchronous>, transform_indices = @transform_12, window_bounds = array<i64: 10, 32>}, {pipeline_mode = #tpu.pipeline_mode<synchronous>, transform_indices = @transform_13, window_bounds = array<i64: 8, 32>}, {pipeline_mode = #tpu.pipeline_mode<synchronous>, transform_indices = @transform_14, window_bounds = array<i64: 1, 32>}, {pipeline_mode = #tpu.pipeline_mode<synchronous>, transform_indices = @transform_15, window_bounds = array<i64: 1, 32>}, {pipeline_mode = #tpu.pipeline_mode<synchronous>, transform_indices = @transform_16, window_bounds = array<i64: 32, 128>}, {pipeline_mode = #tpu.pipeline_mode<synchronous>, transform_indices = @transform_17, window_bounds = array<i64: 1, 128>}, {pipeline_mode = #tpu.pipeline_mode<synchronous>, transform_indices = @transform_18, window_bounds = array<i64: 1, 128>}, {pipeline_mode = #tpu.pipeline_mode<synchronous>, transform_indices = @transform_19, window_bounds = array<i64: 128, 1024>}, {pipeline_mode = #tpu.pipeline_mode<synchronous>, transform_indices = @transform_20, window_bounds = array<i64: 1, 1024>}, {pipeline_mode = #tpu.pipeline_mode<synchronous>, transform_indices = @transform_21, window_bounds = array<i64: 1, 1024>}, {pipeline_mode = #tpu.pipeline_mode<synchronous>, transform_indices = @transform_22, window_bounds = array<i64: 2, 1024>}]} {
    %c0 = arith.constant 0 : index
    %c0_0 = arith.constant 0 : index
    %0 = vector.load %arg1[%c0, %c0_0] : memref<2x1024xf32, #tpu.memory_space<vmem>>, vector<2x1024xf32>
    %c0_1 = arith.constant 0 : index
    %c0_2 = arith.constant 0 : index
    %1 = vector.load %arg4[%c0_1, %c0_2] : memref<1024x16xf32, #tpu.memory_space<vmem>>, vector<1024x16xf32>
    %cst = arith.constant dense<0.000000e+00> : vector<2x16xf32>
    %2 = tpu.matmul %0, %1, %cst {dimension_numbers = #tpu.dot_dimension_numbers<[1], [0], [0], [1], [0, 0, 1, 1], [], []>} : vector<2x1024xf32>, vector<1024x16xf32>, vector<2x16xf32> -> vector<2x16xf32>
    %c0_3 = arith.constant 0 : index
    %c0_4 = arith.constant 0 : index
    %3 = vector.load %arg5[%c0_3, %c0_4] : memref<1x16xf32, #tpu.memory_space<vmem>>, vector<1x16xf32>
    %4 = vector.broadcast %3 : vector<1x16xf32> to vector<2x16xf32>
    %5 = arith.addf %2, %4 : vector<2x16xf32>
    %6 = arith.negf %5 : vector<2x16xf32>
    %7 = math.exp %6 : vector<2x16xf32>
    %cst_5 = arith.constant 1.000000e+00 : f32
    %8 = vector.broadcast %cst_5 : f32 to vector<2x16xf32>
    %9 = arith.addf %8, %7 : vector<2x16xf32>
    %10 = arith.divf %8, %9 : vector<2x16xf32>
    %c0_6 = arith.constant 0 : index
    %c0_7 = arith.constant 0 : index
    %11 = vector.load %arg6[%c0_6, %c0_7] : memref<1x16xf32, #tpu.memory_space<vmem>>, vector<1x16xf32>
    %c0_8 = arith.constant 0 : index
    %c0_9 = arith.constant 0 : index
    %12 = vector.load %arg9[%c0_8, %c0_9] : memref<1x16xf32, #tpu.memory_space<vmem>>, vector<1x16xf32>
    %cst_10 = arith.constant dense<0.000000e+00> : vector<16xf32>
    %13 = vector.multi_reduction <add>, %10, %cst_10 [0] : vector<2x16xf32> to vector<16xf32>
    %14 = vector.shape_cast %13 : vector<16xf32> to vector<1x16xf32>
    %cst_11 = arith.constant 2.000000e+00 : f32
    %15 = vector.broadcast %cst_11 : f32 to vector<1x16xf32>
    %16 = arith.divf %14, %15 : vector<1x16xf32>
    %17 = vector.broadcast %16 : vector<1x16xf32> to vector<2x16xf32>
    %18 = arith.subf %10, %17 : vector<2x16xf32>
    %19 = arith.mulf %18, %18 : vector<2x16xf32>
    %cst_12 = arith.constant dense<0.000000e+00> : vector<16xf32>
    %20 = vector.multi_reduction <add>, %19, %cst_12 [0] : vector<2x16xf32> to vector<16xf32>
    %21 = vector.shape_cast %20 : vector<16xf32> to vector<1x16xf32>
    %cst_13 = arith.constant 2.000000e+00 : f32
    %22 = vector.broadcast %cst_13 : f32 to vector<1x16xf32>
    %23 = arith.divf %21, %22 : vector<1x16xf32>
    %cst_14 = arith.constant 9.99999974E-6 : f32
    %24 = vector.broadcast %cst_14 : f32 to vector<1x16xf32>
    %25 = arith.addf %23, %24 : vector<1x16xf32>
    %26 = math.rsqrt %25 : vector<1x16xf32>
    %27 = arith.mulf %11, %26 : vector<1x16xf32>
    %28 = vector.broadcast %27 : vector<1x16xf32> to vector<2x16xf32>
    %29 = arith.mulf %18, %28 : vector<2x16xf32>
    %30 = vector.broadcast %12 : vector<1x16xf32> to vector<2x16xf32>
    %31 = arith.addf %29, %30 : vector<2x16xf32>
    %cst_15 = arith.constant 0.000000e+00 : f32
    %32 = vector.broadcast %cst_15 : f32 to vector<2x16xf32>
    %33 = arith.maximumf %31, %32 : vector<2x16xf32>
    %c0_16 = arith.constant 0 : index
    %c0_17 = arith.constant 0 : index
    %34 = vector.load %arg2[%c0_16, %c0_17] : memref<2x10xf32, #tpu.memory_space<vmem>>, vector<2x10xf32>
    %c0_18 = arith.constant 0 : index
    %c0_19 = arith.constant 0 : index
    %35 = vector.load %arg7[%c0_18, %c0_19] : memref<1x10xf32, #tpu.memory_space<vmem>>, vector<1x10xf32>
    %c0_20 = arith.constant 0 : index
    %c0_21 = arith.constant 0 : index
    %36 = vector.load %arg10[%c0_20, %c0_21] : memref<1x10xf32, #tpu.memory_space<vmem>>, vector<1x10xf32>
    %cst_22 = arith.constant dense<0.000000e+00> : vector<10xf32>
    %37 = vector.multi_reduction <add>, %34, %cst_22 [0] : vector<2x10xf32> to vector<10xf32>
    %38 = vector.shape_cast %37 : vector<10xf32> to vector<1x10xf32>
    %cst_23 = arith.constant 2.000000e+00 : f32
    %39 = vector.broadcast %cst_23 : f32 to vector<1x10xf32>
    %40 = arith.divf %38, %39 : vector<1x10xf32>
    %41 = vector.broadcast %40 : vector<1x10xf32> to vector<2x10xf32>
    %42 = arith.subf %34, %41 : vector<2x10xf32>
    %43 = arith.mulf %42, %42 : vector<2x10xf32>
    %cst_24 = arith.constant dense<0.000000e+00> : vector<10xf32>
    %44 = vector.multi_reduction <add>, %43, %cst_24 [0] : vector<2x10xf32> to vector<10xf32>
    %45 = vector.shape_cast %44 : vector<10xf32> to vector<1x10xf32>
    %cst_25 = arith.constant 2.000000e+00 : f32
    %46 = vector.broadcast %cst_25 : f32 to vector<1x10xf32>
    %47 = arith.divf %45, %46 : vector<1x10xf32>
    %cst_26 = arith.constant 9.99999974E-6 : f32
    %48 = vector.broadcast %cst_26 : f32 to vector<1x10xf32>
    %49 = arith.addf %47, %48 : vector<1x10xf32>
    %50 = math.rsqrt %49 : vector<1x10xf32>
    %51 = arith.mulf %35, %50 : vector<1x10xf32>
    %52 = vector.broadcast %51 : vector<1x10xf32> to vector<2x10xf32>
    %53 = arith.mulf %42, %52 : vector<2x10xf32>
    %54 = vector.broadcast %36 : vector<1x10xf32> to vector<2x10xf32>
    %55 = arith.addf %53, %54 : vector<2x10xf32>
    %cst_27 = arith.constant 0.000000e+00 : f32
    %56 = vector.broadcast %cst_27 : f32 to vector<2x10xf32>
    %57 = arith.maximumf %55, %56 : vector<2x10xf32>
    %c0_28 = arith.constant 0 : index
    %c0_29 = arith.constant 0 : index
    %58 = vector.load %arg3[%c0_28, %c0_29] : memref<2x8xf32, #tpu.memory_space<vmem>>, vector<2x8xf32>
    %c0_30 = arith.constant 0 : index
    %c0_31 = arith.constant 0 : index
    %59 = vector.load %arg8[%c0_30, %c0_31] : memref<1x8xf32, #tpu.memory_space<vmem>>, vector<1x8xf32>
    %c0_32 = arith.constant 0 : index
    %c0_33 = arith.constant 0 : index
    %60 = vector.load %arg11[%c0_32, %c0_33] : memref<1x8xf32, #tpu.memory_space<vmem>>, vector<1x8xf32>
    %cst_34 = arith.constant dense<0.000000e+00> : vector<8xf32>
    %61 = vector.multi_reduction <add>, %58, %cst_34 [0] : vector<2x8xf32> to vector<8xf32>
    %62 = vector.shape_cast %61 : vector<8xf32> to vector<1x8xf32>
    %cst_35 = arith.constant 2.000000e+00 : f32
    %63 = vector.broadcast %cst_35 : f32 to vector<1x8xf32>
    %64 = arith.divf %62, %63 : vector<1x8xf32>
    %65 = vector.broadcast %64 : vector<1x8xf32> to vector<2x8xf32>
    %66 = arith.subf %58, %65 : vector<2x8xf32>
    %67 = arith.mulf %66, %66 : vector<2x8xf32>
    %cst_36 = arith.constant dense<0.000000e+00> : vector<8xf32>
    %68 = vector.multi_reduction <add>, %67, %cst_36 [0] : vector<2x8xf32> to vector<8xf32>
    %69 = vector.shape_cast %68 : vector<8xf32> to vector<1x8xf32>
    %cst_37 = arith.constant 2.000000e+00 : f32
    %70 = vector.broadcast %cst_37 : f32 to vector<1x8xf32>
    %71 = arith.divf %69, %70 : vector<1x8xf32>
    %cst_38 = arith.constant 9.99999974E-6 : f32
    %72 = vector.broadcast %cst_38 : f32 to vector<1x8xf32>
    %73 = arith.addf %71, %72 : vector<1x8xf32>
    %74 = math.rsqrt %73 : vector<1x8xf32>
    %75 = arith.mulf %59, %74 : vector<1x8xf32>
    %76 = vector.broadcast %75 : vector<1x8xf32> to vector<2x8xf32>
    %77 = arith.mulf %66, %76 : vector<2x8xf32>
    %78 = vector.broadcast %60 : vector<1x8xf32> to vector<2x8xf32>
    %79 = arith.addf %77, %78 : vector<2x8xf32>
    %cst_39 = arith.constant 0.000000e+00 : f32
    %80 = vector.broadcast %cst_39 : f32 to vector<2x8xf32>
    %81 = arith.maximumf %79, %80 : vector<2x8xf32>
    %c0_40 = arith.constant 0 : index
    %c0_41 = arith.constant 0 : index
    %82 = vector.load %arg12[%c0_40, %c0_41] : memref<16x32xf32, #tpu.memory_space<vmem>>, vector<16x32xf32>
    %cst_42 = arith.constant dense<0.000000e+00> : vector<2x32xf32>
    %83 = tpu.matmul %33, %82, %cst_42 {dimension_numbers = #tpu.dot_dimension_numbers<[1], [0], [0], [1], [0, 0, 1, 1], [], []>} : vector<2x16xf32>, vector<16x32xf32>, vector<2x32xf32> -> vector<2x32xf32>
    %c0_43 = arith.constant 0 : index
    %c0_44 = arith.constant 0 : index
    %84 = vector.load %arg13[%c0_43, %c0_44] : memref<10x32xf32, #tpu.memory_space<vmem>>, vector<10x32xf32>
    %cst_45 = arith.constant dense<0.000000e+00> : vector<2x32xf32>
    %85 = tpu.matmul %57, %84, %cst_45 {dimension_numbers = #tpu.dot_dimension_numbers<[1], [0], [0], [1], [0, 0, 1, 1], [], []>} : vector<2x10xf32>, vector<10x32xf32>, vector<2x32xf32> -> vector<2x32xf32>
    %86 = arith.addf %83, %85 : vector<2x32xf32>
    %c0_46 = arith.constant 0 : index
    %c0_47 = arith.constant 0 : index
    %87 = vector.load %arg14[%c0_46, %c0_47] : memref<8x32xf32, #tpu.memory_space<vmem>>, vector<8x32xf32>
    %cst_48 = arith.constant dense<0.000000e+00> : vector<2x32xf32>
    %88 = tpu.matmul %81, %87, %cst_48 {dimension_numbers = #tpu.dot_dimension_numbers<[1], [0], [0], [1], [0, 0, 1, 1], [], []>} : vector<2x8xf32>, vector<8x32xf32>, vector<2x32xf32> -> vector<2x32xf32>
    %89 = arith.addf %86, %88 : vector<2x32xf32>
    %c0_49 = arith.constant 0 : index
    %c0_50 = arith.constant 0 : index
    %90 = vector.load %arg15[%c0_49, %c0_50] : memref<1x32xf32, #tpu.memory_space<vmem>>, vector<1x32xf32>
    %c0_51 = arith.constant 0 : index
    %c0_52 = arith.constant 0 : index
    %91 = vector.load %arg16[%c0_51, %c0_52] : memref<1x32xf32, #tpu.memory_space<vmem>>, vector<1x32xf32>
    %cst_53 = arith.constant dense<0.000000e+00> : vector<32xf32>
    %92 = vector.multi_reduction <add>, %89, %cst_53 [0] : vector<2x32xf32> to vector<32xf32>
    %93 = vector.shape_cast %92 : vector<32xf32> to vector<1x32xf32>
    %cst_54 = arith.constant 2.000000e+00 : f32
    %94 = vector.broadcast %cst_54 : f32 to vector<1x32xf32>
    %95 = arith.divf %93, %94 : vector<1x32xf32>
    %96 = vector.broadcast %95 : vector<1x32xf32> to vector<2x32xf32>
    %97 = arith.subf %89, %96 : vector<2x32xf32>
    %98 = arith.mulf %97, %97 : vector<2x32xf32>
    %cst_55 = arith.constant dense<0.000000e+00> : vector<32xf32>
    %99 = vector.multi_reduction <add>, %98, %cst_55 [0] : vector<2x32xf32> to vector<32xf32>
    %100 = vector.shape_cast %99 : vector<32xf32> to vector<1x32xf32>
    %cst_56 = arith.constant 2.000000e+00 : f32
    %101 = vector.broadcast %cst_56 : f32 to vector<1x32xf32>
    %102 = arith.divf %100, %101 : vector<1x32xf32>
    %cst_57 = arith.constant 9.99999974E-6 : f32
    %103 = vector.broadcast %cst_57 : f32 to vector<1x32xf32>
    %104 = arith.addf %102, %103 : vector<1x32xf32>
    %105 = math.rsqrt %104 : vector<1x32xf32>
    %106 = arith.mulf %90, %105 : vector<1x32xf32>
    %107 = vector.broadcast %106 : vector<1x32xf32> to vector<2x32xf32>
    %108 = arith.mulf %97, %107 : vector<2x32xf32>
    %109 = vector.broadcast %91 : vector<1x32xf32> to vector<2x32xf32>
    %110 = arith.addf %108, %109 : vector<2x32xf32>
    %cst_58 = arith.constant 0.000000e+00 : f32
    %111 = vector.broadcast %cst_58 : f32 to vector<2x32xf32>
    %112 = arith.maximumf %110, %111 : vector<2x32xf32>
    %c0_59 = arith.constant 0 : index
    %c0_60 = arith.constant 0 : index
    %113 = vector.load %arg17[%c0_59, %c0_60] : memref<32x128xf32, #tpu.memory_space<vmem>>, vector<32x128xf32>
    %cst_61 = arith.constant dense<0.000000e+00> : vector<2x128xf32>
    %114 = tpu.matmul %112, %113, %cst_61 {dimension_numbers = #tpu.dot_dimension_numbers<[1], [0], [0], [1], [0, 0, 1, 1], [], []>} : vector<2x32xf32>, vector<32x128xf32>, vector<2x128xf32> -> vector<2x128xf32>
    %c0_62 = arith.constant 0 : index
    %c0_63 = arith.constant 0 : index
    %115 = vector.load %arg18[%c0_62, %c0_63] : memref<1x128xf32, #tpu.memory_space<vmem>>, vector<1x128xf32>
    %c0_64 = arith.constant 0 : index
    %c0_65 = arith.constant 0 : index
    %116 = vector.load %arg19[%c0_64, %c0_65] : memref<1x128xf32, #tpu.memory_space<vmem>>, vector<1x128xf32>
    %cst_66 = arith.constant dense<0.000000e+00> : vector<128xf32>
    %117 = vector.multi_reduction <add>, %114, %cst_66 [0] : vector<2x128xf32> to vector<128xf32>
    %118 = vector.shape_cast %117 : vector<128xf32> to vector<1x128xf32>
    %cst_67 = arith.constant 2.000000e+00 : f32
    %119 = vector.broadcast %cst_67 : f32 to vector<1x128xf32>
    %120 = arith.divf %118, %119 : vector<1x128xf32>
    %121 = vector.broadcast %120 : vector<1x128xf32> to vector<2x128xf32>
    %122 = arith.subf %114, %121 : vector<2x128xf32>
    %123 = arith.mulf %122, %122 : vector<2x128xf32>
    %cst_68 = arith.constant dense<0.000000e+00> : vector<128xf32>
    %124 = vector.multi_reduction <add>, %123, %cst_68 [0] : vector<2x128xf32> to vector<128xf32>
    %125 = vector.shape_cast %124 : vector<128xf32> to vector<1x128xf32>
    %cst_69 = arith.constant 2.000000e+00 : f32
    %126 = vector.broadcast %cst_69 : f32 to vector<1x128xf32>
    %127 = arith.divf %125, %126 : vector<1x128xf32>
    %cst_70 = arith.constant 9.99999974E-6 : f32
    %128 = vector.broadcast %cst_70 : f32 to vector<1x128xf32>
    %129 = arith.addf %127, %128 : vector<1x128xf32>
    %130 = math.rsqrt %129 : vector<1x128xf32>
    %131 = arith.mulf %115, %130 : vector<1x128xf32>
    %132 = vector.broadcast %131 : vector<1x128xf32> to vector<2x128xf32>
    %133 = arith.mulf %122, %132 : vector<2x128xf32>
    %134 = vector.broadcast %116 : vector<1x128xf32> to vector<2x128xf32>
    %135 = arith.addf %133, %134 : vector<2x128xf32>
    %cst_71 = arith.constant 0.000000e+00 : f32
    %136 = vector.broadcast %cst_71 : f32 to vector<2x128xf32>
    %137 = arith.maximumf %135, %136 : vector<2x128xf32>
    %c0_72 = arith.constant 0 : index
    %c0_73 = arith.constant 0 : index
    %138 = vector.load %arg20[%c0_72, %c0_73] : memref<128x1024xf32, #tpu.memory_space<vmem>>, vector<128x1024xf32>
    %cst_74 = arith.constant dense<0.000000e+00> : vector<2x1024xf32>
    %139 = tpu.matmul %137, %138, %cst_74 {dimension_numbers = #tpu.dot_dimension_numbers<[1], [0], [0], [1], [0, 0, 1, 1], [], []>} : vector<2x128xf32>, vector<128x1024xf32>, vector<2x1024xf32> -> vector<2x1024xf32>
    %c0_75 = arith.constant 0 : index
    %c0_76 = arith.constant 0 : index
    %140 = vector.load %arg21[%c0_75, %c0_76] : memref<1x1024xf32, #tpu.memory_space<vmem>>, vector<1x1024xf32>
    %c0_77 = arith.constant 0 : index
    %c0_78 = arith.constant 0 : index
    %141 = vector.load %arg22[%c0_77, %c0_78] : memref<1x1024xf32, #tpu.memory_space<vmem>>, vector<1x1024xf32>
    %cst_79 = arith.constant dense<0.000000e+00> : vector<1024xf32>
    %142 = vector.multi_reduction <add>, %139, %cst_79 [0] : vector<2x1024xf32> to vector<1024xf32>
    %143 = vector.shape_cast %142 : vector<1024xf32> to vector<1x1024xf32>
    %cst_80 = arith.constant 2.000000e+00 : f32
    %144 = vector.broadcast %cst_80 : f32 to vector<1x1024xf32>
    %145 = arith.divf %143, %144 : vector<1x1024xf32>
    %146 = vector.broadcast %145 : vector<1x1024xf32> to vector<2x1024xf32>
    %147 = arith.subf %139, %146 : vector<2x1024xf32>
    %148 = arith.mulf %147, %147 : vector<2x1024xf32>
    %cst_81 = arith.constant dense<0.000000e+00> : vector<1024xf32>
    %149 = vector.multi_reduction <add>, %148, %cst_81 [0] : vector<2x1024xf32> to vector<1024xf32>
    %150 = vector.shape_cast %149 : vector<1024xf32> to vector<1x1024xf32>
    %cst_82 = arith.constant 2.000000e+00 : f32
    %151 = vector.broadcast %cst_82 : f32 to vector<1x1024xf32>
    %152 = arith.divf %150, %151 : vector<1x1024xf32>
    %cst_83 = arith.constant 9.99999974E-6 : f32
    %153 = vector.broadcast %cst_83 : f32 to vector<1x1024xf32>
    %154 = arith.addf %152, %153 : vector<1x1024xf32>
    %155 = math.rsqrt %154 : vector<1x1024xf32>
    %156 = arith.mulf %140, %155 : vector<1x1024xf32>
    %157 = vector.broadcast %156 : vector<1x1024xf32> to vector<2x1024xf32>
    %158 = arith.mulf %147, %157 : vector<2x1024xf32>
    %159 = vector.broadcast %141 : vector<1x1024xf32> to vector<2x1024xf32>
    %160 = arith.addf %158, %159 : vector<2x1024xf32>
    %cst_84 = arith.constant 0.000000e+00 : f32
    %161 = vector.broadcast %cst_84 : f32 to vector<2x1024xf32>
    %162 = arith.maximumf %160, %161 : vector<2x1024xf32>
    %c0_85 = arith.constant 0 : index
    %c0_86 = arith.constant 0 : index
    %163 = vector.load %arg23[%c0_85, %c0_86] : memref<2x1024xf32, #tpu.memory_space<vmem>>, vector<2x1024xf32>
    tpu.vector_store %arg23[%c0_85, %c0_86], %162 {strides = array<i32>} : memref<2x1024xf32, #tpu.memory_space<vmem>>, vector<2x1024xf32>,
    return
  }
  func.func @transform_0(%arg0: i32) -> (i32, i32) {
    %c0_i32 = arith.constant 0 : i32
    %c0_i32_0 = arith.constant 0 : i32
    %c0_i32_1 = arith.constant 0 : i32
    return %c0_i32, %c0_i32_0 : i32, i32
  }
  func.func @transform_1(%arg0: i32) -> (i32, i32) {
    %c0_i32 = arith.constant 0 : i32
    %c0_i32_0 = arith.constant 0 : i32
    %c0_i32_1 = arith.constant 0 : i32
    return %c0_i32, %c0_i32_0 : i32, i32
  }
  func.func @transform_2(%arg0: i32) -> (i32, i32) {
    %c0_i32 = arith.constant 0 : i32
    %c0_i32_0 = arith.constant 0 : i32
    %c0_i32_1 = arith.constant 0 : i32
    return %c0_i32, %c0_i32_0 : i32, i32
  }
  func.func @transform_3(%arg0: i32) -> (i32, i32) {
    %c0_i32 = arith.constant 0 : i32
    %c0_i32_0 = arith.constant 0 : i32
    %c0_i32_1 = arith.constant 0 : i32
    return %c0_i32, %c0_i32_0 : i32, i32
  }
  func.func @transform_4(%arg0: i32) -> (i32, i32) {
    %c0_i32 = arith.constant 0 : i32
    %c0_i32_0 = arith.constant 0 : i32
    %c0_i32_1 = arith.constant 0 : i32
    return %c0_i32, %c0_i32_0 : i32, i32
  }
  func.func @transform_5(%arg0: i32) -> (i32, i32) {
    %c0_i32 = arith.constant 0 : i32
    %c0_i32_0 = arith.constant 0 : i32
    %c0_i32_1 = arith.constant 0 : i32
    return %c0_i32, %c0_i32_0 : i32, i32
  }
  func.func @transform_6(%arg0: i32) -> (i32, i32) {
    %c0_i32 = arith.constant 0 : i32
    %c0_i32_0 = arith.constant 0 : i32
    %c0_i32_1 = arith.constant 0 : i32
    return %c0_i32, %c0_i32_0 : i32, i32
  }
  func.func @transform_7(%arg0: i32) -> (i32, i32) {
    %c0_i32 = arith.constant 0 : i32
    %c0_i32_0 = arith.constant 0 : i32
    %c0_i32_1 = arith.constant 0 : i32
    return %c0_i32, %c0_i32_0 : i32, i32
  }
  func.func @transform_8(%arg0: i32) -> (i32, i32) {
    %c0_i32 = arith.constant 0 : i32
    %c0_i32_0 = arith.constant 0 : i32
    %c0_i32_1 = arith.constant 0 : i32
    return %c0_i32, %c0_i32_0 : i32, i32
  }
  func.func @transform_9(%arg0: i32) -> (i32, i32) {
    %c0_i32 = arith.constant 0 : i32
    %c0_i32_0 = arith.constant 0 : i32
    %c0_i32_1 = arith.constant 0 : i32
    return %c0_i32, %c0_i32_0 : i32, i32
  }
  func.func @transform_10(%arg0: i32) -> (i32, i32) {
    %c0_i32 = arith.constant 0 : i32
    %c0_i32_0 = arith.constant 0 : i32
    %c0_i32_1 = arith.constant 0 : i32
    return %c0_i32, %c0_i32_0 : i32, i32
  }
  func.func @transform_11(%arg0: i32) -> (i32, i32) {
    %c0_i32 = arith.constant 0 : i32
    %c0_i32_0 = arith.constant 0 : i32
    %c0_i32_1 = arith.constant 0 : i32
    return %c0_i32, %c0_i32_0 : i32, i32
  }
  func.func @transform_12(%arg0: i32) -> (i32, i32) {
    %c0_i32 = arith.constant 0 : i32
    %c0_i32_0 = arith.constant 0 : i32
    %c0_i32_1 = arith.constant 0 : i32
    return %c0_i32, %c0_i32_0 : i32, i32
  }
  func.func @transform_13(%arg0: i32) -> (i32, i32) {
    %c0_i32 = arith.constant 0 : i32
    %c0_i32_0 = arith.constant 0 : i32
    %c0_i32_1 = arith.constant 0 : i32
    return %c0_i32, %c0_i32_0 : i32, i32
  }
  func.func @transform_14(%arg0: i32) -> (i32, i32) {
    %c0_i32 = arith.constant 0 : i32
    %c0_i32_0 = arith.constant 0 : i32
    %c0_i32_1 = arith.constant 0 : i32
    return %c0_i32, %c0_i32_0 : i32, i32
  }
  func.func @transform_15(%arg0: i32) -> (i32, i32) {
    %c0_i32 = arith.constant 0 : i32
    %c0_i32_0 = arith.constant 0 : i32
    %c0_i32_1 = arith.constant 0 : i32
    return %c0_i32, %c0_i32_0 : i32, i32
  }
  func.func @transform_16(%arg0: i32) -> (i32, i32) {
    %c0_i32 = arith.constant 0 : i32
    %c0_i32_0 = arith.constant 0 : i32
    %c0_i32_1 = arith.constant 0 : i32
    return %c0_i32, %c0_i32_0 : i32, i32
  }
  func.func @transform_17(%arg0: i32) -> (i32, i32) {
    %c0_i32 = arith.constant 0 : i32
    %c0_i32_0 = arith.constant 0 : i32
    %c0_i32_1 = arith.constant 0 : i32
    return %c0_i32, %c0_i32_0 : i32, i32
  }
  func.func @transform_18(%arg0: i32) -> (i32, i32) {
    %c0_i32 = arith.constant 0 : i32
    %c0_i32_0 = arith.constant 0 : i32
    %c0_i32_1 = arith.constant 0 : i32
    return %c0_i32, %c0_i32_0 : i32, i32
  }
  func.func @transform_19(%arg0: i32) -> (i32, i32) {
    %c0_i32 = arith.constant 0 : i32
    %c0_i32_0 = arith.constant 0 : i32
    %c0_i32_1 = arith.constant 0 : i32
    return %c0_i32, %c0_i32_0 : i32, i32
  }
  func.func @transform_20(%arg0: i32) -> (i32, i32) {
    %c0_i32 = arith.constant 0 : i32
    %c0_i32_0 = arith.constant 0 : i32
    %c0_i32_1 = arith.constant 0 : i32
    return %c0_i32, %c0_i32_0 : i32, i32
  }
  func.func @transform_21(%arg0: i32) -> (i32, i32) {
    %c0_i32 = arith.constant 0 : i32
    %c0_i32_0 = arith.constant 0 : i32
    %c0_i32_1 = arith.constant 0 : i32
    return %c0_i32, %c0_i32_0 : i32, i32
  }
  func.func @transform_22(%arg0: i32) -> (i32, i32) {
    %c0_i32 = arith.constant 0 : i32
    %c0_i32_0 = arith.constant 0 : i32
    %c0_i32_1 = arith.constant 0 : i32
    return %c0_i32, %c0_i32_0 : i32, i32
  }
}

module attributes {stable_mosaic.version = 11 : i64} {
  func.func @_conv_bn_kernel(%arg0: i32, %arg1: memref<64x576xf32, #tpu.memory_space<vmem>>, %arg2: memref<576x32xf32, #tpu.memory_space<vmem>>, %arg3: memref<64x1xf32, #tpu.memory_space<vmem>>, %arg4: memref<64x1xf32, #tpu.memory_space<vmem>>, %arg5: memref<64x32xf32, #tpu.memory_space<vmem>>) attributes {dimension_semantics = [#tpu.dimension_semantics<arbitrary>], iteration_bounds = array<i64: 1>, scalar_prefetch = 0 : i64, scratch_operands = 0 : i64, tpu.core_type = #tpu.core_type<tc>, window_params = [{pipeline_mode = #tpu.pipeline_mode<synchronous>, transform_indices = @transform_0, window_bounds = array<i64: 64, 576>}, {pipeline_mode = #tpu.pipeline_mode<synchronous>, transform_indices = @transform_1, window_bounds = array<i64: 576, 32>}, {pipeline_mode = #tpu.pipeline_mode<synchronous>, transform_indices = @transform_2, window_bounds = array<i64: 64, 1>}, {pipeline_mode = #tpu.pipeline_mode<synchronous>, transform_indices = @transform_3, window_bounds = array<i64: 64, 1>}, {pipeline_mode = #tpu.pipeline_mode<synchronous>, transform_indices = @transform_4, window_bounds = array<i64: 64, 32>}]} {
    %c0 = arith.constant 0 : index
    %c0_0 = arith.constant 0 : index
    %0 = vector.load %arg1[%c0, %c0_0] : memref<64x576xf32, #tpu.memory_space<vmem>>, vector<64x576xf32>
    %c0_1 = arith.constant 0 : index
    %c0_2 = arith.constant 0 : index
    %1 = vector.load %arg2[%c0_1, %c0_2] : memref<576x32xf32, #tpu.memory_space<vmem>>, vector<576x32xf32>
    %cst = arith.constant dense<0.000000e+00> : vector<64x32xf32>
    %2 = tpu.matmul %0, %1, %cst {dimension_numbers = #tpu.dot_dimension_numbers<[1], [0], [0], [1], [0, 0, 1, 1], [], []>} : vector<64x576xf32>, vector<576x32xf32>, vector<64x32xf32> -> vector<64x32xf32>
    %cst_3 = arith.constant dense<0.000000e+00> : vector<64xf32>
    %3 = vector.multi_reduction <add>, %2, %cst_3 [1] : vector<64x32xf32> to vector<64xf32>
    %4 = vector.shape_cast %3 : vector<64xf32> to vector<64x1xf32>
    %cst_4 = arith.constant 3.200000e+01 : f32
    %5 = vector.broadcast %cst_4 : f32 to vector<64x1xf32>
    %6 = arith.divf %4, %5 : vector<64x1xf32>
    %7 = vector.broadcast %6 : vector<64x1xf32> to vector<64x32xf32>
    %8 = arith.subf %2, %7 : vector<64x32xf32>
    %9 = arith.mulf %8, %8 : vector<64x32xf32>
    %cst_5 = arith.constant dense<0.000000e+00> : vector<64xf32>
    %10 = vector.multi_reduction <add>, %9, %cst_5 [1] : vector<64x32xf32> to vector<64xf32>
    %11 = vector.shape_cast %10 : vector<64xf32> to vector<64x1xf32>
    %cst_6 = arith.constant 3.200000e+01 : f32
    %12 = vector.broadcast %cst_6 : f32 to vector<64x1xf32>
    %13 = arith.divf %11, %12 : vector<64x1xf32>
    %c0_7 = arith.constant 0 : index
    %c0_8 = arith.constant 0 : index
    %14 = vector.load %arg3[%c0_7, %c0_8] : memref<64x1xf32, #tpu.memory_space<vmem>>, vector<64x1xf32>
    %cst_9 = arith.constant 9.99999974E-6 : f32
    %15 = vector.broadcast %cst_9 : f32 to vector<64x1xf32>
    %16 = arith.addf %13, %15 : vector<64x1xf32>
    %17 = math.rsqrt %16 : vector<64x1xf32>
    %18 = arith.mulf %14, %17 : vector<64x1xf32>
    %19 = vector.broadcast %18 : vector<64x1xf32> to vector<64x32xf32>
    %20 = arith.mulf %8, %19 : vector<64x32xf32>
    %c0_10 = arith.constant 0 : index
    %c0_11 = arith.constant 0 : index
    %21 = vector.load %arg4[%c0_10, %c0_11] : memref<64x1xf32, #tpu.memory_space<vmem>>, vector<64x1xf32>
    %22 = vector.broadcast %21 : vector<64x1xf32> to vector<64x32xf32>
    %23 = arith.addf %20, %22 : vector<64x32xf32>
    %c0_12 = arith.constant 0 : index
    %c0_13 = arith.constant 0 : index
    %24 = vector.load %arg5[%c0_12, %c0_13] : memref<64x32xf32, #tpu.memory_space<vmem>>, vector<64x32xf32>
    tpu.vector_store %arg5[%c0_12, %c0_13], %23 {strides = array<i32>} : memref<64x32xf32, #tpu.memory_space<vmem>>, vector<64x32xf32>,
    return
  }
  func.func @transform_0(%arg0: i32) -> (i32, i32) {
    %c0_i32 = arith.constant 0 : i32
    %c0_i32_0 = arith.constant 0 : i32
    %c0_i32_1 = arith.constant 0 : i32
    return %c0_i32, %c0_i32_0 : i32, i32
  }
  func.func @transform_1(%arg0: i32) -> (i32, i32) {
    %c0_i32 = arith.constant 0 : i32
    %c0_i32_0 = arith.constant 0 : i32
    %c0_i32_1 = arith.constant 0 : i32
    return %c0_i32, %c0_i32_0 : i32, i32
  }
  func.func @transform_2(%arg0: i32) -> (i32, i32) {
    %c0_i32 = arith.constant 0 : i32
    %c0_i32_0 = arith.constant 0 : i32
    %c0_i32_1 = arith.constant 0 : i32
    return %c0_i32, %c0_i32_0 : i32, i32
  }
  func.func @transform_3(%arg0: i32) -> (i32, i32) {
    %c0_i32 = arith.constant 0 : i32
    %c0_i32_0 = arith.constant 0 : i32
    %c0_i32_1 = arith.constant 0 : i32
    return %c0_i32, %c0_i32_0 : i32, i32
  }
  func.func @transform_4(%arg0: i32) -> (i32, i32) {
    %c0_i32 = arith.constant 0 : i32
    %c0_i32_0 = arith.constant 0 : i32
    %c0_i32_1 = arith.constant 0 : i32
    return %c0_i32, %c0_i32_0 : i32, i32
  }
}

module attributes {stable_mosaic.version = 11 : i64} {
  func.func @_deconv_bn_kernel(%arg0: i32, %arg1: memref<128x512xf32, #tpu.memory_space<vmem>>, %arg2: memref<512x32xf32, #tpu.memory_space<vmem>>, %arg3: memref<128x128xf32, #tpu.memory_space<vmem>>, %arg4: memref<128x1xf32, #tpu.memory_space<vmem>>, %arg5: memref<128x1xf32, #tpu.memory_space<vmem>>, %arg6: memref<128x32xf32, #tpu.memory_space<vmem>>) attributes {dimension_semantics = [#tpu.dimension_semantics<arbitrary>], iteration_bounds = array<i64: 1>, scalar_prefetch = 0 : i64, scratch_operands = 0 : i64, tpu.core_type = #tpu.core_type<tc>, window_params = [{pipeline_mode = #tpu.pipeline_mode<synchronous>, transform_indices = @transform_0, window_bounds = array<i64: 128, 512>}, {pipeline_mode = #tpu.pipeline_mode<synchronous>, transform_indices = @transform_1, window_bounds = array<i64: 512, 32>}, {pipeline_mode = #tpu.pipeline_mode<synchronous>, transform_indices = @transform_2, window_bounds = array<i64: 128, 128>}, {pipeline_mode = #tpu.pipeline_mode<synchronous>, transform_indices = @transform_3, window_bounds = array<i64: 128, 1>}, {pipeline_mode = #tpu.pipeline_mode<synchronous>, transform_indices = @transform_4, window_bounds = array<i64: 128, 1>}, {pipeline_mode = #tpu.pipeline_mode<synchronous>, transform_indices = @transform_5, window_bounds = array<i64: 128, 32>}]} {
    %c0 = arith.constant 0 : index
    %c0_0 = arith.constant 0 : index
    %0 = vector.load %arg1[%c0, %c0_0] : memref<128x512xf32, #tpu.memory_space<vmem>>, vector<128x512xf32>
    %c0_1 = arith.constant 0 : index
    %c0_2 = arith.constant 0 : index
    %1 = vector.load %arg2[%c0_1, %c0_2] : memref<512x32xf32, #tpu.memory_space<vmem>>, vector<512x32xf32>
    %c0_3 = arith.constant 0 : index
    %c0_4 = arith.constant 0 : index
    %2 = vector.load %arg3[%c0_3, %c0_4] : memref<128x128xf32, #tpu.memory_space<vmem>>, vector<128x128xf32>
    %c0_5 = arith.constant 0 : index
    %c0_6 = arith.constant 0 : index
    %3 = vector.load %arg4[%c0_5, %c0_6] : memref<128x1xf32, #tpu.memory_space<vmem>>, vector<128x1xf32>
    %c0_7 = arith.constant 0 : index
    %c0_8 = arith.constant 0 : index
    %4 = vector.load %arg5[%c0_7, %c0_8] : memref<128x1xf32, #tpu.memory_space<vmem>>, vector<128x1xf32>
    %cst = arith.constant dense<0.000000e+00> : vector<128x32xf32>
    %5 = tpu.matmul %0, %1, %cst {dimension_numbers = #tpu.dot_dimension_numbers<[1], [0], [0], [1], [0, 0, 1, 1], [], []>} : vector<128x512xf32>, vector<512x32xf32>, vector<128x32xf32> -> vector<128x32xf32>
    %cst_9 = arith.constant dense<0.000000e+00> : vector<128xf32>
    %6 = vector.multi_reduction <add>, %5, %cst_9 [1] : vector<128x32xf32> to vector<128xf32>
    %7 = vector.shape_cast %6 : vector<128xf32> to vector<128x1xf32>
    %cst_10 = arith.constant dense<0.000000e+00> : vector<128x1xf32>
    %8 = tpu.matmul %2, %7, %cst_10 {dimension_numbers = #tpu.dot_dimension_numbers<[1], [0], [0], [1], [0, 0, 1, 1], [], []>} : vector<128x128xf32>, vector<128x1xf32>, vector<128x1xf32> -> vector<128x1xf32>
    %cst_11 = arith.constant 7.812500e-03 : f32
    %9 = vector.broadcast %cst_11 : f32 to vector<128x1xf32>
    %10 = arith.mulf %8, %9 : vector<128x1xf32>
    %11 = vector.broadcast %10 : vector<128x1xf32> to vector<128x32xf32>
    %12 = arith.subf %5, %11 : vector<128x32xf32>
    %13 = arith.mulf %12, %12 : vector<128x32xf32>
    %cst_12 = arith.constant dense<0.000000e+00> : vector<128xf32>
    %14 = vector.multi_reduction <add>, %13, %cst_12 [1] : vector<128x32xf32> to vector<128xf32>
    %15 = vector.shape_cast %14 : vector<128xf32> to vector<128x1xf32>
    %cst_13 = arith.constant dense<0.000000e+00> : vector<128x1xf32>
    %16 = tpu.matmul %2, %15, %cst_13 {dimension_numbers = #tpu.dot_dimension_numbers<[1], [0], [0], [1], [0, 0, 1, 1], [], []>} : vector<128x128xf32>, vector<128x1xf32>, vector<128x1xf32> -> vector<128x1xf32>
    %cst_14 = arith.constant 7.812500e-03 : f32
    %17 = vector.broadcast %cst_14 : f32 to vector<128x1xf32>
    %18 = arith.mulf %16, %17 : vector<128x1xf32>
    %cst_15 = arith.constant 9.99999974E-6 : f32
    %19 = vector.broadcast %cst_15 : f32 to vector<128x1xf32>
    %20 = arith.addf %18, %19 : vector<128x1xf32>
    %21 = math.rsqrt %20 : vector<128x1xf32>
    %22 = arith.mulf %3, %21 : vector<128x1xf32>
    %23 = vector.broadcast %22 : vector<128x1xf32> to vector<128x32xf32>
    %24 = arith.mulf %12, %23 : vector<128x32xf32>
    %25 = vector.broadcast %4 : vector<128x1xf32> to vector<128x32xf32>
    %26 = arith.addf %24, %25 : vector<128x32xf32>
    %cst_16 = arith.constant 0.000000e+00 : f32
    %27 = vector.broadcast %cst_16 : f32 to vector<128x32xf32>
    %28 = arith.maximumf %26, %27 : vector<128x32xf32>
    %c0_17 = arith.constant 0 : index
    %c0_18 = arith.constant 0 : index
    %29 = vector.load %arg6[%c0_17, %c0_18] : memref<128x32xf32, #tpu.memory_space<vmem>>, vector<128x32xf32>
    tpu.vector_store %arg6[%c0_17, %c0_18], %28 {strides = array<i32>} : memref<128x32xf32, #tpu.memory_space<vmem>>, vector<128x32xf32>,
    return
  }
  func.func @transform_0(%arg0: i32) -> (i32, i32) {
    %c0_i32 = arith.constant 0 : i32
    %c0_i32_0 = arith.constant 0 : i32
    %c0_i32_1 = arith.constant 0 : i32
    return %c0_i32, %c0_i32_0 : i32, i32
  }
  func.func @transform_1(%arg0: i32) -> (i32, i32) {
    %c0_i32 = arith.constant 0 : i32
    %c0_i32_0 = arith.constant 0 : i32
    %c0_i32_1 = arith.constant 0 : i32
    return %c0_i32, %c0_i32_0 : i32, i32
  }
  func.func @transform_2(%arg0: i32) -> (i32, i32) {
    %c0_i32 = arith.constant 0 : i32
    %c0_i32_0 = arith.constant 0 : i32
    %c0_i32_1 = arith.constant 0 : i32
    return %c0_i32, %c0_i32_0 : i32, i32
  }
  func.func @transform_3(%arg0: i32) -> (i32, i32) {
    %c0_i32 = arith.constant 0 : i32
    %c0_i32_0 = arith.constant 0 : i32
    %c0_i32_1 = arith.constant 0 : i32
    return %c0_i32, %c0_i32_0 : i32, i32
  }
  func.func @transform_4(%arg0: i32) -> (i32, i32) {
    %c0_i32 = arith.constant 0 : i32
    %c0_i32_0 = arith.constant 0 : i32
    %c0_i32_1 = arith.constant 0 : i32
    return %c0_i32, %c0_i32_0 : i32, i32
  }
  func.func @transform_5(%arg0: i32) -> (i32, i32) {
    %c0_i32 = arith.constant 0 : i32
    %c0_i32_0 = arith.constant 0 : i32
    %c0_i32_1 = arith.constant 0 : i32
    return %c0_i32, %c0_i32_0 : i32, i32
  }
}

module attributes {stable_mosaic.version = 11 : i64} {
  func.func @_deconv_bn_kernel(%arg0: i32, %arg1: memref<64x256xf32, #tpu.memory_space<vmem>>, %arg2: memref<256x128xf32, #tpu.memory_space<vmem>>, %arg3: memref<64x64xf32, #tpu.memory_space<vmem>>, %arg4: memref<64x1xf32, #tpu.memory_space<vmem>>, %arg5: memref<64x1xf32, #tpu.memory_space<vmem>>, %arg6: memref<64x128xf32, #tpu.memory_space<vmem>>) attributes {dimension_semantics = [#tpu.dimension_semantics<arbitrary>], iteration_bounds = array<i64: 1>, scalar_prefetch = 0 : i64, scratch_operands = 0 : i64, tpu.core_type = #tpu.core_type<tc>, window_params = [{pipeline_mode = #tpu.pipeline_mode<synchronous>, transform_indices = @transform_0, window_bounds = array<i64: 64, 256>}, {pipeline_mode = #tpu.pipeline_mode<synchronous>, transform_indices = @transform_1, window_bounds = array<i64: 256, 128>}, {pipeline_mode = #tpu.pipeline_mode<synchronous>, transform_indices = @transform_2, window_bounds = array<i64: 64, 64>}, {pipeline_mode = #tpu.pipeline_mode<synchronous>, transform_indices = @transform_3, window_bounds = array<i64: 64, 1>}, {pipeline_mode = #tpu.pipeline_mode<synchronous>, transform_indices = @transform_4, window_bounds = array<i64: 64, 1>}, {pipeline_mode = #tpu.pipeline_mode<synchronous>, transform_indices = @transform_5, window_bounds = array<i64: 64, 128>}]} {
    %c0 = arith.constant 0 : index
    %c0_0 = arith.constant 0 : index
    %0 = vector.load %arg1[%c0, %c0_0] : memref<64x256xf32, #tpu.memory_space<vmem>>, vector<64x256xf32>
    %c0_1 = arith.constant 0 : index
    %c0_2 = arith.constant 0 : index
    %1 = vector.load %arg2[%c0_1, %c0_2] : memref<256x128xf32, #tpu.memory_space<vmem>>, vector<256x128xf32>
    %c0_3 = arith.constant 0 : index
    %c0_4 = arith.constant 0 : index
    %2 = vector.load %arg3[%c0_3, %c0_4] : memref<64x64xf32, #tpu.memory_space<vmem>>, vector<64x64xf32>
    %c0_5 = arith.constant 0 : index
    %c0_6 = arith.constant 0 : index
    %3 = vector.load %arg4[%c0_5, %c0_6] : memref<64x1xf32, #tpu.memory_space<vmem>>, vector<64x1xf32>
    %c0_7 = arith.constant 0 : index
    %c0_8 = arith.constant 0 : index
    %4 = vector.load %arg5[%c0_7, %c0_8] : memref<64x1xf32, #tpu.memory_space<vmem>>, vector<64x1xf32>
    %cst = arith.constant dense<0.000000e+00> : vector<64x128xf32>
    %5 = tpu.matmul %0, %1, %cst {dimension_numbers = #tpu.dot_dimension_numbers<[1], [0], [0], [1], [0, 0, 1, 1], [], []>} : vector<64x256xf32>, vector<256x128xf32>, vector<64x128xf32> -> vector<64x128xf32>
    %cst_9 = arith.constant dense<0.000000e+00> : vector<64xf32>
    %6 = vector.multi_reduction <add>, %5, %cst_9 [1] : vector<64x128xf32> to vector<64xf32>
    %7 = vector.shape_cast %6 : vector<64xf32> to vector<64x1xf32>
    %cst_10 = arith.constant dense<0.000000e+00> : vector<64x1xf32>
    %8 = tpu.matmul %2, %7, %cst_10 {dimension_numbers = #tpu.dot_dimension_numbers<[1], [0], [0], [1], [0, 0, 1, 1], [], []>} : vector<64x64xf32>, vector<64x1xf32>, vector<64x1xf32> -> vector<64x1xf32>
    %cst_11 = arith.constant 0.001953125 : f32
    %9 = vector.broadcast %cst_11 : f32 to vector<64x1xf32>
    %10 = arith.mulf %8, %9 : vector<64x1xf32>
    %11 = vector.broadcast %10 : vector<64x1xf32> to vector<64x128xf32>
    %12 = arith.subf %5, %11 : vector<64x128xf32>
    %13 = arith.mulf %12, %12 : vector<64x128xf32>
    %cst_12 = arith.constant dense<0.000000e+00> : vector<64xf32>
    %14 = vector.multi_reduction <add>, %13, %cst_12 [1] : vector<64x128xf32> to vector<64xf32>
    %15 = vector.shape_cast %14 : vector<64xf32> to vector<64x1xf32>
    %cst_13 = arith.constant dense<0.000000e+00> : vector<64x1xf32>
    %16 = tpu.matmul %2, %15, %cst_13 {dimension_numbers = #tpu.dot_dimension_numbers<[1], [0], [0], [1], [0, 0, 1, 1], [], []>} : vector<64x64xf32>, vector<64x1xf32>, vector<64x1xf32> -> vector<64x1xf32>
    %cst_14 = arith.constant 0.001953125 : f32
    %17 = vector.broadcast %cst_14 : f32 to vector<64x1xf32>
    %18 = arith.mulf %16, %17 : vector<64x1xf32>
    %cst_15 = arith.constant 9.99999974E-6 : f32
    %19 = vector.broadcast %cst_15 : f32 to vector<64x1xf32>
    %20 = arith.addf %18, %19 : vector<64x1xf32>
    %21 = math.rsqrt %20 : vector<64x1xf32>
    %22 = arith.mulf %3, %21 : vector<64x1xf32>
    %23 = vector.broadcast %22 : vector<64x1xf32> to vector<64x128xf32>
    %24 = arith.mulf %12, %23 : vector<64x128xf32>
    %25 = vector.broadcast %4 : vector<64x1xf32> to vector<64x128xf32>
    %26 = arith.addf %24, %25 : vector<64x128xf32>
    %cst_16 = arith.constant 0.000000e+00 : f32
    %27 = vector.broadcast %cst_16 : f32 to vector<64x128xf32>
    %28 = arith.maximumf %26, %27 : vector<64x128xf32>
    %c0_17 = arith.constant 0 : index
    %c0_18 = arith.constant 0 : index
    %29 = vector.load %arg6[%c0_17, %c0_18] : memref<64x128xf32, #tpu.memory_space<vmem>>, vector<64x128xf32>
    tpu.vector_store %arg6[%c0_17, %c0_18], %28 {strides = array<i32>} : memref<64x128xf32, #tpu.memory_space<vmem>>, vector<64x128xf32>,
    return
  }
  func.func @transform_0(%arg0: i32) -> (i32, i32) {
    %c0_i32 = arith.constant 0 : i32
    %c0_i32_0 = arith.constant 0 : i32
    %c0_i32_1 = arith.constant 0 : i32
    return %c0_i32, %c0_i32_0 : i32, i32
  }
  func.func @transform_1(%arg0: i32) -> (i32, i32) {
    %c0_i32 = arith.constant 0 : i32
    %c0_i32_0 = arith.constant 0 : i32
    %c0_i32_1 = arith.constant 0 : i32
    return %c0_i32, %c0_i32_0 : i32, i32
  }
  func.func @transform_2(%arg0: i32) -> (i32, i32) {
    %c0_i32 = arith.constant 0 : i32
    %c0_i32_0 = arith.constant 0 : i32
    %c0_i32_1 = arith.constant 0 : i32
    return %c0_i32, %c0_i32_0 : i32, i32
  }
  func.func @transform_3(%arg0: i32) -> (i32, i32) {
    %c0_i32 = arith.constant 0 : i32
    %c0_i32_0 = arith.constant 0 : i32
    %c0_i32_1 = arith.constant 0 : i32
    return %c0_i32, %c0_i32_0 : i32, i32
  }
  func.func @transform_4(%arg0: i32) -> (i32, i32) {
    %c0_i32 = arith.constant 0 : i32
    %c0_i32_0 = arith.constant 0 : i32
    %c0_i32_1 = arith.constant 0 : i32
    return %c0_i32, %c0_i32_0 : i32, i32
  }
  func.func @transform_5(%arg0: i32) -> (i32, i32) {
    %c0_i32 = arith.constant 0 : i32
    %c0_i32_0 = arith.constant 0 : i32
    %c0_i32_1 = arith.constant 0 : i32
    return %c0_i32, %c0_i32_0 : i32, i32
  }
}

module attributes {stable_mosaic.version = 11 : i64} {
  func.func @_deconv_bn_final_kernel(%arg0: i32, %arg1: memref<4x128xf32, #tpu.memory_space<vmem>>, %arg2: memref<128x512xf32, #tpu.memory_space<vmem>>, %arg3: memref<4x4xf32, #tpu.memory_space<vmem>>, %arg4: memref<4x1xf32, #tpu.memory_space<vmem>>, %arg5: memref<4x1xf32, #tpu.memory_space<vmem>>, %arg6: memref<4x512xf32, #tpu.memory_space<vmem>>, %arg7: memref<4x512xf32, #tpu.memory_space<vmem>>) attributes {dimension_semantics = [#tpu.dimension_semantics<arbitrary>], iteration_bounds = array<i64: 1>, scalar_prefetch = 0 : i64, scratch_operands = 0 : i64, tpu.core_type = #tpu.core_type<tc>, window_params = [{pipeline_mode = #tpu.pipeline_mode<synchronous>, transform_indices = @transform_0, window_bounds = array<i64: 4, 128>}, {pipeline_mode = #tpu.pipeline_mode<synchronous>, transform_indices = @transform_1, window_bounds = array<i64: 128, 512>}, {pipeline_mode = #tpu.pipeline_mode<synchronous>, transform_indices = @transform_2, window_bounds = array<i64: 4, 4>}, {pipeline_mode = #tpu.pipeline_mode<synchronous>, transform_indices = @transform_3, window_bounds = array<i64: 4, 1>}, {pipeline_mode = #tpu.pipeline_mode<synchronous>, transform_indices = @transform_4, window_bounds = array<i64: 4, 1>}, {pipeline_mode = #tpu.pipeline_mode<synchronous>, transform_indices = @transform_5, window_bounds = array<i64: 4, 512>}, {pipeline_mode = #tpu.pipeline_mode<synchronous>, transform_indices = @transform_6, window_bounds = array<i64: 4, 512>}]} {
    %c0 = arith.constant 0 : index
    %c0_0 = arith.constant 0 : index
    %0 = vector.load %arg1[%c0, %c0_0] : memref<4x128xf32, #tpu.memory_space<vmem>>, vector<4x128xf32>
    %c0_1 = arith.constant 0 : index
    %c0_2 = arith.constant 0 : index
    %1 = vector.load %arg2[%c0_1, %c0_2] : memref<128x512xf32, #tpu.memory_space<vmem>>, vector<128x512xf32>
    %c0_3 = arith.constant 0 : index
    %c0_4 = arith.constant 0 : index
    %2 = vector.load %arg3[%c0_3, %c0_4] : memref<4x4xf32, #tpu.memory_space<vmem>>, vector<4x4xf32>
    %c0_5 = arith.constant 0 : index
    %c0_6 = arith.constant 0 : index
    %3 = vector.load %arg4[%c0_5, %c0_6] : memref<4x1xf32, #tpu.memory_space<vmem>>, vector<4x1xf32>
    %c0_7 = arith.constant 0 : index
    %c0_8 = arith.constant 0 : index
    %4 = vector.load %arg5[%c0_7, %c0_8] : memref<4x1xf32, #tpu.memory_space<vmem>>, vector<4x1xf32>
    %cst = arith.constant dense<0.000000e+00> : vector<4x512xf32>
    %5 = tpu.matmul %0, %1, %cst {dimension_numbers = #tpu.dot_dimension_numbers<[1], [0], [0], [1], [0, 0, 1, 1], [], []>} : vector<4x128xf32>, vector<128x512xf32>, vector<4x512xf32> -> vector<4x512xf32>
    %cst_9 = arith.constant dense<0.000000e+00> : vector<4xf32>
    %6 = vector.multi_reduction <add>, %5, %cst_9 [1] : vector<4x512xf32> to vector<4xf32>
    %7 = vector.shape_cast %6 : vector<4xf32> to vector<4x1xf32>
    %cst_10 = arith.constant dense<0.000000e+00> : vector<4x1xf32>
    %8 = tpu.matmul %2, %7, %cst_10 {dimension_numbers = #tpu.dot_dimension_numbers<[1], [0], [0], [1], [0, 0, 1, 1], [], []>} : vector<4x4xf32>, vector<4x1xf32>, vector<4x1xf32> -> vector<4x1xf32>
    %cst_11 = arith.constant 4.8828125E-4 : f32
    %9 = vector.broadcast %cst_11 : f32 to vector<4x1xf32>
    %10 = arith.mulf %8, %9 : vector<4x1xf32>
    %11 = vector.broadcast %10 : vector<4x1xf32> to vector<4x512xf32>
    %12 = arith.subf %5, %11 : vector<4x512xf32>
    %13 = arith.mulf %12, %12 : vector<4x512xf32>
    %cst_12 = arith.constant dense<0.000000e+00> : vector<4xf32>
    %14 = vector.multi_reduction <add>, %13, %cst_12 [1] : vector<4x512xf32> to vector<4xf32>
    %15 = vector.shape_cast %14 : vector<4xf32> to vector<4x1xf32>
    %cst_13 = arith.constant dense<0.000000e+00> : vector<4x1xf32>
    %16 = tpu.matmul %2, %15, %cst_13 {dimension_numbers = #tpu.dot_dimension_numbers<[1], [0], [0], [1], [0, 0, 1, 1], [], []>} : vector<4x4xf32>, vector<4x1xf32>, vector<4x1xf32> -> vector<4x1xf32>
    %cst_14 = arith.constant 4.8828125E-4 : f32
    %17 = vector.broadcast %cst_14 : f32 to vector<4x1xf32>
    %18 = arith.mulf %16, %17 : vector<4x1xf32>
    %cst_15 = arith.constant 9.99999974E-6 : f32
    %19 = vector.broadcast %cst_15 : f32 to vector<4x1xf32>
    %20 = arith.addf %18, %19 : vector<4x1xf32>
    %21 = math.rsqrt %20 : vector<4x1xf32>
    %22 = arith.mulf %3, %21 : vector<4x1xf32>
    %23 = vector.broadcast %22 : vector<4x1xf32> to vector<4x512xf32>
    %24 = arith.mulf %12, %23 : vector<4x512xf32>
    %25 = vector.broadcast %4 : vector<4x1xf32> to vector<4x512xf32>
    %26 = arith.addf %24, %25 : vector<4x512xf32>
    %cst_16 = arith.constant 0.000000e+00 : f32
    %27 = vector.broadcast %cst_16 : f32 to vector<4x512xf32>
    %28 = arith.maximumf %26, %27 : vector<4x512xf32>
    %29 = math.tanh %28 : vector<4x512xf32>
    %cst_17 = arith.constant 5.000000e-01 : f32
    %30 = vector.broadcast %cst_17 : f32 to vector<4x512xf32>
    %31 = arith.mulf %29, %30 : vector<4x512xf32>
    %cst_18 = arith.constant 5.000000e-01 : f32
    %32 = vector.broadcast %cst_18 : f32 to vector<4x512xf32>
    %33 = arith.addf %31, %32 : vector<4x512xf32>
    %c0_19 = arith.constant 0 : index
    %c0_20 = arith.constant 0 : index
    %34 = vector.load %arg6[%c0_19, %c0_20] : memref<4x512xf32, #tpu.memory_space<vmem>>, vector<4x512xf32>
    %35 = arith.addf %33, %34 : vector<4x512xf32>
    %cst_21 = arith.constant 0.000000e+00 : f32
    %cst_22 = arith.constant 1.000000e+00 : f32
    %36 = vector.broadcast %cst_21 : f32 to vector<4x512xf32>
    %37 = arith.maximumf %36, %35 : vector<4x512xf32>
    %38 = vector.broadcast %cst_22 : f32 to vector<4x512xf32>
    %39 = arith.minimumf %38, %37 : vector<4x512xf32>
    %c0_23 = arith.constant 0 : index
    %c0_24 = arith.constant 0 : index
    %40 = vector.load %arg7[%c0_23, %c0_24] : memref<4x512xf32, #tpu.memory_space<vmem>>, vector<4x512xf32>
    tpu.vector_store %arg7[%c0_23, %c0_24], %39 {strides = array<i32>} : memref<4x512xf32, #tpu.memory_space<vmem>>, vector<4x512xf32>,
    return
  }
  func.func @transform_0(%arg0: i32) -> (i32, i32) {
    %c0_i32 = arith.constant 0 : i32
    %c0_i32_0 = arith.constant 0 : i32
    %c0_i32_1 = arith.constant 0 : i32
    return %c0_i32, %c0_i32_0 : i32, i32
  }
  func.func @transform_1(%arg0: i32) -> (i32, i32) {
    %c0_i32 = arith.constant 0 : i32
    %c0_i32_0 = arith.constant 0 : i32
    %c0_i32_1 = arith.constant 0 : i32
    return %c0_i32, %c0_i32_0 : i32, i32
  }
  func.func @transform_2(%arg0: i32) -> (i32, i32) {
    %c0_i32 = arith.constant 0 : i32
    %c0_i32_0 = arith.constant 0 : i32
    %c0_i32_1 = arith.constant 0 : i32
    return %c0_i32, %c0_i32_0 : i32, i32
  }
  func.func @transform_3(%arg0: i32) -> (i32, i32) {
    %c0_i32 = arith.constant 0 : i32
    %c0_i32_0 = arith.constant 0 : i32
    %c0_i32_1 = arith.constant 0 : i32
    return %c0_i32, %c0_i32_0 : i32, i32
  }
  func.func @transform_4(%arg0: i32) -> (i32, i32) {
    %c0_i32 = arith.constant 0 : i32
    %c0_i32_0 = arith.constant 0 : i32
    %c0_i32_1 = arith.constant 0 : i32
    return %c0_i32, %c0_i32_0 : i32, i32
  }
  func.func @transform_5(%arg0: i32) -> (i32, i32) {
    %c0_i32 = arith.constant 0 : i32
    %c0_i32_0 = arith.constant 0 : i32
    %c0_i32_1 = arith.constant 0 : i32
    return %c0_i32, %c0_i32_0 : i32, i32
  }
  func.func @transform_6(%arg0: i32) -> (i32, i32) {
    %c0_i32 = arith.constant 0 : i32
    %c0_i32_0 = arith.constant 0 : i32
    %c0_i32_1 = arith.constant 0 : i32
    return %c0_i32, %c0_i32_0 : i32, i32
  }
}

</mosaic_0001>

<bundles_post_ra>
// kernel: generator_forward.9
= control target key start
LH: loop header
LB: loop body
LE: loop exit
PB: predicated region body
PF: predicated region fallthrough
CT: control target
= control target key end

     0   :  { %vm34_vm0 = vcmask 1040384   ;;  %vm337_vm1 = vmmov 1   ;;  %v338_v3 = vmov 0.0   ;;  %vm27_vm3 = vcmask 72704   ;;  %s443_s1 = inlined_call_operand.vmem [shape: f32[9,512], index: 1, kind: input, shape index: {}]   ;;  %s444_s0 = inlined_call_operand.vmem [shape: f32[16,9], index: 0, kind: input, shape index: {}]   ;;  %s445_s3 = inlined_call_operand.vmem [shape: f32[16,1], index: 3, kind: input, shape index: {}]   ;;  %s446_s2 = inlined_call_operand.vmem [shape: f32[16,1], index: 2, kind: input, shape index: {}]   ;;  %s447_s4 = inlined_call_operand.vmem [shape: f32[16,512], index: 4, kind: output, shape index: {}]  }
   0x1   :  { %v20_v0 = vld [vmem:[%s443_s1 + $0x8] sm:$0xff]  ;;  %vm371_vm2 = vmpackc.low %vm34_vm0, %vm337_vm1  ;;  %111 = vmatprep.mubr.f32.mxu0 %v338_v3  ;;  %188 = vmatprep.mubr.f32.mxu1 %v338_v3  ;;  %v19_v5 = vld [vmem:[%s443_s1] sm:$0xff]  ;;  %v339_v56 = vmov 0  }
   0x2   :  { %v24_v1 = vld [vmem:[%s443_s1 + $0x28] sm:$0x1]  ;;  %v23_v6 = vld [vmem:[%s443_s1 + $0x20] sm:$0x1]  ;;  %v22_v7 = vld [vmem:[%s443_s1 + $0x18] sm:$0xff]  ;;  %332 = vset.pattern.permute.xlu1 %v339_v56  ;;  %331 = vset.pattern.permute.xlu0 %v339_v56 }
   0x3   :  { %v316_v4 = vpack.c.bf16 %v24_v1, %v20_v0  ;;  %v319_v8 = vpack.c.bf16 %v23_v6, %v19_v5  ;;  %v26_v9 = vld [vmem:[%s443_s1 + $0x38] sm:$0x1]  ;;  %v21_v10 = vld [vmem:[%s443_s1 + $0x10] sm:$0xff]  ;;  %v17_v14 = vld [vmem:[%s444_s0] sm:$0xff] }
   0x4   :  { %v25_v11 = vld [vmem:[%s443_s1 + $0x30] sm:$0x1]  ;;  %v322_v12 = vpack.c.bf16 %v26_v9, %v22_v7  ;;  %v18_v15 = vld [vmem:[%s444_s0 + $0x8] sm:$0xff]  ;;  %v268_v57 = vld [vmem:[%s445_s3] sm:$0xff] }
   0x5   :  { %318 = vmatprep.subr.msk.bf16.mxu0 %vm371_vm2, %v316_v4  ;;  %v325_v13 = vpack.c.bf16 %v25_v11, %v21_v10  ;;  %v242_v0 = vld [vmem:[%s446_s2] sm:$0xff]  ;;  %v269_v6 = vld [vmem:[%s445_s3 + $0x8] sm:$0xff] }
   0x6   :  { %321 = vmatpush1.bf16.msk.msra.mxu0 %vm371_vm2, %v319_v8  ;;  %324 = vmatprep.subr.msk.bf16.mxu1 %vm371_vm2, %v322_v12 }
   0x7   :  { %327 = vmatpush1.bf16.msk.msra.mxu1 %vm371_vm2, %v325_v13 }
   0x9   :  { %310 = vmatmul.mubr.msk.f32.vlgmr.msra.gmra.mrb[0].mxu0 %vm27_vm3, %v17_v14 }
   0xa   :  { %117 = vmatprep.mubr.f32.mxu0 %v338_v3  ;;  %314 = vmatmul.mubr.msk.f32.vlgmr.msra.gmra.mrb[0].mxu1 %vm27_vm3, %v17_v14 }
   0xb   :  { %194 = vmatprep.mubr.f32.mxu1 %v338_v3  ;;  %v243_v3 = vld [vmem:[%s446_s2 + $0x8] sm:$0xff] }
   0xd   :  { %311 = vmatmul.mubr.msk.f32.gmra.mrb[2].mxu0 %vm27_vm3, %v18_v15 }
   0xe   :  { %315 = vmatmul.mubr.msk.f32.gmra.mrb[2].mxu1 %vm27_vm3, %v18_v15 }
  0xdc   :  { %v113_v16 = vpop.f32.mrb[0].mxu0 }
  0xdd   :  { %v115_v17 = vpop.f32.mrb[1].mxu0  ;;  %v190_v19 = vpop.f32.mrb[0].mxu1 }
  0xde   :  { %v201_v18 = vadd.f32 %v115_v17, %v113_v16  ;;  %v192_v20 = vpop.f32.mrb[1].mxu1 }
  0xe0   :  { %v202_v21 = vadd.f32 %v201_v18, %v190_v19  ;;  %v119_v22 = vpop.f32.mrb[2].mxu0 }
  0xe1   :  { %v121_v23 = vpop.f32.mrb[3].mxu0  ;;  %v196_v25 = vpop.f32.mrb[2].mxu1 }
  0xe2   :  { %v206_v24 = vadd.f32 %v121_v23, %v119_v22  ;;  %v203_v26 = vadd.f32 %v202_v21, %v192_v20  ;;  %v198_v27 = vpop.f32.mrb[3].mxu1 }
  0xe4   :  { %v207_v28 = vadd.f32 %v206_v24, %v196_v25  ;;  %204 = vadd.xlane.f32.xlu0 %v203_v26 }
  0xe6   :  { %v208_v29 = vadd.f32 %v207_v28, %v198_v27 }
  0xe8   :  { %209 = vadd.xlane.f32.xlu0 %v208_v29 }
 0x171   :  { %v205_v30 = vpop.xlane.xlu0 %204 }
 0x172   :  { %v212_v31 = vmul.f32 0.001953125, %v205_v30 }
 0x174   :  { %v214_v32 = vsub.f32 %v113_v16, %v212_v31  ;;  %v215_v33 = vsub.f32 %v115_v17, %v212_v31  ;;  %v216_v34 = vsub.f32 %v190_v19, %v212_v31  ;;  %v217_v36 = vsub.f32 %v192_v20, %v212_v31 }
 0x175   :  { %v210_v35 = vpop.xlane.xlu0 %209 }
 0x176   :  { %v213_v37 = vmul.f32 0.001953125, %v210_v35  ;;  %v222_v38 = vmul.f32 %v214_v32, %v214_v32  ;;  %v223_v39 = vmul.f32 %v215_v33, %v215_v33  ;;  %v224_v40 = vmul.f32 %v216_v34, %v216_v34 }
 0x177   :  { %v225_v45 = vmul.f32 %v217_v36, %v217_v36 }
 0x178   :  { %v218_v41 = vsub.f32 %v119_v22, %v213_v37  ;;  %v219_v42 = vsub.f32 %v121_v23, %v213_v37  ;;  %v230_v43 = vadd.f32 %v223_v39, %v222_v38  ;;  %v220_v44 = vsub.f32 %v196_v25, %v213_v37 }
 0x179   :  { %v221_v47 = vsub.f32 %v198_v27, %v213_v37 }
 0x17a   :  { %v231_v46 = vadd.f32 %v230_v43, %v224_v40  ;;  %v226_v48 = vmul.f32 %v218_v41, %v218_v41  ;;  %v227_v49 = vmul.f32 %v219_v42, %v219_v42  ;;  %v228_v51 = vmul.f32 %v220_v44, %v220_v44 }
 0x17b   :  { %v229_v53 = vmul.f32 %v221_v47, %v221_v47 }
 0x17c   :  { %v232_v50 = vadd.f32 %v231_v46, %v225_v45  ;;  %v235_v52 = vadd.f32 %v227_v49, %v226_v48 }
 0x17e   :  { %233 = vadd.xlane.f32.xlu1 %v232_v50  ;;  %v236_v54 = vadd.f32 %v235_v52, %v228_v51 }
 0x180   :  { %v237_v55 = vadd.f32 %v236_v54, %v229_v53 }
 0x182   :  { %238 = vadd.xlane.f32.xlu1 %v237_v55 }
 0x193   :  { %272 = vperm.xlu1 %332, %v268_v57  }
 0x20b   :  { %v234_v58 = vpop.xlane.xlu1 %233 }
 0x20c   :  { %v240_v59 = vmul.f32 0.001953125, %v234_v58 }
 0x20e   :  { %v244_v60 = vadd.f32 1e-05, %v240_v59 }
 0x20f   :  { %v239_v61 = vpop.xlane.xlu1 %238 }
 0x210   :  { %333 = vrsqrt.f32 %v244_v60  ;;  %v241_v62 = vmul.f32 0.001953125, %v239_v61 }
 0x212   :  { %v245_v63 = vadd.f32 1e-05, %v241_v62 }
 0x213   :  { %v273_v7 = vpop.permute.xlu1 %272 }
 0x214   :  { %335 = vrsqrt.f32 %v245_v63 }
 0x21a   :  { %v334_v1 = vpop.eup %333 }
 0x21b   :  { %v248_v2 = vmul.f32 %v334_v1, %v242_v0 }
 0x21d   :  { %252 = vperm.xlu0 %331, %v248_v2  }
 0x21e   :  { %v336_v4 = vpop.eup %335 }
 0x21f   :  { %v249_v5 = vmul.f32 %v336_v4, %v243_v3 }
 0x221   :  { %257 = vperm.xlu1 %332, %v249_v5  }
 0x225   :  { %277 = vperm.xlu1 %332, %v269_v6  }
 0x29c   :  { %v253_v8 = vpop.permute.xlu0 %252 }
 0x29d   :  { %v260_v9 = vmul.f32 %v253_v8, %v214_v32  ;;  %v261_v10 = vmul.f32 %v253_v8, %v215_v33  ;;  %v262_v11 = vmul.f32 %v253_v8, %v216_v34  ;;  %v263_v12 = vmul.f32 %v253_v8, %v217_v36 }
 0x29f   :  { %v280_v13 = vadd.f32 %v273_v7, %v260_v9  ;;  %v281_v14 = vadd.f32 %v273_v7, %v261_v10  ;;  %v282_v15 = vadd.f32 %v273_v7, %v262_v11  ;;  %v283_v16 = vadd.f32 %v273_v7, %v263_v12 }
 0x2a0   :  { %v258_v17 = vpop.permute.xlu1 %257 }
 0x2a1   :  { %v288_v18 = vmax.f32 %v280_v13, 0.0  ;;  %v289_v19 = vmax.f32 %v281_v14, 0.0  ;;  %v290_v20 = vmax.f32 %v282_v15, 0.0  ;;  %v291_v21 = vmax.f32 %v283_v16, 0.0 }
 0x2a2   :  { %v264_v22 = vmul.f32 %v258_v17, %v218_v41  ;;  %v265_v23 = vmul.f32 %v258_v17, %v219_v42  ;;  %v266_v24 = vmul.f32 %v258_v17, %v220_v44  ;;  %v267_v25 = vmul.f32 %v258_v17, %v221_v47 }
 0x2a3   :  { %296 = vst [vmem:[%s447_s4] sm:$0xff] %v288_v18  ;;  %297 = vst [vmem:[%s447_s4 + $0x8] sm:$0xff] %v289_v19 }
 0x2a4   :  { %298 = vst [vmem:[%s447_s4 + $0x10] sm:$0xff] %v290_v20  ;;  %299 = vst [vmem:[%s447_s4 + $0x18] sm:$0xff] %v291_v21  ;;  %v278_v26 = vpop.permute.xlu1 %277 }
 0x2a5   :  { %v284_v27 = vadd.f32 %v278_v26, %v264_v22  ;;  %v285_v28 = vadd.f32 %v278_v26, %v265_v23  ;;  %v286_v29 = vadd.f32 %v278_v26, %v266_v24  ;;  %v287_v30 = vadd.f32 %v278_v26, %v267_v25 }
 0x2a7   :  { %v292_v31 = vmax.f32 %v284_v27, 0.0  ;;  %v293_v32 = vmax.f32 %v285_v28, 0.0  ;;  %v294_v33 = vmax.f32 %v286_v29, 0.0  ;;  %v295_v34 = vmax.f32 %v287_v30, 0.0 }
 0x2a9   :  { %300 = vst [vmem:[%s447_s4 + $0x20] sm:$0xff] %v292_v31  ;;  %301 = vst [vmem:[%s447_s4 + $0x28] sm:$0xff] %v293_v32 }
 0x2aa   :  { %302 = vst [vmem:[%s447_s4 + $0x30] sm:$0xff] %v294_v33  ;;  %303 = vst [vmem:[%s447_s4 + $0x38] sm:$0xff] %v295_v34 }

// kernel: generator_forward.10
= control target key start
LH: loop header
LB: loop body
LE: loop exit
PB: predicated region body
PF: predicated region fallthrough
CT: control target
= control target key end

     0   :  { %v315_v0 = vmov 0.0|0.0   ;;  %vm43_vm0 = vcmask 130048   ;;  %v316_v60 = vmov 0   ;;  %s498_s1 = inlined_call_operand.vmem [shape: f32[144,128], index: 1, kind: input, shape index: {}]   ;;  %s499_s0 = inlined_call_operand.vmem [shape: f32[32,144], index: 0, kind: input, shape index: {}]   ;;  %s500_s3 = inlined_call_operand.vmem [shape: f32[32,1], index: 3, kind: input, shape index: {}]   ;;  %s501_s2 = inlined_call_operand.vmem [shape: f32[32,1], index: 2, kind: input, shape index: {}]   ;;  %s502_s4 = inlined_call_operand.vmem [shape: f32[32,128], index: 4, kind: output, shape index: {}]  }
   0x1   :  { %258 = vmatprep.subr.bf16.mxu0 %v315_v0  ;;  %285 = vmatprep.subr.bf16.mxu1 %v315_v0  ;;  %v25_v1 = vld [vmem:[%s498_s1] sm:$0xff]  ;;  %v26_v2 = vld [vmem:[%s498_s1 + $0x8] sm:$0xff]  ;;  %v27_v3 = vld [vmem:[%s498_s1 + $0x10] sm:$0xff] }
   0x2   :  { %v259_v4 = vpack.c.bf16 %v26_v2, %v25_v1  ;;  %v28_v5 = vld [vmem:[%s498_s1 + $0x18] sm:$0xff]  ;;  %v29_v7 = vld [vmem:[%s498_s1 + $0x20] sm:$0xff]  ;;  %v30_v8 = vld [vmem:[%s498_s1 + $0x28] sm:$0xff]  ;;  %306 = vset.pattern.permute.xlu1 %v316_v60  ;;  %305 = vset.pattern.permute.xlu0 %v316_v60 }
   0x3   :  { %v262_v6 = vpack.c.bf16 %v28_v5, %v27_v3  ;;  %v18_v9 = vld [vmem:[%s499_s0 + $0x8] sm:$0xff]  ;;  %v265_v11 = vpack.c.bf16 %v30_v8, %v29_v7  ;;  %v31_v12 = vld [vmem:[%s498_s1 + $0x30] sm:$0xff]  ;;  %v32_v13 = vld [vmem:[%s498_s1 + $0x38] sm:$0xff] }
   0x4   :  { %260 = vmatpush1.bf16.msra.mxu0 %v259_v4  ;;  %294 = vmatpush1.bf16.msra.mxu1 %v259_v4  ;;  %v22_v10 = vld [vmem:[%s499_s0 + $0x28] sm:$0xff]  ;;  %v268_v14 = vpack.c.bf16 %v32_v13, %v31_v12  ;;  %v33_v15 = vld [vmem:[%s498_s1 + $0x40] sm:$0xff]  ;;  %v35_v18 = vld [vmem:[%s498_s1 + $0x50] sm:$0xff] }
   0x5   :  { %261 = vmatprep.subr.bf16.mxu0 %v315_v0  ;;  %286 = vmatprep.subr.bf16.mxu1 %v315_v0  ;;  %v34_v16 = vld [vmem:[%s498_s1 + $0x48] sm:$0xff]  ;;  %v36_v19 = vld [vmem:[%s498_s1 + $0x58] sm:$0xff]  ;;  %v37_v21 = vld [vmem:[%s498_s1 + $0x60] sm:$0xff] }
   0x6   :  { %254 = vmatprep.mubr.msk.f32.mxu0 %vm43_vm0, %v18_v9  ;;  %256 = vmatprep.mubr.msk.f32.mxu1 %vm43_vm0, %v22_v10  ;;  %v271_v17 = vpack.c.bf16 %v34_v16, %v33_v15  ;;  %v274_v20 = vpack.c.bf16 %v36_v19, %v35_v18  ;;  %v38_v22 = vld [vmem:[%s498_s1 + $0x68] sm:$0xff]  ;;  %v39_v24 = vld [vmem:[%s498_s1 + $0x70] sm:$0xff]  ;;  %v40_v25 = vld [vmem:[%s498_s1 + $0x78] sm:$0xff] }
   0x7   :  { %v277_v23 = vpack.c.bf16 %v38_v22, %v37_v21  ;;  %v280_v26 = vpack.c.bf16 %v40_v25, %v39_v24  ;;  %v41_v27 = vld [vmem:[%s498_s1 + $0x80] sm:$0xff]  ;;  %v42_v28 = vld [vmem:[%s498_s1 + $0x88] sm:$0xff]  ;;  %v20_v32 = vld [vmem:[%s499_s0 + $0x18] sm:$0xff] }
   0x8   :  { %263 = vmatpush1.bf16.msra.mxu0 %v262_v6  ;;  %295 = vmatpush1.bf16.msra.mxu1 %v262_v6  ;;  %v283_v29 = vpack.c.bf16 %v42_v28, %v41_v27  ;;  %v17_v30 = vld [vmem:[%s499_s0] sm:$0xff]  ;;  %v24_v33 = vld [vmem:[%s499_s0 + $0x38] sm:$0xff]  ;;  %v19_v34 = vld [vmem:[%s499_s0 + $0x10] sm:$0xff] }
   0x9   :  { %264 = vmatprep.subr.bf16.mxu0 %v315_v0  ;;  %287 = vmatprep.subr.bf16.mxu1 %v315_v0  ;;  %v21_v31 = vld [vmem:[%s499_s0 + $0x20] sm:$0xff]  ;;  %v23_v35 = vld [vmem:[%s499_s0 + $0x30] sm:$0xff]  ;;  %v215_v62 = vld [vmem:[%s500_s3 + $0x8] sm:$0xff] }
   0xa   :  { %v214_v61 = vld [vmem:[%s500_s3] sm:$0xff]  ;;  %v216_v63 = vld [vmem:[%s500_s3 + $0x10] sm:$0xff]  ;;  %v175_v19 = vld [vmem:[%s501_s2 + $0x8] sm:$0xff] }
   0xb   :  { %v174_v12 = vld [vmem:[%s501_s2] sm:$0xff]  ;;  %v176_v15 = vld [vmem:[%s501_s2 + $0x10] sm:$0xff]  ;;  %v177_v22 = vld [vmem:[%s501_s2 + $0x18] sm:$0xff] }
   0xc   :  { %266 = vmatpush1.bf16.msra.mxu0 %v265_v11  ;;  %296 = vmatpush1.bf16.msra.mxu1 %v265_v11  ;;  %v217_v24 = vld [vmem:[%s500_s3 + $0x18] sm:$0xff] }
   0xd   :  { %267 = vmatprep.subr.bf16.mxu0 %v315_v0  ;;  %288 = vmatprep.subr.bf16.mxu1 %v315_v0 }
  0x10   :  { %269 = vmatpush1.bf16.msra.mxu0 %v268_v14  ;;  %297 = vmatpush1.bf16.msra.mxu1 %v268_v14 }
  0x11   :  { %270 = vmatprep.subr.bf16.mxu0 %v315_v0  ;;  %289 = vmatprep.subr.bf16.mxu1 %v315_v0 }
  0x14   :  { %272 = vmatpush1.bf16.msra.mxu0 %v271_v17  ;;  %298 = vmatpush1.bf16.msra.mxu1 %v271_v17 }
  0x15   :  { %273 = vmatprep.subr.bf16.mxu0 %v315_v0  ;;  %290 = vmatprep.subr.bf16.mxu1 %v315_v0 }
  0x18   :  { %275 = vmatpush1.bf16.msra.mxu0 %v274_v20  ;;  %299 = vmatpush1.bf16.msra.mxu1 %v274_v20 }
  0x19   :  { %276 = vmatprep.subr.bf16.mxu0 %v315_v0  ;;  %291 = vmatprep.subr.bf16.mxu1 %v315_v0 }
  0x1c   :  { %278 = vmatpush1.bf16.msra.mxu0 %v277_v23  ;;  %300 = vmatpush1.bf16.msra.mxu1 %v277_v23 }
  0x1d   :  { %279 = vmatprep.subr.bf16.mxu0 %v315_v0  ;;  %292 = vmatprep.subr.bf16.mxu1 %v315_v0 }
  0x20   :  { %281 = vmatpush1.bf16.msra.mxu0 %v280_v26  ;;  %301 = vmatpush1.bf16.msra.mxu1 %v280_v26 }
  0x21   :  { %282 = vmatprep.subr.bf16.mxu0 %v315_v0  ;;  %293 = vmatprep.subr.bf16.mxu1 %v315_v0 }
  0x24   :  { %284 = vmatpush1.bf16.msra.mxu0 %v283_v29  ;;  %302 = vmatpush1.bf16.msra.mxu1 %v283_v29 }
  0x27   :  { %121 = vmatmul.mubr.f32.vlgmr.msra.gmra.mrb[0].mxu0 %v17_v30  ;;  %131 = vmatmul.mubr.f32.vlgmr.msra.gmra.mrb[0].mxu1 %v21_v31 }
  0x28   :  { %255 = vmatprep.mubr.msk.f32.mxu0 %vm43_vm0, %v20_v32  ;;  %257 = vmatprep.mubr.msk.f32.mxu1 %vm43_vm0, %v24_v33 }
  0x2b   :  { %126 = vmatmul.mubr.f32.gmra.mrb[2].mxu0 %v19_v34  ;;  %136 = vmatmul.mubr.f32.gmra.mrb[2].mxu1 %v23_v35 }
  0xfa   :  { %v122_v36 = vpop.f32.mrb[0].mxu0  ;;  %v132_v37 = vpop.f32.mrb[0].mxu1 }
  0xfb   :  { %145 = vadd.xlane.f32.xlu1 %v132_v37  ;;  %141 = vadd.xlane.f32.xlu0 %v122_v36  ;;  %v124_v38 = vpop.f32.mrb[1].mxu0  ;;  %v134_v39 = vpop.f32.mrb[1].mxu1 }
  0xfe   :  { %v127_v40 = vpop.f32.mrb[2].mxu0  ;;  %v137_v41 = vpop.f32.mrb[2].mxu1 }
  0xff   :  { %147 = vadd.xlane.f32.xlu1 %v137_v41  ;;  %143 = vadd.xlane.f32.xlu0 %v127_v40  ;;  %v129_v42 = vpop.f32.mrb[3].mxu0  ;;  %v139_v43 = vpop.f32.mrb[3].mxu1 }
 0x188   :  { %v146_v44 = vpop.xlane.xlu1 %145  ;;  %v142_v45 = vpop.xlane.xlu0 %141 }
 0x189   :  { %v152_v46 = vmul.f32 0.0078125, %v146_v44  ;;  %v150_v47 = vmul.f32 0.0078125, %v142_v45 }
 0x18b   :  { %v442_v48 = vsub.f32 %v122_v36, %v150_v47  ;;  %v444_v51 = vsub.f32 %v132_v37, %v152_v46 }
 0x18c   :  { %v148_v49 = vpop.xlane.xlu1 %147  ;;  %v144_v50 = vpop.xlane.xlu0 %143 }
 0x18d   :  { %v153_v52 = vmul.f32 0.0078125, %v148_v49  ;;  %v151_v53 = vmul.f32 0.0078125, %v144_v50  ;;  %v158_v54 = vmul.f32 %v442_v48, %v442_v48  ;;  %v160_v57 = vmul.f32 %v444_v51, %v444_v51 }
 0x18f   :  { %v448_v55 = vsub.f32 %v127_v40, %v151_v53  ;;  %162 = vadd.xlane.f32.xlu0 %v158_v54  ;;  %v450_v56 = vsub.f32 %v137_v41, %v153_v52 }
 0x191   :  { %v159_v58 = vmul.f32 %v448_v55, %v448_v55  ;;  %v161_v59 = vmul.f32 %v450_v56, %v450_v56 }
 0x193   :  { %166 = vadd.xlane.f32.xlu0 %v160_v57  ;;  %164 = vadd.xlane.f32.xlu1 %v159_v58 }
 0x197   :  { %168 = vadd.xlane.f32.xlu1 %v161_v59 }
 0x1a8   :  { %220 = vperm.xlu1 %306, %v214_v61  }
 0x1ac   :  { %225 = vperm.xlu1 %306, %v215_v62  }
 0x1b0   :  { %230 = vperm.xlu1 %306, %v216_v63  }
 0x21c   :  { %v163_v0 = vpop.xlane.xlu0 %162 }
 0x21d   :  { %v170_v1 = vmul.f32 0.0078125, %v163_v0 }
 0x21f   :  { %v178_v2 = vadd.f32 1e-05, %v170_v1 }
 0x220   :  { %v165_v3 = vpop.xlane.xlu1 %164  ;;  %v167_v4 = vpop.xlane.xlu0 %166 }
 0x221   :  { %307 = vrsqrt.f32 %v178_v2  ;;  %v171_v5 = vmul.f32 0.0078125, %v165_v3  ;;  %v172_v6 = vmul.f32 0.0078125, %v167_v4 }
 0x223   :  { %v180_v7 = vadd.f32 1e-05, %v172_v6  ;;  %v179_v8 = vadd.f32 1e-05, %v171_v5 }
 0x224   :  { %v169_v9 = vpop.xlane.xlu1 %168 }
 0x225   :  { %v173_v10 = vmul.f32 0.0078125, %v169_v9  ;;  %309 = vrsqrt.f32 %v180_v7 }
 0x226   :  { %311 = vrsqrt.f32 %v179_v8 }
 0x227   :  { %v181_v11 = vadd.f32 1e-05, %v173_v10 }
 0x228   :  { %v221_v25 = vpop.permute.xlu1 %220 }
 0x229   :  { %313 = vrsqrt.f32 %v181_v11 }
 0x22b   :  { %v308_v13 = vpop.eup %307 }
 0x22c   :  { %v186_v14 = vmul.f32 %v308_v13, %v174_v12  ;;  %v226_v26 = vpop.permute.xlu1 %225 }
 0x22e   :  { %192 = vperm.xlu0 %305, %v186_v14  }
 0x22f   :  { %v310_v16 = vpop.eup %309 }
 0x230   :  { %v188_v17 = vmul.f32 %v310_v16, %v176_v15  ;;  %v312_v18 = vpop.eup %311  ;;  %v231_v28 = vpop.permute.xlu1 %230 }
 0x231   :  { %v187_v20 = vmul.f32 %v312_v18, %v175_v19 }
 0x232   :  { %202 = vperm.xlu1 %306, %v188_v17  }
 0x233   :  { %v314_v21 = vpop.eup %313 }
 0x234   :  { %v189_v23 = vmul.f32 %v314_v21, %v177_v22 }
 0x236   :  { %197 = vperm.xlu1 %306, %v187_v20  }
 0x23a   :  { %207 = vperm.xlu1 %306, %v189_v23  }
 0x23e   :  { %235 = vperm.xlu1 %306, %v217_v24  }
 0x2ad   :  { %v193_v27 = vpop.permute.xlu0 %192 }
 0x2ae   :  { %v210_v29 = vmul.f32 %v193_v27, %v442_v48 }
 0x2b0   :  { %v238_v30 = vadd.f32 %v221_v25, %v210_v29 }
 0x2b1   :  { %v203_v32 = vpop.permute.xlu1 %202 }
 0x2b2   :  { %v242_v31 = vmax.f32 %v238_v30, 0.0  ;;  %v212_v33 = vmul.f32 %v203_v32, %v444_v51 }
 0x2b4   :  { %246 = vst [vmem:[%s502_s4] sm:$0xff] %v242_v31  ;;  %v240_v34 = vadd.f32 %v231_v28, %v212_v33 }
 0x2b5   :  { %v198_v35 = vpop.permute.xlu1 %197 }
 0x2b6   :  { %v244_v36 = vmax.f32 %v240_v34, 0.0  ;;  %v211_v37 = vmul.f32 %v198_v35, %v448_v55 }
 0x2b8   :  { %248 = vst [vmem:[%s502_s4 + $0x10] sm:$0xff] %v244_v36  ;;  %v239_v38 = vadd.f32 %v226_v26, %v211_v37 }
 0x2b9   :  { %v208_v39 = vpop.permute.xlu1 %207 }
 0x2ba   :  { %v243_v40 = vmax.f32 %v239_v38, 0.0  ;;  %v213_v41 = vmul.f32 %v208_v39, %v450_v56 }
 0x2bc   :  { %247 = vst [vmem:[%s502_s4 + $0x8] sm:$0xff] %v243_v40 }
 0x2bd   :  { %v236_v42 = vpop.permute.xlu1 %235 }
 0x2be   :  { %v241_v43 = vadd.f32 %v236_v42, %v213_v41 }
 0x2c0   :  { %v245_v44 = vmax.f32 %v241_v43, 0.0 }
 0x2c2   :  { %249 = vst [vmem:[%s502_s4 + $0x18] sm:$0xff] %v245_v44 }

// kernel: generator_forward.11
= control target key start
LH: loop header
LB: loop body
LE: loop exit
PB: predicated region body
PF: predicated region fallthrough
CT: control target
= control target key end

     0   :  { %vm77_vm0 = vcmask 261120   ;;  %s1070_s1 = inlined_call_operand.vmem [shape: f32[288,32], index: 1, kind: input, shape index: {}]   ;;  %s1071_s0 = inlined_call_operand.vmem [shape: f32[64,288], index: 0, kind: input, shape index: {}]   ;;  %s1072_s3 = inlined_call_operand.vmem [shape: f32[64,1], index: 3, kind: input, shape index: {}]   ;;  %s1073_s2 = inlined_call_operand.vmem [shape: f32[64,1], index: 2, kind: input, shape index: {}]   ;;  %s1074_s4 = inlined_call_operand.vmem [shape: f32[64,32], index: 4, kind: output, shape index: {}]  }
   0x1   :  { %v57_v0 = vld [vmem:[%s1070_s1 + $0x80] sm:$0xff]  ;;  %v58_v1 = vld [vmem:[%s1070_s1 + $0x88] sm:$0xff]  ;;  %v59_v5 = vld [vmem:[%s1070_s1 + $0x90] sm:$0xff] }
   0x2   :  { %v41_v2 = vld [vmem:[%s1070_s1] sm:$0xff]  ;;  %v645_v3 = vpack.c.bf16 %v58_v1, %v57_v0  ;;  %v42_v4 = vld [vmem:[%s1070_s1 + $0x8] sm:$0xff]  ;;  %v60_v6 = vld [vmem:[%s1070_s1 + $0x98] sm:$0xff] }
   0x3   :  { %v647_v7 = vpack.c.bf16 %v42_v4, %v41_v2  ;;  %v649_v8 = vpack.c.bf16 %v60_v6, %v59_v5  ;;  %v43_v9 = vld [vmem:[%s1070_s1 + $0x10] sm:$0xff]  ;;  %v44_v10 = vld [vmem:[%s1070_s1 + $0x18] sm:$0xff]  ;;  %v61_v11 = vld [vmem:[%s1070_s1 + $0xa0] sm:$0xff] }
   0x4   :  { %646 = vmatprep.subr.bf16.mxu0 %v645_v3  ;;  %685 = vmatprep.subr.bf16.mxu1 %v645_v3  ;;  %v62_v12 = vld [vmem:[%s1070_s1 + $0xa8] sm:$0xff]  ;;  %v651_v13 = vpack.c.bf16 %v44_v10, %v43_v9  ;;  %v45_v15 = vld [vmem:[%s1070_s1 + $0x20] sm:$0xff]  ;;  %v63_v17 = vld [vmem:[%s1070_s1 + $0xb0] sm:$0xff] }
   0x5   :  { %648 = vmatpush3.bf16.msra.mxu0 %v647_v7  ;;  %693 = vmatpush3.bf16.msra.mxu1 %v647_v7  ;;  %v653_v14 = vpack.c.bf16 %v62_v12, %v61_v11  ;;  %v46_v16 = vld [vmem:[%s1070_s1 + $0x28] sm:$0xff]  ;;  %v64_v18 = vld [vmem:[%s1070_s1 + $0xb8] sm:$0xff]  ;;  %v47_v21 = vld [vmem:[%s1070_s1 + $0x30] sm:$0xff] }
   0x6   :  { %650 = vmatprep.subr.bf16.mxu0 %v649_v8  ;;  %686 = vmatprep.subr.bf16.mxu1 %v649_v8  ;;  %v655_v19 = vpack.c.bf16 %v46_v16, %v45_v15  ;;  %v657_v20 = vpack.c.bf16 %v64_v18, %v63_v17  ;;  %v48_v22 = vld [vmem:[%s1070_s1 + $0x38] sm:$0xff]  ;;  %v65_v23 = vld [vmem:[%s1070_s1 + $0xc0] sm:$0xff]  ;;  %v66_v24 = vld [vmem:[%s1070_s1 + $0xc8] sm:$0xff] }
   0x7   :  { %v18_v25 = vld [vmem:[%s1071_s0 + $0x8] sm:$0xff]  ;;  %v36_v26 = vld [vmem:[%s1071_s0 + $0x98] sm:$0xff]  ;;  %v659_v27 = vpack.c.bf16 %v48_v22, %v47_v21  ;;  %v661_v28 = vpack.c.bf16 %v66_v24, %v65_v23  ;;  %v49_v29 = vld [vmem:[%s1070_s1 + $0x40] sm:$0xff] }
   0x8   :  { %166 = vmatprep.mubr.f32.mxu0 %v18_v25  ;;  %v50_v30 = vld [vmem:[%s1070_s1 + $0x48] sm:$0xff]  ;;  %v67_v31 = vld [vmem:[%s1070_s1 + $0xd0] sm:$0xff]  ;;  %v68_v32 = vld [vmem:[%s1070_s1 + $0xd8] sm:$0xff]  ;;  %196 = vmatprep.mubr.f32.mxu1 %v36_v26 }
   0x9   :  { %652 = vmatpush3.bf16.msra.mxu0 %v651_v13  ;;  %694 = vmatpush3.bf16.msra.mxu1 %v651_v13  ;;  %v663_v33 = vpack.c.bf16 %v50_v30, %v49_v29  ;;  %v665_v34 = vpack.c.bf16 %v68_v32, %v67_v31  ;;  %v51_v35 = vld [vmem:[%s1070_s1 + $0x50] sm:$0xff]  ;;  %v52_v36 = vld [vmem:[%s1070_s1 + $0x58] sm:$0xff]  ;;  %v69_v37 = vld [vmem:[%s1070_s1 + $0xe0] sm:$0xff] }
   0xa   :  { %654 = vmatprep.subr.bf16.mxu0 %v653_v14  ;;  %687 = vmatprep.subr.bf16.mxu1 %v653_v14  ;;  %v70_v38 = vld [vmem:[%s1070_s1 + $0xe8] sm:$0xff]  ;;  %v667_v39 = vpack.c.bf16 %v52_v36, %v51_v35  ;;  %v53_v41 = vld [vmem:[%s1070_s1 + $0x60] sm:$0xff]  ;;  %v71_v43 = vld [vmem:[%s1070_s1 + $0xf0] sm:$0xff] }
   0xb   :  { %v669_v40 = vpack.c.bf16 %v70_v38, %v69_v37  ;;  %v54_v42 = vld [vmem:[%s1070_s1 + $0x68] sm:$0xff]  ;;  %v72_v44 = vld [vmem:[%s1070_s1 + $0xf8] sm:$0xff]  ;;  %v55_v47 = vld [vmem:[%s1070_s1 + $0x70] sm:$0xff] }
   0xc   :  { %v671_v45 = vpack.c.bf16 %v54_v42, %v53_v41  ;;  %v673_v46 = vpack.c.bf16 %v72_v44, %v71_v43  ;;  %v56_v48 = vld [vmem:[%s1070_s1 + $0x78] sm:$0xff]  ;;  %v73_v49 = vld [vmem:[%s1070_s1 + $0x100] sm:$0xff]  ;;  %v74_v50 = vld [vmem:[%s1070_s1 + $0x108] sm:$0xff] }
   0xd   :  { %656 = vmatpush3.bf16.msra.mxu0 %v655_v19  ;;  %695 = vmatpush3.bf16.msra.mxu1 %v655_v19  ;;  %v675_v51 = vpack.c.bf16 %v56_v48, %v55_v47  ;;  %v677_v52 = vpack.c.bf16 %v74_v50, %v73_v49  ;;  %v75_v53 = vld [vmem:[%s1070_s1 + $0x110] sm:$0xff]  ;;  %v76_v54 = vld [vmem:[%s1070_s1 + $0x118] sm:$0xff]  ;;  %v17_v55 = vld [vmem:[%s1071_s0] sm:$0xff] }
   0xe   :  { %658 = vmatprep.subr.bf16.mxu0 %v657_v20  ;;  %688 = vmatprep.subr.bf16.mxu1 %v657_v20  ;;  %v35_v56 = vld [vmem:[%s1071_s0 + $0x90] sm:$0xff]  ;;  %v21_v57 = vld [vmem:[%s1071_s0 + $0x20] sm:$0xff]  ;;  %v681_v58 = vpack.c.bf16 %v76_v54, %v75_v53  ;;  %v20_v60 = vld [vmem:[%s1071_s0 + $0x18] sm:$0xff] }
   0xf   :  { %v39_v59 = vld [vmem:[%s1071_s0 + $0xb0] sm:$0xff]  ;;  %v38_v61 = vld [vmem:[%s1071_s0 + $0xa8] sm:$0xff]  ;;  %v24_v62 = vld [vmem:[%s1071_s0 + $0x38] sm:$0xff] }
  0x10   :  { %v19_v63 = vld [vmem:[%s1071_s0 + $0x10] sm:$0xff]  ;;  %v22_v1 = vld [vmem:[%s1071_s0 + $0x28] sm:$0xff]  ;;  %v25_v3 = vld [vmem:[%s1071_s0 + $0x40] sm:$0xff] }
  0x11   :  { %660 = vmatpush3.bf16.msra.mxu0 %v659_v27  ;;  %696 = vmatpush3.bf16.msra.mxu1 %v659_v27  ;;  %v23_v0 = vld [vmem:[%s1071_s0 + $0x30] sm:$0xff]  ;;  %v26_v4 = vld [vmem:[%s1071_s0 + $0x48] sm:$0xff]  ;;  %v28_v5 = vld [vmem:[%s1071_s0 + $0x58] sm:$0xff] }
  0x12   :  { %662 = vmatprep.subr.bf16.mxu0 %v661_v28  ;;  %689 = vmatprep.subr.bf16.mxu1 %v661_v28  ;;  %v27_v2 = vld [vmem:[%s1071_s0 + $0x50] sm:$0xff]  ;;  %v30_v6 = vld [vmem:[%s1071_s0 + $0x68] sm:$0xff]  ;;  %v29_v8 = vld [vmem:[%s1071_s0 + $0x60] sm:$0xff] }
  0x13   :  { %v31_v7 = vld [vmem:[%s1071_s0 + $0x70] sm:$0xff]  ;;  %v34_v9 = vld [vmem:[%s1071_s0 + $0x88] sm:$0xff]  ;;  %v33_v10 = vld [vmem:[%s1071_s0 + $0x80] sm:$0xff] }
  0x14   :  { %v37_v11 = vld [vmem:[%s1071_s0 + $0xa0] sm:$0xff]  ;;  %v32_v12 = vld [vmem:[%s1071_s0 + $0x78] sm:$0xff] }
  0x15   :  { %664 = vmatpush3.bf16.msra.mxu0 %v663_v33  ;;  %697 = vmatpush3.bf16.msra.mxu1 %v663_v33  ;;  %v40_v13 = vld [vmem:[%s1071_s0 + $0xb8] sm:$0xff] }
  0x16   :  { %666 = vmatprep.subr.bf16.mxu0 %v665_v34  ;;  %690 = vmatprep.subr.bf16.mxu1 %v665_v34 }
  0x19   :  { %668 = vmatpush3.bf16.msra.mxu0 %v667_v39  ;;  %698 = vmatpush3.bf16.msra.mxu1 %v667_v39 }
  0x1a   :  { %670 = vmatprep.subr.bf16.mxu0 %v669_v40  ;;  %691 = vmatprep.subr.bf16.mxu1 %v669_v40 }
  0x1d   :  { %672 = vmatpush3.bf16.msra.mxu0 %v671_v45  ;;  %699 = vmatpush3.bf16.msra.mxu1 %v671_v45 }
  0x1e   :  { %674 = vmatprep.subr.bf16.mxu0 %v673_v46  ;;  %692 = vmatprep.subr.bf16.mxu1 %v673_v46 }
  0x21   :  { %676 = vmatpush3.bf16.msra.mxu0 %v675_v51  ;;  %700 = vmatpush3.bf16.msra.mxu1 %v675_v51 }
  0x22   :  { %678 = vmatprep.subr.bf16.mxu1 %v677_v52 }
  0x24   :  { %167 = vmatmul.mubr.f32.vlgmr.msra.gmra.mrb[0].mxu0 %v17_v55  ;;  %197 = vmatmul.mubr.f32.vlgmr.msra.gmra.mrb[0].mxu1 %v35_v56 }
  0x25   :  { %680 = vmatpush3.bf16.msra.mxu1 %v677_v52  ;;  %171 = vmatprep.mubr.f32.mxu0 %v21_v57 }
  0x26   :  { %201 = vmatprep.mubr.f32.mxu1 %v39_v59  ;;  %682 = vmatprep.subr.bf16.mxu1 %v681_v58 }
  0x28   :  { %172 = vmatmul.mubr.f32.gmra.mrb[2].mxu0 %v20_v60  ;;  %202 = vmatmul.mubr.f32.gmra.mrb[2].mxu1 %v38_v61 }
  0x29   :  { %684 = vmatpush3.bf16.msra.mxu1 %v681_v58  ;;  %176 = vmatprep.mubr.f32.mxu0 %v24_v62 }
  0x2a   :  { %633 = vmatprep.mubr.msk.f32.mxu1 %vm77_vm0, %v19_v63 }
  0x2c   :  { %177 = vmatmul.mubr.f32.gmra.mrb[4].mxu0 %v23_v0  ;;  %634 = vmatmul.mubr.msk.f32.vlgmr.msra.gmra.mrb[4].mxu1 %vm77_vm0, %v22_v1 }
  0x2d   :  { %181 = vmatprep.mubr.f32.mxu0 %v27_v2  ;;  %636 = vmatprep.mubr.msk.f32.mxu1 %vm77_vm0, %v25_v3 }
  0x30   :  { %182 = vmatmul.mubr.f32.gmra.mrb[6].mxu0 %v26_v4  ;;  %637 = vmatmul.mubr.msk.f32.gmra.mrb[6].mxu1 %vm77_vm0, %v28_v5 }
  0x31   :  { %186 = vmatprep.mubr.f32.mxu0 %v30_v6  ;;  %639 = vmatprep.mubr.msk.f32.mxu1 %vm77_vm0, %v31_v7 }
  0x34   :  { %187 = vmatmul.mubr.f32.gmra.mrb[8].mxu0 %v29_v8  ;;  %640 = vmatmul.mubr.msk.f32.gmra.mrb[8].mxu1 %vm77_vm0, %v34_v9 }
  0x35   :  { %191 = vmatprep.mubr.f32.mxu0 %v33_v10  ;;  %642 = vmatprep.mubr.msk.f32.mxu1 %vm77_vm0, %v37_v11 }
  0x38   :  { %192 = vmatmul.mubr.f32.gmra.mrb[10].mxu0 %v32_v12  ;;  %643 = vmatmul.mubr.msk.f32.gmra.mrb[10].mxu1 %vm77_vm0, %v40_v13 }
  0xf7   :  { %v607_v14 = vpop.f32.mrb[0].mxu1  ;;  %v589_v15 = vpop.f32.mrb[0].mxu0 }
  0xf8   :  { %v608_v16 = vpop.f32.mrb[1].mxu1  ;;  %v590_v17 = vpop.f32.mrb[1].mxu0 }
  0xf9   :  { %v609_v18 = vadd.f32 %v608_v16, %v607_v14  ;;  %v591_v19 = vadd.f32 %v590_v17, %v589_v15 }
  0xfb   :  { %v610_v20 = vpop.f32.mrb[2].mxu1  ;;  %v592_v21 = vpop.f32.mrb[2].mxu0 }
  0xfc   :  { %v611_v22 = vpop.f32.mrb[3].mxu1  ;;  %v593_v23 = vpop.f32.mrb[3].mxu0 }
  0xfd   :  { %v612_v24 = vadd.f32 %v611_v22, %v610_v20  ;;  %v594_v25 = vadd.f32 %v593_v23, %v592_v21 }
  0xff   :  { %v635_v26 = vpop.f32.mrb[4].mxu1  ;;  %v595_v27 = vpop.f32.mrb[4].mxu0 }
 0x100   :  { %v279_v28 = vadd.f32 %v635_v26, %v594_v25  ;;  %v273_v29 = vpop.f32.mrb[5].mxu1  ;;  %v596_v30 = vpop.f32.mrb[5].mxu0 }
 0x101   :  { %v274_v31 = vadd.f32 %v591_v19, %v273_v29  ;;  %v597_v32 = vadd.f32 %v596_v30, %v595_v27 }
 0x102   :  { %v315_v33 = vsel %vm77_vm0, %v279_v28, 0.0 }
 0x103   :  { %v638_v34 = vpop.f32.mrb[6].mxu1  ;;  %316 = vadd.xlane.f32.xlu0 %v315_v33  ;;  %v598_v35 = vpop.f32.mrb[6].mxu0  ;;  %v312_v40 = vsel %vm77_vm0, %v274_v31, 0.0 }
 0x104   :  { %v283_v36 = vpop.f32.mrb[7].mxu1  ;;  %v599_v37 = vpop.f32.mrb[7].mxu0 }
 0x105   :  { %v284_v38 = vadd.f32 %v597_v32, %v283_v36  ;;  %v600_v39 = vadd.f32 %v599_v37, %v598_v35  ;;  %v720_v36 = vmov 0  }
 0x106   :  { %702 = vset.pattern.permute.xlu1 %v720_v36  ;;  %703 = vset.pattern.permute.xlu0 %v720_v36  ;;  %v398_v36 = vld [vmem:[%s1073_s2 + $0x28] sm:$0xff] }
 0x107   :  { %v601_v41 = vpop.f32.mrb[8].mxu0  ;;  %313 = vadd.xlane.f32.xlu0 %v312_v40  ;;  %v318_v42 = vsel %vm77_vm0, %v284_v38, 0.0  ;;  %v641_v43 = vpop.f32.mrb[8].mxu1  ;;  %v289_v44 = vadd.f32 %v638_v34, %v600_v39  ;;  %v473_v39 = vld [vmem:[%s1072_s3] sm:$0xff]  ;;  %v474_v40 = vld [vmem:[%s1072_s3 + $0x8] sm:$0xff] }
 0x108   :  { %v602_v45 = vpop.f32.mrb[9].mxu0  ;;  %319 = vadd.xlane.f32.xlu1 %v318_v42  ;;  %v293_v46 = vpop.f32.mrb[9].mxu1  ;;  %v476_v42 = vld [vmem:[%s1072_s3 + $0x18] sm:$0xff] }
 0x109   :  { %v603_v47 = vadd.f32 %v602_v45, %v601_v41  ;;  %v321_v51 = vsel %vm77_vm0, %v289_v44, 0.0  ;;  %v475_v41 = vld [vmem:[%s1072_s3 + $0x10] sm:$0xff] }
 0x10b   :  { %v294_v48 = vadd.f32 %v603_v47, %v293_v46  ;;  %v604_v49 = vpop.f32.mrb[10].mxu0  ;;  %v644_v50 = vpop.f32.mrb[10].mxu1 }
 0x10c   :  { %v309_v52 = vadd.f32 %v644_v50, %v612_v24  ;;  %v605_v53 = vpop.f32.mrb[11].mxu0  ;;  %v303_v54 = vpop.f32.mrb[11].mxu1  ;;  %322 = vadd.xlane.f32.xlu1 %v321_v51 }
 0x10d   :  { %v606_v55 = vadd.f32 %v605_v53, %v604_v49  ;;  %v304_v56 = vadd.f32 %v609_v18, %v303_v54  ;;  %v324_v57 = vsel %vm77_vm0, %v294_v48, 0.0 }
 0x10e   :  { %325 = vadd.xlane.f32.xlu0 %v324_v57  ;;  %v333_v61 = vsel %vm77_vm0, %v309_v52, 0.0 }
 0x10f   :  { %v299_v58 = vadd.f32 %v641_v43, %v606_v55  ;;  %v330_v60 = vsel %vm77_vm0, %v304_v56, 0.0  ;;  %v477_v43 = vld [vmem:[%s1072_s3 + $0x20] sm:$0xff] }
 0x111   :  { %v327_v59 = vsel %vm77_vm0, %v299_v58, 0.0 }
 0x112   :  { %328 = vadd.xlane.f32.xlu1 %v327_v59  ;;  %331 = vadd.xlane.f32.xlu0 %v330_v60  ;;  %v394_v59 = vld [vmem:[%s1073_s2 + $0x8] sm:$0xff] }
 0x116   :  { %334 = vadd.xlane.f32.xlu1 %v333_v61 }
 0x190   :  { %v317_v62 = vpop.xlane.xlu0 %316 }
 0x191   :  { %v338_v63 = vmul.f32 0.03125, %v317_v62 }
 0x193   :  { %v942_v0 = vsub.f32 %v279_v28, %v338_v63 }
 0x194   :  { %v314_v1 = vpop.xlane.xlu0 %313 }
 0x195   :  { %v337_v2 = vmul.f32 0.03125, %v314_v1  ;;  %v320_v3 = vpop.xlane.xlu1 %319  ;;  %v354_v4 = vmul.f32 %v942_v0, %v942_v0 }
 0x196   :  { %v339_v5 = vmul.f32 0.03125, %v320_v3 }
 0x197   :  { %v946_v6 = vsub.f32 %v274_v31, %v337_v2  ;;  %v364_v7 = vsel %vm77_vm0, %v354_v4, 0.0  ;;  %v393_v2 = vld [vmem:[%s1073_s2] sm:$0xff] }
 0x198   :  { %v949_v8 = vsub.f32 %v284_v38, %v339_v5  ;;  %365 = vadd.xlane.f32.xlu1 %v364_v7 }
 0x199   :  { %v323_v9 = vpop.xlane.xlu1 %322  ;;  %v353_v10 = vmul.f32 %v946_v6, %v946_v6 }
 0x19a   :  { %v340_v11 = vmul.f32 0.03125, %v323_v9  ;;  %v355_v14 = vmul.f32 %v949_v8, %v949_v8 }
 0x19b   :  { %v326_v12 = vpop.xlane.xlu0 %325  ;;  %v361_v13 = vsel %vm77_vm0, %v353_v10, 0.0  ;;  %v395_v10 = vld [vmem:[%s1073_s2 + $0x10] sm:$0xff] }
 0x19c   :  { %v956_v15 = vsub.f32 %v289_v44, %v340_v11  ;;  %v341_v16 = vmul.f32 0.03125, %v326_v12  ;;  %362 = vadd.xlane.f32.xlu0 %v361_v13  ;;  %v367_v21 = vsel %vm77_vm0, %v355_v14, 0.0  ;;  %v478_v44 = vld [vmem:[%s1072_s3 + $0x28] sm:$0xff] }
 0x19e   :  { %v958_v17 = vsub.f32 %v294_v48, %v341_v16  ;;  %v356_v18 = vmul.f32 %v956_v15, %v956_v15  ;;  %v480_v16 = vld [vmem:[%s1072_s3 + $0x38] sm:$0xff] }
 0x19f   :  { %v329_v19 = vpop.xlane.xlu1 %328  ;;  %v332_v20 = vpop.xlane.xlu0 %331 }
 0x1a0   :  { %v342_v22 = vmul.f32 0.03125, %v329_v19  ;;  %v343_v23 = vmul.f32 0.03125, %v332_v20  ;;  %368 = vadd.xlane.f32.xlu0 %v367_v21  ;;  %v370_v24 = vsel %vm77_vm0, %v356_v18, 0.0  ;;  %v357_v25 = vmul.f32 %v958_v17, %v958_v17  ;;  %v396_v20 = vld [vmem:[%s1073_s2 + $0x18] sm:$0xff] }
 0x1a1   :  { %371 = vadd.xlane.f32.xlu1 %v370_v24  ;;  %v397_v24 = vld [vmem:[%s1073_s2 + $0x20] sm:$0xff] }
 0x1a2   :  { %v966_v26 = vsub.f32 %v299_v58, %v342_v22  ;;  %v968_v27 = vsub.f32 %v304_v56, %v343_v23  ;;  %v373_v28 = vsel %vm77_vm0, %v357_v25, 0.0 }
 0x1a3   :  { %v335_v29 = vpop.xlane.xlu1 %334 }
 0x1a4   :  { %v344_v30 = vmul.f32 0.03125, %v335_v29  ;;  %374 = vadd.xlane.f32.xlu0 %v373_v28  ;;  %v358_v31 = vmul.f32 %v966_v26, %v966_v26  ;;  %v359_v32 = vmul.f32 %v968_v27, %v968_v27  ;;  %v400_v28 = vld [vmem:[%s1073_s2 + $0x38] sm:$0xff] }
 0x1a6   :  { %v975_v33 = vsub.f32 %v309_v52, %v344_v30  ;;  %v376_v34 = vsel %vm77_vm0, %v358_v31, 0.0  ;;  %v379_v35 = vsel %vm77_vm0, %v359_v32, 0.0  ;;  %v399_v32 = vld [vmem:[%s1073_s2 + $0x30] sm:$0xff] }
 0x1a7   :  { %377 = vadd.xlane.f32.xlu1 %v376_v34 }
 0x1a8   :  { %380 = vadd.xlane.f32.xlu0 %v379_v35  ;;  %v360_v37 = vmul.f32 %v975_v33, %v975_v33 }
 0x1aa   :  { %v382_v38 = vsel %vm77_vm0, %v360_v37, 0.0 }
 0x1ab   :  { %383 = vadd.xlane.f32.xlu1 %v382_v38  ;;  %v479_v38 = vld [vmem:[%s1072_s3 + $0x30] sm:$0xff] }
 0x1bc   :  { %483 = vperm.xlu1 %702, %v473_v39  }
 0x1be   :  { %488 = vperm.xlu0 %703, %v474_v40  }
 0x1c0   :  { %493 = vperm.xlu1 %702, %v475_v41  }
 0x1c2   :  { %498 = vperm.xlu0 %703, %v476_v42  }
 0x1c4   :  { %503 = vperm.xlu1 %702, %v477_v43  }
 0x1c6   :  { %508 = vperm.xlu0 %703, %v478_v44  }
 0x225   :  { %v366_v45 = vpop.xlane.xlu1 %365 }
 0x226   :  { %v386_v46 = vmul.f32 0.03125, %v366_v45 }
 0x228   :  { %v402_v47 = vadd.f32 1e-05, %v386_v46 }
 0x229   :  { %v363_v48 = vpop.xlane.xlu0 %362 }
 0x22a   :  { %704 = vrsqrt.f32 %v402_v47  ;;  %v385_v49 = vmul.f32 0.03125, %v363_v48 }
 0x22c   :  { %v401_v50 = vadd.f32 1e-05, %v385_v49 }
 0x22d   :  { %v369_v51 = vpop.xlane.xlu0 %368 }
 0x22e   :  { %706 = vrsqrt.f32 %v401_v50  ;;  %v387_v52 = vmul.f32 0.03125, %v369_v51  ;;  %v372_v53 = vpop.xlane.xlu1 %371 }
 0x22f   :  { %v388_v54 = vmul.f32 0.03125, %v372_v53 }
 0x230   :  { %v403_v55 = vadd.f32 1e-05, %v387_v52 }
 0x231   :  { %v404_v56 = vadd.f32 1e-05, %v388_v54  ;;  %v375_v57 = vpop.xlane.xlu0 %374 }
 0x232   :  { %708 = vrsqrt.f32 %v403_v55  ;;  %v389_v58 = vmul.f32 0.03125, %v375_v57 }
 0x233   :  { %710 = vrsqrt.f32 %v404_v56 }
 0x234   :  { %v705_v60 = vpop.eup %704  ;;  %v405_v61 = vadd.f32 1e-05, %v389_v58  ;;  %v378_v62 = vpop.xlane.xlu1 %377 }
 0x235   :  { %v381_v63 = vpop.xlane.xlu0 %380  ;;  %v418_v1 = vmul.f32 %v705_v60, %v394_v59  ;;  %v390_v13 = vmul.f32 0.03125, %v378_v62 }
 0x236   :  { %712 = vrsqrt.f32 %v405_v61  ;;  %v391_v4 = vmul.f32 0.03125, %v381_v63 }
 0x237   :  { %432 = vperm.xlu1 %702, %v418_v1   ;;  %v406_v21 = vadd.f32 1e-05, %v390_v13 }
 0x238   :  { %v707_v3 = vpop.eup %706  ;;  %v384_v5 = vpop.xlane.xlu1 %383  ;;  %v407_v14 = vadd.f32 1e-05, %v391_v4 }
 0x239   :  { %v392_v7 = vmul.f32 0.03125, %v384_v5  ;;  %v417_v9 = vmul.f32 %v707_v3, %v393_v2 }
 0x23b   :  { %v408_v11 = vadd.f32 1e-05, %v392_v7  ;;  %427 = vperm.xlu0 %703, %v417_v9  }
 0x23c   :  { %v709_v12 = vpop.eup %708  ;;  %v484_v39 = vpop.permute.xlu1 %483 }
 0x23d   :  { %714 = vrsqrt.f32 %v408_v11  ;;  %v419_v18 = vmul.f32 %v709_v12, %v395_v10  ;;  %v711_v19 = vpop.eup %710  ;;  %v489_v40 = vpop.permute.xlu0 %488 }
 0x23e   :  { %716 = vrsqrt.f32 %v407_v14  ;;  %v420_v22 = vmul.f32 %v711_v19, %v396_v20 }
 0x23f   :  { %437 = vperm.xlu1 %702, %v419_v18   ;;  %518 = vperm.xlu0 %703, %v480_v16   ;;  %718 = vrsqrt.f32 %v406_v21 }
 0x240   :  { %v713_v23 = vpop.eup %712  ;;  %v494_v41 = vpop.permute.xlu1 %493 }
 0x241   :  { %v421_v25 = vmul.f32 %v713_v23, %v397_v24  ;;  %v499_v42 = vpop.permute.xlu0 %498 }
 0x243   :  { %442 = vperm.xlu1 %702, %v420_v22  }
 0x244   :  { %v504_v43 = vpop.permute.xlu1 %503 }
 0x245   :  { %v509_v44 = vpop.permute.xlu0 %508 }
 0x247   :  { %v715_v29 = vpop.eup %714  ;;  %447 = vperm.xlu1 %702, %v421_v25  }
 0x248   :  { %v424_v30 = vmul.f32 %v715_v29, %v400_v28  ;;  %v717_v31 = vpop.eup %716 }
 0x249   :  { %v423_v34 = vmul.f32 %v717_v31, %v399_v32  ;;  %v719_v35 = vpop.eup %718 }
 0x24a   :  { %v422_v37 = vmul.f32 %v719_v35, %v398_v36 }
 0x24b   :  { %462 = vperm.xlu1 %702, %v424_v30  }
 0x24f   :  { %457 = vperm.xlu1 %702, %v423_v34  }
 0x253   :  { %452 = vperm.xlu1 %702, %v422_v37  }
 0x257   :  { %513 = vperm.xlu1 %702, %v479_v38  }
 0x2b6   :  { %v433_v45 = vpop.permute.xlu1 %432 }
 0x2b7   :  { %v466_v46 = vmul.f32 %v433_v45, %v942_v0 }
 0x2b9   :  { %v522_v47 = vadd.f32 %v489_v40, %v466_v46 }
 0x2ba   :  { %v428_v48 = vpop.permute.xlu0 %427 }
 0x2bb   :  { %v530_v49 = vmax.f32 %v522_v47, 0.0  ;;  %v465_v50 = vmul.f32 %v428_v48, %v946_v6 }
 0x2bd   :  { %538 = vst.msk [vmem:[%s1074_s4 + $0x8] sm:$0xff] %vm77_vm0, %v530_v49  ;;  %v521_v51 = vadd.f32 %v484_v39, %v465_v50 }
 0x2be   :  { %v438_v52 = vpop.permute.xlu1 %437  ;;  %v519_v63 = vpop.permute.xlu0 %518 }
 0x2bf   :  { %v529_v53 = vmax.f32 %v521_v51, 0.0  ;;  %v467_v54 = vmul.f32 %v438_v52, %v949_v8 }
 0x2c1   :  { %537 = vst.msk [vmem:[%s1074_s4] sm:$0xff] %vm77_vm0, %v529_v53  ;;  %v523_v0 = vadd.f32 %v494_v41, %v467_v54 }
 0x2c2   :  { %v443_v55 = vpop.permute.xlu1 %442 }
 0x2c3   :  { %v531_v56 = vmax.f32 %v523_v0, 0.0  ;;  %v468_v6 = vmul.f32 %v443_v55, %v956_v15 }
 0x2c5   :  { %539 = vst.msk [vmem:[%s1074_s4 + $0x10] sm:$0xff] %vm77_vm0, %v531_v56  ;;  %v524_v57 = vadd.f32 %v499_v42, %v468_v6 }
 0x2c6   :  { %v448_v58 = vpop.permute.xlu1 %447 }
 0x2c7   :  { %v532_v59 = vmax.f32 %v524_v57, 0.0  ;;  %v469_v8 = vmul.f32 %v448_v58, %v958_v17 }
 0x2c9   :  { %540 = vst.msk [vmem:[%s1074_s4 + $0x18] sm:$0xff] %vm77_vm0, %v532_v59  ;;  %v525_v60 = vadd.f32 %v504_v43, %v469_v8 }
 0x2ca   :  { %v463_v61 = vpop.permute.xlu1 %462 }
 0x2cb   :  { %v533_v62 = vmax.f32 %v525_v60, 0.0  ;;  %v472_v15 = vmul.f32 %v463_v61, %v975_v33 }
 0x2cd   :  { %541 = vst.msk [vmem:[%s1074_s4 + $0x20] sm:$0xff] %vm77_vm0, %v533_v62  ;;  %v528_v1 = vadd.f32 %v519_v63, %v472_v15 }
 0x2ce   :  { %v458_v2 = vpop.permute.xlu1 %457 }
 0x2cf   :  { %v536_v3 = vmax.f32 %v528_v1, 0.0  ;;  %v471_v5 = vmul.f32 %v458_v2, %v968_v27 }
 0x2d1   :  { %544 = vst.msk [vmem:[%s1074_s4 + $0x38] sm:$0xff] %vm77_vm0, %v536_v3 }
 0x2d2   :  { %v453_v17 = vpop.permute.xlu1 %452 }
 0x2d3   :  { %v470_v4 = vmul.f32 %v453_v17, %v966_v26 }
 0x2d5   :  { %v526_v33 = vadd.f32 %v509_v44, %v470_v4 }
 0x2d6   :  { %v514_v7 = vpop.permute.xlu1 %513 }
 0x2d7   :  { %v534_v9 = vmax.f32 %v526_v33, 0.0  ;;  %v527_v10 = vadd.f32 %v514_v7, %v471_v5 }
 0x2d9   :  { %542 = vst.msk [vmem:[%s1074_s4 + $0x28] sm:$0xff] %vm77_vm0, %v534_v9  ;;  %v535_v11 = vmax.f32 %v527_v10, 0.0 }
 0x2db   :  { %543 = vst.msk [vmem:[%s1074_s4 + $0x30] sm:$0xff] %vm77_vm0, %v535_v11 }

// kernel: generator_forward.12
= control target key start
LH: loop header
LB: loop body
LE: loop exit
PB: predicated region body
PF: predicated region fallthrough
CT: control target
= control target key end

     0   :  { %vm129_vm0 = vcmask 523264   ;;  %vm469_vm1 = vcmask 261120   ;;  %s1484_s1 = inlined_call_operand.vmem [shape: f32[576,32], index: 1, kind: input, shape index: {}]   ;;  %s1485_s0 = inlined_call_operand.vmem [shape: f32[64,576], index: 0, kind: input, shape index: {}]   ;;  %s1486_s3 = inlined_call_operand.vmem [shape: f32[64,1], index: 3, kind: input, shape index: {}]   ;;  %s1487_s2 = inlined_call_operand.vmem [shape: f32[64,1], index: 2, kind: input, shape index: {}]   ;;  %s1488_s4 = inlined_call_operand.vmem [shape: f32[64,32], index: 4, kind: output, shape index: {}]  }
   0x1   :  { %v73_v0 = vld [vmem:[%s1484_s1 + $0x80] sm:$0xff]  ;;  %v74_v1 = vld [vmem:[%s1484_s1 + $0x88] sm:$0xff]  ;;  %v75_v11 = vld [vmem:[%s1484_s1 + $0x90] sm:$0xff] }
   0x2   :  { %v105_v2 = vld [vmem:[%s1484_s1 + $0x180] sm:$0xff]  ;;  %v871_v3 = vpack.c.bf16 %v74_v1, %v73_v0  ;;  %v106_v4 = vld [vmem:[%s1484_s1 + $0x188] sm:$0xff]  ;;  %v76_v13 = vld [vmem:[%s1484_s1 + $0x98] sm:$0xff] }
   0x3   :  { %v57_v5 = vld [vmem:[%s1484_s1] sm:$0xff]  ;;  %v58_v6 = vld [vmem:[%s1484_s1 + $0x8] sm:$0xff]  ;;  %v903_v7 = vpack.c.bf16 %v106_v4, %v105_v2  ;;  %v107_v14 = vld [vmem:[%s1484_s1 + $0x190] sm:$0xff]  ;;  %v875_v16 = vpack.c.bf16 %v76_v13, %v75_v11 }
   0x4   :  { %v873_v8 = vpack.c.bf16 %v58_v6, %v57_v5  ;;  %v89_v9 = vld [vmem:[%s1484_s1 + $0x100] sm:$0xff]  ;;  %v90_v10 = vld [vmem:[%s1484_s1 + $0x108] sm:$0xff]  ;;  %872 = vmatprep.subr.bf16.mxu0 %v871_v3  ;;  %v108_v15 = vld [vmem:[%s1484_s1 + $0x198] sm:$0xff] }
   0x5   :  { %v905_v12 = vpack.c.bf16 %v90_v10, %v89_v9  ;;  %904 = vmatprep.subr.bf16.mxu1 %v903_v7  ;;  %v907_v17 = vpack.c.bf16 %v108_v15, %v107_v14  ;;  %v59_v18 = vld [vmem:[%s1484_s1 + $0x10] sm:$0xff]  ;;  %v60_v19 = vld [vmem:[%s1484_s1 + $0x18] sm:$0xff]  ;;  %v77_v23 = vld [vmem:[%s1484_s1 + $0xa0] sm:$0xff] }
   0x6   :  { %874 = vmatpush3.bf16.msra.mxu0 %v873_v8  ;;  %v91_v20 = vld [vmem:[%s1484_s1 + $0x110] sm:$0xff]  ;;  %v877_v21 = vpack.c.bf16 %v60_v19, %v59_v18  ;;  %v92_v22 = vld [vmem:[%s1484_s1 + $0x118] sm:$0xff]  ;;  %v78_v24 = vld [vmem:[%s1484_s1 + $0xa8] sm:$0xff] }
   0x7   :  { %906 = vmatpush3.bf16.msra.mxu1 %v905_v12  ;;  %876 = vmatprep.subr.bf16.mxu0 %v875_v16  ;;  %v909_v25 = vpack.c.bf16 %v92_v22, %v91_v20  ;;  %v879_v26 = vpack.c.bf16 %v78_v24, %v77_v23  ;;  %v109_v27 = vld [vmem:[%s1484_s1 + $0x1a0] sm:$0xff]  ;;  %v110_v28 = vld [vmem:[%s1484_s1 + $0x1a8] sm:$0xff]  ;;  %v79_v35 = vld [vmem:[%s1484_s1 + $0xb0] sm:$0xff] }
   0x8   :  { %908 = vmatprep.subr.bf16.mxu1 %v907_v17  ;;  %v61_v29 = vld [vmem:[%s1484_s1 + $0x20] sm:$0xff]  ;;  %v911_v30 = vpack.c.bf16 %v110_v28, %v109_v27  ;;  %v62_v31 = vld [vmem:[%s1484_s1 + $0x28] sm:$0xff]  ;;  %v80_v36 = vld [vmem:[%s1484_s1 + $0xb8] sm:$0xff] }
   0x9   :  { %v93_v32 = vld [vmem:[%s1484_s1 + $0x120] sm:$0xff]  ;;  %v94_v33 = vld [vmem:[%s1484_s1 + $0x128] sm:$0xff]  ;;  %v881_v34 = vpack.c.bf16 %v62_v31, %v61_v29  ;;  %v111_v37 = vld [vmem:[%s1484_s1 + $0x1b0] sm:$0xff]  ;;  %v883_v39 = vpack.c.bf16 %v80_v36, %v79_v35 }
   0xa   :  { %878 = vmatpush3.bf16.msra.mxu0 %v877_v21  ;;  %v913_v38 = vpack.c.bf16 %v94_v33, %v93_v32  ;;  %v112_v40 = vld [vmem:[%s1484_s1 + $0x1b8] sm:$0xff]  ;;  %v63_v41 = vld [vmem:[%s1484_s1 + $0x30] sm:$0xff]  ;;  %v81_v46 = vld [vmem:[%s1484_s1 + $0xc0] sm:$0xff] }
   0xb   :  { %910 = vmatpush3.bf16.msra.mxu1 %v909_v25  ;;  %880 = vmatprep.subr.bf16.mxu0 %v879_v26  ;;  %v64_v42 = vld [vmem:[%s1484_s1 + $0x38] sm:$0xff]  ;;  %v915_v43 = vpack.c.bf16 %v112_v40, %v111_v37  ;;  %v95_v44 = vld [vmem:[%s1484_s1 + $0x130] sm:$0xff]  ;;  %v82_v47 = vld [vmem:[%s1484_s1 + $0xc8] sm:$0xff] }
   0xc   :  { %912 = vmatprep.subr.bf16.mxu1 %v911_v30  ;;  %v96_v45 = vld [vmem:[%s1484_s1 + $0x138] sm:$0xff]  ;;  %v113_v48 = vld [vmem:[%s1484_s1 + $0x1c0] sm:$0xff]  ;;  %v114_v49 = vld [vmem:[%s1484_s1 + $0x1c8] sm:$0xff]  ;;  %v885_v50 = vpack.c.bf16 %v64_v42, %v63_v41  ;;  %v887_v52 = vpack.c.bf16 %v82_v47, %v81_v46 }
   0xd   :  { %v917_v51 = vpack.c.bf16 %v96_v45, %v95_v44  ;;  %v65_v53 = vld [vmem:[%s1484_s1 + $0x40] sm:$0xff]  ;;  %v66_v54 = vld [vmem:[%s1484_s1 + $0x48] sm:$0xff]  ;;  %v919_v56 = vpack.c.bf16 %v114_v49, %v113_v48  ;;  %v83_v58 = vld [vmem:[%s1484_s1 + $0xd0] sm:$0xff] }
   0xe   :  { %882 = vmatpush3.bf16.msra.mxu0 %v881_v34  ;;  %v97_v55 = vld [vmem:[%s1484_s1 + $0x140] sm:$0xff]  ;;  %v98_v57 = vld [vmem:[%s1484_s1 + $0x148] sm:$0xff]  ;;  %v84_v59 = vld [vmem:[%s1484_s1 + $0xd8] sm:$0xff]  ;;  %v889_v62 = vpack.c.bf16 %v66_v54, %v65_v53 }
   0xf   :  { %914 = vmatpush3.bf16.msra.mxu1 %v913_v38  ;;  %884 = vmatprep.subr.bf16.mxu0 %v883_v39  ;;  %v115_v60 = vld [vmem:[%s1484_s1 + $0x1d0] sm:$0xff]  ;;  %v116_v61 = vld [vmem:[%s1484_s1 + $0x1d8] sm:$0xff]  ;;  %v921_v63 = vpack.c.bf16 %v98_v57, %v97_v55  ;;  %v891_v0 = vpack.c.bf16 %v84_v59, %v83_v58  ;;  %v85_v6 = vld [vmem:[%s1484_s1 + $0xe0] sm:$0xff] }
  0x10   :  { %916 = vmatprep.subr.bf16.mxu1 %v915_v43  ;;  %v67_v1 = vld [vmem:[%s1484_s1 + $0x50] sm:$0xff]  ;;  %v68_v2 = vld [vmem:[%s1484_s1 + $0x58] sm:$0xff]  ;;  %v923_v4 = vpack.c.bf16 %v116_v61, %v115_v60  ;;  %v86_v7 = vld [vmem:[%s1484_s1 + $0xe8] sm:$0xff] }
  0x11   :  { %v99_v3 = vld [vmem:[%s1484_s1 + $0x150] sm:$0xff]  ;;  %v100_v5 = vld [vmem:[%s1484_s1 + $0x158] sm:$0xff]  ;;  %v117_v8 = vld [vmem:[%s1484_s1 + $0x1e0] sm:$0xff]  ;;  %v893_v10 = vpack.c.bf16 %v68_v2, %v67_v1  ;;  %v895_v14 = vpack.c.bf16 %v86_v7, %v85_v6 }
  0x12   :  { %886 = vmatpush3.bf16.msra.mxu0 %v885_v50  ;;  %v118_v9 = vld [vmem:[%s1484_s1 + $0x1e8] sm:$0xff]  ;;  %v69_v11 = vld [vmem:[%s1484_s1 + $0x60] sm:$0xff]  ;;  %v925_v13 = vpack.c.bf16 %v100_v5, %v99_v3  ;;  %v20_v17 = vld [vmem:[%s1485_s0 + $0x18] sm:$0xff] }
  0x13   :  { %918 = vmatpush3.bf16.msra.mxu1 %v917_v51  ;;  %888 = vmatprep.subr.bf16.mxu0 %v887_v52  ;;  %v70_v12 = vld [vmem:[%s1484_s1 + $0x68] sm:$0xff]  ;;  %v101_v15 = vld [vmem:[%s1484_s1 + $0x160] sm:$0xff]  ;;  %v927_v18 = vpack.c.bf16 %v118_v9, %v117_v8  ;;  %v87_v20 = vld [vmem:[%s1484_s1 + $0xf0] sm:$0xff] }
  0x14   :  { %920 = vmatprep.subr.bf16.mxu1 %v919_v56  ;;  %v18_v16 = vld [vmem:[%s1485_s0 + $0x8] sm:$0xff]  ;;  %v88_v21 = vld [vmem:[%s1484_s1 + $0xf8] sm:$0xff]  ;;  %v119_v22 = vld [vmem:[%s1484_s1 + $0x1f0] sm:$0xff]  ;;  %323 = vmatprep.mubr.f32.mxu1 %v20_v17  ;;  %v897_v24 = vpack.c.bf16 %v70_v12, %v69_v11 }
  0x15   :  { %v102_v19 = vld [vmem:[%s1484_s1 + $0x168] sm:$0xff]  ;;  %218 = vmatprep.mubr.f32.mxu0 %v18_v16  ;;  %v120_v23 = vld [vmem:[%s1484_s1 + $0x1f8] sm:$0xff]  ;;  %v899_v26 = vpack.c.bf16 %v88_v21, %v87_v20  ;;  %v71_v27 = vld [vmem:[%s1484_s1 + $0x70] sm:$0xff] }
  0x16   :  { %890 = vmatpush3.bf16.msra.mxu0 %v889_v62  ;;  %v929_v25 = vpack.c.bf16 %v102_v19, %v101_v15  ;;  %v72_v28 = vld [vmem:[%s1484_s1 + $0x78] sm:$0xff]  ;;  %v103_v29 = vld [vmem:[%s1484_s1 + $0x170] sm:$0xff]  ;;  %v931_v30 = vpack.c.bf16 %v120_v23, %v119_v22  ;;  %v121_v32 = vld [vmem:[%s1484_s1 + $0x200] sm:$0xff] }
  0x17   :  { %922 = vmatpush3.bf16.msra.mxu1 %v921_v63  ;;  %892 = vmatprep.subr.bf16.mxu0 %v891_v0  ;;  %v104_v31 = vld [vmem:[%s1484_s1 + $0x178] sm:$0xff]  ;;  %v122_v33 = vld [vmem:[%s1484_s1 + $0x208] sm:$0xff]  ;;  %v901_v34 = vpack.c.bf16 %v72_v28, %v71_v27  ;;  %v123_v37 = vld [vmem:[%s1484_s1 + $0x210] sm:$0xff] }
  0x18   :  { %924 = vmatprep.subr.bf16.mxu1 %v923_v4  ;;  %v933_v35 = vpack.c.bf16 %v104_v31, %v103_v29  ;;  %v935_v36 = vpack.c.bf16 %v122_v33, %v121_v32  ;;  %v124_v38 = vld [vmem:[%s1484_s1 + $0x218] sm:$0xff]  ;;  %v17_v39 = vld [vmem:[%s1485_s0] sm:$0xff]  ;;  %v19_v40 = vld [vmem:[%s1485_s0 + $0x10] sm:$0xff] }
  0x19   :  { %v23_v41 = vld [vmem:[%s1485_s0 + $0x30] sm:$0xff]  ;;  %v25_v42 = vld [vmem:[%s1485_s0 + $0x40] sm:$0xff]  ;;  %v939_v43 = vpack.c.bf16 %v124_v38, %v123_v37  ;;  %v126_v45 = vld [vmem:[%s1484_s1 + $0x228] sm:$0xff] }
  0x1a   :  { %894 = vmatpush3.bf16.msra.mxu0 %v893_v10  ;;  %v125_v44 = vld [vmem:[%s1484_s1 + $0x220] sm:$0xff]  ;;  %v22_v46 = vld [vmem:[%s1485_s0 + $0x28] sm:$0xff]  ;;  %v24_v47 = vld [vmem:[%s1485_s0 + $0x38] sm:$0xff] }
  0x1b   :  { %926 = vmatpush3.bf16.msra.mxu1 %v925_v13  ;;  %896 = vmatprep.subr.bf16.mxu0 %v895_v14  ;;  %v28_v48 = vld [vmem:[%s1485_s0 + $0x58] sm:$0xff]  ;;  %v30_v49 = vld [vmem:[%s1485_s0 + $0x68] sm:$0xff]  ;;  %v943_v50 = vpack.c.bf16 %v126_v45, %v125_v44  ;;  %v127_v51 = vld [vmem:[%s1484_s1 + $0x230] sm:$0xff] }
  0x1c   :  { %928 = vmatprep.subr.bf16.mxu1 %v927_v18  ;;  %v128_v52 = vld [vmem:[%s1484_s1 + $0x238] sm:$0xff]  ;;  %v27_v53 = vld [vmem:[%s1485_s0 + $0x50] sm:$0xff]  ;;  %v29_v54 = vld [vmem:[%s1485_s0 + $0x60] sm:$0xff] }
  0x1d   :  { %v33_v55 = vld [vmem:[%s1485_s0 + $0x80] sm:$0xff]  ;;  %v35_v56 = vld [vmem:[%s1485_s0 + $0x90] sm:$0xff]  ;;  %v947_v57 = vpack.c.bf16 %v128_v52, %v127_v51  ;;  %v32_v58 = vld [vmem:[%s1485_s0 + $0x78] sm:$0xff] }
  0x1e   :  { %898 = vmatpush3.bf16.msra.mxu0 %v897_v24  ;;  %v34_v59 = vld [vmem:[%s1485_s0 + $0x88] sm:$0xff]  ;;  %v40_v61 = vld [vmem:[%s1485_s0 + $0xb8] sm:$0xff]  ;;  %v37_v62 = vld [vmem:[%s1485_s0 + $0xa0] sm:$0xff] }
  0x1f   :  { %930 = vmatpush3.bf16.msra.mxu1 %v929_v25  ;;  %900 = vmatprep.subr.bf16.mxu0 %v899_v26  ;;  %v38_v60 = vld [vmem:[%s1485_s0 + $0xa8] sm:$0xff]  ;;  %v39_v63 = vld [vmem:[%s1485_s0 + $0xb0] sm:$0xff]  ;;  %v45_v1 = vld [vmem:[%s1485_s0 + $0xe0] sm:$0xff] }
  0x20   :  { %932 = vmatprep.subr.bf16.mxu1 %v931_v30  ;;  %v43_v0 = vld [vmem:[%s1485_s0 + $0xd0] sm:$0xff]  ;;  %v42_v2 = vld [vmem:[%s1485_s0 + $0xc8] sm:$0xff]  ;;  %v44_v3 = vld [vmem:[%s1485_s0 + $0xd8] sm:$0xff] }
  0x21   :  { %v48_v4 = vld [vmem:[%s1485_s0 + $0xf8] sm:$0xff]  ;;  %v50_v5 = vld [vmem:[%s1485_s0 + $0x108] sm:$0xff]  ;;  %v47_v6 = vld [vmem:[%s1485_s0 + $0xf0] sm:$0xff] }
  0x22   :  { %902 = vmatpush3.bf16.msra.mxu0 %v901_v34  ;;  %v49_v7 = vld [vmem:[%s1485_s0 + $0x100] sm:$0xff]  ;;  %v55_v9 = vld [vmem:[%s1485_s0 + $0x130] sm:$0xff]  ;;  %v52_v10 = vld [vmem:[%s1485_s0 + $0x118] sm:$0xff] }
  0x23   :  { %934 = vmatpush3.bf16.msra.mxu1 %v933_v35  ;;  %936 = vmatprep.subr.bf16.mxu0 %v935_v36  ;;  %v53_v8 = vld [vmem:[%s1485_s0 + $0x120] sm:$0xff]  ;;  %v54_v11 = vld [vmem:[%s1485_s0 + $0x128] sm:$0xff]  ;;  %v31_v16 = vld [vmem:[%s1485_s0 + $0x70] sm:$0xff] }
  0x24   :  { %951 = vmatprep.subr.bf16.mxu1 %v935_v36  ;;  %v21_v12 = vld [vmem:[%s1485_s0 + $0x20] sm:$0xff]  ;;  %v26_v14 = vld [vmem:[%s1485_s0 + $0x48] sm:$0xff]  ;;  %v51_v17 = vld [vmem:[%s1485_s0 + $0x110] sm:$0xff] }
  0x25   :  { %219 = vmatmul.mubr.f32.vlgmr.msra.gmra.mrb[0].mxu0 %v17_v39  ;;  %v41_v13 = vld [vmem:[%s1485_s0 + $0xc0] sm:$0xff]  ;;  %v46_v15 = vld [vmem:[%s1485_s0 + $0xe8] sm:$0xff]  ;;  %v36_v18 = vld [vmem:[%s1485_s0 + $0x98] sm:$0xff] }
  0x26   :  { %324 = vmatmul.mubr.f32.vlgmr.msra.gmra.mrb[0].mxu1 %v19_v40  ;;  %938 = vmatpush3.bf16.msra.mxu0 %v935_v36  ;;  %v56_v19 = vld [vmem:[%s1485_s0 + $0x138] sm:$0xff] }
  0x27   :  { %223 = vmatprep.mubr.f32.mxu0 %v23_v41  ;;  %328 = vmatprep.mubr.f32.mxu1 %v25_v42 }
  0x28   :  { %955 = vmatpush3.bf16.msra.mxu1 %v935_v36  ;;  %940 = vmatprep.subr.bf16.mxu0 %v939_v43 }
  0x29   :  { %224 = vmatmul.mubr.f32.gmra.mrb[2].mxu0 %v22_v46  ;;  %952 = vmatprep.subr.bf16.mxu1 %v939_v43 }
  0x2a   :  { %329 = vmatmul.mubr.f32.gmra.mrb[2].mxu1 %v24_v47  ;;  %228 = vmatprep.mubr.f32.mxu0 %v28_v48 }
  0x2b   :  { %333 = vmatprep.mubr.f32.mxu1 %v30_v49  ;;  %942 = vmatpush3.bf16.msra.mxu0 %v939_v43 }
  0x2c   :  { %956 = vmatpush3.bf16.msra.mxu1 %v939_v43  ;;  %944 = vmatprep.subr.bf16.mxu0 %v943_v50 }
  0x2d   :  { %229 = vmatmul.mubr.f32.gmra.mrb[4].mxu0 %v27_v53  ;;  %953 = vmatprep.subr.bf16.mxu1 %v943_v50 }
  0x2e   :  { %334 = vmatmul.mubr.f32.gmra.mrb[4].mxu1 %v29_v54  ;;  %233 = vmatprep.mubr.f32.mxu0 %v33_v55 }
  0x2f   :  { %338 = vmatprep.mubr.f32.mxu1 %v35_v56  ;;  %946 = vmatpush3.bf16.msra.mxu0 %v943_v50 }
  0x30   :  { %957 = vmatpush3.bf16.msra.mxu1 %v943_v50  ;;  %948 = vmatprep.subr.bf16.mxu0 %v947_v57 }
  0x31   :  { %234 = vmatmul.mubr.f32.gmra.mrb[6].mxu0 %v32_v58  ;;  %954 = vmatprep.subr.bf16.mxu1 %v947_v57 }
  0x32   :  { %339 = vmatmul.mubr.f32.gmra.mrb[6].mxu1 %v34_v59  ;;  %238 = vmatprep.mubr.f32.mxu0 %v38_v60 }
  0x33   :  { %343 = vmatprep.mubr.f32.mxu1 %v40_v61  ;;  %950 = vmatpush3.bf16.msra.mxu0 %v947_v57 }
  0x34   :  { %958 = vmatpush3.bf16.msra.mxu1 %v947_v57 }
  0x35   :  { %239 = vmatmul.mubr.f32.gmra.mrb[8].mxu0 %v37_v62 }
  0x36   :  { %344 = vmatmul.mubr.f32.gmra.mrb[8].mxu1 %v39_v63  ;;  %243 = vmatprep.mubr.f32.mxu0 %v43_v0 }
  0x37   :  { %348 = vmatprep.mubr.f32.mxu1 %v45_v1 }
  0x39   :  { %244 = vmatmul.mubr.f32.gmra.mrb[10].mxu0 %v42_v2 }
  0x3a   :  { %349 = vmatmul.mubr.f32.gmra.mrb[10].mxu1 %v44_v3  ;;  %248 = vmatprep.mubr.f32.mxu0 %v48_v4 }
  0x3b   :  { %353 = vmatprep.mubr.f32.mxu1 %v50_v5 }
  0x3d   :  { %249 = vmatmul.mubr.f32.gmra.mrb[12].mxu0 %v47_v6 }
  0x3e   :  { %354 = vmatmul.mubr.f32.gmra.mrb[12].mxu1 %v49_v7  ;;  %253 = vmatprep.mubr.f32.mxu0 %v53_v8 }
  0x3f   :  { %358 = vmatprep.mubr.f32.mxu1 %v55_v9 }
  0x41   :  { %254 = vmatmul.mubr.f32.gmra.mrb[14].mxu0 %v52_v10 }
  0x42   :  { %359 = vmatmul.mubr.f32.gmra.mrb[14].mxu1 %v54_v11  ;;  %859 = vmatprep.mubr.msk.f32.mxu0 %vm129_vm0, %v21_v12 }
  0x43   :  { %865 = vmatprep.mubr.msk.f32.mxu1 %vm129_vm0, %v41_v13 }
  0x45   :  { %860 = vmatmul.mubr.msk.f32.vlgmr.msra.gmra.mrb[16].mxu0 %vm129_vm0, %v26_v14 }
  0x46   :  { %866 = vmatmul.mubr.msk.f32.vlgmr.msra.gmra.mrb[16].mxu1 %vm129_vm0, %v46_v15  ;;  %862 = vmatprep.mubr.msk.f32.mxu0 %vm129_vm0, %v31_v16 }
  0x47   :  { %868 = vmatprep.mubr.msk.f32.mxu1 %vm129_vm0, %v51_v17 }
  0x49   :  { %863 = vmatmul.mubr.msk.f32.gmra.mrb[18].mxu0 %vm129_vm0, %v36_v18 }
  0x4a   :  { %869 = vmatmul.mubr.msk.f32.gmra.mrb[18].mxu1 %vm129_vm0, %v56_v19 }
  0xf8   :  { %v747_v20 = vpop.f32.mrb[0].mxu0 }
  0xf9   :  { %v803_v21 = vpop.f32.mrb[0].mxu1  ;;  %v748_v22 = vpop.f32.mrb[1].mxu0 }
  0xfa   :  { %v749_v23 = vadd.f32 %v748_v22, %v747_v20  ;;  %v804_v24 = vpop.f32.mrb[1].mxu1 }
  0xfb   :  { %v805_v25 = vadd.f32 %v804_v24, %v803_v21 }
  0xfc   :  { %v750_v26 = vpop.f32.mrb[2].mxu0 }
  0xfd   :  { %v806_v27 = vpop.f32.mrb[2].mxu1  ;;  %v751_v28 = vpop.f32.mrb[3].mxu0  ;;  %v326_v29 = vadd.f32 %v805_v25, %v749_v23 }
  0xfe   :  { %v752_v30 = vadd.f32 %v751_v28, %v750_v26  ;;  %v807_v31 = vpop.f32.mrb[3].mxu1 }
  0xff   :  { %v808_v32 = vadd.f32 %v807_v31, %v806_v27 }
 0x100   :  { %v753_v33 = vpop.f32.mrb[4].mxu0 }
 0x101   :  { %v809_v34 = vpop.f32.mrb[4].mxu1  ;;  %v754_v35 = vpop.f32.mrb[5].mxu0  ;;  %v331_v36 = vadd.f32 %v808_v32, %v752_v30 }
 0x102   :  { %v755_v37 = vadd.f32 %v754_v35, %v753_v33  ;;  %v810_v38 = vpop.f32.mrb[5].mxu1 }
 0x103   :  { %v811_v39 = vadd.f32 %v810_v38, %v809_v34 }
 0x104   :  { %v756_v40 = vpop.f32.mrb[6].mxu0 }
 0x105   :  { %v812_v41 = vpop.f32.mrb[6].mxu1  ;;  %v757_v42 = vpop.f32.mrb[7].mxu0  ;;  %v336_v43 = vadd.f32 %v811_v39, %v755_v37 }
 0x106   :  { %v758_v44 = vadd.f32 %v757_v42, %v756_v40  ;;  %v813_v45 = vpop.f32.mrb[7].mxu1 }
 0x107   :  { %v814_v46 = vadd.f32 %v813_v45, %v812_v41 }
 0x108   :  { %v759_v47 = vpop.f32.mrb[8].mxu0 }
 0x109   :  { %v815_v48 = vpop.f32.mrb[8].mxu1  ;;  %v760_v49 = vpop.f32.mrb[9].mxu0  ;;  %v341_v50 = vadd.f32 %v814_v46, %v758_v44 }
 0x10a   :  { %v761_v51 = vadd.f32 %v760_v49, %v759_v47  ;;  %v816_v52 = vpop.f32.mrb[9].mxu1 }
 0x10b   :  { %v817_v53 = vadd.f32 %v816_v52, %v815_v48 }
 0x10c   :  { %v762_v54 = vpop.f32.mrb[10].mxu0 }
 0x10d   :  { %v818_v55 = vpop.f32.mrb[10].mxu1  ;;  %v763_v56 = vpop.f32.mrb[11].mxu0  ;;  %v346_v57 = vadd.f32 %v817_v53, %v761_v51 }
 0x10e   :  { %v764_v58 = vadd.f32 %v763_v56, %v762_v54  ;;  %v819_v59 = vpop.f32.mrb[11].mxu1 }
 0x10f   :  { %v820_v60 = vadd.f32 %v819_v59, %v818_v55 }
 0x110   :  { %v765_v61 = vpop.f32.mrb[12].mxu0 }
 0x111   :  { %v821_v62 = vpop.f32.mrb[12].mxu1  ;;  %v766_v63 = vpop.f32.mrb[13].mxu0  ;;  %v351_v0 = vadd.f32 %v820_v60, %v764_v58 }
 0x112   :  { %v767_v1 = vadd.f32 %v766_v63, %v765_v61  ;;  %v822_v2 = vpop.f32.mrb[13].mxu1 }
 0x113   :  { %v823_v3 = vadd.f32 %v822_v2, %v821_v62 }
 0x114   :  { %v768_v4 = vpop.f32.mrb[14].mxu0 }
 0x115   :  { %v824_v5 = vpop.f32.mrb[14].mxu1  ;;  %v769_v6 = vpop.f32.mrb[15].mxu0  ;;  %v356_v7 = vadd.f32 %v823_v3, %v767_v1 }
 0x116   :  { %v770_v8 = vadd.f32 %v769_v6, %v768_v4  ;;  %v825_v9 = vpop.f32.mrb[15].mxu1 }
 0x117   :  { %v826_v10 = vadd.f32 %v825_v9, %v824_v5 }
 0x118   :  { %v861_v11 = vpop.f32.mrb[16].mxu0 }
 0x119   :  { %v436_v12 = vadd.f32 %v861_v11, %v331_v36  ;;  %v867_v13 = vpop.f32.mrb[16].mxu1  ;;  %v430_v14 = vpop.f32.mrb[17].mxu0  ;;  %v361_v15 = vadd.f32 %v826_v10, %v770_v8  ;;  %v978_v36 = vmov 0  }
 0x11a   :  { %v456_v16 = vadd.f32 %v867_v13, %v351_v0  ;;  %v431_v17 = vadd.f32 %v430_v14, %v326_v29  ;;  %v450_v18 = vpop.f32.mrb[17].mxu1  ;;  %960 = vset.pattern.permute.xlu1 %v978_v36  ;;  %961 = vset.pattern.permute.xlu0 %v978_v36  ;;  %v631_v13 = vld [vmem:[%s1486_s3] sm:$0xff]  ;;  %v633_v14 = vld [vmem:[%s1486_s3 + $0x10] sm:$0xff]  ;;  %v552_v36 = vld [vmem:[%s1487_s2 + $0x8] sm:$0xff] }
 0x11b   :  { %v451_v19 = vadd.f32 %v450_v18, %v346_v57  ;;  %v473_v20 = vsel %vm469_vm1, %v436_v12, 0.0  ;;  %v636_v18 = vld [vmem:[%s1486_s3 + $0x28] sm:$0xff] }
 0x11c   :  { %v864_v21 = vpop.f32.mrb[18].mxu0  ;;  %v485_v22 = vsel %vm469_vm1, %v456_v16, 0.0  ;;  %474 = vadd.xlane.f32.xlu0 %v473_v20  ;;  %v470_v29 = vsel %vm469_vm1, %v431_v17, 0.0 }
 0x11d   :  { %v446_v23 = vadd.f32 %v864_v21, %v341_v50  ;;  %v870_v24 = vpop.f32.mrb[18].mxu1  ;;  %486 = vadd.xlane.f32.xlu1 %v485_v22  ;;  %v440_v25 = vpop.f32.mrb[19].mxu0  ;;  %v482_v32 = vsel %vm469_vm1, %v451_v19, 0.0 }
 0x11e   :  { %v466_v26 = vadd.f32 %v870_v24, %v361_v15  ;;  %v441_v27 = vadd.f32 %v440_v25, %v336_v43  ;;  %v460_v28 = vpop.f32.mrb[19].mxu1  ;;  %v635_v15 = vld [vmem:[%s1486_s3 + $0x20] sm:$0xff] }
 0x11f   :  { %v461_v30 = vadd.f32 %v460_v28, %v356_v7  ;;  %v479_v31 = vsel %vm469_vm1, %v446_v23, 0.0 }
 0x120   :  { %471 = vadd.xlane.f32.xlu0 %v470_v29  ;;  %v476_v33 = vsel %vm469_vm1, %v441_v27, 0.0  ;;  %v491_v35 = vsel %vm469_vm1, %v466_v26, 0.0 }
 0x121   :  { %480 = vadd.xlane.f32.xlu1 %v479_v31  ;;  %v488_v34 = vsel %vm469_vm1, %v461_v30, 0.0 }
 0x124   :  { %483 = vadd.xlane.f32.xlu0 %v482_v32 }
 0x125   :  { %477 = vadd.xlane.f32.xlu1 %v476_v33 }
 0x128   :  { %489 = vadd.xlane.f32.xlu0 %v488_v34 }
 0x129   :  { %492 = vadd.xlane.f32.xlu1 %v491_v35 }
 0x1a9   :  { %v475_v37 = vpop.xlane.xlu0 %474 }
 0x1aa   :  { %v487_v38 = vpop.xlane.xlu1 %486  ;;  %v496_v39 = vmul.f32 0.03125, %v475_v37 }
 0x1ab   :  { %v500_v40 = vmul.f32 0.03125, %v487_v38 }
 0x1ac   :  { %v1356_v41 = vsub.f32 %v436_v12, %v496_v39 }
 0x1ad   :  { %v1358_v42 = vsub.f32 %v456_v16, %v500_v40  ;;  %v472_v43 = vpop.xlane.xlu0 %471  ;;  %v632_v16 = vld [vmem:[%s1486_s3 + $0x8] sm:$0xff] }
 0x1ae   :  { %v481_v44 = vpop.xlane.xlu1 %480  ;;  %v495_v45 = vmul.f32 0.03125, %v472_v43  ;;  %v512_v46 = vmul.f32 %v1356_v41, %v1356_v41 }
 0x1af   :  { %v498_v47 = vmul.f32 0.03125, %v481_v44  ;;  %v516_v50 = vmul.f32 %v1358_v42, %v1358_v42 }
 0x1b0   :  { %v1362_v48 = vsub.f32 %v431_v17, %v495_v45  ;;  %v522_v49 = vsel %vm469_vm1, %v512_v46, 0.0  ;;  %v634_v17 = vld [vmem:[%s1486_s3 + $0x18] sm:$0xff]  ;;  %v556_v45 = vld [vmem:[%s1487_s2 + $0x28] sm:$0xff]  ;;  %v551_v46 = vld [vmem:[%s1487_s2] sm:$0xff] }
 0x1b1   :  { %v1367_v51 = vsub.f32 %v446_v23, %v498_v47  ;;  %523 = vadd.xlane.f32.xlu1 %v522_v49  ;;  %v484_v52 = vpop.xlane.xlu0 %483  ;;  %v534_v58 = vsel %vm469_vm1, %v516_v50, 0.0 }
 0x1b2   :  { %v478_v53 = vpop.xlane.xlu1 %477  ;;  %v499_v54 = vmul.f32 0.03125, %v484_v52  ;;  %v511_v55 = vmul.f32 %v1362_v48, %v1362_v48 }
 0x1b3   :  { %v497_v56 = vmul.f32 0.03125, %v478_v53  ;;  %v514_v60 = vmul.f32 %v1367_v51, %v1367_v51 }
 0x1b4   :  { %v1371_v57 = vsub.f32 %v451_v19, %v499_v54  ;;  %v519_v59 = vsel %vm469_vm1, %v511_v55, 0.0  ;;  %v555_v55 = vld [vmem:[%s1487_s2 + $0x20] sm:$0xff] }
 0x1b5   :  { %v1377_v61 = vsub.f32 %v441_v27, %v497_v56  ;;  %535 = vadd.xlane.f32.xlu1 %v534_v58  ;;  %520 = vadd.xlane.f32.xlu0 %v519_v59  ;;  %v490_v62 = vpop.xlane.xlu0 %489  ;;  %v528_v4 = vsel %vm469_vm1, %v514_v60, 0.0  ;;  %v638_v59 = vld [vmem:[%s1486_s3 + $0x38] sm:$0xff] }
 0x1b6   :  { %v493_v63 = vpop.xlane.xlu1 %492  ;;  %v501_v0 = vmul.f32 0.03125, %v490_v62  ;;  %v515_v1 = vmul.f32 %v1371_v57, %v1371_v57 }
 0x1b7   :  { %v502_v2 = vmul.f32 0.03125, %v493_v63  ;;  %v513_v6 = vmul.f32 %v1377_v61, %v1377_v61  ;;  %v554_v63 = vld [vmem:[%s1487_s2 + $0x18] sm:$0xff] }
 0x1b8   :  { %v1381_v3 = vsub.f32 %v461_v30, %v501_v0  ;;  %v531_v5 = vsel %vm469_vm1, %v515_v1, 0.0 }
 0x1b9   :  { %v1387_v7 = vsub.f32 %v466_v26, %v502_v2  ;;  %529 = vadd.xlane.f32.xlu1 %v528_v4  ;;  %532 = vadd.xlane.f32.xlu0 %v531_v5  ;;  %v525_v9 = vsel %vm469_vm1, %v513_v6, 0.0  ;;  %v558_v2 = vld [vmem:[%s1487_s2 + $0x38] sm:$0xff]  ;;  %v553_v6 = vld [vmem:[%s1487_s2 + $0x10] sm:$0xff] }
 0x1ba   :  { %v517_v10 = vmul.f32 %v1381_v3, %v1381_v3 }
 0x1bb   :  { %v518_v8 = vmul.f32 %v1387_v7, %v1387_v7 }
 0x1bc   :  { %v537_v12 = vsel %vm469_vm1, %v517_v10, 0.0  ;;  %v557_v10 = vld [vmem:[%s1487_s2 + $0x30] sm:$0xff] }
 0x1bd   :  { %v540_v11 = vsel %vm469_vm1, %v518_v8, 0.0  ;;  %526 = vadd.xlane.f32.xlu0 %v525_v9 }
 0x1be   :  { %541 = vadd.xlane.f32.xlu1 %v540_v11 }
 0x1c1   :  { %538 = vadd.xlane.f32.xlu0 %v537_v12  ;;  %v637_v12 = vld [vmem:[%s1486_s3 + $0x30] sm:$0xff] }
 0x1cf   :  { %641 = vperm.xlu1 %960, %v631_v13  }
 0x1d3   :  { %651 = vperm.xlu1 %960, %v633_v14  }
 0x1d7   :  { %661 = vperm.xlu1 %960, %v635_v15   ;;  %646 = vperm.xlu0 %961, %v632_v16  }
 0x1db   :  { %656 = vperm.xlu0 %961, %v634_v17  }
 0x1df   :  { %666 = vperm.xlu0 %961, %v636_v18  }
 0x23e   :  { %v524_v19 = vpop.xlane.xlu1 %523 }
 0x23f   :  { %v544_v20 = vmul.f32 0.03125, %v524_v19 }
 0x241   :  { %v560_v21 = vadd.f32 1e-05, %v544_v20 }
 0x242   :  { %v536_v22 = vpop.xlane.xlu1 %535  ;;  %v521_v23 = vpop.xlane.xlu0 %520 }
 0x243   :  { %962 = vrsqrt.f32 %v560_v21  ;;  %v548_v24 = vmul.f32 0.03125, %v536_v22  ;;  %v543_v25 = vmul.f32 0.03125, %v521_v23 }
 0x245   :  { %v564_v26 = vadd.f32 1e-05, %v548_v24  ;;  %v559_v27 = vadd.f32 1e-05, %v543_v25 }
 0x246   :  { %v530_v28 = vpop.xlane.xlu1 %529  ;;  %v533_v30 = vpop.xlane.xlu0 %532 }
 0x247   :  { %964 = vrsqrt.f32 %v564_v26  ;;  %v546_v31 = vmul.f32 0.03125, %v530_v28  ;;  %v547_v29 = vmul.f32 0.03125, %v533_v30 }
 0x248   :  { %966 = vrsqrt.f32 %v559_v27 }
 0x249   :  { %v563_v32 = vadd.f32 1e-05, %v547_v29  ;;  %v562_v33 = vadd.f32 1e-05, %v546_v31 }
 0x24a   :  { %v527_v34 = vpop.xlane.xlu0 %526 }
 0x24b   :  { %v542_v35 = vpop.xlane.xlu1 %541  ;;  %968 = vrsqrt.f32 %v563_v32  ;;  %v545_v40 = vmul.f32 0.03125, %v527_v34 }
 0x24c   :  { %v550_v37 = vmul.f32 0.03125, %v542_v35  ;;  %970 = vrsqrt.f32 %v562_v33 }
 0x24d   :  { %v963_v38 = vpop.eup %962  ;;  %v561_v50 = vadd.f32 1e-05, %v545_v40 }
 0x24e   :  { %v566_v39 = vadd.f32 1e-05, %v550_v37  ;;  %v576_v43 = vmul.f32 %v963_v38, %v552_v36  ;;  %v539_v44 = vpop.xlane.xlu0 %538 }
 0x24f   :  { %v549_v52 = vmul.f32 0.03125, %v539_v44  ;;  %v642_v13 = vpop.permute.xlu1 %641 }
 0x250   :  { %590 = vperm.xlu1 %960, %v576_v43   ;;  %972 = vrsqrt.f32 %v566_v39 }
 0x251   :  { %v965_v47 = vpop.eup %964  ;;  %974 = vrsqrt.f32 %v561_v50  ;;  %v565_v58 = vadd.f32 1e-05, %v549_v52 }
 0x252   :  { %v967_v49 = vpop.eup %966  ;;  %v580_v53 = vmul.f32 %v965_v47, %v556_v45 }
 0x253   :  { %v575_v54 = vmul.f32 %v967_v49, %v551_v46  ;;  %976 = vrsqrt.f32 %v565_v58  ;;  %v652_v15 = vpop.permute.xlu1 %651 }
 0x254   :  { %610 = vperm.xlu1 %960, %v580_v53  }
 0x255   :  { %585 = vperm.xlu0 %961, %v575_v54   ;;  %v969_v56 = vpop.eup %968 }
 0x256   :  { %v579_v60 = vmul.f32 %v969_v56, %v555_v55  ;;  %v971_v62 = vpop.eup %970  ;;  %v647_v14 = vpop.permute.xlu0 %646 }
 0x257   :  { %v578_v0 = vmul.f32 %v971_v62, %v554_v63  ;;  %v662_v17 = vpop.permute.xlu1 %661 }
 0x258   :  { %605 = vperm.xlu1 %960, %v579_v60  }
 0x259   :  { %676 = vperm.xlu0 %961, %v638_v59  }
 0x25a   :  { %v973_v1 = vpop.eup %972  ;;  %v657_v16 = vpop.permute.xlu0 %656 }
 0x25b   :  { %v582_v4 = vmul.f32 %v973_v1, %v558_v2  ;;  %v975_v5 = vpop.eup %974 }
 0x25c   :  { %600 = vperm.xlu1 %960, %v578_v0   ;;  %v577_v8 = vmul.f32 %v975_v5, %v553_v6 }
 0x25d   :  { %v977_v9 = vpop.eup %976 }
 0x25e   :  { %v581_v11 = vmul.f32 %v977_v9, %v557_v10  ;;  %v667_v18 = vpop.permute.xlu0 %666 }
 0x260   :  { %620 = vperm.xlu1 %960, %v582_v4  }
 0x264   :  { %595 = vperm.xlu1 %960, %v577_v8  }
 0x268   :  { %615 = vperm.xlu1 %960, %v581_v11  }
 0x26c   :  { %671 = vperm.xlu1 %960, %v637_v12  }
 0x2cf   :  { %v591_v19 = vpop.permute.xlu1 %590 }
 0x2d0   :  { %v624_v20 = vmul.f32 %v591_v19, %v1356_v41 }
 0x2d2   :  { %v680_v21 = vadd.f32 %v647_v14, %v624_v20 }
 0x2d3   :  { %v611_v22 = vpop.permute.xlu1 %610 }
 0x2d4   :  { %v688_v23 = vmax.f32 %v680_v21, 0.0  ;;  %v628_v24 = vmul.f32 %v611_v22, %v1358_v42  ;;  %v586_v25 = vpop.permute.xlu0 %585 }
 0x2d5   :  { %v623_v26 = vmul.f32 %v586_v25, %v1362_v48 }
 0x2d6   :  { %696 = vst.msk [vmem:[%s1488_s4 + $0x8] sm:$0xff] %vm469_vm1, %v688_v23  ;;  %v684_v27 = vadd.f32 %v667_v18, %v628_v24 }
 0x2d7   :  { %v679_v28 = vadd.f32 %v642_v13, %v623_v26  ;;  %v606_v31 = vpop.permute.xlu1 %605 }
 0x2d8   :  { %v692_v30 = vmax.f32 %v684_v27, 0.0  ;;  %v627_v41 = vmul.f32 %v606_v31, %v1371_v57  ;;  %v677_v37 = vpop.permute.xlu0 %676 }
 0x2d9   :  { %v687_v29 = vmax.f32 %v679_v28, 0.0 }
 0x2da   :  { %700 = vst.msk [vmem:[%s1488_s4 + $0x28] sm:$0xff] %vm469_vm1, %v692_v30  ;;  %v683_v42 = vadd.f32 %v662_v17, %v627_v41 }
 0x2db   :  { %695 = vst.msk [vmem:[%s1488_s4] sm:$0xff] %vm469_vm1, %v687_v29  ;;  %v601_v48 = vpop.permute.xlu1 %600 }
 0x2dc   :  { %v691_v32 = vmax.f32 %v683_v42, 0.0  ;;  %v626_v33 = vmul.f32 %v601_v48, %v1367_v51 }
 0x2de   :  { %699 = vst.msk [vmem:[%s1488_s4 + $0x20] sm:$0xff] %vm469_vm1, %v691_v32  ;;  %v682_v57 = vadd.f32 %v657_v16, %v626_v33 }
 0x2df   :  { %v621_v34 = vpop.permute.xlu1 %620 }
 0x2e0   :  { %v690_v35 = vmax.f32 %v682_v57, 0.0  ;;  %v630_v36 = vmul.f32 %v621_v34, %v1387_v7 }
 0x2e2   :  { %698 = vst.msk [vmem:[%s1488_s4 + $0x18] sm:$0xff] %vm469_vm1, %v690_v35  ;;  %v686_v38 = vadd.f32 %v677_v37, %v630_v36 }
 0x2e3   :  { %v596_v39 = vpop.permute.xlu1 %595 }
 0x2e4   :  { %v694_v40 = vmax.f32 %v686_v38, 0.0  ;;  %v625_v51 = vmul.f32 %v596_v39, %v1377_v61 }
 0x2e6   :  { %702 = vst.msk [vmem:[%s1488_s4 + $0x38] sm:$0xff] %vm469_vm1, %v694_v40  ;;  %v681_v43 = vadd.f32 %v652_v15, %v625_v51 }
 0x2e7   :  { %v616_v44 = vpop.permute.xlu1 %615 }
 0x2e8   :  { %v689_v45 = vmax.f32 %v681_v43, 0.0  ;;  %v629_v7 = vmul.f32 %v616_v44, %v1381_v3 }
 0x2ea   :  { %697 = vst.msk [vmem:[%s1488_s4 + $0x10] sm:$0xff] %vm469_vm1, %v689_v45 }
 0x2eb   :  { %v672_v46 = vpop.permute.xlu1 %671 }
 0x2ec   :  { %v685_v47 = vadd.f32 %v672_v46, %v629_v7 }
 0x2ee   :  { %v693_v49 = vmax.f32 %v685_v47, 0.0 }
 0x2f0   :  { %701 = vst.msk [vmem:[%s1488_s4 + $0x30] sm:$0xff] %vm469_vm1, %v693_v49 }

// kernel: generator_forward.13
= control target key start
LH: loop header
LB: loop body
LE: loop exit
PB: predicated region body
PF: predicated region fallthrough
CT: control target
= control target key end

     0   :  { %v2340_v47 = vmov 1983009808   ;;  %v214_v49 = vlaneseq  ;;  %vm581_vm0 = vcmask 74752   ;;  %vm666_vm1 = vcmask 1041408   ;;  %s3450_s3 = inlined_call_operand.vmem [shape: f32[1024,16], index: 3, kind: input, shape index: {}]   ;;  %s3451_s0 = inlined_call_operand.vmem [shape: f32[2,1024], index: 0, kind: input, shape index: {}]   ;;  %s3452_s1 = inlined_call_operand.vmem [shape: f32[2,10], index: 1, kind: input, shape index: {}]   ;;  %s3453_s12 = inlined_call_operand.vmem [shape: f32[10,32], index: 12, kind: input, shape index: {}]   ;;  %s3454_s6 = inlined_call_operand.vmem [shape: f32[1,10], index: 6, kind: input, shape index: {}]   ;;  %s3455_s9 = inlined_call_operand.vmem [shape: f32[1,10], index: 9, kind: input, shape index: {}]   ;;  %s3456_s11 = inlined_call_operand.vmem [shape: f32[16,32], index: 11, kind: input, shape index: {}]   ;;  %s3457_s4 = inlined_call_operand.vmem [shape: f32[1,16], index: 4, kind: input, shape index: {}]   ;;  %s3458_s2 = inlined_call_operand.vmem [shape: f32[2,8], index: 2, kind: input, shape index: {}]   ;;  %s3459_s7 = inlined_call_operand.vmem [shape: f32[1,8], index: 7, kind: input, shape index: {}]   ;;  %s3460_s5 = inlined_call_operand.vmem [shape: f32[1,16], index: 5, kind: input, shape index: {}]   ;;  %s3461_s8 = inlined_call_operand.vmem [shape: f32[1,16], index: 8, kind: input, shape index: {}]   ;;  %s3462_s10 = inlined_call_operand.vmem [shape: f32[1,8], index: 10, kind: input, shape index: {}]   ;;  %s3463_s13 = inlined_call_operand.vmem [shape: f32[8,32], index: 13, kind: input, shape index: {}]   ;;  %s3464_s16 = inlined_call_operand.vmem [shape: f32[32,128], index: 16, kind: input, shape index: {}]   ;;  %s3465_s14 = inlined_call_operand.vmem [shape: f32[1,32], index: 14, kind: input, shape index: {}]   ;;  %s3466_s15 = inlined_call_operand.vmem [shape: f32[1,32], index: 15, kind: input, shape index: {}]   ;;  %s3467_s19 = inlined_call_operand.vmem [shape: f32[128,1024], index: 19, kind: input, shape index: {}]   ;;  %s3468_s17 = inlined_call_operand.vmem [shape: f32[1,128], index: 17, kind: input, shape index: {}]   ;;  %s3469_s18 = inlined_call_operand.vmem [shape: f32[1,128], index: 18, kind: input, shape index: {}]   ;;  %s3470_s21 = inlined_call_operand.vmem [shape: f32[1,1024], index: 21, kind: input, shape index: {}]   ;;  %s3471_s20 = inlined_call_operand.vmem [shape: f32[1,1024], index: 20, kind: input, shape index: {}]   ;;  %s3472_s22 = inlined_call_operand.vmem [shape: f32[2,1024], index: 22, kind: output, shape index: {}]  }
   0x1   :  { %3477 = sst [smem:[#allocation2_spill]] %s3450_s3  ;;  %v212_v48 = vunpack.c.l.s4 %v2340_v47  ;;  %vm2342_vm2 = vmmov 1   ;;  %vm2343_vm4 = vmmov 0   ;;  %vm662_vm5 = vcmask 80896  }
   0x2   :  { %3478 = sst [smem:[#allocation3_spill]] %s3451_s0  ;;  %s3484_s29 = sld [smem:[#allocation2_spill]]  ;;  %vm2159_vm3 = vmpackc.low %vm666_vm1, %vm2342_vm2  ;;  %vm621_vm6 = vcmask 58368   ;;  %vm540_vm7 = vcmask 123904   ;;  %vm740_vm8 = vcmask 130048   ;;  %vm815_vm9 = vcmask 64512  }
   0x3   :  { %3479 = sst [smem:[#allocation4_spill]] %s3452_s1  ;;  %v213_v63 = vunpack.c.0.s8 %v212_v48  ;;  %vm892_vm10 = vcmask 254976   ;;  %vm933_vm11 = vcmask 261120  }
   0x4   :  { %3480 = sst [smem:[#allocation5_spill]] %s3453_s12  ;;  %s3485_s12 = sld [smem:[#allocation3_spill]] }
   0x5   :  { %3481 = sst [smem:[#allocation6_spill]] %s3454_s6  ;;  %s3486_s26 = sld [smem:[#allocation4_spill]] }
   0x6   :  { %3482 = sst [smem:[#allocation7_spill]] %s3455_s9  ;;  %s3487_s27 = sld [smem:[#allocation5_spill]] }
   0x7   :  { %3483 = sst [smem:[#allocation8_spill]] %s3456_s11  ;;  %s3488_s23 = sld [smem:[#allocation6_spill]] }
   0x8   :  { %v89_v0 = vld [vmem:[%s3484_s29 + $0x80] sm:$0xff]  ;;  %v90_v1 = vld [vmem:[%s3484_s29 + $0x88] sm:$0xff]  ;;  %v91_v11 = vld [vmem:[%s3484_s29 + $0x90] sm:$0xff]  ;;  %s3489_s9 = sld [smem:[#allocation7_spill]]  ;;  %s3490_s25 = sld [smem:[#allocation8_spill]] }
   0x9   :  { %v73_v2 = vld [vmem:[%s3484_s29] sm:$0xff]  ;;  %v2029_v3 = vpack.c.bf16 %v90_v1, %v89_v0  ;;  %v74_v4 = vld [vmem:[%s3484_s29 + $0x8] sm:$0xff]  ;;  %v92_v13 = vld [vmem:[%s3484_s29 + $0x98] sm:$0xff]  ;;  %v2587_v0 = vshrl.u32 %v214_v49, 7 }
   0xa   :  { %v121_v5 = vld [vmem:[%s3484_s29 + $0x180] sm:$0xff]  ;;  %v122_v6 = vld [vmem:[%s3484_s29 + $0x188] sm:$0xff]  ;;  %v2031_v7 = vpack.c.bf16 %v74_v4, %v73_v2  ;;  %v75_v14 = vld [vmem:[%s3484_s29 + $0x10] sm:$0xff]  ;;  %v2033_v16 = vpack.c.bf16 %v92_v13, %v91_v11 }
   0xb   :  { %v2061_v8 = vpack.c.bf16 %v122_v6, %v121_v5  ;;  %v105_v9 = vld [vmem:[%s3484_s29 + $0x100] sm:$0xff]  ;;  %v106_v10 = vld [vmem:[%s3484_s29 + $0x108] sm:$0xff]  ;;  %2030 = vmatprep.subr.bf16.mxu0 %v2029_v3  ;;  %v76_v15 = vld [vmem:[%s3484_s29 + $0x18] sm:$0xff]  ;;  %v2614_v13 = vsub.s32 %v213_v63, %v2587_v0 }
   0xc   :  { %v2063_v12 = vpack.c.bf16 %v106_v10, %v105_v9  ;;  %2032 = vmatpush3.bf16.msra.mxu0 %v2031_v7  ;;  %v2035_v17 = vpack.c.bf16 %v76_v15, %v75_v14  ;;  %v123_v18 = vld [vmem:[%s3484_s29 + $0x190] sm:$0xff]  ;;  %v124_v19 = vld [vmem:[%s3484_s29 + $0x198] sm:$0xff]  ;;  %v93_v23 = vld [vmem:[%s3484_s29 + $0xa0] sm:$0xff] }
   0xd   :  { %2062 = vmatprep.subr.bf16.mxu1 %v2061_v8  ;;  %v107_v20 = vld [vmem:[%s3484_s29 + $0x110] sm:$0xff]  ;;  %v2065_v21 = vpack.c.bf16 %v124_v19, %v123_v18  ;;  %v108_v22 = vld [vmem:[%s3484_s29 + $0x118] sm:$0xff]  ;;  %v94_v24 = vld [vmem:[%s3484_s29 + $0xa8] sm:$0xff]  ;;  %2034 = vmatprep.subr.bf16.mxu0 %v2033_v16 }
   0xe   :  { %2064 = vmatpush3.bf16.msra.mxu1 %v2063_v12  ;;  %v2067_v25 = vpack.c.bf16 %v108_v22, %v107_v20  ;;  %v2037_v26 = vpack.c.bf16 %v94_v24, %v93_v23  ;;  %v77_v27 = vld [vmem:[%s3484_s29 + $0x20] sm:$0xff]  ;;  %v78_v28 = vld [vmem:[%s3484_s29 + $0x28] sm:$0xff]  ;;  %v95_v35 = vld [vmem:[%s3484_s29 + $0xb0] sm:$0xff] }
   0xf   :  { %v125_v29 = vld [vmem:[%s3484_s29 + $0x1a0] sm:$0xff]  ;;  %2066 = vmatprep.subr.bf16.mxu1 %v2065_v21  ;;  %v126_v30 = vld [vmem:[%s3484_s29 + $0x1a8] sm:$0xff]  ;;  %v2039_v33 = vpack.c.bf16 %v78_v28, %v77_v27  ;;  %v96_v36 = vld [vmem:[%s3484_s29 + $0xb8] sm:$0xff] }
  0x10   :  { %v109_v31 = vld [vmem:[%s3484_s29 + $0x120] sm:$0xff]  ;;  %v110_v32 = vld [vmem:[%s3484_s29 + $0x128] sm:$0xff]  ;;  %2036 = vmatpush3.bf16.msra.mxu0 %v2035_v17  ;;  %v2069_v34 = vpack.c.bf16 %v126_v30, %v125_v29  ;;  %v79_v37 = vld [vmem:[%s3484_s29 + $0x30] sm:$0xff]  ;;  %v2041_v39 = vpack.c.bf16 %v96_v36, %v95_v35 }
  0x11   :  { %2038 = vmatprep.subr.bf16.mxu0 %v2037_v26  ;;  %v2071_v38 = vpack.c.bf16 %v110_v32, %v109_v31  ;;  %v80_v40 = vld [vmem:[%s3484_s29 + $0x38] sm:$0xff]  ;;  %v127_v41 = vld [vmem:[%s3484_s29 + $0x1b0] sm:$0xff]  ;;  %v97_v46 = vld [vmem:[%s3484_s29 + $0xc0] sm:$0xff] }
  0x12   :  { %2068 = vmatpush3.bf16.msra.mxu1 %v2067_v25  ;;  %v128_v42 = vld [vmem:[%s3484_s29 + $0x1b8] sm:$0xff]  ;;  %v111_v44 = vld [vmem:[%s3484_s29 + $0x130] sm:$0xff]  ;;  %v98_v50 = vld [vmem:[%s3484_s29 + $0xc8] sm:$0xff]  ;;  %v2043_v51 = vpack.c.bf16 %v80_v40, %v79_v37 }
  0x13   :  { %2070 = vmatprep.subr.bf16.mxu1 %v2069_v34  ;;  %v2073_v43 = vpack.c.bf16 %v128_v42, %v127_v41  ;;  %v112_v45 = vld [vmem:[%s3484_s29 + $0x138] sm:$0xff]  ;;  %v129_v52 = vld [vmem:[%s3484_s29 + $0x1c0] sm:$0xff]  ;;  %v130_v53 = vld [vmem:[%s3484_s29 + $0x1c8] sm:$0xff]  ;;  %v2045_v55 = vpack.c.bf16 %v98_v50, %v97_v46 }
  0x14   :  { %2040 = vmatpush3.bf16.msra.mxu0 %v2039_v33  ;;  %v2075_v54 = vpack.c.bf16 %v112_v45, %v111_v44  ;;  %v81_v56 = vld [vmem:[%s3484_s29 + $0x40] sm:$0xff]  ;;  %v82_v57 = vld [vmem:[%s3484_s29 + $0x48] sm:$0xff]  ;;  %v2077_v59 = vpack.c.bf16 %v130_v53, %v129_v52  ;;  %v99_v61 = vld [vmem:[%s3484_s29 + $0xd0] sm:$0xff] }
  0x15   :  { %2042 = vmatprep.subr.bf16.mxu0 %v2041_v39  ;;  %v113_v58 = vld [vmem:[%s3484_s29 + $0x140] sm:$0xff]  ;;  %v114_v60 = vld [vmem:[%s3484_s29 + $0x148] sm:$0xff]  ;;  %v100_v62 = vld [vmem:[%s3484_s29 + $0xd8] sm:$0xff]  ;;  %v2047_v3 = vpack.c.bf16 %v82_v57, %v81_v56 }
  0x16   :  { %2072 = vmatpush3.bf16.msra.mxu1 %v2071_v38  ;;  %v131_v1 = vld [vmem:[%s3484_s29 + $0x1d0] sm:$0xff]  ;;  %v132_v2 = vld [vmem:[%s3484_s29 + $0x1d8] sm:$0xff]  ;;  %v2079_v4 = vpack.c.bf16 %v114_v60, %v113_v58  ;;  %v2049_v5 = vpack.c.bf16 %v100_v62, %v99_v61  ;;  %v101_v11 = vld [vmem:[%s3484_s29 + $0xe0] sm:$0xff] }
  0x17   :  { %2074 = vmatprep.subr.bf16.mxu1 %v2073_v43  ;;  %v83_v6 = vld [vmem:[%s3484_s29 + $0x50] sm:$0xff]  ;;  %v84_v7 = vld [vmem:[%s3484_s29 + $0x58] sm:$0xff]  ;;  %v2081_v9 = vpack.c.bf16 %v132_v2, %v131_v1  ;;  %v102_v12 = vld [vmem:[%s3484_s29 + $0xe8] sm:$0xff] }
  0x18   :  { %2044 = vmatpush3.bf16.msra.mxu0 %v2043_v51  ;;  %v115_v8 = vld [vmem:[%s3484_s29 + $0x150] sm:$0xff]  ;;  %v116_v10 = vld [vmem:[%s3484_s29 + $0x158] sm:$0xff]  ;;  %v133_v14 = vld [vmem:[%s3484_s29 + $0x1e0] sm:$0xff]  ;;  %v2051_v16 = vpack.c.bf16 %v84_v7, %v83_v6  ;;  %v2053_v19 = vpack.c.bf16 %v102_v12, %v101_v11 }
  0x19   :  { %2046 = vmatprep.subr.bf16.mxu0 %v2045_v55  ;;  %v134_v15 = vld [vmem:[%s3484_s29 + $0x1e8] sm:$0xff]  ;;  %v85_v17 = vld [vmem:[%s3484_s29 + $0x60] sm:$0xff]  ;;  %v2083_v18 = vpack.c.bf16 %v116_v10, %v115_v8  ;;  %v103_v25 = vld [vmem:[%s3484_s29 + $0xf0] sm:$0xff] }
  0x1a   :  { %2076 = vmatpush3.bf16.msra.mxu1 %v2075_v54  ;;  %v86_v20 = vld [vmem:[%s3484_s29 + $0x68] sm:$0xff]  ;;  %v117_v21 = vld [vmem:[%s3484_s29 + $0x160] sm:$0xff]  ;;  %v2085_v23 = vpack.c.bf16 %v134_v15, %v133_v14  ;;  %v104_v26 = vld [vmem:[%s3484_s29 + $0xf8] sm:$0xff] }
  0x1b   :  { %2078 = vmatprep.subr.bf16.mxu1 %v2077_v59  ;;  %v71_v22 = vld [vmem:[%s3485_s12] sm:$0xff]  ;;  %v118_v24 = vld [vmem:[%s3484_s29 + $0x168] sm:$0xff]  ;;  %v135_v29 = vld [vmem:[%s3484_s29 + $0x1f0] sm:$0xff]  ;;  %v2055_v31 = vpack.c.bf16 %v86_v20, %v85_v17  ;;  %v2057_v36 = vpack.c.bf16 %v104_v26, %v103_v25 }
  0x1c   :  { %2048 = vmatpush3.bf16.msra.mxu0 %v2047_v3  ;;  %v217_v27 = vrot.slane %v71_v22, %v2614_v13  ;;  %v210_v28 = vcombine.high %v71_v22, %v71_v22  ;;  %v136_v30 = vld [vmem:[%s3484_s29 + $0x1f8] sm:$0xff]  ;;  %v72_v32 = vld [vmem:[%s3485_s12 + $0x8] sm:$0xff]  ;;  %v2087_v35 = vpack.c.bf16 %v118_v24, %v117_v21  ;;  %v87_v37 = vld [vmem:[%s3484_s29 + $0x70] sm:$0xff] }
  0x1d   :  { %2050 = vmatprep.subr.bf16.mxu0 %v2049_v5  ;;  %v88_v38 = vld [vmem:[%s3484_s29 + $0x78] sm:$0xff]  ;;  %v119_v39 = vld [vmem:[%s3484_s29 + $0x170] sm:$0xff]  ;;  %v2089_v40 = vpack.c.bf16 %v136_v30, %v135_v29  ;;  %v153_v42 = vld [vmem:[%s3484_s29 + $0x280] sm:$0xff]  ;;  %v227_v45 = vcombine.high %v72_v32, %v72_v32  ;;  %v2697_v58 = vrot.slane %v72_v32, %v2614_v13 }
  0x1e   :  { %2080 = vmatpush3.bf16.msra.mxu1 %v2079_v4  ;;  %v225_v33 = vcombine.high %v217_v27, %v217_v27  ;;  %v224_v34 = vrot.slane %v210_v28, %v2614_v13  ;;  %v120_v41 = vld [vmem:[%s3484_s29 + $0x178] sm:$0xff]  ;;  %v154_v43 = vld [vmem:[%s3484_s29 + $0x288] sm:$0xff]  ;;  %v185_v46 = vld [vmem:[%s3484_s29 + $0x380] sm:$0xff]  ;;  %v2059_v48 = vpack.c.bf16 %v88_v38, %v87_v37 }
  0x1f   :  { %2082 = vmatprep.subr.bf16.mxu1 %v2081_v9  ;;  %v186_v47 = vld [vmem:[%s3484_s29 + $0x388] sm:$0xff]  ;;  %v2091_v49 = vpack.c.bf16 %v120_v41, %v119_v39  ;;  %v2093_v50 = vpack.c.bf16 %v154_v43, %v153_v42  ;;  %v137_v51 = vld [vmem:[%s3484_s29 + $0x200] sm:$0xff]  ;;  %v155_v56 = vld [vmem:[%s3484_s29 + $0x290] sm:$0xff]  ;;  %v2706_v61 = vrot.slane %v227_v45, %v2614_v13  ;;  %v242_v9 = vcombine.high %v2697_v58, %v2697_v58 }
  0x20   :  { %2052 = vmatpush3.bf16.msra.mxu0 %v2051_v16  ;;  %316 = vmatprep.mubr.f32.mxu0 %v225_v33  ;;  %v226_v44 = vcombine.high %v224_v34, %v224_v34  ;;  %v138_v52 = vld [vmem:[%s3484_s29 + $0x208] sm:$0xff]  ;;  %v169_v53 = vld [vmem:[%s3484_s29 + $0x300] sm:$0xff]  ;;  %v2125_v54 = vpack.c.bf16 %v186_v47, %v185_v46  ;;  %v156_v57 = vld [vmem:[%s3484_s29 + $0x298] sm:$0xff] }
  0x21   :  { %2054 = vmatprep.subr.bf16.mxu0 %v2053_v19  ;;  %v170_v55 = vld [vmem:[%s3484_s29 + $0x308] sm:$0xff]  ;;  %v187_v59 = vld [vmem:[%s3484_s29 + $0x390] sm:$0xff]  ;;  %v188_v60 = vld [vmem:[%s3484_s29 + $0x398] sm:$0xff]  ;;  %v2095_v62 = vpack.c.bf16 %v138_v52, %v137_v51  ;;  %v2097_v1 = vpack.c.bf16 %v156_v57, %v155_v56  ;;  %v243_v12 = vcombine.high %v2706_v61, %v2706_v61 }
  0x22   :  { %2084 = vmatpush3.bf16.msra.mxu1 %v2083_v18  ;;  %386 = vmatprep.mubr.f32.mxu1 %v226_v44  ;;  %v2127_v63 = vpack.c.bf16 %v170_v55, %v169_v53  ;;  %v139_v2 = vld [vmem:[%s3484_s29 + $0x210] sm:$0xff]  ;;  %v140_v3 = vld [vmem:[%s3484_s29 + $0x218] sm:$0xff]  ;;  %v2129_v5 = vpack.c.bf16 %v188_v60, %v187_v59  ;;  %v157_v7 = vld [vmem:[%s3484_s29 + $0x2a0] sm:$0xff] }
  0x23   :  { %2086 = vmatprep.subr.bf16.mxu1 %v2085_v23  ;;  %v171_v4 = vld [vmem:[%s3484_s29 + $0x310] sm:$0xff]  ;;  %v172_v6 = vld [vmem:[%s3484_s29 + $0x318] sm:$0xff]  ;;  %v158_v8 = vld [vmem:[%s3484_s29 + $0x2a8] sm:$0xff]  ;;  %v2099_v14 = vpack.c.bf16 %v140_v3, %v139_v2 }
  0x24   :  { %2056 = vmatpush3.bf16.msra.mxu0 %v2055_v31  ;;  %v189_v10 = vld [vmem:[%s3484_s29 + $0x3a0] sm:$0xff]  ;;  %v190_v11 = vld [vmem:[%s3484_s29 + $0x3a8] sm:$0xff]  ;;  %v2131_v15 = vpack.c.bf16 %v172_v6, %v171_v4  ;;  %v2101_v16 = vpack.c.bf16 %v158_v8, %v157_v7  ;;  %v159_v22 = vld [vmem:[%s3484_s29 + $0x2b0] sm:$0xff] }
  0x25   :  { %2058 = vmatprep.subr.bf16.mxu0 %v2057_v36  ;;  %v141_v17 = vld [vmem:[%s3484_s29 + $0x220] sm:$0xff]  ;;  %v142_v18 = vld [vmem:[%s3484_s29 + $0x228] sm:$0xff]  ;;  %v2133_v20 = vpack.c.bf16 %v190_v11, %v189_v10  ;;  %v160_v23 = vld [vmem:[%s3484_s29 + $0x2b8] sm:$0xff] }
  0x26   :  { %2088 = vmatpush3.bf16.msra.mxu1 %v2087_v35  ;;  %v173_v19 = vld [vmem:[%s3484_s29 + $0x320] sm:$0xff]  ;;  %v174_v21 = vld [vmem:[%s3484_s29 + $0x328] sm:$0xff]  ;;  %v191_v24 = vld [vmem:[%s3484_s29 + $0x3b0] sm:$0xff]  ;;  %v2103_v26 = vpack.c.bf16 %v142_v18, %v141_v17  ;;  %v2105_v28 = vpack.c.bf16 %v160_v23, %v159_v22 }
  0x27   :  { %2090 = vmatprep.subr.bf16.mxu1 %v2089_v40  ;;  %v192_v25 = vld [vmem:[%s3484_s29 + $0x3b8] sm:$0xff]  ;;  %v143_v29 = vld [vmem:[%s3484_s29 + $0x230] sm:$0xff]  ;;  %v162_v35 = vld [vmem:[%s3484_s29 + $0x2c8] sm:$0xff] }
  0x28   :  { %2060 = vmatpush3.bf16.msra.mxu0 %v2059_v48  ;;  %v144_v30 = vld [vmem:[%s3484_s29 + $0x238] sm:$0xff]  ;;  %v175_v31 = vld [vmem:[%s3484_s29 + $0x330] sm:$0xff]  ;;  %v2137_v32 = vpack.c.bf16 %v192_v25, %v191_v24  ;;  %v193_v36 = vld [vmem:[%s3484_s29 + $0x3c0] sm:$0xff] }
  0x29   :  { %2094 = vmatprep.subr.bf16.mxu0 %v2093_v50  ;;  %v176_v33 = vld [vmem:[%s3484_s29 + $0x338] sm:$0xff]  ;;  %v194_v37 = vld [vmem:[%s3484_s29 + $0x3c8] sm:$0xff]  ;;  %v2107_v38 = vpack.c.bf16 %v144_v30, %v143_v29  ;;  %v145_v41 = vld [vmem:[%s3484_s29 + $0x240] sm:$0xff] }
  0x2a   :  { %2092 = vmatpush3.bf16.msra.mxu1 %v2091_v49  ;;  %v2139_v39 = vpack.c.bf16 %v176_v33, %v175_v31  ;;  %v146_v42 = vld [vmem:[%s3484_s29 + $0x248] sm:$0xff]  ;;  %v177_v43 = vld [vmem:[%s3484_s29 + $0x340] sm:$0xff]  ;;  %v2141_v44 = vpack.c.bf16 %v194_v37, %v193_v36  ;;  %v163_v46 = vld [vmem:[%s3484_s29 + $0x2d0] sm:$0xff]  ;;  %v2341_v33 = vmov 0.0|0.0   ;;  %v2344_v36 = vmov 0.0  }
  0x2b   :  { %2126 = vmatprep.subr.bf16.mxu1 %v2125_v54  ;;  %317 = vmatmul.mubr.f32.vlgmr.msra.gmra.mrb[0].mxu0 %v217_v27  ;;  %v2135_v27 = vpack.c.bf16 %v174_v21, %v173_v19  ;;  %v178_v45 = vld [vmem:[%s3484_s29 + $0x348] sm:$0xff]  ;;  %v164_v47 = vld [vmem:[%s3484_s29 + $0x2d8] sm:$0xff]  ;;  %v195_v48 = vld [vmem:[%s3484_s29 + $0x3d0] sm:$0xff]  ;;  %v2111_v50 = vpack.c.bf16 %v146_v42, %v145_v41 }
  0x2c   :  { %2096 = vmatpush3.bf16.msra.mxu0 %v2095_v62  ;;  %456 = vmatprep.mubr.f32.mxu0 %v242_v9  ;;  %v196_v49 = vld [vmem:[%s3484_s29 + $0x3d8] sm:$0xff]  ;;  %v2143_v51 = vpack.c.bf16 %v178_v45, %v177_v43  ;;  %v2113_v52 = vpack.c.bf16 %v164_v47, %v163_v46  ;;  %v147_v53 = vld [vmem:[%s3484_s29 + $0x250] sm:$0xff]  ;;  %v165_v59 = vld [vmem:[%s3484_s29 + $0x2e0] sm:$0xff] }
  0x2d   :  { %387 = vmatmul.mubr.f32.vlgmr.msra.gmra.mrb[0].mxu1 %v224_v34  ;;  %2098 = vmatprep.subr.bf16.mxu0 %v2097_v1  ;;  %v161_v34 = vld [vmem:[%s3484_s29 + $0x2c0] sm:$0xff]  ;;  %v148_v54 = vld [vmem:[%s3484_s29 + $0x258] sm:$0xff]  ;;  %v179_v55 = vld [vmem:[%s3484_s29 + $0x350] sm:$0xff]  ;;  %v2145_v56 = vpack.c.bf16 %v196_v49, %v195_v48  ;;  %v2893_v48 = vsub.s32 0, %v2587_v0 }
  0x2e   :  { %2128 = vmatpush3.bf16.msra.mxu1 %v2127_v63  ;;  %526 = vmatprep.mubr.f32.mxu1 %v243_v12  ;;  %v2109_v40 = vpack.c.bf16 %v162_v35, %v161_v34  ;;  %v180_v57 = vld [vmem:[%s3484_s29 + $0x358] sm:$0xff]  ;;  %v166_v60 = vld [vmem:[%s3484_s29 + $0x2e8] sm:$0xff]  ;;  %v197_v62 = vld [vmem:[%s3484_s29 + $0x3e0] sm:$0xff]  ;;  %v2115_v1 = vpack.c.bf16 %v148_v54, %v147_v53 }
  0x2f   :  { %2130 = vmatprep.subr.bf16.mxu1 %v2129_v5  ;;  %v198_v63 = vld [vmem:[%s3484_s29 + $0x3e8] sm:$0xff]  ;;  %v2147_v2 = vpack.c.bf16 %v180_v57, %v179_v55  ;;  %v2117_v3 = vpack.c.bf16 %v166_v60, %v165_v59  ;;  %v149_v4 = vld [vmem:[%s3484_s29 + $0x260] sm:$0xff]  ;;  %v167_v9 = vld [vmem:[%s3484_s29 + $0x2f0] sm:$0xff] }
  0x30   :  { %2100 = vmatpush3.bf16.msra.mxu0 %v2099_v14  ;;  %v150_v5 = vld [vmem:[%s3484_s29 + $0x268] sm:$0xff]  ;;  %v181_v6 = vld [vmem:[%s3484_s29 + $0x360] sm:$0xff]  ;;  %v2149_v7 = vpack.c.bf16 %v198_v63, %v197_v62  ;;  %v168_v10 = vld [vmem:[%s3484_s29 + $0x2f8] sm:$0xff] }
  0x31   :  { %2102 = vmatprep.subr.bf16.mxu0 %v2101_v16  ;;  %v182_v8 = vld [vmem:[%s3484_s29 + $0x368] sm:$0xff]  ;;  %v199_v11 = vld [vmem:[%s3484_s29 + $0x3f0] sm:$0xff]  ;;  %v200_v12 = vld [vmem:[%s3484_s29 + $0x3f8] sm:$0xff]  ;;  %v2119_v14 = vpack.c.bf16 %v150_v5, %v149_v4  ;;  %v2121_v16 = vpack.c.bf16 %v168_v10, %v167_v9 }
  0x32   :  { %2132 = vmatpush3.bf16.msra.mxu1 %v2131_v15  ;;  %v2151_v15 = vpack.c.bf16 %v182_v8, %v181_v6  ;;  %v151_v17 = vld [vmem:[%s3484_s29 + $0x270] sm:$0xff]  ;;  %v152_v18 = vld [vmem:[%s3484_s29 + $0x278] sm:$0xff]  ;;  %v2153_v19 = vpack.c.bf16 %v200_v12, %v199_v11  ;;  %v578_v24 = vld [vmem:[%s3486_s26] sm:$0x3] }
  0x33   :  { %2134 = vmatprep.subr.bf16.mxu1 %v2133_v20  ;;  %v183_v20 = vld [vmem:[%s3484_s29 + $0x370] sm:$0xff]  ;;  %v184_v21 = vld [vmem:[%s3484_s29 + $0x378] sm:$0xff]  ;;  %v2123_v22 = vpack.c.bf16 %v152_v18, %v151_v17  ;;  %v582_v25 = vsel %vm581_vm0, %v578_v24, 0.0  ;;  %v579_v47 = vld [vmem:[%s3488_s23] sm:$0x1] }
  0x34   :  { %2104 = vmatpush3.bf16.msra.mxu0 %v2103_v26  ;;  %v2155_v23 = vpack.c.bf16 %v184_v21, %v183_v20  ;;  %v583_v26 = vrot.slane %v582_v25, 4  ;;  %v658_v54 = vld [vmem:[%s3490_s25] sm:$0xff]  ;;  %v659_v55 = vld [vmem:[%s3490_s25 + $0x8] sm:$0xff] }
  0x35   :  { %2106 = vmatprep.subr.bf16.mxu0 %v2105_v28  ;;  %v2162_v57 = vpack.c.bf16 %v659_v55, %v658_v54  ;;  %v1834_v62 = vld [vmem:[%s3457_s4] ss:$0 sm:$0xff] }
  0x36   :  { %2136 = vmatpush3.bf16.msra.mxu1 %v2135_v27  ;;  %v584_v27 = vadd.f32 %v583_v26, %v582_v25 }
  0x37   :  { %2138 = vmatprep.subr.bf16.mxu1 %v2137_v32 }
  0x38   :  { %2108 = vmatpush3.bf16.msra.mxu0 %v2107_v38  ;;  %v585_v28 = vrot.slane %v584_v27, 2 }
  0x39   :  { %2110 = vmatprep.subr.bf16.mxu0 %v2109_v40 }
  0x3a   :  { %2140 = vmatpush3.bf16.msra.mxu1 %v2139_v39  ;;  %v586_v29 = vadd.f32 %v585_v28, %v584_v27 }
  0x3b   :  { %2142 = vmatprep.subr.bf16.mxu1 %v2141_v44 }
  0x3c   :  { %2112 = vmatpush3.bf16.msra.mxu0 %v2111_v50  ;;  %v587_v30 = vrot.slane %v586_v29, 1 }
  0x3d   :  { %2114 = vmatprep.subr.bf16.mxu0 %v2113_v52  ;;  %v1837_v52 = vld [vmem:[%s3489_s9] ss:$0 sm:$0xff] }
  0x3e   :  { %2144 = vmatpush3.bf16.msra.mxu1 %v2143_v51  ;;  %v588_v31 = vadd.f32 %v587_v30, %v586_v29 }
  0x3f   :  { %2146 = vmatprep.subr.bf16.mxu1 %v2145_v56 }
  0x40   :  { %2116 = vmatpush3.bf16.msra.mxu0 %v2115_v1  ;;  %v589_v32 = vmul.f32 0.5, %v588_v31 }
  0x41   :  { %2118 = vmatprep.subr.bf16.mxu0 %v2117_v3 }
  0x42   :  { %2148 = vmatpush3.bf16.msra.mxu1 %v2147_v2  ;;  %v590_v34 = vsub.f32 %v578_v24, %v589_v32 }
  0x43   :  { %2150 = vmatprep.subr.bf16.mxu1 %v2149_v7  ;;  %v618_v7 = vld [vmem:[%s3458_s2] sm:$0x3] }
  0x44   :  { %2120 = vmatpush3.bf16.msra.mxu0 %v2119_v14  ;;  %v591_v37 = vmul.f32 %v590_v34, %v590_v34  ;;  %v622_v8 = vsel %vm621_vm6, %v618_v7, 0.0 }
  0x45   :  { %2122 = vmatprep.subr.bf16.mxu0 %v2121_v16  ;;  %v623_v9 = vrot.slane %v622_v8, 4 }
  0x46   :  { %2152 = vmatpush3.bf16.msra.mxu1 %v2151_v15  ;;  %v592_v38 = vsel %vm581_vm0, %v591_v37, 0.0 }
  0x47   :  { %2154 = vmatprep.subr.bf16.mxu1 %v2153_v19  ;;  %v593_v39 = vrot.slane %v592_v38, 4  ;;  %v624_v10 = vadd.f32 %v623_v9, %v622_v8 }
  0x48   :  { %2124 = vmatpush3.bf16.msra.mxu0 %v2123_v22 }
  0x49   :  { %2157 = vmatprep.subr.bf16.mxu0 %v2341_v33  ;;  %v594_v40 = vadd.f32 %v593_v39, %v592_v38  ;;  %v625_v18 = vrot.slane %v624_v10, 2 }
  0x4a   :  { %2156 = vmatpush3.bf16.msra.mxu1 %v2155_v23 }
  0x4b   :  { %457 = vmatmul.mubr.f32.vlgmr.msra.gmra.mrb[2].mxu0 %v2697_v58  ;;  %v660_v58 = vld [vmem:[%s3487_s27] sm:$0xff]  ;;  %2164 = vmatprep.subr.bf16.mxu1 %v2341_v33  ;;  %v595_v41 = vrot.slane %v594_v40, 2  ;;  %v626_v21 = vadd.f32 %v625_v18, %v624_v10  ;;  %v930_v18 = vld [vmem:[%s3464_s16 + $0x8] sm:$0xff] }
  0x4c   :  { %2003 = vmatprep.mubr.msk.f32.mxu0 %vm2343_vm4, %v2344_v36 }
  0x4d   :  { %527 = vmatmul.mubr.f32.vlgmr.msra.gmra.mrb[2].mxu1 %v2706_v61  ;;  %v661_v61 = vld [vmem:[%s3487_s27 + $0x8] sm:$0x3]  ;;  %v596_v42 = vadd.f32 %v595_v41, %v594_v40  ;;  %v627_v23 = vrot.slane %v626_v21, 1 }
  0x4e   :  { %v2158_v35 = vpack.c.bf16 %v661_v61, %v660_v58  ;;  %2026 = vmatprep.mubr.msk.f32.mxu1 %vm2343_vm4, %v2344_v36 }
  0x4f   :  { %v597_v43 = vrot.slane %v596_v42, 1  ;;  %v628_v24 = vadd.f32 %v627_v23, %v626_v21  ;;  %v932_v21 = vld [vmem:[%s3464_s16 + $0x18] sm:$0xff] }
  0x50   :  { %2160 = vmatpush3.bf16.msk.msra.mxu0 %vm2159_vm3, %v2158_v35 }
  0x51   :  { %2161 = vmatprep.subr.bf16.mxu0 %v2341_v33  ;;  %v598_v44 = vadd.f32 %v597_v43, %v596_v42  ;;  %v629_v25 = vmul.f32 0.5, %v628_v24 }
  0x53   :  { %v599_v45 = vmul.f32 0.5, %v598_v44  ;;  %v630_v28 = vsub.f32 %v618_v7, %v629_v25  ;;  %v1836_v7 = vld [vmem:[%s3461_s8] ss:$0 sm:$0xff] }
  0x55   :  { %v600_v46 = vadd.f32 1e-05, %v599_v45  ;;  %v631_v29 = vmul.f32 %v630_v28, %v630_v28 }
  0x57   :  { %2310 = vrsqrt.f32 %v600_v46  ;;  %v632_v30 = vsel %vm621_vm6, %v631_v29, 0.0 }
  0x58   :  { %v633_v58 = vrot.slane %v632_v30, 4 }
  0x5a   :  { %v634_v35 = vadd.f32 %v633_v58, %v632_v30 }
  0x5c   :  { %v635_v39 = vrot.slane %v634_v35, 2 }
  0x5e   :  { %v636_v42 = vadd.f32 %v635_v39, %v634_v35 }
  0x60   :  { %v637_v45 = vrot.slane %v636_v42, 1 }
  0x61   :  { %v2311_v49 = vpop.eup %2310 }
  0x62   :  { %v602_v50 = vmul.f32 %v2311_v49, %v579_v47 }
  0x64   :  { %v607_v51 = vrot.slane %v602_v50, %v2893_v48  ;;  %v638_v50 = vadd.f32 %v637_v45, %v636_v42 }
  0x66   :  { %v609_v53 = vmul.f32 %v607_v51, %v590_v34 }
  0x68   :  { %v616_v56 = vadd.f32 %v1837_v52, %v609_v53  ;;  %v639_v53 = vmul.f32 0.5, %v638_v50 }
  0x6a   :  { %v617_v59 = vmax.f32 %v616_v56, 0.0  ;;  %v640_v56 = vadd.f32 1e-05, %v639_v53  ;;  %v1054_v53 = vld [vmem:[%s3467_s19 + $0x48] sm:$0xff] }
  0x6c   :  { %2004 = vmatmul.mubr.msk.f32.vlgmr.msra.gmra.mrb[4].mxu0 %vm662_vm5, %v617_v59 }
  0x6d   :  { %2163 = vmatpush3.bf16.msra.mxu0 %v2162_v57  ;;  %2010 = vmatprep.mubr.msk.f32.mxu0 %vm2343_vm4, %v2344_v36 }
  0x6e   :  { %2013 = vmatprep.subr.mxu0 %v2344_v36 }
  0xfe   :  { %v1878_v60 = vpop.f32.mrb[0].mxu0 }
  0xff   :  { %v1879_v63 = vpop.f32.mrb[1].mxu0 }
 0x100   :  { %v1913_v1 = vpop.f32.mrb[0].mxu1  ;;  %v1880_v2 = vadd.f32 %v1879_v63, %v1878_v60  ;;  %v619_v63 = vld [vmem:[%s3459_s7] sm:$0x1] }
 0x101   :  { %v1914_v3 = vpop.f32.mrb[1].mxu1 }
 0x102   :  { %v1915_v4 = vadd.f32 %v1914_v3, %v1913_v1  ;;  %v319_v5 = vadd.f32 %v1880_v2, %v1834_v62  ;;  %v538_v1 = vld [vmem:[%s3460_s5] sm:$0x1] }
 0x104   :  { %v389_v6 = vadd.f32 %v1915_v4, %v319_v5 }
 0x11e   :  { %v1948_v11 = vpop.f32.mrb[2].mxu0 }
 0x11f   :  { %v1949_v12 = vpop.f32.mrb[3].mxu0 }
 0x120   :  { %v1983_v14 = vpop.f32.mrb[2].mxu1  ;;  %v1950_v15 = vadd.f32 %v1949_v12, %v1948_v11  ;;  %v1838_v11 = vld [vmem:[%s3462_s10] ss:$0 sm:$0xff] }
 0x121   :  { %v1984_v16 = vpop.f32.mrb[3].mxu1 }
 0x122   :  { %v1985_v17 = vadd.f32 %v1984_v16, %v1983_v14  ;;  %v459_v19 = vadd.f32 %v1950_v15, %v389_v6  ;;  %v814_v14 = vld [vmem:[%s3463_s13] sm:$0xff] }
 0x124   :  { %v529_v20 = vadd.f32 %v1985_v17, %v459_v19  ;;  %v929_v17 = vld [vmem:[%s3464_s16] sm:$0xff] }
 0x125   :  { %v2165_v19 = vpack.c.bf16 %v930_v18, %v929_v17  ;;  %v1086_v17 = vld [vmem:[%s3467_s19 + $0x148] sm:$0xff]  ;;  %v1080_v18 = vld [vmem:[%s3467_s19 + $0x118] sm:$0xff] }
 0x126   :  { %v1835_v22 = vmul.f32 -1.442695, %v529_v20  ;;  %v931_v20 = vld [vmem:[%s3464_s16 + $0x10] sm:$0xff] }
 0x127   :  { %2166 = vmatpush3.bf16.msra.mxu1 %v2165_v19 }
 0x128   :  { %2312 = vpow2.f32 %v1835_v22  ;;  %2167 = vmatprep.subr.bf16.mxu1 %v2341_v33  ;;  %v2168_v22 = vpack.c.bf16 %v932_v21, %v931_v20  ;;  %v1088_v20 = vld [vmem:[%s3467_s19 + $0x158] sm:$0xff]  ;;  %v1077_v21 = vld [vmem:[%s3467_s19 + $0x100] sm:$0xff] }
 0x12b   :  { %2169 = vmatpush3.bf16.msra.mxu1 %v2168_v22  ;;  %v1085_v22 = vld [vmem:[%s3467_s19 + $0x140] sm:$0xff] }
 0x132   :  { %v2313_v26 = vpop.eup %2312 }
 0x133   :  { %v535_v27 = vadd.f32 1.0, %v2313_v26 }
 0x135   :  { %2314 = vrcp.f32 %v535_v27 }
 0x136   :  { %2316 = vrsqrt.f32 %v640_v56  ;;  %v1056_v56 = vld [vmem:[%s3467_s19 + $0x58] sm:$0xff] }
 0x13f   :  { %v2315_v31 = vpop.eup %2314 }
 0x140   :  { %v541_v32 = vsel %vm540_vm7, %v2315_v31, 0.0  ;;  %v2317_v62 = vpop.eup %2316 }
 0x141   :  { %v542_v61 = vrot.slane %v541_v32, 4  ;;  %v642_v2 = vmul.f32 %v2317_v62, %v619_v63  ;;  %v1047_v63 = vld [vmem:[%s3467_s19 + $0x10] sm:$0xff] }
 0x143   :  { %v543_v34 = vadd.f32 %v542_v61, %v541_v32  ;;  %v647_v6 = vrot.slane %v642_v2, %v2893_v48 }
 0x145   :  { %v544_v37 = vrot.slane %v543_v34, 2  ;;  %v649_v10 = vmul.f32 %v647_v6, %v630_v28 }
 0x147   :  { %v545_v38 = vadd.f32 %v544_v37, %v543_v34  ;;  %v656_v15 = vadd.f32 %v1838_v11, %v649_v10 }
 0x149   :  { %v546_v40 = vrot.slane %v545_v38, 1  ;;  %v657_v16 = vmax.f32 %v656_v15, 0.0 }
 0x14b   :  { %v547_v41 = vadd.f32 %v546_v40, %v545_v38 }
 0x14d   :  { %v549_v43 = vmul.f32 0.5, %v547_v41 }
 0x14f   :  { %v550_v44 = vsub.f32 %v2315_v31, %v549_v43  ;;  %v890_v43 = vld [vmem:[%s3465_s14] sm:$0x1] }
 0x151   :  { %v551_v46 = vmul.f32 %v550_v44, %v550_v44 }
 0x153   :  { %v552_v47 = vsel %vm540_vm7, %v551_v46, 0.0 }
 0x154   :  { %v553_v49 = vrot.slane %v552_v47, 4 }
 0x156   :  { %v554_v51 = vadd.f32 %v553_v49, %v552_v47  ;;  %v1843_v47 = vld [vmem:[%s3466_s15] ss:$0 sm:$0xff] }
 0x158   :  { %v555_v52 = vrot.slane %v554_v51, 2 }
 0x15a   :  { %v556_v54 = vadd.f32 %v555_v52, %v554_v51  ;;  %v1046_v52 = vld [vmem:[%s3467_s19 + $0x8] sm:$0xff] }
 0x15c   :  { %v557_v55 = vrot.slane %v556_v54, 1 }
 0x15e   :  { %v558_v57 = vadd.f32 %v557_v55, %v556_v54  ;;  %v1048_v54 = vld [vmem:[%s3467_s19 + $0x18] sm:$0xff]  ;;  %v2170_v55 = vpack.c.bf16 %v1054_v53, %v1046_v52  ;;  %v1126_v52 = vld [vmem:[%s3467_s19 + $0x288] sm:$0xff] }
 0x15f   :  { %v1134_v53 = vld [vmem:[%s3467_s19 + $0x2c8] sm:$0xff] }
 0x160   :  { %v559_v59 = vmul.f32 0.5, %v558_v57  ;;  %v1045_v57 = vld [vmem:[%s3467_s19] sm:$0xff]  ;;  %2171 = vmatprep.subr.bf16.mxu1 %v2170_v55  ;;  %v2190_v55 = vpack.c.bf16 %v1134_v53, %v1126_v52 }
 0x162   :  { %v560_v60 = vadd.f32 1e-05, %v559_v59  ;;  %v1053_v59 = vld [vmem:[%s3467_s19 + $0x40] sm:$0xff] }
 0x163   :  { %v2172_v62 = vpack.c.bf16 %v1053_v59, %v1045_v57  ;;  %v1125_v57 = vld [vmem:[%s3467_s19 + $0x280] sm:$0xff] }
 0x164   :  { %2318 = vrsqrt.f32 %v560_v60  ;;  %v2202_v60 = vpack.c.bf16 %v1056_v56, %v1048_v54  ;;  %v1128_v54 = vld [vmem:[%s3467_s19 + $0x298] sm:$0xff]  ;;  %v1133_v59 = vld [vmem:[%s3467_s19 + $0x2c0] sm:$0xff] }
 0x165   :  { %v1136_v56 = vld [vmem:[%s3467_s19 + $0x2d8] sm:$0xff] }
 0x16e   :  { %v2319_v3 = vpop.eup %2318 }
 0x16f   :  { %v562_v4 = vmul.f32 %v2319_v3, %v538_v1  ;;  %v1055_v1 = vld [vmem:[%s3467_s19 + $0x50] sm:$0xff]  ;;  %v1062_v3 = vld [vmem:[%s3467_s19 + $0x88] sm:$0xff] }
 0x170   :  { %v2204_v2 = vpack.c.bf16 %v1055_v1, %v1047_v63  ;;  %v1127_v63 = vld [vmem:[%s3467_s19 + $0x290] sm:$0xff] }
 0x171   :  { %v567_v5 = vrot.slane %v562_v4, %v2893_v48  ;;  %v1070_v4 = vld [vmem:[%s3467_s19 + $0xc8] sm:$0xff]  ;;  %v1135_v1 = vld [vmem:[%s3467_s19 + $0x2d0] sm:$0xff] }
 0x172   :  { %v2174_v6 = vpack.c.bf16 %v1070_v4, %v1062_v3  ;;  %v1142_v3 = vld [vmem:[%s3467_s19 + $0x308] sm:$0xff] }
 0x173   :  { %v569_v8 = vmul.f32 %v567_v5, %v550_v44  ;;  %v1064_v5 = vld [vmem:[%s3467_s19 + $0x98] sm:$0xff]  ;;  %v1150_v4 = vld [vmem:[%s3467_s19 + $0x348] sm:$0xff] }
 0x175   :  { %v576_v9 = vadd.f32 %v1836_v7, %v569_v8  ;;  %v1072_v7 = vld [vmem:[%s3467_s19 + $0xd8] sm:$0xff]  ;;  %v1061_v8 = vld [vmem:[%s3467_s19 + $0x80] sm:$0xff] }
 0x176   :  { %v2206_v10 = vpack.c.bf16 %v1072_v7, %v1064_v5  ;;  %v1144_v5 = vld [vmem:[%s3467_s19 + $0x318] sm:$0xff] }
 0x177   :  { %v577_v12 = vmax.f32 %v576_v9, 0.0  ;;  %v1069_v9 = vld [vmem:[%s3467_s19 + $0xc0] sm:$0xff]  ;;  %v1152_v7 = vld [vmem:[%s3467_s19 + $0x358] sm:$0xff] }
 0x178   :  { %v2176_v11 = vpack.c.bf16 %v1069_v9, %v1061_v8  ;;  %v1141_v8 = vld [vmem:[%s3467_s19 + $0x300] sm:$0xff] }
 0x179   :  { %2011 = vmatmul.mubr.msk.f32.vlgmr.msra.gmra.mrb[4].mxu0 %vm740_vm8, %v577_v12  ;;  %v1063_v12 = vld [vmem:[%s3467_s19 + $0x90] sm:$0xff]  ;;  %v1149_v9 = vld [vmem:[%s3467_s19 + $0x340] sm:$0xff] }
 0x17a   :  { %2014 = vmatpush3.msra.mxu0 %v814_v14  ;;  %2015 = vmatprep.mubr.msk.f32.mxu0 %vm2343_vm4, %v2344_v36  ;;  %v1071_v14 = vld [vmem:[%s3467_s19 + $0xd0] sm:$0xff] }
 0x17b   :  { %2203 = vmatprep.subr.bf16.mxu0 %v2202_v60  ;;  %v2208_v15 = vpack.c.bf16 %v1071_v14, %v1063_v12  ;;  %v2222_v60 = vpack.c.bf16 %v1136_v56, %v1128_v54  ;;  %v1143_v12 = vld [vmem:[%s3467_s19 + $0x310] sm:$0xff] }
 0x17c   :  { %v1151_v14 = vld [vmem:[%s3467_s19 + $0x350] sm:$0xff] }
 0x181   :  { %2016 = vmatmul.mubr.msk.f32.vlgmr.msra.gmra.mrb[4].mxu0 %vm815_vm9, %v657_v16  ;;  %v1078_v16 = vld [vmem:[%s3467_s19 + $0x108] sm:$0xff] }
 0x182   :  { %1308 = vmatprep.mubr.f32.mxu0 %v2344_v36  ;;  %2205 = vmatpush1.bf16.msra.mxu0 %v2204_v2  ;;  %v2178_v19 = vpack.c.bf16 %v1086_v17, %v1078_v16  ;;  %v2224_v2 = vpack.c.bf16 %v1135_v1, %v1127_v63  ;;  %v1158_v16 = vld [vmem:[%s3467_s19 + $0x388] sm:$0xff]  ;;  %v1057_v63 = vld [vmem:[%s3467_s19 + $0x60] sm:$0xff] }
 0x183   :  { %2207 = vmatprep.subr.bf16.mxu0 %v2206_v10  ;;  %v2226_v10 = vpack.c.bf16 %v1152_v7, %v1144_v5  ;;  %v1166_v17 = vld [vmem:[%s3467_s19 + $0x3c8] sm:$0xff]  ;;  %v1076_v7 = vld [vmem:[%s3467_s19 + $0xf8] sm:$0xff] }
 0x184   :  { %v1074_v5 = vld [vmem:[%s3467_s19 + $0xe8] sm:$0xff] }
 0x186   :  { %2209 = vmatpush1.bf16.msra.mxu0 %v2208_v15  ;;  %v2228_v15 = vpack.c.bf16 %v1151_v14, %v1143_v12  ;;  %v1073_v12 = vld [vmem:[%s3467_s19 + $0xe0] sm:$0xff] }
 0x254   :  { %v885_v23 = vpop.f32.mrb[4].mxu0 }
 0x255   :  { %v893_v24 = vsel %vm892_vm10, %v885_v23, 0.0  ;;  %v2017_v25 = vpop.f32.mrb[5].mxu0 }
 0x256   :  { %v894_v26 = vrot.slane %v893_v24, 4  ;;  %v1079_v25 = vld [vmem:[%s3467_s19 + $0x110] sm:$0xff] }
 0x258   :  { %v895_v27 = vadd.f32 %v894_v26, %v893_v24  ;;  %v2180_v24 = vpack.c.bf16 %v1085_v22, %v1077_v21  ;;  %v1087_v26 = vld [vmem:[%s3467_s19 + $0x150] sm:$0xff]  ;;  %v1157_v21 = vld [vmem:[%s3467_s19 + $0x380] sm:$0xff] }
 0x259   :  { %v1165_v22 = vld [vmem:[%s3467_s19 + $0x3c0] sm:$0xff] }
 0x25a   :  { %v896_v28 = vrot.slane %v895_v27, 2 }
 0x25c   :  { %v897_v29 = vadd.f32 %v896_v28, %v895_v27  ;;  %v2212_v27 = vpack.c.bf16 %v1087_v26, %v1079_v25  ;;  %v1094_v28 = vld [vmem:[%s3467_s19 + $0x188] sm:$0xff]  ;;  %v1159_v25 = vld [vmem:[%s3467_s19 + $0x390] sm:$0xff] }
 0x25d   :  { %v1167_v26 = vld [vmem:[%s3467_s19 + $0x3d0] sm:$0xff] }
 0x25e   :  { %v898_v30 = vrot.slane %v897_v29, 1 }
 0x260   :  { %v899_v33 = vadd.f32 %v898_v30, %v897_v29  ;;  %v1102_v29 = vld [vmem:[%s3467_s19 + $0x1c8] sm:$0xff]  ;;  %v1096_v30 = vld [vmem:[%s3467_s19 + $0x198] sm:$0xff] }
 0x262   :  { %v900_v31 = vmul.f32 0.5, %v899_v33  ;;  %v2182_v33 = vpack.c.bf16 %v1102_v29, %v1094_v28  ;;  %v1050_v28 = vld [vmem:[%s3467_s19 + $0x28] sm:$0xff] }
 0x263   :  { %v1058_v29 = vld [vmem:[%s3467_s19 + $0x68] sm:$0xff] }
 0x264   :  { %v901_v32 = vsub.f32 %v885_v23, %v900_v31  ;;  %v2210_v23 = vpack.c.bf16 %v1088_v20, %v1080_v18  ;;  %v1104_v31 = vld [vmem:[%s3467_s19 + $0x1d8] sm:$0xff] }
 0x265   :  { %v1160_v18 = vld [vmem:[%s3467_s19 + $0x398] sm:$0xff] }
 0x266   :  { %v902_v58 = vmul.f32 %v901_v32, %v901_v32  ;;  %2211 = vmatprep.subr.bf16.mxu0 %v2210_v23  ;;  %v1168_v20 = vld [vmem:[%s3467_s19 + $0x3d8] sm:$0xff] }
 0x267   :  { %2213 = vmatpush1.bf16.msra.mxu0 %v2212_v27  ;;  %v2230_v23 = vpack.c.bf16 %v1168_v20, %v1160_v18  ;;  %v2232_v27 = vpack.c.bf16 %v1167_v26, %v1159_v25  ;;  %v1075_v18 = vld [vmem:[%s3467_s19 + $0xf0] sm:$0xff]  ;;  %v1090_v20 = vld [vmem:[%s3467_s19 + $0x168] sm:$0xff]  ;;  %v1081_v25 = vld [vmem:[%s3467_s19 + $0x120] sm:$0xff] }
 0x268   :  { %v903_v61 = vsel %vm892_vm10, %v902_v58, 0.0  ;;  %v1101_v58 = vld [vmem:[%s3467_s19 + $0x1c0] sm:$0xff] }
 0x269   :  { %v904_v34 = vrot.slane %v903_v61, 4  ;;  %v1089_v26 = vld [vmem:[%s3467_s19 + $0x160] sm:$0xff] }
 0x26b   :  { %v905_v35 = vadd.f32 %v904_v34, %v903_v61  ;;  %v2214_v61 = vpack.c.bf16 %v1104_v31, %v1096_v30  ;;  %v1052_v30 = vld [vmem:[%s3467_s19 + $0x38] sm:$0xff] }
 0x26c   :  { %v1060_v31 = vld [vmem:[%s3467_s19 + $0x78] sm:$0xff] }
 0x26d   :  { %v906_v37 = vrot.slane %v905_v35, 2  ;;  %2215 = vmatprep.subr.bf16.mxu0 %v2214_v61 }
 0x26f   :  { %v907_v38 = vadd.f32 %v906_v37, %v905_v35  ;;  %v1095_v35 = vld [vmem:[%s3467_s19 + $0x190] sm:$0xff] }
 0x270   :  { %v1103_v37 = vld [vmem:[%s3467_s19 + $0x1d0] sm:$0xff] }
 0x271   :  { %v908_v39 = vrot.slane %v907_v38, 1 }
 0x273   :  { %v909_v40 = vadd.f32 %v908_v39, %v907_v38  ;;  %v2216_v38 = vpack.c.bf16 %v1103_v37, %v1095_v35  ;;  %v1110_v39 = vld [vmem:[%s3467_s19 + $0x208] sm:$0xff] }
 0x275   :  { %v910_v41 = vmul.f32 0.5, %v909_v40  ;;  %v1118_v40 = vld [vmem:[%s3467_s19 + $0x248] sm:$0xff]  ;;  %2217 = vmatpush1.bf16.msra.mxu0 %v2216_v38 }
 0x277   :  { %v911_v42 = vadd.f32 1e-05, %v910_v41  ;;  %v1112_v41 = vld [vmem:[%s3467_s19 + $0x218] sm:$0xff] }
 0x279   :  { %2320 = vrsqrt.f32 %v911_v42  ;;  %v2186_v42 = vpack.c.bf16 %v1118_v40, %v1110_v39 }
 0x283   :  { %v2321_v44 = vpop.eup %2320 }
 0x284   :  { %v913_v45 = vmul.f32 %v2321_v44, %v890_v43  ;;  %v1120_v43 = vld [vmem:[%s3467_s19 + $0x258] sm:$0xff]  ;;  %v1109_v44 = vld [vmem:[%s3467_s19 + $0x200] sm:$0xff] }
 0x286   :  { %v918_v46 = vrot.slane %v913_v45, %v2893_v48  ;;  %v1117_v45 = vld [vmem:[%s3467_s19 + $0x240] sm:$0xff] }
 0x288   :  { %v920_v49 = vmul.f32 %v918_v46, %v901_v32  ;;  %v1093_v32 = vld [vmem:[%s3467_s19 + $0x180] sm:$0xff]  ;;  %v2218_v46 = vpack.c.bf16 %v1120_v43, %v1112_v41 }
 0x289   :  { %v2184_v34 = vpack.c.bf16 %v1101_v58, %v1093_v32  ;;  %v2266_v32 = vpack.c.bf16 %v1060_v31, %v1052_v30  ;;  %v1091_v30 = vld [vmem:[%s3467_s19 + $0x170] sm:$0xff]  ;;  %v1106_v31 = vld [vmem:[%s3467_s19 + $0x1e8] sm:$0xff] }
 0x28a   :  { %v927_v50 = vadd.f32 %v1843_v47, %v920_v49  ;;  %v2188_v47 = vpack.c.bf16 %v1117_v45, %v1109_v44  ;;  %v1111_v49 = vld [vmem:[%s3467_s19 + $0x210] sm:$0xff]  ;;  %2219 = vmatprep.subr.bf16.mxu0 %v2218_v46 }
 0x28c   :  { %v928_v51 = vmax.f32 %v927_v50, 0.0  ;;  %v1119_v50 = vld [vmem:[%s3467_s19 + $0x250] sm:$0xff] }
 0x28e   :  { %2027 = vmatmul.mubr.msk.f32.vlgmr.msra.gmra.mrb[4].mxu1 %vm933_vm11, %v928_v51  ;;  %v2220_v51 = vpack.c.bf16 %v1119_v50, %v1111_v49 }
 0x28f   :  { %1237 = vmatprep.mubr.f32.mxu1 %v2344_v36  ;;  %2173 = vmatpush1.bf16.msra.mxu1 %v2172_v62  ;;  %v2192_v62 = vpack.c.bf16 %v1133_v59, %v1125_v57 }
 0x290   :  { %2175 = vmatprep.subr.bf16.mxu1 %v2174_v6  ;;  %2221 = vmatpush1.bf16.msra.mxu0 %v2220_v51  ;;  %v2194_v6 = vpack.c.bf16 %v1150_v4, %v1142_v3  ;;  %v1059_v3 = vld [vmem:[%s3467_s19 + $0x70] sm:$0xff]  ;;  %v1066_v4 = vld [vmem:[%s3467_s19 + $0xa8] sm:$0xff] }
 0x291   :  { %2223 = vmatprep.subr.bf16.mxu0 %v2222_v60  ;;  %v1845_v60 = vld [vmem:[%s3469_s18] ss:$0 sm:$0xff] }
 0x293   :  { %2177 = vmatpush1.bf16.msra.mxu1 %v2176_v11  ;;  %v2196_v11 = vpack.c.bf16 %v1149_v9, %v1141_v8 }
 0x294   :  { %2179 = vmatprep.subr.bf16.mxu1 %v2178_v19  ;;  %2225 = vmatpush1.bf16.msra.mxu0 %v2224_v2  ;;  %v2198_v19 = vpack.c.bf16 %v1166_v17, %v1158_v16  ;;  %v1051_v2 = vld [vmem:[%s3467_s19 + $0x30] sm:$0xff] }
 0x295   :  { %2227 = vmatprep.subr.bf16.mxu0 %v2226_v10  ;;  %v2268_v10 = vpack.c.bf16 %v1059_v3, %v1051_v2  ;;  %v1067_v17 = vld [vmem:[%s3467_s19 + $0xb0] sm:$0xff] }
 0x296   :  { %v1131_v3 = vld [vmem:[%s3467_s19 + $0x2b0] sm:$0xff] }
 0x297   :  { %2181 = vmatpush1.bf16.msra.mxu1 %v2180_v24  ;;  %v2200_v24 = vpack.c.bf16 %v1165_v22, %v1157_v21  ;;  %v1084_v21 = vld [vmem:[%s3467_s19 + $0x138] sm:$0xff] }
 0x298   :  { %2183 = vmatprep.subr.bf16.mxu1 %v2182_v33  ;;  %2229 = vmatpush1.bf16.msra.mxu0 %v2228_v15  ;;  %v2234_v33 = vpack.c.bf16 %v1058_v29, %v1050_v28  ;;  %v2238_v15 = vpack.c.bf16 %v1074_v5, %v1066_v4  ;;  %v1092_v22 = vld [vmem:[%s3467_s19 + $0x178] sm:$0xff]  ;;  %v1083_v29 = vld [vmem:[%s3467_s19 + $0x130] sm:$0xff]  ;;  %v1146_v5 = vld [vmem:[%s3467_s19 + $0x328] sm:$0xff] }
 0x299   :  { %2231 = vmatprep.subr.bf16.mxu0 %v2230_v23  ;;  %v2274_v28 = vpack.c.bf16 %v1092_v22, %v1084_v21  ;;  %v1139_v4 = vld [vmem:[%s3467_s19 + $0x2f0] sm:$0xff]  ;;  %v1164_v21 = vld [vmem:[%s3467_s19 + $0x3b8] sm:$0xff] }
 0x29a   :  { %v1172_v22 = vld [vmem:[%s3467_s19 + $0x3f8] sm:$0xff] }
 0x29b   :  { %2185 = vmatpush1.bf16.msra.mxu1 %v2184_v34 }
 0x29c   :  { %2187 = vmatprep.subr.bf16.mxu1 %v2186_v42  ;;  %2233 = vmatpush1.bf16.msra.mxu0 %v2232_v27 }
 0x29d   :  { %2267 = vmatprep.subr.bf16.mxu0 %v2266_v32  ;;  %v1100_v32 = vld [vmem:[%s3467_s19 + $0x1b8] sm:$0xff] }
 0x29f   :  { %2189 = vmatpush1.bf16.msra.mxu1 %v2188_v47 }
 0x2a0   :  { %2191 = vmatprep.subr.bf16.mxu1 %v2190_v55  ;;  %v1007_v55 = vld [vmem:[%s3468_s17] sm:$0x1] }
 0x2a3   :  { %2193 = vmatpush1.bf16.msra.mxu1 %v2192_v62  ;;  %v1049_v62 = vld [vmem:[%s3467_s19 + $0x20] sm:$0xff] }
 0x2a4   :  { %2195 = vmatprep.subr.bf16.mxu1 %v2194_v6  ;;  %v1068_v6 = vld [vmem:[%s3467_s19 + $0xb8] sm:$0xff]  ;;  %v2236_v9 = vpack.c.bf16 %v1057_v63, %v1049_v62  ;;  %v1129_v62 = vld [vmem:[%s3467_s19 + $0x2a0] sm:$0xff] }
 0x2a5   :  { %v2270_v16 = vpack.c.bf16 %v1076_v7, %v1068_v6  ;;  %v1137_v63 = vld [vmem:[%s3467_s19 + $0x2e0] sm:$0xff]  ;;  %v1154_v6 = vld [vmem:[%s3467_s19 + $0x368] sm:$0xff]  ;;  %v1148_v7 = vld [vmem:[%s3467_s19 + $0x338] sm:$0xff] }
 0x2a7   :  { %2197 = vmatpush1.bf16.msra.mxu1 %v2196_v11  ;;  %v1065_v11 = vld [vmem:[%s3467_s19 + $0xa0] sm:$0xff] }
 0x2a8   :  { %2199 = vmatprep.subr.bf16.mxu1 %v2198_v19  ;;  %v1082_v19 = vld [vmem:[%s3467_s19 + $0x128] sm:$0xff]  ;;  %v2240_v23 = vpack.c.bf16 %v1073_v12, %v1065_v11  ;;  %v1145_v11 = vld [vmem:[%s3467_s19 + $0x320] sm:$0xff] }
 0x2a9   :  { %v2242_v27 = vpack.c.bf16 %v1090_v20, %v1082_v19  ;;  %v1153_v12 = vld [vmem:[%s3467_s19 + $0x360] sm:$0xff]  ;;  %v1162_v19 = vld [vmem:[%s3467_s19 + $0x3a8] sm:$0xff] }
 0x2aa   :  { %v1170_v20 = vld [vmem:[%s3467_s19 + $0x3e8] sm:$0xff] }
 0x2ab   :  { %2201 = vmatpush1.bf16.msra.mxu1 %v2200_v24  ;;  %v2272_v24 = vpack.c.bf16 %v1075_v18, %v1067_v17  ;;  %v1147_v17 = vld [vmem:[%s3467_s19 + $0x330] sm:$0xff] }
 0x2ac   :  { %2235 = vmatprep.subr.bf16.mxu1 %v2234_v33  ;;  %v1098_v33 = vld [vmem:[%s3467_s19 + $0x1a8] sm:$0xff]  ;;  %v1155_v18 = vld [vmem:[%s3467_s19 + $0x370] sm:$0xff] }
 0x361   :  { %v1003_v58 = vpop.f32.mrb[4].mxu1 }
 0x362   :  { %v1009_v61 = vsel %vm666_vm1, %v1003_v58, 0.0  ;;  %v2028_v34 = vpop.f32.mrb[5].mxu1 }
 0x363   :  { %v1010_v35 = vrot.slane %v1009_v61, 4  ;;  %v2276_v34 = vpack.c.bf16 %v1091_v30, %v1083_v29  ;;  %v1163_v29 = vld [vmem:[%s3467_s19 + $0x3b0] sm:$0xff] }
 0x364   :  { %v1171_v30 = vld [vmem:[%s3467_s19 + $0x3f0] sm:$0xff] }
 0x365   :  { %v1011_v37 = vadd.f32 %v1010_v35, %v1009_v61  ;;  %v2244_v61 = vpack.c.bf16 %v1089_v26, %v1081_v25  ;;  %v1097_v35 = vld [vmem:[%s3467_s19 + $0x1a0] sm:$0xff]  ;;  %v2262_v26 = vpack.c.bf16 %v1170_v20, %v1162_v19 }
 0x366   :  { %v1161_v25 = vld [vmem:[%s3467_s19 + $0x3a0] sm:$0xff] }
 0x367   :  { %v1012_v38 = vrot.slane %v1011_v37, 2 }
 0x369   :  { %v1013_v39 = vadd.f32 %v1012_v38, %v1011_v37  ;;  %v1105_v37 = vld [vmem:[%s3467_s19 + $0x1e0] sm:$0xff]  ;;  %v2246_v38 = vpack.c.bf16 %v1106_v31, %v1098_v33  ;;  %v2296_v31 = vpack.c.bf16 %v1171_v30, %v1163_v29 }
 0x36b   :  { %v1014_v40 = vrot.slane %v1013_v39, 1 }
 0x36d   :  { %v1015_v41 = vadd.f32 %v1014_v40, %v1013_v39  ;;  %v1107_v40 = vld [vmem:[%s3467_s19 + $0x1f0] sm:$0xff] }
 0x36f   :  { %v1016_v42 = vmul.f32 0.5, %v1015_v41  ;;  %v1114_v41 = vld [vmem:[%s3467_s19 + $0x228] sm:$0xff] }
 0x371   :  { %v1017_v43 = vsub.f32 %v1003_v58, %v1016_v42  ;;  %v1108_v58 = vld [vmem:[%s3467_s19 + $0x1f8] sm:$0xff]  ;;  %v1122_v42 = vld [vmem:[%s3467_s19 + $0x268] sm:$0xff] }
 0x372   :  { %v2278_v39 = vpack.c.bf16 %v1108_v58, %v1100_v32 }
 0x373   :  { %v1018_v44 = vmul.f32 %v1017_v43, %v1017_v43 }
 0x375   :  { %v1019_v45 = vsel %vm666_vm1, %v1018_v44, 0.0  ;;  %v1124_v44 = vld [vmem:[%s3467_s19 + $0x278] sm:$0xff] }
 0x376   :  { %v1020_v46 = vrot.slane %v1019_v45, 4 }
 0x378   :  { %v1021_v47 = vadd.f32 %v1020_v46, %v1019_v45  ;;  %v2248_v45 = vpack.c.bf16 %v1105_v37, %v1097_v35 }
 0x37a   :  { %v1022_v49 = vrot.slane %v1021_v47, 2 }
 0x37c   :  { %v1023_v50 = vadd.f32 %v1022_v49, %v1021_v47  ;;  %v1113_v47 = vld [vmem:[%s3467_s19 + $0x220] sm:$0xff] }
 0x37d   :  { %v1121_v49 = vld [vmem:[%s3467_s19 + $0x260] sm:$0xff] }
 0x37e   :  { %v1024_v51 = vrot.slane %v1023_v50, 1 }
 0x380   :  { %v1025_v52 = vadd.f32 %v1024_v51, %v1023_v50  ;;  %v2250_v50 = vpack.c.bf16 %v1122_v42, %v1114_v41 }
 0x382   :  { %v1026_v53 = vmul.f32 0.5, %v1025_v52  ;;  %v1115_v52 = vld [vmem:[%s3467_s19 + $0x230] sm:$0xff] }
 0x384   :  { %v1027_v54 = vadd.f32 1e-05, %v1026_v53  ;;  %v1123_v53 = vld [vmem:[%s3467_s19 + $0x270] sm:$0xff] }
 0x386   :  { %2322 = vrsqrt.f32 %v1027_v54  ;;  %v1130_v54 = vld [vmem:[%s3467_s19 + $0x2a8] sm:$0xff] }
 0x390   :  { %v2323_v56 = vpop.eup %2322 }
 0x391   :  { %v1029_v57 = vmul.f32 %v2323_v56, %v1007_v55  ;;  %v1138_v55 = vld [vmem:[%s3467_s19 + $0x2e8] sm:$0xff]  ;;  %v1132_v56 = vld [vmem:[%s3467_s19 + $0x2b8] sm:$0xff] }
 0x393   :  { %v1034_v59 = vrot.slane %v1029_v57, %v2893_v48  ;;  %v1140_v57 = vld [vmem:[%s3467_s19 + $0x2f8] sm:$0xff] }
 0x394   :  { %v2286_v2 = vpack.c.bf16 %v1140_v57, %v1132_v56 }
 0x395   :  { %v1036_v1 = vmul.f32 %v1034_v59, %v1017_v43  ;;  %v1116_v43 = vld [vmem:[%s3467_s19 + $0x238] sm:$0xff]  ;;  %v2252_v59 = vpack.c.bf16 %v1121_v49, %v1113_v47 }
 0x396   :  { %v2282_v51 = vpack.c.bf16 %v1124_v44, %v1116_v43 }
 0x397   :  { %v1043_v8 = vadd.f32 %v1845_v60, %v1036_v1  ;;  %v2284_v60 = vpack.c.bf16 %v1123_v53, %v1115_v52  ;;  %v2254_v1 = vpack.c.bf16 %v1138_v55, %v1130_v54 }
 0x399   :  { %v3202_v14 = vmax.f32 %v1043_v8, 0.0  ;;  %v1156_v8 = vld [vmem:[%s3467_s19 + $0x378] sm:$0xff] }
 0x39b   :  { %1238 = vmatmul.mubr.f32.vlgmr.msra.gmra.mrb[6].mxu1 %v3202_v14  ;;  %1309 = vmatmul.mubr.f32.vlgmr.msra.gmra.mrb[6].mxu0 %v3202_v14 }
 0x39c   :  { %2237 = vmatpush1.bf16.msra.mxu1 %v2236_v9  ;;  %2269 = vmatpush1.bf16.msra.mxu0 %v2268_v10  ;;  %v2256_v9 = vpack.c.bf16 %v1137_v63, %v1129_v62  ;;  %v2288_v10 = vpack.c.bf16 %v1139_v4, %v1131_v3 }
 0x39d   :  { %2239 = vmatprep.subr.bf16.mxu1 %v2238_v15  ;;  %2271 = vmatprep.subr.bf16.mxu0 %v2270_v16  ;;  %v2258_v15 = vpack.c.bf16 %v1154_v6, %v1146_v5  ;;  %v2290_v16 = vpack.c.bf16 %v1156_v8, %v1148_v7 }
 0x39e   :  { %1379 = vmatprep.mubr.f32.mxu1 %v2344_v36  ;;  %1450 = vmatprep.mubr.f32.mxu0 %v2344_v36  ;;  %v1099_v36 = vld [vmem:[%s3467_s19 + $0x1b0] sm:$0xff] }
 0x39f   :  { %v2280_v46 = vpack.c.bf16 %v1107_v40, %v1099_v36 }
 0x3a0   :  { %2241 = vmatpush1.bf16.msra.mxu1 %v2240_v23  ;;  %2273 = vmatpush1.bf16.msra.mxu0 %v2272_v24  ;;  %v2260_v23 = vpack.c.bf16 %v1153_v12, %v1145_v11  ;;  %v2292_v24 = vpack.c.bf16 %v1155_v18, %v1147_v17 }
 0x3a1   :  { %2243 = vmatprep.subr.bf16.mxu1 %v2242_v27  ;;  %2275 = vmatprep.subr.bf16.mxu0 %v2274_v28  ;;  %v2294_v27 = vpack.c.bf16 %v1172_v22, %v1164_v21  ;;  %v1169_v28 = vld [vmem:[%s3467_s19 + $0x3e0] sm:$0xff] }
 0x3a2   :  { %v2264_v33 = vpack.c.bf16 %v1169_v28, %v1161_v25 }
 0x3a4   :  { %2245 = vmatpush1.bf16.msra.mxu1 %v2244_v61  ;;  %2277 = vmatpush1.bf16.msra.mxu0 %v2276_v34 }
 0x3a5   :  { %2247 = vmatprep.subr.bf16.mxu1 %v2246_v38  ;;  %2279 = vmatprep.subr.bf16.mxu0 %v2278_v39 }
 0x3a8   :  { %2249 = vmatpush1.bf16.msra.mxu1 %v2248_v45  ;;  %2281 = vmatpush1.bf16.msra.mxu0 %v2280_v46 }
 0x3a9   :  { %2251 = vmatprep.subr.bf16.mxu1 %v2250_v50  ;;  %2283 = vmatprep.subr.bf16.mxu0 %v2282_v51 }
 0x3ac   :  { %2253 = vmatpush1.bf16.msra.mxu1 %v2252_v59  ;;  %2285 = vmatpush1.bf16.msra.mxu0 %v2284_v60 }
 0x3ad   :  { %2255 = vmatprep.subr.bf16.mxu1 %v2254_v1  ;;  %2287 = vmatprep.subr.bf16.mxu0 %v2286_v2 }
 0x3b0   :  { %2257 = vmatpush1.bf16.msra.mxu1 %v2256_v9  ;;  %2289 = vmatpush1.bf16.msra.mxu0 %v2288_v10 }
 0x3b1   :  { %2259 = vmatprep.subr.bf16.mxu1 %v2258_v15  ;;  %2291 = vmatprep.subr.bf16.mxu0 %v2290_v16 }
 0x3b4   :  { %2261 = vmatpush1.bf16.msra.mxu1 %v2260_v23  ;;  %2293 = vmatpush1.bf16.msra.mxu0 %v2292_v24 }
 0x3b5   :  { %2263 = vmatprep.subr.bf16.mxu1 %v2262_v26  ;;  %2295 = vmatprep.subr.bf16.mxu0 %v2294_v27 }
 0x3b8   :  { %2265 = vmatpush1.bf16.msra.mxu1 %v2264_v33  ;;  %2297 = vmatpush1.bf16.msra.mxu0 %v2296_v31 }
 0x3bb   :  { %1380 = vmatmul.mubr.f32.vlgmr.msra.gmra.mrb[8].mxu1 %v3202_v14  ;;  %1451 = vmatmul.mubr.f32.vlgmr.msra.gmra.mrb[8].mxu0 %v3202_v14 }
 0x46e   :  { %v1239_v32 = vpop.f32.mrb[6].mxu1  ;;  %v1310_v58 = vpop.f32.mrb[6].mxu0 }
 0x46f   :  { %v1459_v61 = vsel %vm666_vm1, %v1239_v32, 0.0  ;;  %v1473_v34 = vsel %vm666_vm1, %v1310_v58, 0.0  ;;  %v1241_v35 = vpop.f32.mrb[7].mxu1  ;;  %v1312_v37 = vpop.f32.mrb[7].mxu0 }
 0x470   :  { %v1460_v38 = vrot.slane %v1459_v61, 4  ;;  %v1474_v39 = vrot.slane %v1473_v34, 4  ;;  %v1466_v36 = vsel %vm666_vm1, %v1241_v35, 0.0  ;;  %v1480_v40 = vsel %vm666_vm1, %v1312_v37, 0.0 }
 0x471   :  { %v1467_v41 = vrot.slane %v1466_v36, 4  ;;  %v1481_v42 = vrot.slane %v1480_v40, 4 }
 0x472   :  { %v1461_v43 = vadd.f32 %v1460_v38, %v1459_v61  ;;  %v1475_v44 = vadd.f32 %v1474_v39, %v1473_v34 }
 0x473   :  { %v1468_v45 = vadd.f32 %v1467_v41, %v1466_v36  ;;  %v1482_v14 = vadd.f32 %v1481_v42, %v1480_v40 }
 0x474   :  { %v1462_v46 = vrot.slane %v1461_v43, 2  ;;  %v1476_v47 = vrot.slane %v1475_v44, 2 }
 0x475   :  { %v1469_v49 = vrot.slane %v1468_v45, 2  ;;  %v1483_v50 = vrot.slane %v1482_v14, 2 }
 0x476   :  { %v1463_v51 = vadd.f32 %v1462_v46, %v1461_v43  ;;  %v1477_v52 = vadd.f32 %v1476_v47, %v1475_v44 }
 0x477   :  { %v1470_v53 = vadd.f32 %v1469_v49, %v1468_v45  ;;  %v1484_v54 = vadd.f32 %v1483_v50, %v1482_v14 }
 0x478   :  { %v1464_v55 = vrot.slane %v1463_v51, 1  ;;  %v1478_v56 = vrot.slane %v1477_v52, 1 }
 0x479   :  { %v1471_v57 = vrot.slane %v1470_v53, 1  ;;  %v1485_v59 = vrot.slane %v1484_v54, 1 }
 0x47a   :  { %v1465_v60 = vadd.f32 %v1464_v55, %v1463_v51  ;;  %v1479_v62 = vadd.f32 %v1478_v56, %v1477_v52 }
 0x47b   :  { %v1472_v63 = vadd.f32 %v1471_v57, %v1470_v53  ;;  %v1486_v1 = vadd.f32 %v1485_v59, %v1484_v54 }
 0x47c   :  { %v1515_v2 = vmul.f32 0.5, %v1465_v60  ;;  %v1517_v3 = vmul.f32 0.5, %v1479_v62 }
 0x47d   :  { %v1516_v4 = vmul.f32 0.5, %v1472_v63  ;;  %v1518_v5 = vmul.f32 0.5, %v1486_v1 }
 0x47e   :  { %v3364_v6 = vsub.f32 %v1239_v32, %v1515_v2  ;;  %v3366_v7 = vsub.f32 %v1310_v58, %v1517_v3 }
 0x47f   :  { %v3368_v8 = vsub.f32 %v1241_v35, %v1516_v4  ;;  %v3370_v9 = vsub.f32 %v1312_v37, %v1518_v5 }
 0x480   :  { %v1531_v10 = vmul.f32 %v3364_v6, %v3364_v6  ;;  %v1533_v11 = vmul.f32 %v3366_v7, %v3366_v7 }
 0x481   :  { %v1532_v12 = vmul.f32 %v3368_v8, %v3368_v8  ;;  %v1534_v15 = vmul.f32 %v3370_v9, %v3370_v9 }
 0x482   :  { %v1539_v16 = vsel %vm666_vm1, %v1531_v10, 0.0  ;;  %v1553_v17 = vsel %vm666_vm1, %v1533_v11, 0.0  ;;  %v2345_v11 = vmov 1966171168  }
 0x483   :  { %v1540_v18 = vrot.slane %v1539_v16, 4  ;;  %v1554_v19 = vrot.slane %v1553_v17, 4  ;;  %v1546_v20 = vsel %vm666_vm1, %v1532_v12, 0.0  ;;  %v1560_v21 = vsel %vm666_vm1, %v1534_v15, 0.0 }
 0x484   :  { %v1547_v22 = vrot.slane %v1546_v20, 4  ;;  %v1561_v23 = vrot.slane %v1560_v21, 4  ;;  %v1632_v12 = vunpack.c.l.s4 %v2345_v11 }
 0x485   :  { %v1541_v24 = vadd.f32 %v1540_v18, %v1539_v16  ;;  %v1555_v25 = vadd.f32 %v1554_v19, %v1553_v17 }
 0x486   :  { %v1548_v26 = vadd.f32 %v1547_v22, %v1546_v20  ;;  %v1562_v27 = vadd.f32 %v1561_v23, %v1560_v21  ;;  %v1633_v23 = vunpack.c.0.s8 %v1632_v12 }
 0x487   :  { %v1542_v28 = vrot.slane %v1541_v24, 2  ;;  %v1556_v29 = vrot.slane %v1555_v25, 2 }
 0x488   :  { %v1549_v30 = vrot.slane %v1548_v26, 2  ;;  %v1563_v33 = vrot.slane %v1562_v27, 2 }
 0x489   :  { %v1543_v31 = vadd.f32 %v1542_v28, %v1541_v24  ;;  %v1557_v32 = vadd.f32 %v1556_v29, %v1555_v25 }
 0x48a   :  { %v1550_v58 = vadd.f32 %v1549_v30, %v1548_v26  ;;  %v1564_v61 = vadd.f32 %v1563_v33, %v1562_v27 }
 0x48b   :  { %v1544_v34 = vrot.slane %v1543_v31, 1  ;;  %v1558_v35 = vrot.slane %v1557_v32, 1 }
 0x48c   :  { %v1551_v37 = vrot.slane %v1550_v58, 1  ;;  %v1565_v38 = vrot.slane %v1564_v61, 1 }
 0x48d   :  { %v1545_v39 = vadd.f32 %v1544_v34, %v1543_v31  ;;  %v1559_v36 = vadd.f32 %v1558_v35, %v1557_v32 }
 0x48e   :  { %v1552_v40 = vadd.f32 %v1551_v37, %v1550_v58  ;;  %v1566_v41 = vadd.f32 %v1565_v38, %v1564_v61  ;;  %v1381_v42 = vpop.f32.mrb[8].mxu1  ;;  %v1452_v43 = vpop.f32.mrb[8].mxu0  ;;  %v3389_v58 = vsub.s32 %v1633_v23, %v2587_v0 }
 0x48f   :  { %v1595_v44 = vmul.f32 0.5, %v1545_v39  ;;  %v1597_v45 = vmul.f32 0.5, %v1559_v36  ;;  %v1487_v14 = vsel %vm666_vm1, %v1381_v42, 0.0  ;;  %v1501_v46 = vsel %vm666_vm1, %v1452_v43, 0.0  ;;  %v1383_v47 = vpop.f32.mrb[9].mxu1  ;;  %v1454_v49 = vpop.f32.mrb[9].mxu0 }
 0x490   :  { %v1596_v50 = vmul.f32 0.5, %v1552_v40  ;;  %v1598_v51 = vmul.f32 0.5, %v1566_v41  ;;  %v1488_v52 = vrot.slane %v1487_v14, 4  ;;  %v1502_v53 = vrot.slane %v1501_v46, 4 }
 0x491   :  { %v1603_v54 = vadd.f32 1e-05, %v1595_v44  ;;  %v1605_v55 = vadd.f32 1e-05, %v1597_v45  ;;  %v1494_v56 = vsel %vm666_vm1, %v1383_v47, 0.0  ;;  %v1508_v57 = vsel %vm666_vm1, %v1454_v49, 0.0 }
 0x492   :  { %v1604_v59 = vadd.f32 1e-05, %v1596_v50  ;;  %v1606_v60 = vadd.f32 1e-05, %v1598_v51  ;;  %v1489_v62 = vadd.f32 %v1488_v52, %v1487_v14  ;;  %v1503_v63 = vadd.f32 %v1502_v53, %v1501_v46 }
 0x493   :  { %2324 = vrsqrt.f32 %v1603_v54  ;;  %v1495_v1 = vrot.slane %v1494_v56, 4  ;;  %v1509_v2 = vrot.slane %v1508_v57, 4 }
 0x494   :  { %2326 = vrsqrt.f32 %v1605_v55  ;;  %v1490_v3 = vrot.slane %v1489_v62, 2  ;;  %v1504_v4 = vrot.slane %v1503_v63, 2 }
 0x495   :  { %2328 = vrsqrt.f32 %v1604_v59  ;;  %v1496_v5 = vadd.f32 %v1495_v1, %v1494_v56  ;;  %v1510_v10 = vadd.f32 %v1509_v2, %v1508_v57 }
 0x496   :  { %2330 = vrsqrt.f32 %v1606_v60  ;;  %v1491_v15 = vadd.f32 %v1490_v3, %v1489_v62  ;;  %v1505_v16 = vadd.f32 %v1504_v4, %v1503_v63 }
 0x497   :  { %v1497_v17 = vrot.slane %v1496_v5, 2  ;;  %v1511_v18 = vrot.slane %v1510_v10, 2 }
 0x498   :  { %v1492_v19 = vrot.slane %v1491_v15, 1  ;;  %v1506_v20 = vrot.slane %v1505_v16, 1 }
 0x499   :  { %v1498_v21 = vadd.f32 %v1497_v17, %v1496_v5  ;;  %v1512_v22 = vadd.f32 %v1511_v18, %v1510_v10 }
 0x49a   :  { %v1493_v24 = vadd.f32 %v1492_v19, %v1491_v15  ;;  %v1507_v25 = vadd.f32 %v1506_v20, %v1505_v16 }
 0x49b   :  { %v1499_v26 = vrot.slane %v1498_v21, 1  ;;  %v1513_v27 = vrot.slane %v1512_v22, 1 }
 0x49c   :  { %v1519_v28 = vmul.f32 0.5, %v1493_v24  ;;  %v1521_v29 = vmul.f32 0.5, %v1507_v25 }
 0x49d   :  { %v2325_v30 = vpop.eup %2324  ;;  %v1500_v33 = vadd.f32 %v1499_v26, %v1498_v21  ;;  %v1514_v31 = vadd.f32 %v1513_v27, %v1512_v22 }
 0x49e   :  { %v2327_v32 = vpop.eup %2326  ;;  %v3391_v61 = vsub.f32 %v1381_v42, %v1519_v28  ;;  %v3393_v34 = vsub.f32 %v1452_v43, %v1521_v29 }
 0x49f   :  { %v2329_v35 = vpop.eup %2328  ;;  %v1520_v37 = vmul.f32 0.5, %v1500_v33  ;;  %v1522_v38 = vmul.f32 0.5, %v1514_v31 }
 0x4a0   :  { %v2331_v39 = vpop.eup %2330  ;;  %v1627_v36 = vcombine.low %v2325_v30, %v2329_v35  ;;  %v1535_v40 = vmul.f32 %v3391_v61, %v3391_v61  ;;  %v1537_v41 = vmul.f32 %v3393_v34, %v3393_v34 }
 0x4a1   :  { %v1628_v44 = vcombine.low %v2327_v32, %v2331_v39  ;;  %v3399_v45 = vsub.f32 %v1383_v47, %v1520_v37  ;;  %v3401_v14 = vsub.f32 %v1454_v49, %v1522_v38 }
 0x4a2   :  { %v1637_v42 = vrot.slane %v1627_v36, %v3389_v58  ;;  %v1567_v43 = vsel %vm666_vm1, %v1535_v40, 0.0  ;;  %v1581_v46 = vsel %vm666_vm1, %v1537_v41, 0.0 }
 0x4a3   :  { %v1644_v50 = vrot.slane %v1628_v44, %v3389_v58  ;;  %v1568_v51 = vrot.slane %v1567_v43, 4  ;;  %v1582_v52 = vrot.slane %v1581_v46, 4  ;;  %v1536_v53 = vmul.f32 %v3399_v45, %v3399_v45  ;;  %v1458_v44 = vld [vmem:[%s3470_s21] sm:$0xff] }
 0x4a4   :  { %v1538_v54 = vmul.f32 %v3401_v14, %v3401_v14 }
 0x4a5   :  { %v1659_v47 = vcombine.low %v1637_v42, %v1644_v50  ;;  %v1569_v55 = vadd.f32 %v1568_v51, %v1567_v43  ;;  %v1583_v49 = vadd.f32 %v1582_v52, %v1581_v46  ;;  %v1574_v56 = vsel %vm666_vm1, %v1536_v53, 0.0  ;;  %v1457_v43 = vld [vmem:[%s3471_s20] sm:$0xff] }
 0x4a6   :  { %v1575_v57 = vrot.slane %v1574_v56, 4  ;;  %v1588_v59 = vsel %vm666_vm1, %v1538_v54, 0.0  ;;  %v1685_v46 = vsub.s32 1, %v2587_v0  ;;  %v1689_v51 = vsub.s32 2, %v2587_v0 }
 0x4a7   :  { %v1570_v60 = vrot.slane %v1569_v55, 2  ;;  %v1584_v62 = vrot.slane %v1583_v49, 2  ;;  %v1589_v63 = vrot.slane %v1588_v59, 4  ;;  %v1667_v41 = vrot.slane %v1659_v47, %v3389_v58 }
 0x4a8   :  { %v1576_v1 = vadd.f32 %v1575_v57, %v1574_v56  ;;  %v1693_v52 = vsub.s32 3, %v2587_v0  ;;  %v1697_v53 = vsub.s32 4, %v2587_v0  ;;  %v1701_v54 = vsub.s32 5, %v2587_v0 }
 0x4a9   :  { %v1571_v2 = vadd.f32 %v1570_v60, %v1569_v55  ;;  %v1585_v3 = vadd.f32 %v1584_v62, %v1583_v49  ;;  %v1590_v4 = vadd.f32 %v1589_v63, %v1588_v59  ;;  %v1705_v47 = vsub.s32 6, %v2587_v0 }
 0x4aa   :  { %v1577_v5 = vrot.slane %v1576_v1, 2  ;;  %v1709_v55 = vsub.s32 7, %v2587_v0  ;;  %v1735_v56 = vrot.slane %v1458_v44, %v1685_v46  ;;  %v1739_v57 = vrot.slane %v1458_v44, %v1689_v51 }
 0x4ab   :  { %v1572_v10 = vrot.slane %v1571_v2, 1  ;;  %v1586_v11 = vrot.slane %v1585_v3, 1  ;;  %v1591_v12 = vrot.slane %v1590_v4, 2  ;;  %v1743_v59 = vrot.slane %v1458_v44, %v1693_v52 }
 0x4ac   :  { %v1578_v15 = vadd.f32 %v1577_v5, %v1576_v1  ;;  %v1747_v60 = vrot.slane %v1458_v44, %v1697_v53  ;;  %v1751_v62 = vrot.slane %v1458_v44, %v1701_v54  ;;  %v1755_v63 = vrot.slane %v1458_v44, %v1705_v47 }
 0x4ad   :  { %v1573_v16 = vadd.f32 %v1572_v10, %v1571_v2  ;;  %v1587_v17 = vadd.f32 %v1586_v11, %v1585_v3  ;;  %v1592_v18 = vadd.f32 %v1591_v12, %v1590_v4  ;;  %v1759_v1 = vrot.slane %v1458_v44, %v1709_v55 }
 0x4ae   :  { %v1579_v19 = vrot.slane %v1578_v15, 1 }
 0x4af   :  { %v1599_v20 = vmul.f32 0.5, %v1573_v16  ;;  %v1601_v21 = vmul.f32 0.5, %v1587_v17  ;;  %v1593_v22 = vrot.slane %v1592_v18, 1 }
 0x4b0   :  { %v1580_v23 = vadd.f32 %v1579_v19, %v1578_v15 }
 0x4b1   :  { %v1607_v24 = vadd.f32 1e-05, %v1599_v20  ;;  %v1609_v25 = vadd.f32 1e-05, %v1601_v21  ;;  %v1594_v26 = vadd.f32 %v1593_v22, %v1592_v18 }
 0x4b2   :  { %v1600_v27 = vmul.f32 0.5, %v1580_v23 }
 0x4b3   :  { %v1602_v28 = vmul.f32 0.5, %v1594_v26  ;;  %2332 = vrsqrt.f32 %v1607_v24 }
 0x4b4   :  { %v1608_v29 = vadd.f32 1e-05, %v1600_v27  ;;  %2334 = vrsqrt.f32 %v1609_v25 }
 0x4b5   :  { %v1610_v30 = vadd.f32 1e-05, %v1602_v28 }
 0x4b6   :  { %2336 = vrsqrt.f32 %v1608_v29 }
 0x4b7   :  { %2338 = vrsqrt.f32 %v1610_v30 }
 0x4bd   :  { %v2333_v33 = vpop.eup %2332 }
 0x4be   :  { %v2335_v31 = vpop.eup %2334 }
 0x4c0   :  { %v2337_v32 = vpop.eup %2336 }
 0x4c1   :  { %v2339_v35 = vpop.eup %2338  ;;  %v1629_v37 = vcombine.low %v2333_v33, %v2337_v32 }
 0x4c2   :  { %v1630_v38 = vcombine.low %v2335_v31, %v2339_v35 }
 0x4c3   :  { %v1651_v39 = vrot.slane %v1629_v37, %v3389_v58 }
 0x4c4   :  { %v1658_v36 = vrot.slane %v1630_v38, %v3389_v58 }
 0x4c6   :  { %v1660_v40 = vcombine.low %v1651_v39, %v1658_v36 }
 0x4c8   :  { %v1674_v42 = vrot.slane %v1660_v40, %v3389_v58  ;;  %v1731_v58 = vrot.slane %v1458_v44, %v2893_v48 }
 0x4ca   :  { %v1675_v50 = vcombine.low %v1667_v41, %v1674_v42 }
 0x4cc   :  { %v1677_v49 = vmul.f32 %v1675_v50, %v1457_v43 }
 0x4ce   :  { %v1682_v2 = vrot.slane %v1677_v49, %v2893_v48  ;;  %v1686_v3 = vrot.slane %v1677_v49, %v1685_v46  ;;  %v1690_v4 = vrot.slane %v1677_v49, %v1689_v51  ;;  %v1694_v5 = vrot.slane %v1677_v49, %v1693_v52 }
 0x4cf   :  { %v1698_v10 = vrot.slane %v1677_v49, %v1697_v53  ;;  %v1702_v11 = vrot.slane %v1677_v49, %v1701_v54  ;;  %v1706_v12 = vrot.slane %v1677_v49, %v1705_v47  ;;  %v1710_v15 = vrot.slane %v1677_v49, %v1709_v55 }
 0x4d0   :  { %v1719_v0 = vmul.f32 %v1682_v2, %v3364_v6  ;;  %v1720_v16 = vmul.f32 %v1686_v3, %v3368_v8  ;;  %v1721_v17 = vmul.f32 %v1690_v4, %v3366_v7  ;;  %v1722_v18 = vmul.f32 %v1694_v5, %v3370_v9 }
 0x4d1   :  { %v1723_v19 = vmul.f32 %v1698_v10, %v3391_v61  ;;  %v1724_v20 = vmul.f32 %v1702_v11, %v3399_v45  ;;  %v1725_v48 = vmul.f32 %v1706_v12, %v3393_v34  ;;  %v1726_v21 = vmul.f32 %v1710_v15, %v3401_v14 }
 0x4d2   :  { %v1768_v22 = vadd.f32 %v1731_v58, %v1719_v0  ;;  %v1769_v23 = vadd.f32 %v1735_v56, %v1720_v16  ;;  %v1770_v24 = vadd.f32 %v1739_v57, %v1721_v17  ;;  %v1771_v25 = vadd.f32 %v1743_v59, %v1722_v18 }
 0x4d3   :  { %v1772_v26 = vadd.f32 %v1747_v60, %v1723_v19  ;;  %v1773_v6 = vadd.f32 %v1751_v62, %v1724_v20  ;;  %v1774_v27 = vadd.f32 %v1755_v63, %v1725_v48  ;;  %v1775_v8 = vadd.f32 %v1759_v1, %v1726_v21 }
 0x4d4   :  { %v1776_v28 = vmax.f32 %v1768_v22, 0.0  ;;  %v1777_v7 = vmax.f32 %v1769_v23, 0.0  ;;  %v1778_v29 = vmax.f32 %v1770_v24, 0.0  ;;  %v1779_v9 = vmax.f32 %v1771_v25, 0.0 }
 0x4d5   :  { %v1780_v30 = vmax.f32 %v1772_v26, 0.0  ;;  %v1781_v61 = vmax.f32 %v1773_v6, 0.0  ;;  %v1782_v33 = vmax.f32 %v1774_v27, 0.0  ;;  %v1783_v45 = vmax.f32 %v1775_v8, 0.0 }
 0x4d6   :  { %v1792_v31 = vcombine.low %v1776_v28, %v1777_v7  ;;  %v1793_v34 = vcombine.low %v1778_v29, %v1779_v9 }
 0x4d7   :  { %v1809_v32 = vcombine.low %v1780_v30, %v1781_v61  ;;  %v1810_v14 = vcombine.low %v1782_v33, %v1783_v45 }
 0x4d8   :  { %v1800_v35 = vrot.slane %v1792_v31, %v2614_v13  ;;  %v1807_v37 = vrot.slane %v1793_v34, %v2614_v13 }
 0x4d9   :  { %v1817_v38 = vrot.slane %v1809_v32, %v2614_v13  ;;  %v1824_v39 = vrot.slane %v1810_v14, %v2614_v13 }
 0x4da   :  { %v1808_v36 = vcombine.low %v1800_v35, %v1807_v37 }
 0x4db   :  { %v1825_v40 = vcombine.low %v1817_v38, %v1824_v39 }
 0x4dc   :  { %1828 = vst [vmem:[%s3472_s22] sm:$0xff] %v1808_v36 }
 0x4dd   :  { %1829 = vst [vmem:[%s3472_s22 + $0x8] sm:$0xff] %v1825_v40 }

// kernel: generator_forward.14
= control target key start
LH: loop header
LB: loop body
LE: loop exit
PB: predicated region body
PF: predicated region fallthrough
CT: control target
= control target key end

     0   :  { %vm129_vm0 = vcmask 523264   ;;  %vm469_vm1 = vcmask 261120   ;;  %s1476_s1 = inlined_call_operand.vmem [shape: f32[576,32], index: 1, kind: input, shape index: {}]   ;;  %s1477_s0 = inlined_call_operand.vmem [shape: f32[64,576], index: 0, kind: input, shape index: {}]   ;;  %s1478_s3 = inlined_call_operand.vmem [shape: f32[64,1], index: 3, kind: input, shape index: {}]   ;;  %s1479_s2 = inlined_call_operand.vmem [shape: f32[64,1], index: 2, kind: input, shape index: {}]   ;;  %s1480_s4 = inlined_call_operand.vmem [shape: f32[64,32], index: 4, kind: output, shape index: {}]  }
   0x1   :  { %v73_v0 = vld [vmem:[%s1476_s1 + $0x80] sm:$0xff]  ;;  %v74_v1 = vld [vmem:[%s1476_s1 + $0x88] sm:$0xff]  ;;  %v75_v11 = vld [vmem:[%s1476_s1 + $0x90] sm:$0xff] }
   0x2   :  { %v105_v2 = vld [vmem:[%s1476_s1 + $0x180] sm:$0xff]  ;;  %v863_v3 = vpack.c.bf16 %v74_v1, %v73_v0  ;;  %v106_v4 = vld [vmem:[%s1476_s1 + $0x188] sm:$0xff]  ;;  %v76_v13 = vld [vmem:[%s1476_s1 + $0x98] sm:$0xff] }
   0x3   :  { %v57_v5 = vld [vmem:[%s1476_s1] sm:$0xff]  ;;  %v58_v6 = vld [vmem:[%s1476_s1 + $0x8] sm:$0xff]  ;;  %v895_v7 = vpack.c.bf16 %v106_v4, %v105_v2  ;;  %v107_v14 = vld [vmem:[%s1476_s1 + $0x190] sm:$0xff]  ;;  %v867_v16 = vpack.c.bf16 %v76_v13, %v75_v11 }
   0x4   :  { %v865_v8 = vpack.c.bf16 %v58_v6, %v57_v5  ;;  %v89_v9 = vld [vmem:[%s1476_s1 + $0x100] sm:$0xff]  ;;  %v90_v10 = vld [vmem:[%s1476_s1 + $0x108] sm:$0xff]  ;;  %864 = vmatprep.subr.bf16.mxu0 %v863_v3  ;;  %v108_v15 = vld [vmem:[%s1476_s1 + $0x198] sm:$0xff] }
   0x5   :  { %v897_v12 = vpack.c.bf16 %v90_v10, %v89_v9  ;;  %896 = vmatprep.subr.bf16.mxu1 %v895_v7  ;;  %v899_v17 = vpack.c.bf16 %v108_v15, %v107_v14  ;;  %v59_v18 = vld [vmem:[%s1476_s1 + $0x10] sm:$0xff]  ;;  %v60_v19 = vld [vmem:[%s1476_s1 + $0x18] sm:$0xff]  ;;  %v77_v23 = vld [vmem:[%s1476_s1 + $0xa0] sm:$0xff] }
   0x6   :  { %866 = vmatpush3.bf16.msra.mxu0 %v865_v8  ;;  %v91_v20 = vld [vmem:[%s1476_s1 + $0x110] sm:$0xff]  ;;  %v869_v21 = vpack.c.bf16 %v60_v19, %v59_v18  ;;  %v92_v22 = vld [vmem:[%s1476_s1 + $0x118] sm:$0xff]  ;;  %v78_v24 = vld [vmem:[%s1476_s1 + $0xa8] sm:$0xff] }
   0x7   :  { %898 = vmatpush3.bf16.msra.mxu1 %v897_v12  ;;  %868 = vmatprep.subr.bf16.mxu0 %v867_v16  ;;  %v901_v25 = vpack.c.bf16 %v92_v22, %v91_v20  ;;  %v871_v26 = vpack.c.bf16 %v78_v24, %v77_v23  ;;  %v109_v27 = vld [vmem:[%s1476_s1 + $0x1a0] sm:$0xff]  ;;  %v110_v28 = vld [vmem:[%s1476_s1 + $0x1a8] sm:$0xff]  ;;  %v79_v35 = vld [vmem:[%s1476_s1 + $0xb0] sm:$0xff] }
   0x8   :  { %900 = vmatprep.subr.bf16.mxu1 %v899_v17  ;;  %v61_v29 = vld [vmem:[%s1476_s1 + $0x20] sm:$0xff]  ;;  %v903_v30 = vpack.c.bf16 %v110_v28, %v109_v27  ;;  %v62_v31 = vld [vmem:[%s1476_s1 + $0x28] sm:$0xff]  ;;  %v80_v36 = vld [vmem:[%s1476_s1 + $0xb8] sm:$0xff] }
   0x9   :  { %v93_v32 = vld [vmem:[%s1476_s1 + $0x120] sm:$0xff]  ;;  %v94_v33 = vld [vmem:[%s1476_s1 + $0x128] sm:$0xff]  ;;  %v873_v34 = vpack.c.bf16 %v62_v31, %v61_v29  ;;  %v111_v37 = vld [vmem:[%s1476_s1 + $0x1b0] sm:$0xff]  ;;  %v875_v39 = vpack.c.bf16 %v80_v36, %v79_v35 }
   0xa   :  { %870 = vmatpush3.bf16.msra.mxu0 %v869_v21  ;;  %v905_v38 = vpack.c.bf16 %v94_v33, %v93_v32  ;;  %v112_v40 = vld [vmem:[%s1476_s1 + $0x1b8] sm:$0xff]  ;;  %v63_v41 = vld [vmem:[%s1476_s1 + $0x30] sm:$0xff]  ;;  %v81_v46 = vld [vmem:[%s1476_s1 + $0xc0] sm:$0xff] }
   0xb   :  { %902 = vmatpush3.bf16.msra.mxu1 %v901_v25  ;;  %872 = vmatprep.subr.bf16.mxu0 %v871_v26  ;;  %v64_v42 = vld [vmem:[%s1476_s1 + $0x38] sm:$0xff]  ;;  %v907_v43 = vpack.c.bf16 %v112_v40, %v111_v37  ;;  %v95_v44 = vld [vmem:[%s1476_s1 + $0x130] sm:$0xff]  ;;  %v82_v47 = vld [vmem:[%s1476_s1 + $0xc8] sm:$0xff] }
   0xc   :  { %904 = vmatprep.subr.bf16.mxu1 %v903_v30  ;;  %v96_v45 = vld [vmem:[%s1476_s1 + $0x138] sm:$0xff]  ;;  %v113_v48 = vld [vmem:[%s1476_s1 + $0x1c0] sm:$0xff]  ;;  %v114_v49 = vld [vmem:[%s1476_s1 + $0x1c8] sm:$0xff]  ;;  %v877_v50 = vpack.c.bf16 %v64_v42, %v63_v41  ;;  %v879_v52 = vpack.c.bf16 %v82_v47, %v81_v46 }
   0xd   :  { %v909_v51 = vpack.c.bf16 %v96_v45, %v95_v44  ;;  %v65_v53 = vld [vmem:[%s1476_s1 + $0x40] sm:$0xff]  ;;  %v66_v54 = vld [vmem:[%s1476_s1 + $0x48] sm:$0xff]  ;;  %v911_v56 = vpack.c.bf16 %v114_v49, %v113_v48  ;;  %v83_v58 = vld [vmem:[%s1476_s1 + $0xd0] sm:$0xff] }
   0xe   :  { %874 = vmatpush3.bf16.msra.mxu0 %v873_v34  ;;  %v97_v55 = vld [vmem:[%s1476_s1 + $0x140] sm:$0xff]  ;;  %v98_v57 = vld [vmem:[%s1476_s1 + $0x148] sm:$0xff]  ;;  %v84_v59 = vld [vmem:[%s1476_s1 + $0xd8] sm:$0xff]  ;;  %v881_v62 = vpack.c.bf16 %v66_v54, %v65_v53 }
   0xf   :  { %906 = vmatpush3.bf16.msra.mxu1 %v905_v38  ;;  %876 = vmatprep.subr.bf16.mxu0 %v875_v39  ;;  %v115_v60 = vld [vmem:[%s1476_s1 + $0x1d0] sm:$0xff]  ;;  %v116_v61 = vld [vmem:[%s1476_s1 + $0x1d8] sm:$0xff]  ;;  %v913_v63 = vpack.c.bf16 %v98_v57, %v97_v55  ;;  %v883_v0 = vpack.c.bf16 %v84_v59, %v83_v58  ;;  %v85_v6 = vld [vmem:[%s1476_s1 + $0xe0] sm:$0xff] }
  0x10   :  { %908 = vmatprep.subr.bf16.mxu1 %v907_v43  ;;  %v67_v1 = vld [vmem:[%s1476_s1 + $0x50] sm:$0xff]  ;;  %v68_v2 = vld [vmem:[%s1476_s1 + $0x58] sm:$0xff]  ;;  %v915_v4 = vpack.c.bf16 %v116_v61, %v115_v60  ;;  %v86_v7 = vld [vmem:[%s1476_s1 + $0xe8] sm:$0xff] }
  0x11   :  { %v99_v3 = vld [vmem:[%s1476_s1 + $0x150] sm:$0xff]  ;;  %v100_v5 = vld [vmem:[%s1476_s1 + $0x158] sm:$0xff]  ;;  %v117_v8 = vld [vmem:[%s1476_s1 + $0x1e0] sm:$0xff]  ;;  %v885_v10 = vpack.c.bf16 %v68_v2, %v67_v1  ;;  %v887_v14 = vpack.c.bf16 %v86_v7, %v85_v6 }
  0x12   :  { %878 = vmatpush3.bf16.msra.mxu0 %v877_v50  ;;  %v118_v9 = vld [vmem:[%s1476_s1 + $0x1e8] sm:$0xff]  ;;  %v69_v11 = vld [vmem:[%s1476_s1 + $0x60] sm:$0xff]  ;;  %v917_v13 = vpack.c.bf16 %v100_v5, %v99_v3  ;;  %v20_v17 = vld [vmem:[%s1477_s0 + $0x18] sm:$0xff] }
  0x13   :  { %910 = vmatpush3.bf16.msra.mxu1 %v909_v51  ;;  %880 = vmatprep.subr.bf16.mxu0 %v879_v52  ;;  %v70_v12 = vld [vmem:[%s1476_s1 + $0x68] sm:$0xff]  ;;  %v101_v15 = vld [vmem:[%s1476_s1 + $0x160] sm:$0xff]  ;;  %v919_v18 = vpack.c.bf16 %v118_v9, %v117_v8  ;;  %v87_v20 = vld [vmem:[%s1476_s1 + $0xf0] sm:$0xff] }
  0x14   :  { %912 = vmatprep.subr.bf16.mxu1 %v911_v56  ;;  %v18_v16 = vld [vmem:[%s1477_s0 + $0x8] sm:$0xff]  ;;  %v88_v21 = vld [vmem:[%s1476_s1 + $0xf8] sm:$0xff]  ;;  %v119_v22 = vld [vmem:[%s1476_s1 + $0x1f0] sm:$0xff]  ;;  %323 = vmatprep.mubr.f32.mxu1 %v20_v17  ;;  %v889_v24 = vpack.c.bf16 %v70_v12, %v69_v11 }
  0x15   :  { %v102_v19 = vld [vmem:[%s1476_s1 + $0x168] sm:$0xff]  ;;  %218 = vmatprep.mubr.f32.mxu0 %v18_v16  ;;  %v120_v23 = vld [vmem:[%s1476_s1 + $0x1f8] sm:$0xff]  ;;  %v891_v26 = vpack.c.bf16 %v88_v21, %v87_v20  ;;  %v71_v27 = vld [vmem:[%s1476_s1 + $0x70] sm:$0xff] }
  0x16   :  { %882 = vmatpush3.bf16.msra.mxu0 %v881_v62  ;;  %v921_v25 = vpack.c.bf16 %v102_v19, %v101_v15  ;;  %v72_v28 = vld [vmem:[%s1476_s1 + $0x78] sm:$0xff]  ;;  %v103_v29 = vld [vmem:[%s1476_s1 + $0x170] sm:$0xff]  ;;  %v923_v30 = vpack.c.bf16 %v120_v23, %v119_v22  ;;  %v121_v32 = vld [vmem:[%s1476_s1 + $0x200] sm:$0xff] }
  0x17   :  { %914 = vmatpush3.bf16.msra.mxu1 %v913_v63  ;;  %884 = vmatprep.subr.bf16.mxu0 %v883_v0  ;;  %v104_v31 = vld [vmem:[%s1476_s1 + $0x178] sm:$0xff]  ;;  %v122_v33 = vld [vmem:[%s1476_s1 + $0x208] sm:$0xff]  ;;  %v893_v34 = vpack.c.bf16 %v72_v28, %v71_v27  ;;  %v123_v37 = vld [vmem:[%s1476_s1 + $0x210] sm:$0xff] }
  0x18   :  { %916 = vmatprep.subr.bf16.mxu1 %v915_v4  ;;  %v925_v35 = vpack.c.bf16 %v104_v31, %v103_v29  ;;  %v927_v36 = vpack.c.bf16 %v122_v33, %v121_v32  ;;  %v124_v38 = vld [vmem:[%s1476_s1 + $0x218] sm:$0xff]  ;;  %v17_v39 = vld [vmem:[%s1477_s0] sm:$0xff]  ;;  %v19_v40 = vld [vmem:[%s1477_s0 + $0x10] sm:$0xff] }
  0x19   :  { %v23_v41 = vld [vmem:[%s1477_s0 + $0x30] sm:$0xff]  ;;  %v25_v42 = vld [vmem:[%s1477_s0 + $0x40] sm:$0xff]  ;;  %v931_v43 = vpack.c.bf16 %v124_v38, %v123_v37  ;;  %v126_v45 = vld [vmem:[%s1476_s1 + $0x228] sm:$0xff] }
  0x1a   :  { %886 = vmatpush3.bf16.msra.mxu0 %v885_v10  ;;  %v125_v44 = vld [vmem:[%s1476_s1 + $0x220] sm:$0xff]  ;;  %v22_v46 = vld [vmem:[%s1477_s0 + $0x28] sm:$0xff]  ;;  %v24_v47 = vld [vmem:[%s1477_s0 + $0x38] sm:$0xff] }
  0x1b   :  { %918 = vmatpush3.bf16.msra.mxu1 %v917_v13  ;;  %888 = vmatprep.subr.bf16.mxu0 %v887_v14  ;;  %v28_v48 = vld [vmem:[%s1477_s0 + $0x58] sm:$0xff]  ;;  %v30_v49 = vld [vmem:[%s1477_s0 + $0x68] sm:$0xff]  ;;  %v935_v50 = vpack.c.bf16 %v126_v45, %v125_v44  ;;  %v127_v51 = vld [vmem:[%s1476_s1 + $0x230] sm:$0xff] }
  0x1c   :  { %920 = vmatprep.subr.bf16.mxu1 %v919_v18  ;;  %v128_v52 = vld [vmem:[%s1476_s1 + $0x238] sm:$0xff]  ;;  %v27_v53 = vld [vmem:[%s1477_s0 + $0x50] sm:$0xff]  ;;  %v29_v54 = vld [vmem:[%s1477_s0 + $0x60] sm:$0xff] }
  0x1d   :  { %v33_v55 = vld [vmem:[%s1477_s0 + $0x80] sm:$0xff]  ;;  %v35_v56 = vld [vmem:[%s1477_s0 + $0x90] sm:$0xff]  ;;  %v939_v57 = vpack.c.bf16 %v128_v52, %v127_v51  ;;  %v32_v58 = vld [vmem:[%s1477_s0 + $0x78] sm:$0xff] }
  0x1e   :  { %890 = vmatpush3.bf16.msra.mxu0 %v889_v24  ;;  %v34_v59 = vld [vmem:[%s1477_s0 + $0x88] sm:$0xff]  ;;  %v40_v61 = vld [vmem:[%s1477_s0 + $0xb8] sm:$0xff]  ;;  %v37_v62 = vld [vmem:[%s1477_s0 + $0xa0] sm:$0xff] }
  0x1f   :  { %922 = vmatpush3.bf16.msra.mxu1 %v921_v25  ;;  %892 = vmatprep.subr.bf16.mxu0 %v891_v26  ;;  %v38_v60 = vld [vmem:[%s1477_s0 + $0xa8] sm:$0xff]  ;;  %v39_v63 = vld [vmem:[%s1477_s0 + $0xb0] sm:$0xff]  ;;  %v45_v1 = vld [vmem:[%s1477_s0 + $0xe0] sm:$0xff] }
  0x20   :  { %924 = vmatprep.subr.bf16.mxu1 %v923_v30  ;;  %v43_v0 = vld [vmem:[%s1477_s0 + $0xd0] sm:$0xff]  ;;  %v42_v2 = vld [vmem:[%s1477_s0 + $0xc8] sm:$0xff]  ;;  %v44_v3 = vld [vmem:[%s1477_s0 + $0xd8] sm:$0xff] }
  0x21   :  { %v48_v4 = vld [vmem:[%s1477_s0 + $0xf8] sm:$0xff]  ;;  %v50_v5 = vld [vmem:[%s1477_s0 + $0x108] sm:$0xff]  ;;  %v47_v6 = vld [vmem:[%s1477_s0 + $0xf0] sm:$0xff] }
  0x22   :  { %894 = vmatpush3.bf16.msra.mxu0 %v893_v34  ;;  %v49_v7 = vld [vmem:[%s1477_s0 + $0x100] sm:$0xff]  ;;  %v55_v9 = vld [vmem:[%s1477_s0 + $0x130] sm:$0xff]  ;;  %v52_v10 = vld [vmem:[%s1477_s0 + $0x118] sm:$0xff] }
  0x23   :  { %926 = vmatpush3.bf16.msra.mxu1 %v925_v35  ;;  %928 = vmatprep.subr.bf16.mxu0 %v927_v36  ;;  %v53_v8 = vld [vmem:[%s1477_s0 + $0x120] sm:$0xff]  ;;  %v54_v11 = vld [vmem:[%s1477_s0 + $0x128] sm:$0xff]  ;;  %v31_v16 = vld [vmem:[%s1477_s0 + $0x70] sm:$0xff] }
  0x24   :  { %943 = vmatprep.subr.bf16.mxu1 %v927_v36  ;;  %v21_v12 = vld [vmem:[%s1477_s0 + $0x20] sm:$0xff]  ;;  %v26_v14 = vld [vmem:[%s1477_s0 + $0x48] sm:$0xff]  ;;  %v51_v17 = vld [vmem:[%s1477_s0 + $0x110] sm:$0xff] }
  0x25   :  { %219 = vmatmul.mubr.f32.vlgmr.msra.gmra.mrb[0].mxu0 %v17_v39  ;;  %v41_v13 = vld [vmem:[%s1477_s0 + $0xc0] sm:$0xff]  ;;  %v46_v15 = vld [vmem:[%s1477_s0 + $0xe8] sm:$0xff]  ;;  %v36_v18 = vld [vmem:[%s1477_s0 + $0x98] sm:$0xff] }
  0x26   :  { %324 = vmatmul.mubr.f32.vlgmr.msra.gmra.mrb[0].mxu1 %v19_v40  ;;  %930 = vmatpush3.bf16.msra.mxu0 %v927_v36  ;;  %v56_v19 = vld [vmem:[%s1477_s0 + $0x138] sm:$0xff] }
  0x27   :  { %223 = vmatprep.mubr.f32.mxu0 %v23_v41  ;;  %328 = vmatprep.mubr.f32.mxu1 %v25_v42 }
  0x28   :  { %947 = vmatpush3.bf16.msra.mxu1 %v927_v36  ;;  %932 = vmatprep.subr.bf16.mxu0 %v931_v43 }
  0x29   :  { %224 = vmatmul.mubr.f32.gmra.mrb[2].mxu0 %v22_v46  ;;  %944 = vmatprep.subr.bf16.mxu1 %v931_v43 }
  0x2a   :  { %329 = vmatmul.mubr.f32.gmra.mrb[2].mxu1 %v24_v47  ;;  %228 = vmatprep.mubr.f32.mxu0 %v28_v48 }
  0x2b   :  { %333 = vmatprep.mubr.f32.mxu1 %v30_v49  ;;  %934 = vmatpush3.bf16.msra.mxu0 %v931_v43 }
  0x2c   :  { %948 = vmatpush3.bf16.msra.mxu1 %v931_v43  ;;  %936 = vmatprep.subr.bf16.mxu0 %v935_v50 }
  0x2d   :  { %229 = vmatmul.mubr.f32.gmra.mrb[4].mxu0 %v27_v53  ;;  %945 = vmatprep.subr.bf16.mxu1 %v935_v50 }
  0x2e   :  { %334 = vmatmul.mubr.f32.gmra.mrb[4].mxu1 %v29_v54  ;;  %233 = vmatprep.mubr.f32.mxu0 %v33_v55 }
  0x2f   :  { %338 = vmatprep.mubr.f32.mxu1 %v35_v56  ;;  %938 = vmatpush3.bf16.msra.mxu0 %v935_v50 }
  0x30   :  { %949 = vmatpush3.bf16.msra.mxu1 %v935_v50  ;;  %940 = vmatprep.subr.bf16.mxu0 %v939_v57 }
  0x31   :  { %234 = vmatmul.mubr.f32.gmra.mrb[6].mxu0 %v32_v58  ;;  %946 = vmatprep.subr.bf16.mxu1 %v939_v57 }
  0x32   :  { %339 = vmatmul.mubr.f32.gmra.mrb[6].mxu1 %v34_v59  ;;  %238 = vmatprep.mubr.f32.mxu0 %v38_v60 }
  0x33   :  { %343 = vmatprep.mubr.f32.mxu1 %v40_v61  ;;  %942 = vmatpush3.bf16.msra.mxu0 %v939_v57 }
  0x34   :  { %950 = vmatpush3.bf16.msra.mxu1 %v939_v57 }
  0x35   :  { %239 = vmatmul.mubr.f32.gmra.mrb[8].mxu0 %v37_v62 }
  0x36   :  { %344 = vmatmul.mubr.f32.gmra.mrb[8].mxu1 %v39_v63  ;;  %243 = vmatprep.mubr.f32.mxu0 %v43_v0 }
  0x37   :  { %348 = vmatprep.mubr.f32.mxu1 %v45_v1 }
  0x39   :  { %244 = vmatmul.mubr.f32.gmra.mrb[10].mxu0 %v42_v2 }
  0x3a   :  { %349 = vmatmul.mubr.f32.gmra.mrb[10].mxu1 %v44_v3  ;;  %248 = vmatprep.mubr.f32.mxu0 %v48_v4 }
  0x3b   :  { %353 = vmatprep.mubr.f32.mxu1 %v50_v5 }
  0x3d   :  { %249 = vmatmul.mubr.f32.gmra.mrb[12].mxu0 %v47_v6 }
  0x3e   :  { %354 = vmatmul.mubr.f32.gmra.mrb[12].mxu1 %v49_v7  ;;  %253 = vmatprep.mubr.f32.mxu0 %v53_v8 }
  0x3f   :  { %358 = vmatprep.mubr.f32.mxu1 %v55_v9 }
  0x41   :  { %254 = vmatmul.mubr.f32.gmra.mrb[14].mxu0 %v52_v10 }
  0x42   :  { %359 = vmatmul.mubr.f32.gmra.mrb[14].mxu1 %v54_v11  ;;  %851 = vmatprep.mubr.msk.f32.mxu0 %vm129_vm0, %v21_v12 }
  0x43   :  { %857 = vmatprep.mubr.msk.f32.mxu1 %vm129_vm0, %v41_v13 }
  0x45   :  { %852 = vmatmul.mubr.msk.f32.vlgmr.msra.gmra.mrb[16].mxu0 %vm129_vm0, %v26_v14 }
  0x46   :  { %858 = vmatmul.mubr.msk.f32.vlgmr.msra.gmra.mrb[16].mxu1 %vm129_vm0, %v46_v15  ;;  %854 = vmatprep.mubr.msk.f32.mxu0 %vm129_vm0, %v31_v16 }
  0x47   :  { %860 = vmatprep.mubr.msk.f32.mxu1 %vm129_vm0, %v51_v17 }
  0x49   :  { %855 = vmatmul.mubr.msk.f32.gmra.mrb[18].mxu0 %vm129_vm0, %v36_v18 }
  0x4a   :  { %861 = vmatmul.mubr.msk.f32.gmra.mrb[18].mxu1 %vm129_vm0, %v56_v19 }
  0xf8   :  { %v739_v20 = vpop.f32.mrb[0].mxu0 }
  0xf9   :  { %v795_v21 = vpop.f32.mrb[0].mxu1  ;;  %v740_v22 = vpop.f32.mrb[1].mxu0 }
  0xfa   :  { %v741_v23 = vadd.f32 %v740_v22, %v739_v20  ;;  %v796_v24 = vpop.f32.mrb[1].mxu1 }
  0xfb   :  { %v797_v25 = vadd.f32 %v796_v24, %v795_v21 }
  0xfc   :  { %v742_v26 = vpop.f32.mrb[2].mxu0 }
  0xfd   :  { %v798_v27 = vpop.f32.mrb[2].mxu1  ;;  %v743_v28 = vpop.f32.mrb[3].mxu0  ;;  %v326_v29 = vadd.f32 %v797_v25, %v741_v23 }
  0xfe   :  { %v744_v30 = vadd.f32 %v743_v28, %v742_v26  ;;  %v799_v31 = vpop.f32.mrb[3].mxu1 }
  0xff   :  { %v800_v32 = vadd.f32 %v799_v31, %v798_v27 }
 0x100   :  { %v745_v33 = vpop.f32.mrb[4].mxu0 }
 0x101   :  { %v801_v34 = vpop.f32.mrb[4].mxu1  ;;  %v746_v35 = vpop.f32.mrb[5].mxu0  ;;  %v331_v36 = vadd.f32 %v800_v32, %v744_v30 }
 0x102   :  { %v747_v37 = vadd.f32 %v746_v35, %v745_v33  ;;  %v802_v38 = vpop.f32.mrb[5].mxu1 }
 0x103   :  { %v803_v39 = vadd.f32 %v802_v38, %v801_v34 }
 0x104   :  { %v748_v40 = vpop.f32.mrb[6].mxu0 }
 0x105   :  { %v804_v41 = vpop.f32.mrb[6].mxu1  ;;  %v749_v42 = vpop.f32.mrb[7].mxu0  ;;  %v336_v43 = vadd.f32 %v803_v39, %v747_v37 }
 0x106   :  { %v750_v44 = vadd.f32 %v749_v42, %v748_v40  ;;  %v805_v45 = vpop.f32.mrb[7].mxu1 }
 0x107   :  { %v806_v46 = vadd.f32 %v805_v45, %v804_v41 }
 0x108   :  { %v751_v47 = vpop.f32.mrb[8].mxu0 }
 0x109   :  { %v807_v48 = vpop.f32.mrb[8].mxu1  ;;  %v752_v49 = vpop.f32.mrb[9].mxu0  ;;  %v341_v50 = vadd.f32 %v806_v46, %v750_v44 }
 0x10a   :  { %v753_v51 = vadd.f32 %v752_v49, %v751_v47  ;;  %v808_v52 = vpop.f32.mrb[9].mxu1 }
 0x10b   :  { %v809_v53 = vadd.f32 %v808_v52, %v807_v48 }
 0x10c   :  { %v754_v54 = vpop.f32.mrb[10].mxu0 }
 0x10d   :  { %v810_v55 = vpop.f32.mrb[10].mxu1  ;;  %v755_v56 = vpop.f32.mrb[11].mxu0  ;;  %v346_v57 = vadd.f32 %v809_v53, %v753_v51 }
 0x10e   :  { %v756_v58 = vadd.f32 %v755_v56, %v754_v54  ;;  %v811_v59 = vpop.f32.mrb[11].mxu1 }
 0x10f   :  { %v812_v60 = vadd.f32 %v811_v59, %v810_v55 }
 0x110   :  { %v757_v61 = vpop.f32.mrb[12].mxu0 }
 0x111   :  { %v813_v62 = vpop.f32.mrb[12].mxu1  ;;  %v758_v63 = vpop.f32.mrb[13].mxu0  ;;  %v351_v0 = vadd.f32 %v812_v60, %v756_v58 }
 0x112   :  { %v759_v1 = vadd.f32 %v758_v63, %v757_v61  ;;  %v814_v2 = vpop.f32.mrb[13].mxu1 }
 0x113   :  { %v815_v3 = vadd.f32 %v814_v2, %v813_v62 }
 0x114   :  { %v760_v4 = vpop.f32.mrb[14].mxu0 }
 0x115   :  { %v816_v5 = vpop.f32.mrb[14].mxu1  ;;  %v761_v6 = vpop.f32.mrb[15].mxu0  ;;  %v356_v7 = vadd.f32 %v815_v3, %v759_v1 }
 0x116   :  { %v762_v8 = vadd.f32 %v761_v6, %v760_v4  ;;  %v817_v9 = vpop.f32.mrb[15].mxu1 }
 0x117   :  { %v818_v10 = vadd.f32 %v817_v9, %v816_v5 }
 0x118   :  { %v853_v11 = vpop.f32.mrb[16].mxu0 }
 0x119   :  { %v436_v12 = vadd.f32 %v853_v11, %v331_v36  ;;  %v859_v13 = vpop.f32.mrb[16].mxu1  ;;  %v430_v14 = vpop.f32.mrb[17].mxu0  ;;  %v361_v15 = vadd.f32 %v818_v10, %v762_v8  ;;  %v970_v36 = vmov 0  }
 0x11a   :  { %v456_v16 = vadd.f32 %v859_v13, %v351_v0  ;;  %v431_v17 = vadd.f32 %v430_v14, %v326_v29  ;;  %v450_v18 = vpop.f32.mrb[17].mxu1  ;;  %952 = vset.pattern.permute.xlu1 %v970_v36  ;;  %953 = vset.pattern.permute.xlu0 %v970_v36  ;;  %v631_v13 = vld [vmem:[%s1478_s3] sm:$0xff]  ;;  %v633_v14 = vld [vmem:[%s1478_s3 + $0x10] sm:$0xff]  ;;  %v552_v36 = vld [vmem:[%s1479_s2 + $0x8] sm:$0xff] }
 0x11b   :  { %v451_v19 = vadd.f32 %v450_v18, %v346_v57  ;;  %v473_v20 = vsel %vm469_vm1, %v436_v12, 0.0  ;;  %v636_v18 = vld [vmem:[%s1478_s3 + $0x28] sm:$0xff] }
 0x11c   :  { %v856_v21 = vpop.f32.mrb[18].mxu0  ;;  %v485_v22 = vsel %vm469_vm1, %v456_v16, 0.0  ;;  %474 = vadd.xlane.f32.xlu0 %v473_v20  ;;  %v470_v29 = vsel %vm469_vm1, %v431_v17, 0.0 }
 0x11d   :  { %v446_v23 = vadd.f32 %v856_v21, %v341_v50  ;;  %v862_v24 = vpop.f32.mrb[18].mxu1  ;;  %486 = vadd.xlane.f32.xlu1 %v485_v22  ;;  %v440_v25 = vpop.f32.mrb[19].mxu0  ;;  %v482_v32 = vsel %vm469_vm1, %v451_v19, 0.0 }
 0x11e   :  { %v466_v26 = vadd.f32 %v862_v24, %v361_v15  ;;  %v441_v27 = vadd.f32 %v440_v25, %v336_v43  ;;  %v460_v28 = vpop.f32.mrb[19].mxu1  ;;  %v635_v15 = vld [vmem:[%s1478_s3 + $0x20] sm:$0xff] }
 0x11f   :  { %v461_v30 = vadd.f32 %v460_v28, %v356_v7  ;;  %v479_v31 = vsel %vm469_vm1, %v446_v23, 0.0 }
 0x120   :  { %471 = vadd.xlane.f32.xlu0 %v470_v29  ;;  %v476_v33 = vsel %vm469_vm1, %v441_v27, 0.0  ;;  %v491_v35 = vsel %vm469_vm1, %v466_v26, 0.0 }
 0x121   :  { %480 = vadd.xlane.f32.xlu1 %v479_v31  ;;  %v488_v34 = vsel %vm469_vm1, %v461_v30, 0.0 }
 0x124   :  { %483 = vadd.xlane.f32.xlu0 %v482_v32 }
 0x125   :  { %477 = vadd.xlane.f32.xlu1 %v476_v33 }
 0x128   :  { %489 = vadd.xlane.f32.xlu0 %v488_v34 }
 0x129   :  { %492 = vadd.xlane.f32.xlu1 %v491_v35 }
 0x1a9   :  { %v475_v37 = vpop.xlane.xlu0 %474 }
 0x1aa   :  { %v487_v38 = vpop.xlane.xlu1 %486  ;;  %v496_v39 = vmul.f32 0.03125, %v475_v37 }
 0x1ab   :  { %v500_v40 = vmul.f32 0.03125, %v487_v38 }
 0x1ac   :  { %v1348_v41 = vsub.f32 %v436_v12, %v496_v39 }
 0x1ad   :  { %v1350_v42 = vsub.f32 %v456_v16, %v500_v40  ;;  %v472_v43 = vpop.xlane.xlu0 %471  ;;  %v632_v16 = vld [vmem:[%s1478_s3 + $0x8] sm:$0xff] }
 0x1ae   :  { %v481_v44 = vpop.xlane.xlu1 %480  ;;  %v495_v45 = vmul.f32 0.03125, %v472_v43  ;;  %v512_v46 = vmul.f32 %v1348_v41, %v1348_v41 }
 0x1af   :  { %v498_v47 = vmul.f32 0.03125, %v481_v44  ;;  %v516_v50 = vmul.f32 %v1350_v42, %v1350_v42 }
 0x1b0   :  { %v1354_v48 = vsub.f32 %v431_v17, %v495_v45  ;;  %v522_v49 = vsel %vm469_vm1, %v512_v46, 0.0  ;;  %v634_v17 = vld [vmem:[%s1478_s3 + $0x18] sm:$0xff]  ;;  %v556_v45 = vld [vmem:[%s1479_s2 + $0x28] sm:$0xff]  ;;  %v551_v46 = vld [vmem:[%s1479_s2] sm:$0xff] }
 0x1b1   :  { %v1359_v51 = vsub.f32 %v446_v23, %v498_v47  ;;  %523 = vadd.xlane.f32.xlu1 %v522_v49  ;;  %v484_v52 = vpop.xlane.xlu0 %483  ;;  %v534_v58 = vsel %vm469_vm1, %v516_v50, 0.0 }
 0x1b2   :  { %v478_v53 = vpop.xlane.xlu1 %477  ;;  %v499_v54 = vmul.f32 0.03125, %v484_v52  ;;  %v511_v55 = vmul.f32 %v1354_v48, %v1354_v48 }
 0x1b3   :  { %v497_v56 = vmul.f32 0.03125, %v478_v53  ;;  %v514_v60 = vmul.f32 %v1359_v51, %v1359_v51 }
 0x1b4   :  { %v1363_v57 = vsub.f32 %v451_v19, %v499_v54  ;;  %v519_v59 = vsel %vm469_vm1, %v511_v55, 0.0  ;;  %v555_v55 = vld [vmem:[%s1479_s2 + $0x20] sm:$0xff] }
 0x1b5   :  { %v1369_v61 = vsub.f32 %v441_v27, %v497_v56  ;;  %535 = vadd.xlane.f32.xlu1 %v534_v58  ;;  %520 = vadd.xlane.f32.xlu0 %v519_v59  ;;  %v490_v62 = vpop.xlane.xlu0 %489  ;;  %v528_v4 = vsel %vm469_vm1, %v514_v60, 0.0  ;;  %v638_v59 = vld [vmem:[%s1478_s3 + $0x38] sm:$0xff] }
 0x1b6   :  { %v493_v63 = vpop.xlane.xlu1 %492  ;;  %v501_v0 = vmul.f32 0.03125, %v490_v62  ;;  %v515_v1 = vmul.f32 %v1363_v57, %v1363_v57 }
 0x1b7   :  { %v502_v2 = vmul.f32 0.03125, %v493_v63  ;;  %v513_v6 = vmul.f32 %v1369_v61, %v1369_v61  ;;  %v554_v63 = vld [vmem:[%s1479_s2 + $0x18] sm:$0xff] }
 0x1b8   :  { %v1373_v3 = vsub.f32 %v461_v30, %v501_v0  ;;  %v531_v5 = vsel %vm469_vm1, %v515_v1, 0.0 }
 0x1b9   :  { %v1379_v7 = vsub.f32 %v466_v26, %v502_v2  ;;  %529 = vadd.xlane.f32.xlu1 %v528_v4  ;;  %532 = vadd.xlane.f32.xlu0 %v531_v5  ;;  %v525_v9 = vsel %vm469_vm1, %v513_v6, 0.0  ;;  %v558_v2 = vld [vmem:[%s1479_s2 + $0x38] sm:$0xff]  ;;  %v553_v6 = vld [vmem:[%s1479_s2 + $0x10] sm:$0xff] }
 0x1ba   :  { %v517_v10 = vmul.f32 %v1373_v3, %v1373_v3 }
 0x1bb   :  { %v518_v8 = vmul.f32 %v1379_v7, %v1379_v7 }
 0x1bc   :  { %v537_v12 = vsel %vm469_vm1, %v517_v10, 0.0  ;;  %v557_v10 = vld [vmem:[%s1479_s2 + $0x30] sm:$0xff] }
 0x1bd   :  { %v540_v11 = vsel %vm469_vm1, %v518_v8, 0.0  ;;  %526 = vadd.xlane.f32.xlu0 %v525_v9 }
 0x1be   :  { %541 = vadd.xlane.f32.xlu1 %v540_v11 }
 0x1c1   :  { %538 = vadd.xlane.f32.xlu0 %v537_v12  ;;  %v637_v12 = vld [vmem:[%s1478_s3 + $0x30] sm:$0xff] }
 0x1cf   :  { %641 = vperm.xlu1 %952, %v631_v13  }
 0x1d3   :  { %651 = vperm.xlu1 %952, %v633_v14  }
 0x1d7   :  { %661 = vperm.xlu1 %952, %v635_v15   ;;  %646 = vperm.xlu0 %953, %v632_v16  }
 0x1db   :  { %656 = vperm.xlu0 %953, %v634_v17  }
 0x1df   :  { %666 = vperm.xlu0 %953, %v636_v18  }
 0x23e   :  { %v524_v19 = vpop.xlane.xlu1 %523 }
 0x23f   :  { %v544_v20 = vmul.f32 0.03125, %v524_v19 }
 0x241   :  { %v560_v21 = vadd.f32 1e-05, %v544_v20 }
 0x242   :  { %v536_v22 = vpop.xlane.xlu1 %535  ;;  %v521_v23 = vpop.xlane.xlu0 %520 }
 0x243   :  { %954 = vrsqrt.f32 %v560_v21  ;;  %v548_v24 = vmul.f32 0.03125, %v536_v22  ;;  %v543_v25 = vmul.f32 0.03125, %v521_v23 }
 0x245   :  { %v564_v26 = vadd.f32 1e-05, %v548_v24  ;;  %v559_v27 = vadd.f32 1e-05, %v543_v25 }
 0x246   :  { %v530_v28 = vpop.xlane.xlu1 %529  ;;  %v533_v30 = vpop.xlane.xlu0 %532 }
 0x247   :  { %956 = vrsqrt.f32 %v564_v26  ;;  %v546_v31 = vmul.f32 0.03125, %v530_v28  ;;  %v547_v29 = vmul.f32 0.03125, %v533_v30 }
 0x248   :  { %958 = vrsqrt.f32 %v559_v27 }
 0x249   :  { %v563_v32 = vadd.f32 1e-05, %v547_v29  ;;  %v562_v33 = vadd.f32 1e-05, %v546_v31 }
 0x24a   :  { %v527_v34 = vpop.xlane.xlu0 %526 }
 0x24b   :  { %v542_v35 = vpop.xlane.xlu1 %541  ;;  %960 = vrsqrt.f32 %v563_v32  ;;  %v545_v40 = vmul.f32 0.03125, %v527_v34 }
 0x24c   :  { %v550_v37 = vmul.f32 0.03125, %v542_v35  ;;  %962 = vrsqrt.f32 %v562_v33 }
 0x24d   :  { %v955_v38 = vpop.eup %954  ;;  %v561_v50 = vadd.f32 1e-05, %v545_v40 }
 0x24e   :  { %v566_v39 = vadd.f32 1e-05, %v550_v37  ;;  %v576_v43 = vmul.f32 %v955_v38, %v552_v36  ;;  %v539_v44 = vpop.xlane.xlu0 %538 }
 0x24f   :  { %v549_v52 = vmul.f32 0.03125, %v539_v44  ;;  %v642_v13 = vpop.permute.xlu1 %641 }
 0x250   :  { %590 = vperm.xlu1 %952, %v576_v43   ;;  %964 = vrsqrt.f32 %v566_v39 }
 0x251   :  { %v957_v47 = vpop.eup %956  ;;  %966 = vrsqrt.f32 %v561_v50  ;;  %v565_v58 = vadd.f32 1e-05, %v549_v52 }
 0x252   :  { %v959_v49 = vpop.eup %958  ;;  %v580_v53 = vmul.f32 %v957_v47, %v556_v45 }
 0x253   :  { %v575_v54 = vmul.f32 %v959_v49, %v551_v46  ;;  %968 = vrsqrt.f32 %v565_v58  ;;  %v652_v15 = vpop.permute.xlu1 %651 }
 0x254   :  { %610 = vperm.xlu1 %952, %v580_v53  }
 0x255   :  { %585 = vperm.xlu0 %953, %v575_v54   ;;  %v961_v56 = vpop.eup %960 }
 0x256   :  { %v579_v60 = vmul.f32 %v961_v56, %v555_v55  ;;  %v963_v62 = vpop.eup %962  ;;  %v647_v14 = vpop.permute.xlu0 %646 }
 0x257   :  { %v578_v0 = vmul.f32 %v963_v62, %v554_v63  ;;  %v662_v17 = vpop.permute.xlu1 %661 }
 0x258   :  { %605 = vperm.xlu1 %952, %v579_v60  }
 0x259   :  { %676 = vperm.xlu0 %953, %v638_v59  }
 0x25a   :  { %v965_v1 = vpop.eup %964  ;;  %v657_v16 = vpop.permute.xlu0 %656 }
 0x25b   :  { %v582_v4 = vmul.f32 %v965_v1, %v558_v2  ;;  %v967_v5 = vpop.eup %966 }
 0x25c   :  { %600 = vperm.xlu1 %952, %v578_v0   ;;  %v577_v8 = vmul.f32 %v967_v5, %v553_v6 }
 0x25d   :  { %v969_v9 = vpop.eup %968 }
 0x25e   :  { %v581_v11 = vmul.f32 %v969_v9, %v557_v10  ;;  %v667_v18 = vpop.permute.xlu0 %666 }
 0x260   :  { %620 = vperm.xlu1 %952, %v582_v4  }
 0x264   :  { %595 = vperm.xlu1 %952, %v577_v8  }
 0x268   :  { %615 = vperm.xlu1 %952, %v581_v11  }
 0x26c   :  { %671 = vperm.xlu1 %952, %v637_v12  }
 0x2cf   :  { %v591_v19 = vpop.permute.xlu1 %590 }
 0x2d0   :  { %v624_v20 = vmul.f32 %v591_v19, %v1348_v41 }
 0x2d2   :  { %v680_v21 = vadd.f32 %v647_v14, %v624_v20 }
 0x2d3   :  { %v611_v22 = vpop.permute.xlu1 %610 }
 0x2d4   :  { %688 = vst.msk [vmem:[%s1480_s4 + $0x8] sm:$0xff] %vm469_vm1, %v680_v21  ;;  %v628_v23 = vmul.f32 %v611_v22, %v1350_v42  ;;  %v586_v24 = vpop.permute.xlu0 %585 }
 0x2d5   :  { %v623_v25 = vmul.f32 %v586_v24, %v1354_v48 }
 0x2d6   :  { %v684_v26 = vadd.f32 %v667_v18, %v628_v23 }
 0x2d7   :  { %v679_v27 = vadd.f32 %v642_v13, %v623_v25  ;;  %v606_v41 = vpop.permute.xlu1 %605 }
 0x2d8   :  { %692 = vst.msk [vmem:[%s1480_s4 + $0x28] sm:$0xff] %vm469_vm1, %v684_v26  ;;  %v627_v28 = vmul.f32 %v606_v41, %v1363_v57  ;;  %v677_v33 = vpop.permute.xlu0 %676 }
 0x2d9   :  { %687 = vst.msk [vmem:[%s1480_s4] sm:$0xff] %vm469_vm1, %v679_v27 }
 0x2da   :  { %v683_v30 = vadd.f32 %v662_v17, %v627_v28 }
 0x2db   :  { %v601_v42 = vpop.permute.xlu1 %600 }
 0x2dc   :  { %691 = vst.msk [vmem:[%s1480_s4 + $0x20] sm:$0xff] %vm469_vm1, %v683_v30  ;;  %v626_v48 = vmul.f32 %v601_v42, %v1359_v51 }
 0x2de   :  { %v682_v31 = vadd.f32 %v657_v16, %v626_v48 }
 0x2df   :  { %v621_v29 = vpop.permute.xlu1 %620 }
 0x2e0   :  { %690 = vst.msk [vmem:[%s1480_s4 + $0x18] sm:$0xff] %vm469_vm1, %v682_v31  ;;  %v630_v32 = vmul.f32 %v621_v29, %v1379_v7 }
 0x2e2   :  { %v686_v57 = vadd.f32 %v677_v33, %v630_v32 }
 0x2e3   :  { %v596_v34 = vpop.permute.xlu1 %595 }
 0x2e4   :  { %694 = vst.msk [vmem:[%s1480_s4 + $0x38] sm:$0xff] %vm469_vm1, %v686_v57  ;;  %v625_v35 = vmul.f32 %v596_v34, %v1369_v61 }
 0x2e6   :  { %v681_v51 = vadd.f32 %v652_v15, %v625_v35 }
 0x2e7   :  { %v616_v36 = vpop.permute.xlu1 %615 }
 0x2e8   :  { %689 = vst.msk [vmem:[%s1480_s4 + $0x10] sm:$0xff] %vm469_vm1, %v681_v51  ;;  %v629_v37 = vmul.f32 %v616_v36, %v1373_v3 }
 0x2eb   :  { %v672_v7 = vpop.permute.xlu1 %671 }
 0x2ec   :  { %v685_v38 = vadd.f32 %v672_v7, %v629_v37 }
 0x2ee   :  { %693 = vst.msk [vmem:[%s1480_s4 + $0x30] sm:$0xff] %vm469_vm1, %v685_v38 }

// kernel: generator_forward.15
= control target key start
LH: loop header
LB: loop body
LE: loop exit
PB: predicated region body
PF: predicated region fallthrough
CT: control target
= control target key end

     0   :  { %vm486_vm0 = vcmask 261120   ;;  %s2657_s1 = inlined_call_operand.vmem [shape: f32[512,32], index: 1, kind: input, shape index: {}]   ;;  %s2658_s0 = inlined_call_operand.vmem [shape: f32[128,512], index: 0, kind: input, shape index: {}]   ;;  %s2659_s2 = inlined_call_operand.vmem [shape: f32[128,128], index: 2, kind: input, shape index: {}]   ;;  %s2660_s4 = inlined_call_operand.vmem [shape: f32[128,1], index: 4, kind: input, shape index: {}]   ;;  %s2661_s3 = inlined_call_operand.vmem [shape: f32[128,1], index: 3, kind: input, shape index: {}]   ;;  %s2662_s5 = inlined_call_operand.vmem [shape: f32[128,32], index: 5, kind: output, shape index: {}]  }
   0x1   :  { %v100_v0 = vld [vmem:[%s2657_s1 + $0x80] sm:$0xff]  ;;  %v101_v1 = vld [vmem:[%s2657_s1 + $0x88] sm:$0xff]  ;;  %v102_v11 = vld [vmem:[%s2657_s1 + $0x90] sm:$0xff] }
   0x2   :  { %v132_v2 = vld [vmem:[%s2657_s1 + $0x180] sm:$0xff]  ;;  %v1629_v3 = vpack.c.bf16 %v101_v1, %v100_v0  ;;  %v133_v4 = vld [vmem:[%s2657_s1 + $0x188] sm:$0xff]  ;;  %v103_v13 = vld [vmem:[%s2657_s1 + $0x98] sm:$0xff] }
   0x3   :  { %v84_v5 = vld [vmem:[%s2657_s1] sm:$0xff]  ;;  %v85_v6 = vld [vmem:[%s2657_s1 + $0x8] sm:$0xff]  ;;  %v1661_v7 = vpack.c.bf16 %v133_v4, %v132_v2  ;;  %v134_v14 = vld [vmem:[%s2657_s1 + $0x190] sm:$0xff]  ;;  %v1633_v16 = vpack.c.bf16 %v103_v13, %v102_v11 }
   0x4   :  { %v1631_v8 = vpack.c.bf16 %v85_v6, %v84_v5  ;;  %v116_v9 = vld [vmem:[%s2657_s1 + $0x100] sm:$0xff]  ;;  %v117_v10 = vld [vmem:[%s2657_s1 + $0x108] sm:$0xff]  ;;  %1630 = vmatprep.subr.bf16.mxu0 %v1629_v3  ;;  %v135_v15 = vld [vmem:[%s2657_s1 + $0x198] sm:$0xff] }
   0x5   :  { %v1663_v12 = vpack.c.bf16 %v117_v10, %v116_v9  ;;  %1662 = vmatprep.subr.bf16.mxu1 %v1661_v7  ;;  %v1665_v17 = vpack.c.bf16 %v135_v15, %v134_v14  ;;  %v86_v18 = vld [vmem:[%s2657_s1 + $0x10] sm:$0xff]  ;;  %v87_v19 = vld [vmem:[%s2657_s1 + $0x18] sm:$0xff]  ;;  %v104_v23 = vld [vmem:[%s2657_s1 + $0xa0] sm:$0xff] }
   0x6   :  { %1632 = vmatpush3.bf16.msra.mxu0 %v1631_v8  ;;  %v118_v20 = vld [vmem:[%s2657_s1 + $0x110] sm:$0xff]  ;;  %v1635_v21 = vpack.c.bf16 %v87_v19, %v86_v18  ;;  %v119_v22 = vld [vmem:[%s2657_s1 + $0x118] sm:$0xff]  ;;  %v105_v24 = vld [vmem:[%s2657_s1 + $0xa8] sm:$0xff] }
   0x7   :  { %1664 = vmatpush3.bf16.msra.mxu1 %v1663_v12  ;;  %1634 = vmatprep.subr.bf16.mxu0 %v1633_v16  ;;  %v1667_v25 = vpack.c.bf16 %v119_v22, %v118_v20  ;;  %v1637_v26 = vpack.c.bf16 %v105_v24, %v104_v23  ;;  %v136_v27 = vld [vmem:[%s2657_s1 + $0x1a0] sm:$0xff]  ;;  %v137_v28 = vld [vmem:[%s2657_s1 + $0x1a8] sm:$0xff]  ;;  %v106_v35 = vld [vmem:[%s2657_s1 + $0xb0] sm:$0xff] }
   0x8   :  { %1666 = vmatprep.subr.bf16.mxu1 %v1665_v17  ;;  %v88_v29 = vld [vmem:[%s2657_s1 + $0x20] sm:$0xff]  ;;  %v1669_v30 = vpack.c.bf16 %v137_v28, %v136_v27  ;;  %v89_v31 = vld [vmem:[%s2657_s1 + $0x28] sm:$0xff]  ;;  %v107_v36 = vld [vmem:[%s2657_s1 + $0xb8] sm:$0xff] }
   0x9   :  { %v120_v32 = vld [vmem:[%s2657_s1 + $0x120] sm:$0xff]  ;;  %v121_v33 = vld [vmem:[%s2657_s1 + $0x128] sm:$0xff]  ;;  %v1639_v34 = vpack.c.bf16 %v89_v31, %v88_v29  ;;  %v138_v37 = vld [vmem:[%s2657_s1 + $0x1b0] sm:$0xff]  ;;  %v1641_v39 = vpack.c.bf16 %v107_v36, %v106_v35 }
   0xa   :  { %1636 = vmatpush3.bf16.msra.mxu0 %v1635_v21  ;;  %v1671_v38 = vpack.c.bf16 %v121_v33, %v120_v32  ;;  %v139_v40 = vld [vmem:[%s2657_s1 + $0x1b8] sm:$0xff]  ;;  %v90_v41 = vld [vmem:[%s2657_s1 + $0x30] sm:$0xff]  ;;  %v108_v46 = vld [vmem:[%s2657_s1 + $0xc0] sm:$0xff] }
   0xb   :  { %1668 = vmatpush3.bf16.msra.mxu1 %v1667_v25  ;;  %1638 = vmatprep.subr.bf16.mxu0 %v1637_v26  ;;  %v91_v42 = vld [vmem:[%s2657_s1 + $0x38] sm:$0xff]  ;;  %v1673_v43 = vpack.c.bf16 %v139_v40, %v138_v37  ;;  %v122_v44 = vld [vmem:[%s2657_s1 + $0x130] sm:$0xff]  ;;  %v109_v47 = vld [vmem:[%s2657_s1 + $0xc8] sm:$0xff] }
   0xc   :  { %1670 = vmatprep.subr.bf16.mxu1 %v1669_v30  ;;  %v123_v45 = vld [vmem:[%s2657_s1 + $0x138] sm:$0xff]  ;;  %v140_v48 = vld [vmem:[%s2657_s1 + $0x1c0] sm:$0xff]  ;;  %v141_v49 = vld [vmem:[%s2657_s1 + $0x1c8] sm:$0xff]  ;;  %v1643_v50 = vpack.c.bf16 %v91_v42, %v90_v41  ;;  %v1645_v52 = vpack.c.bf16 %v109_v47, %v108_v46 }
   0xd   :  { %v1675_v51 = vpack.c.bf16 %v123_v45, %v122_v44  ;;  %v92_v53 = vld [vmem:[%s2657_s1 + $0x40] sm:$0xff]  ;;  %v93_v54 = vld [vmem:[%s2657_s1 + $0x48] sm:$0xff]  ;;  %v1677_v56 = vpack.c.bf16 %v141_v49, %v140_v48  ;;  %v110_v58 = vld [vmem:[%s2657_s1 + $0xd0] sm:$0xff] }
   0xe   :  { %1640 = vmatpush3.bf16.msra.mxu0 %v1639_v34  ;;  %v124_v55 = vld [vmem:[%s2657_s1 + $0x140] sm:$0xff]  ;;  %v125_v57 = vld [vmem:[%s2657_s1 + $0x148] sm:$0xff]  ;;  %v111_v59 = vld [vmem:[%s2657_s1 + $0xd8] sm:$0xff]  ;;  %v1647_v62 = vpack.c.bf16 %v93_v54, %v92_v53 }
   0xf   :  { %1672 = vmatpush3.bf16.msra.mxu1 %v1671_v38  ;;  %1642 = vmatprep.subr.bf16.mxu0 %v1641_v39  ;;  %v142_v60 = vld [vmem:[%s2657_s1 + $0x1d0] sm:$0xff]  ;;  %v143_v61 = vld [vmem:[%s2657_s1 + $0x1d8] sm:$0xff]  ;;  %v1679_v63 = vpack.c.bf16 %v125_v57, %v124_v55  ;;  %v1649_v0 = vpack.c.bf16 %v111_v59, %v110_v58  ;;  %v112_v6 = vld [vmem:[%s2657_s1 + $0xe0] sm:$0xff] }
  0x10   :  { %1674 = vmatprep.subr.bf16.mxu1 %v1673_v43  ;;  %v94_v1 = vld [vmem:[%s2657_s1 + $0x50] sm:$0xff]  ;;  %v95_v2 = vld [vmem:[%s2657_s1 + $0x58] sm:$0xff]  ;;  %v1681_v4 = vpack.c.bf16 %v143_v61, %v142_v60  ;;  %v113_v7 = vld [vmem:[%s2657_s1 + $0xe8] sm:$0xff] }
  0x11   :  { %v126_v3 = vld [vmem:[%s2657_s1 + $0x150] sm:$0xff]  ;;  %v127_v5 = vld [vmem:[%s2657_s1 + $0x158] sm:$0xff]  ;;  %v144_v8 = vld [vmem:[%s2657_s1 + $0x1e0] sm:$0xff]  ;;  %v1651_v10 = vpack.c.bf16 %v95_v2, %v94_v1  ;;  %v1653_v14 = vpack.c.bf16 %v113_v7, %v112_v6 }
  0x12   :  { %1644 = vmatpush3.bf16.msra.mxu0 %v1643_v50  ;;  %v145_v9 = vld [vmem:[%s2657_s1 + $0x1e8] sm:$0xff]  ;;  %v96_v11 = vld [vmem:[%s2657_s1 + $0x60] sm:$0xff]  ;;  %v1683_v13 = vpack.c.bf16 %v127_v5, %v126_v3  ;;  %v23_v17 = vld [vmem:[%s2658_s0 + $0x18] sm:$0xff] }
  0x13   :  { %1676 = vmatpush3.bf16.msra.mxu1 %v1675_v51  ;;  %1646 = vmatprep.subr.bf16.mxu0 %v1645_v52  ;;  %v97_v12 = vld [vmem:[%s2657_s1 + $0x68] sm:$0xff]  ;;  %v128_v15 = vld [vmem:[%s2657_s1 + $0x160] sm:$0xff]  ;;  %v1685_v18 = vpack.c.bf16 %v145_v9, %v144_v8  ;;  %v114_v20 = vld [vmem:[%s2657_s1 + $0xf0] sm:$0xff] }
  0x14   :  { %1678 = vmatprep.subr.bf16.mxu1 %v1677_v56  ;;  %v21_v16 = vld [vmem:[%s2658_s0 + $0x8] sm:$0xff]  ;;  %v115_v21 = vld [vmem:[%s2657_s1 + $0xf8] sm:$0xff]  ;;  %v146_v22 = vld [vmem:[%s2657_s1 + $0x1f0] sm:$0xff]  ;;  %405 = vmatprep.mubr.f32.mxu1 %v23_v17  ;;  %v1655_v24 = vpack.c.bf16 %v97_v12, %v96_v11 }
  0x15   :  { %v129_v19 = vld [vmem:[%s2657_s1 + $0x168] sm:$0xff]  ;;  %260 = vmatprep.mubr.f32.mxu0 %v21_v16  ;;  %v147_v23 = vld [vmem:[%s2657_s1 + $0x1f8] sm:$0xff]  ;;  %v1657_v26 = vpack.c.bf16 %v115_v21, %v114_v20  ;;  %v98_v27 = vld [vmem:[%s2657_s1 + $0x70] sm:$0xff] }
  0x16   :  { %1648 = vmatpush3.bf16.msra.mxu0 %v1647_v62  ;;  %v1687_v25 = vpack.c.bf16 %v129_v19, %v128_v15  ;;  %v99_v28 = vld [vmem:[%s2657_s1 + $0x78] sm:$0xff]  ;;  %v1689_v29 = vpack.c.bf16 %v147_v23, %v146_v22  ;;  %v130_v30 = vld [vmem:[%s2657_s1 + $0x170] sm:$0xff]  ;;  %v20_v34 = vld [vmem:[%s2658_s0] sm:$0xff] }
  0x17   :  { %1680 = vmatpush3.bf16.msra.mxu1 %v1679_v63  ;;  %1650 = vmatprep.subr.bf16.mxu0 %v1649_v0  ;;  %v131_v31 = vld [vmem:[%s2657_s1 + $0x178] sm:$0xff]  ;;  %v1659_v32 = vpack.c.bf16 %v99_v28, %v98_v27  ;;  %v22_v35 = vld [vmem:[%s2658_s0 + $0x10] sm:$0xff]  ;;  %v25_v36 = vld [vmem:[%s2658_s0 + $0x28] sm:$0xff] }
  0x18   :  { %1682 = vmatprep.subr.bf16.mxu1 %v1681_v4  ;;  %v1691_v33 = vpack.c.bf16 %v131_v31, %v130_v30  ;;  %v27_v37 = vld [vmem:[%s2658_s0 + $0x38] sm:$0xff]  ;;  %v24_v38 = vld [vmem:[%s2658_s0 + $0x20] sm:$0xff]  ;;  %v26_v39 = vld [vmem:[%s2658_s0 + $0x30] sm:$0xff] }
  0x19   :  { %v29_v40 = vld [vmem:[%s2658_s0 + $0x48] sm:$0xff]  ;;  %v31_v41 = vld [vmem:[%s2658_s0 + $0x58] sm:$0xff]  ;;  %v28_v42 = vld [vmem:[%s2658_s0 + $0x40] sm:$0xff] }
  0x1a   :  { %1652 = vmatpush3.bf16.msra.mxu0 %v1651_v10  ;;  %v30_v43 = vld [vmem:[%s2658_s0 + $0x50] sm:$0xff]  ;;  %v33_v44 = vld [vmem:[%s2658_s0 + $0x68] sm:$0xff]  ;;  %v35_v45 = vld [vmem:[%s2658_s0 + $0x78] sm:$0xff] }
  0x1b   :  { %1684 = vmatpush3.bf16.msra.mxu1 %v1683_v13  ;;  %1654 = vmatprep.subr.bf16.mxu0 %v1653_v14  ;;  %v32_v46 = vld [vmem:[%s2658_s0 + $0x60] sm:$0xff]  ;;  %v34_v47 = vld [vmem:[%s2658_s0 + $0x70] sm:$0xff]  ;;  %v37_v48 = vld [vmem:[%s2658_s0 + $0x88] sm:$0xff] }
  0x1c   :  { %1686 = vmatprep.subr.bf16.mxu1 %v1685_v18  ;;  %v39_v49 = vld [vmem:[%s2658_s0 + $0x98] sm:$0xff]  ;;  %v36_v50 = vld [vmem:[%s2658_s0 + $0x80] sm:$0xff]  ;;  %v38_v51 = vld [vmem:[%s2658_s0 + $0x90] sm:$0xff] }
  0x1d   :  { %v41_v52 = vld [vmem:[%s2658_s0 + $0xa8] sm:$0xff]  ;;  %v43_v53 = vld [vmem:[%s2658_s0 + $0xb8] sm:$0xff]  ;;  %v40_v54 = vld [vmem:[%s2658_s0 + $0xa0] sm:$0xff] }
  0x1e   :  { %1656 = vmatpush3.bf16.msra.mxu0 %v1655_v24  ;;  %v42_v55 = vld [vmem:[%s2658_s0 + $0xb0] sm:$0xff]  ;;  %v45_v56 = vld [vmem:[%s2658_s0 + $0xc8] sm:$0xff]  ;;  %v47_v57 = vld [vmem:[%s2658_s0 + $0xd8] sm:$0xff] }
  0x1f   :  { %1688 = vmatpush3.bf16.msra.mxu1 %v1687_v25  ;;  %1658 = vmatprep.subr.bf16.mxu0 %v1657_v26  ;;  %v44_v58 = vld [vmem:[%s2658_s0 + $0xc0] sm:$0xff]  ;;  %v46_v59 = vld [vmem:[%s2658_s0 + $0xd0] sm:$0xff]  ;;  %v49_v60 = vld [vmem:[%s2658_s0 + $0xe8] sm:$0xff] }
  0x20   :  { %1690 = vmatprep.subr.bf16.mxu1 %v1689_v29  ;;  %v51_v61 = vld [vmem:[%s2658_s0 + $0xf8] sm:$0xff]  ;;  %v48_v62 = vld [vmem:[%s2658_s0 + $0xe0] sm:$0xff]  ;;  %v50_v63 = vld [vmem:[%s2658_s0 + $0xf0] sm:$0xff] }
  0x21   :  { %v53_v0 = vld [vmem:[%s2658_s0 + $0x108] sm:$0xff]  ;;  %v55_v1 = vld [vmem:[%s2658_s0 + $0x118] sm:$0xff]  ;;  %v52_v2 = vld [vmem:[%s2658_s0 + $0x100] sm:$0xff] }
  0x22   :  { %1660 = vmatpush3.bf16.msra.mxu0 %v1659_v32  ;;  %v54_v3 = vld [vmem:[%s2658_s0 + $0x110] sm:$0xff]  ;;  %v57_v4 = vld [vmem:[%s2658_s0 + $0x128] sm:$0xff]  ;;  %v59_v5 = vld [vmem:[%s2658_s0 + $0x138] sm:$0xff] }
  0x23   :  { %1692 = vmatpush3.bf16.msra.mxu1 %v1691_v33  ;;  %v56_v6 = vld [vmem:[%s2658_s0 + $0x120] sm:$0xff]  ;;  %v58_v7 = vld [vmem:[%s2658_s0 + $0x130] sm:$0xff]  ;;  %v61_v8 = vld [vmem:[%s2658_s0 + $0x148] sm:$0xff] }
  0x24   :  { %v63_v9 = vld [vmem:[%s2658_s0 + $0x158] sm:$0xff]  ;;  %v60_v10 = vld [vmem:[%s2658_s0 + $0x140] sm:$0xff]  ;;  %v62_v11 = vld [vmem:[%s2658_s0 + $0x150] sm:$0xff] }
  0x25   :  { %261 = vmatmul.mubr.f32.vlgmr.msra.gmra.mrb[0].mxu0 %v20_v34  ;;  %v65_v12 = vld [vmem:[%s2658_s0 + $0x168] sm:$0xff]  ;;  %v67_v13 = vld [vmem:[%s2658_s0 + $0x178] sm:$0xff]  ;;  %v64_v14 = vld [vmem:[%s2658_s0 + $0x160] sm:$0xff] }
  0x26   :  { %406 = vmatmul.mubr.f32.vlgmr.msra.gmra.mrb[0].mxu1 %v22_v35  ;;  %265 = vmatprep.mubr.f32.mxu0 %v25_v36  ;;  %v66_v15 = vld [vmem:[%s2658_s0 + $0x170] sm:$0xff]  ;;  %v69_v16 = vld [vmem:[%s2658_s0 + $0x188] sm:$0xff]  ;;  %v71_v17 = vld [vmem:[%s2658_s0 + $0x198] sm:$0xff] }
  0x27   :  { %410 = vmatprep.mubr.f32.mxu1 %v27_v37  ;;  %v68_v18 = vld [vmem:[%s2658_s0 + $0x180] sm:$0xff]  ;;  %v70_v19 = vld [vmem:[%s2658_s0 + $0x190] sm:$0xff]  ;;  %v73_v20 = vld [vmem:[%s2658_s0 + $0x1a8] sm:$0xff] }
  0x28   :  { %v75_v21 = vld [vmem:[%s2658_s0 + $0x1b8] sm:$0xff]  ;;  %v72_v22 = vld [vmem:[%s2658_s0 + $0x1a0] sm:$0xff]  ;;  %v74_v23 = vld [vmem:[%s2658_s0 + $0x1b0] sm:$0xff] }
  0x29   :  { %266 = vmatmul.mubr.f32.gmra.mrb[2].mxu0 %v24_v38  ;;  %v77_v24 = vld [vmem:[%s2658_s0 + $0x1c8] sm:$0xff]  ;;  %v79_v25 = vld [vmem:[%s2658_s0 + $0x1d8] sm:$0xff]  ;;  %v76_v26 = vld [vmem:[%s2658_s0 + $0x1c0] sm:$0xff] }
  0x2a   :  { %411 = vmatmul.mubr.f32.gmra.mrb[2].mxu1 %v26_v39  ;;  %270 = vmatprep.mubr.f32.mxu0 %v29_v40  ;;  %v78_v27 = vld [vmem:[%s2658_s0 + $0x1d0] sm:$0xff]  ;;  %v81_v28 = vld [vmem:[%s2658_s0 + $0x1e8] sm:$0xff]  ;;  %v83_v29 = vld [vmem:[%s2658_s0 + $0x1f8] sm:$0xff] }
  0x2b   :  { %415 = vmatprep.mubr.f32.mxu1 %v31_v41  ;;  %v80_v30 = vld [vmem:[%s2658_s0 + $0x1e0] sm:$0xff]  ;;  %v82_v31 = vld [vmem:[%s2658_s0 + $0x1f0] sm:$0xff] }
  0x2d   :  { %271 = vmatmul.mubr.f32.gmra.mrb[4].mxu0 %v28_v42 }
  0x2e   :  { %416 = vmatmul.mubr.f32.gmra.mrb[4].mxu1 %v30_v43  ;;  %275 = vmatprep.mubr.f32.mxu0 %v33_v44 }
  0x2f   :  { %420 = vmatprep.mubr.f32.mxu1 %v35_v45 }
  0x31   :  { %276 = vmatmul.mubr.f32.gmra.mrb[6].mxu0 %v32_v46 }
  0x32   :  { %421 = vmatmul.mubr.f32.gmra.mrb[6].mxu1 %v34_v47  ;;  %280 = vmatprep.mubr.f32.mxu0 %v37_v48 }
  0x33   :  { %425 = vmatprep.mubr.f32.mxu1 %v39_v49 }
  0x35   :  { %281 = vmatmul.mubr.f32.gmra.mrb[8].mxu0 %v36_v50 }
  0x36   :  { %426 = vmatmul.mubr.f32.gmra.mrb[8].mxu1 %v38_v51  ;;  %285 = vmatprep.mubr.f32.mxu0 %v41_v52 }
  0x37   :  { %430 = vmatprep.mubr.f32.mxu1 %v43_v53 }
  0x39   :  { %286 = vmatmul.mubr.f32.gmra.mrb[10].mxu0 %v40_v54 }
  0x3a   :  { %431 = vmatmul.mubr.f32.gmra.mrb[10].mxu1 %v42_v55  ;;  %290 = vmatprep.mubr.f32.mxu0 %v45_v56 }
  0x3b   :  { %435 = vmatprep.mubr.f32.mxu1 %v47_v57 }
  0x3d   :  { %291 = vmatmul.mubr.f32.gmra.mrb[12].mxu0 %v44_v58 }
  0x3e   :  { %436 = vmatmul.mubr.f32.gmra.mrb[12].mxu1 %v46_v59  ;;  %295 = vmatprep.mubr.f32.mxu0 %v49_v60 }
  0x3f   :  { %440 = vmatprep.mubr.f32.mxu1 %v51_v61 }
  0x41   :  { %296 = vmatmul.mubr.f32.gmra.mrb[14].mxu0 %v48_v62 }
  0x42   :  { %441 = vmatmul.mubr.f32.gmra.mrb[14].mxu1 %v50_v63  ;;  %300 = vmatprep.mubr.f32.mxu0 %v53_v0 }
  0x43   :  { %445 = vmatprep.mubr.f32.mxu1 %v55_v1 }
  0x45   :  { %301 = vmatmul.mubr.f32.gmra.mrb[16].mxu0 %v52_v2 }
  0x46   :  { %446 = vmatmul.mubr.f32.gmra.mrb[16].mxu1 %v54_v3  ;;  %305 = vmatprep.mubr.f32.mxu0 %v57_v4 }
  0x47   :  { %450 = vmatprep.mubr.f32.mxu1 %v59_v5 }
  0x49   :  { %306 = vmatmul.mubr.f32.gmra.mrb[18].mxu0 %v56_v6 }
  0x4a   :  { %451 = vmatmul.mubr.f32.gmra.mrb[18].mxu1 %v58_v7  ;;  %310 = vmatprep.mubr.f32.mxu0 %v61_v8 }
  0x4b   :  { %455 = vmatprep.mubr.f32.mxu1 %v63_v9 }
  0x4d   :  { %311 = vmatmul.mubr.f32.gmra.mrb[20].mxu0 %v60_v10 }
  0x4e   :  { %456 = vmatmul.mubr.f32.gmra.mrb[20].mxu1 %v62_v11  ;;  %315 = vmatprep.mubr.f32.mxu0 %v65_v12 }
  0x4f   :  { %460 = vmatprep.mubr.f32.mxu1 %v67_v13 }
  0x51   :  { %316 = vmatmul.mubr.f32.gmra.mrb[22].mxu0 %v64_v14 }
  0x52   :  { %461 = vmatmul.mubr.f32.gmra.mrb[22].mxu1 %v66_v15  ;;  %320 = vmatprep.mubr.f32.mxu0 %v69_v16 }
  0x53   :  { %465 = vmatprep.mubr.f32.mxu1 %v71_v17 }
  0x55   :  { %321 = vmatmul.mubr.f32.gmra.mrb[24].mxu0 %v68_v18 }
  0x56   :  { %466 = vmatmul.mubr.f32.gmra.mrb[24].mxu1 %v70_v19  ;;  %325 = vmatprep.mubr.f32.mxu0 %v73_v20 }
  0x57   :  { %470 = vmatprep.mubr.f32.mxu1 %v75_v21 }
  0x59   :  { %326 = vmatmul.mubr.f32.gmra.mrb[26].mxu0 %v72_v22 }
  0x5a   :  { %471 = vmatmul.mubr.f32.gmra.mrb[26].mxu1 %v74_v23  ;;  %330 = vmatprep.mubr.f32.mxu0 %v77_v24 }
  0x5b   :  { %475 = vmatprep.mubr.f32.mxu1 %v79_v25 }
  0x5d   :  { %331 = vmatmul.mubr.f32.gmra.mrb[28].mxu0 %v76_v26 }
  0x5e   :  { %476 = vmatmul.mubr.f32.gmra.mrb[28].mxu1 %v78_v27  ;;  %335 = vmatprep.mubr.f32.mxu0 %v81_v28 }
  0x5f   :  { %480 = vmatprep.mubr.f32.mxu1 %v83_v29 }
  0x61   :  { %336 = vmatmul.mubr.f32.gmra.mrb[30].mxu0 %v80_v30 }
  0x62   :  { %481 = vmatmul.mubr.f32.gmra.mrb[30].mxu1 %v82_v31 }
  0xf8   :  { %v1325_v32 = vpop.f32.mrb[0].mxu0 }
  0xf9   :  { %v1405_v33 = vpop.f32.mrb[0].mxu1  ;;  %v1326_v34 = vpop.f32.mrb[1].mxu0 }
  0xfa   :  { %v1327_v35 = vadd.f32 %v1326_v34, %v1325_v32  ;;  %v1406_v36 = vpop.f32.mrb[1].mxu1 }
  0xfb   :  { %v1407_v37 = vadd.f32 %v1406_v36, %v1405_v33 }
  0xfc   :  { %v1328_v38 = vpop.f32.mrb[2].mxu0 }
  0xfd   :  { %v1408_v39 = vpop.f32.mrb[2].mxu1  ;;  %v1329_v40 = vpop.f32.mrb[3].mxu0  ;;  %v2207_v41 = vadd.f32 %v1407_v37, %v1327_v35 }
  0xfe   :  { %v1330_v42 = vadd.f32 %v1329_v40, %v1328_v38  ;;  %v1409_v43 = vpop.f32.mrb[3].mxu1 }
  0xff   :  { %v1410_v44 = vadd.f32 %v1409_v43, %v1408_v39  ;;  %v487_v45 = vsel %vm486_vm0, %v2207_v41, 0.0 }
 0x100   :  { %488 = vadd.xlane.f32.xlu0 %v487_v45  ;;  %v1331_v46 = vpop.f32.mrb[4].mxu0 }
 0x101   :  { %v1411_v47 = vpop.f32.mrb[4].mxu1  ;;  %v1332_v48 = vpop.f32.mrb[5].mxu0  ;;  %v2211_v49 = vadd.f32 %v1410_v44, %v1330_v42 }
 0x102   :  { %v1333_v50 = vadd.f32 %v1332_v48, %v1331_v46  ;;  %v1412_v51 = vpop.f32.mrb[5].mxu1 }
 0x103   :  { %v1413_v52 = vadd.f32 %v1412_v51, %v1411_v47  ;;  %v490_v53 = vsel %vm486_vm0, %v2211_v49, 0.0 }
 0x104   :  { %491 = vadd.xlane.f32.xlu0 %v490_v53  ;;  %v1334_v54 = vpop.f32.mrb[6].mxu0 }
 0x105   :  { %v1414_v55 = vpop.f32.mrb[6].mxu1  ;;  %v1335_v56 = vpop.f32.mrb[7].mxu0  ;;  %v2215_v57 = vadd.f32 %v1413_v52, %v1333_v50 }
 0x106   :  { %v1336_v58 = vadd.f32 %v1335_v56, %v1334_v54  ;;  %v1415_v59 = vpop.f32.mrb[7].mxu1 }
 0x107   :  { %v1416_v60 = vadd.f32 %v1415_v59, %v1414_v55  ;;  %v493_v61 = vsel %vm486_vm0, %v2215_v57, 0.0 }
 0x108   :  { %494 = vadd.xlane.f32.xlu1 %v493_v61  ;;  %v1337_v62 = vpop.f32.mrb[8].mxu0 }
 0x109   :  { %v1417_v63 = vpop.f32.mrb[8].mxu1  ;;  %v1338_v0 = vpop.f32.mrb[9].mxu0  ;;  %v2219_v1 = vadd.f32 %v1416_v60, %v1336_v58 }
 0x10a   :  { %v1339_v2 = vadd.f32 %v1338_v0, %v1337_v62  ;;  %v1418_v3 = vpop.f32.mrb[9].mxu1 }
 0x10b   :  { %v1419_v4 = vadd.f32 %v1418_v3, %v1417_v63  ;;  %v496_v5 = vsel %vm486_vm0, %v2219_v1, 0.0 }
 0x10c   :  { %497 = vadd.xlane.f32.xlu1 %v496_v5  ;;  %v1340_v6 = vpop.f32.mrb[10].mxu0 }
 0x10d   :  { %v1420_v7 = vpop.f32.mrb[10].mxu1  ;;  %v1341_v8 = vpop.f32.mrb[11].mxu0  ;;  %v2223_v9 = vadd.f32 %v1419_v4, %v1339_v2 }
 0x10e   :  { %v1342_v10 = vadd.f32 %v1341_v8, %v1340_v6  ;;  %v1421_v11 = vpop.f32.mrb[11].mxu1 }
 0x10f   :  { %v1422_v12 = vadd.f32 %v1421_v11, %v1420_v7  ;;  %v499_v13 = vsel %vm486_vm0, %v2223_v9, 0.0 }
 0x110   :  { %500 = vadd.xlane.f32.xlu0 %v499_v13  ;;  %v1343_v14 = vpop.f32.mrb[12].mxu0 }
 0x111   :  { %v1423_v15 = vpop.f32.mrb[12].mxu1  ;;  %v1344_v16 = vpop.f32.mrb[13].mxu0  ;;  %v2227_v17 = vadd.f32 %v1422_v12, %v1342_v10 }
 0x112   :  { %v1345_v18 = vadd.f32 %v1344_v16, %v1343_v14  ;;  %v1424_v19 = vpop.f32.mrb[13].mxu1 }
 0x113   :  { %v1425_v20 = vadd.f32 %v1424_v19, %v1423_v15  ;;  %v502_v21 = vsel %vm486_vm0, %v2227_v17, 0.0 }
 0x114   :  { %503 = vadd.xlane.f32.xlu1 %v502_v21  ;;  %v1346_v22 = vpop.f32.mrb[14].mxu0 }
 0x115   :  { %v1426_v23 = vpop.f32.mrb[14].mxu1  ;;  %v1347_v24 = vpop.f32.mrb[15].mxu0  ;;  %v2231_v25 = vadd.f32 %v1425_v20, %v1345_v18 }
 0x116   :  { %v1348_v26 = vadd.f32 %v1347_v24, %v1346_v22  ;;  %v1427_v27 = vpop.f32.mrb[15].mxu1 }
 0x117   :  { %v1428_v28 = vadd.f32 %v1427_v27, %v1426_v23  ;;  %v505_v29 = vsel %vm486_vm0, %v2231_v25, 0.0 }
 0x118   :  { %506 = vadd.xlane.f32.xlu0 %v505_v29  ;;  %v1349_v30 = vpop.f32.mrb[16].mxu0 }
 0x119   :  { %v1429_v31 = vpop.f32.mrb[16].mxu1  ;;  %v1350_v32 = vpop.f32.mrb[17].mxu0  ;;  %v2235_v33 = vadd.f32 %v1428_v28, %v1348_v26 }
 0x11a   :  { %v1351_v34 = vadd.f32 %v1350_v32, %v1349_v30  ;;  %v1430_v35 = vpop.f32.mrb[17].mxu1 }
 0x11b   :  { %v1431_v36 = vadd.f32 %v1430_v35, %v1429_v31  ;;  %v508_v37 = vsel %vm486_vm0, %v2235_v33, 0.0 }
 0x11c   :  { %509 = vadd.xlane.f32.xlu1 %v508_v37  ;;  %v1352_v38 = vpop.f32.mrb[18].mxu0 }
 0x11d   :  { %v1432_v39 = vpop.f32.mrb[18].mxu1  ;;  %v1353_v40 = vpop.f32.mrb[19].mxu0  ;;  %v2239_v42 = vadd.f32 %v1431_v36, %v1351_v34 }
 0x11e   :  { %v1354_v43 = vadd.f32 %v1353_v40, %v1352_v38  ;;  %v1433_v44 = vpop.f32.mrb[19].mxu1  ;;  %v148_v40 = vld [vmem:[%s2659_s2] sm:$0xff] }
 0x11f   :  { %v1434_v45 = vadd.f32 %v1433_v44, %v1432_v39  ;;  %v511_v46 = vsel %vm486_vm0, %v2239_v42, 0.0  ;;  %1549 = vmatprep.mubr.f32.mxu0 %v148_v40  ;;  %1605 = vmatprep.mubr.f32.mxu1 %v148_v40 }
 0x120   :  { %512 = vadd.xlane.f32.xlu0 %v511_v46  ;;  %v1355_v47 = vpop.f32.mrb[20].mxu0 }
 0x121   :  { %v1435_v48 = vpop.f32.mrb[20].mxu1  ;;  %v1356_v50 = vpop.f32.mrb[21].mxu0  ;;  %v2243_v51 = vadd.f32 %v1434_v45, %v1354_v43 }
 0x122   :  { %v1357_v52 = vadd.f32 %v1356_v50, %v1355_v47  ;;  %v1436_v53 = vpop.f32.mrb[21].mxu1 }
 0x123   :  { %v1437_v54 = vadd.f32 %v1436_v53, %v1435_v48  ;;  %v514_v55 = vsel %vm486_vm0, %v2243_v51, 0.0 }
 0x124   :  { %515 = vadd.xlane.f32.xlu1 %v514_v55  ;;  %v1358_v56 = vpop.f32.mrb[22].mxu0 }
 0x125   :  { %v1438_v58 = vpop.f32.mrb[22].mxu1  ;;  %v1359_v59 = vpop.f32.mrb[23].mxu0  ;;  %v2247_v60 = vadd.f32 %v1437_v54, %v1357_v52 }
 0x126   :  { %v1360_v61 = vadd.f32 %v1359_v59, %v1358_v56  ;;  %v1439_v62 = vpop.f32.mrb[23].mxu1 }
 0x127   :  { %v1440_v63 = vadd.f32 %v1439_v62, %v1438_v58  ;;  %v517_v0 = vsel %vm486_vm0, %v2247_v60, 0.0 }
 0x128   :  { %518 = vadd.xlane.f32.xlu0 %v517_v0  ;;  %v1361_v2 = vpop.f32.mrb[24].mxu0 }
 0x129   :  { %v1441_v3 = vpop.f32.mrb[24].mxu1  ;;  %v1362_v4 = vpop.f32.mrb[25].mxu0  ;;  %v2251_v5 = vadd.f32 %v1440_v63, %v1360_v61 }
 0x12a   :  { %v1363_v6 = vadd.f32 %v1362_v4, %v1361_v2  ;;  %v1442_v7 = vpop.f32.mrb[25].mxu1 }
 0x12b   :  { %v1443_v8 = vadd.f32 %v1442_v7, %v1441_v3  ;;  %v520_v10 = vsel %vm486_vm0, %v2251_v5, 0.0 }
 0x12c   :  { %521 = vadd.xlane.f32.xlu1 %v520_v10  ;;  %v1364_v11 = vpop.f32.mrb[26].mxu0  ;;  %v2277_v10 = vld [vmem:[%s2659_s2 + $0x8] sm:$0xff] }
 0x12d   :  { %v1444_v12 = vpop.f32.mrb[26].mxu1  ;;  %v1365_v13 = vpop.f32.mrb[27].mxu0  ;;  %v2255_v14 = vadd.f32 %v1443_v8, %v1363_v6 }
 0x12e   :  { %v1366_v15 = vadd.f32 %v1365_v13, %v1364_v11  ;;  %v1445_v16 = vpop.f32.mrb[27].mxu1  ;;  %v2282_v11 = vld [vmem:[%s2659_s2 + $0x10] sm:$0xff]  ;;  %v2294_v13 = vld [vmem:[%s2659_s2 + $0x20] sm:$0xff] }
 0x12f   :  { %v1446_v18 = vadd.f32 %v1445_v16, %v1444_v12  ;;  %v523_v19 = vsel %vm486_vm0, %v2255_v14, 0.0  ;;  %v2289_v12 = vld [vmem:[%s2659_s2 + $0x18] sm:$0xff]  ;;  %v2306_v16 = vld [vmem:[%s2659_s2 + $0x30] sm:$0xff] }
 0x130   :  { %524 = vadd.xlane.f32.xlu0 %v523_v19  ;;  %v1367_v20 = vpop.f32.mrb[28].mxu0  ;;  %v2318_v19 = vld [vmem:[%s2659_s2 + $0x40] sm:$0xff] }
 0x131   :  { %v1447_v21 = vpop.f32.mrb[28].mxu1  ;;  %v1368_v22 = vpop.f32.mrb[29].mxu0  ;;  %v2259_v23 = vadd.f32 %v1446_v18, %v1366_v15  ;;  %v2301_v15 = vld [vmem:[%s2659_s2 + $0x28] sm:$0xff]  ;;  %v2313_v18 = vld [vmem:[%s2659_s2 + $0x38] sm:$0xff] }
 0x132   :  { %v1369_v24 = vadd.f32 %v1368_v22, %v1367_v20  ;;  %v1448_v26 = vpop.f32.mrb[29].mxu1  ;;  %v2325_v20 = vld [vmem:[%s2659_s2 + $0x48] sm:$0xff]  ;;  %v2337_v22 = vld [vmem:[%s2659_s2 + $0x58] sm:$0xff] }
 0x133   :  { %v1449_v27 = vadd.f32 %v1448_v26, %v1447_v21  ;;  %v526_v28 = vsel %vm486_vm0, %v2259_v23, 0.0  ;;  %v2330_v21 = vld [vmem:[%s2659_s2 + $0x50] sm:$0xff]  ;;  %v2349_v26 = vld [vmem:[%s2659_s2 + $0x68] sm:$0xff] }
 0x134   :  { %527 = vadd.xlane.f32.xlu1 %v526_v28  ;;  %v1370_v29 = vpop.f32.mrb[30].mxu0  ;;  %v2361_v28 = vld [vmem:[%s2659_s2 + $0x78] sm:$0xff] }
 0x135   :  { %v1450_v30 = vpop.f32.mrb[30].mxu1  ;;  %v1371_v31 = vpop.f32.mrb[31].mxu0  ;;  %v2263_v32 = vadd.f32 %v1449_v27, %v1369_v24  ;;  %v2342_v24 = vld [vmem:[%s2659_s2 + $0x60] sm:$0xff]  ;;  %v2354_v27 = vld [vmem:[%s2659_s2 + $0x70] sm:$0xff] }
 0x136   :  { %v1372_v34 = vadd.f32 %v1371_v31, %v1370_v29  ;;  %v1451_v35 = vpop.f32.mrb[31].mxu1  ;;  %v1792_v29 = vmov 0  }
 0x137   :  { %v1452_v36 = vadd.f32 %v1451_v35, %v1450_v30  ;;  %v529_v37 = vsel %vm486_vm0, %v2263_v32, 0.0  ;;  %1759 = vset.pattern.permute.xlu1 %v1792_v29  ;;  %1758 = vset.pattern.permute.xlu0 %v1792_v29 }
 0x138   :  { %530 = vadd.xlane.f32.xlu0 %v529_v37 }
 0x139   :  { %v2267_v38 = vadd.f32 %v1452_v36, %v1372_v34 }
 0x13b   :  { %v532_v39 = vsel %vm486_vm0, %v2267_v38, 0.0 }
 0x13c   :  { %533 = vadd.xlane.f32.xlu1 %v532_v39 }
 0x18d   :  { %v489_v43 = vpop.xlane.xlu0 %488 }
 0x191   :  { %v492_v44 = vpop.xlane.xlu0 %491 }
 0x192   :  { %v1693_v45 = vpack.c.bf16 %v492_v44, %v489_v43 }
 0x194   :  { %1694 = vmatprep.subr.bf16.mxu0 %v1693_v45 }
 0x195   :  { %v495_v46 = vpop.xlane.xlu1 %494  ;;  %1696 = vmatpush3.bf16.msra.mxu0 %v1693_v45 }
 0x199   :  { %v498_v47 = vpop.xlane.xlu1 %497 }
 0x19a   :  { %v1697_v48 = vpack.c.bf16 %v498_v47, %v495_v46 }
 0x19c   :  { %1698 = vmatprep.subr.bf16.mxu0 %v1697_v48 }
 0x19d   :  { %1700 = vmatpush3.bf16.msra.mxu0 %v1697_v48  ;;  %v501_v50 = vpop.xlane.xlu0 %500 }
 0x1a1   :  { %v504_v52 = vpop.xlane.xlu1 %503 }
 0x1a2   :  { %v1701_v53 = vpack.c.bf16 %v504_v52, %v501_v50 }
 0x1a4   :  { %1702 = vmatprep.subr.bf16.mxu0 %v1701_v53 }
 0x1a5   :  { %1704 = vmatpush3.bf16.msra.mxu0 %v1701_v53  ;;  %v507_v54 = vpop.xlane.xlu0 %506 }
 0x1a9   :  { %v510_v55 = vpop.xlane.xlu1 %509 }
 0x1aa   :  { %v1705_v56 = vpack.c.bf16 %v510_v55, %v507_v54 }
 0x1ac   :  { %1706 = vmatprep.subr.bf16.mxu0 %v1705_v56 }
 0x1ad   :  { %1708 = vmatpush3.bf16.msra.mxu0 %v1705_v56  ;;  %v513_v58 = vpop.xlane.xlu0 %512 }
 0x1b1   :  { %v516_v59 = vpop.xlane.xlu1 %515 }
 0x1b2   :  { %v1709_v61 = vpack.c.bf16 %v516_v59, %v513_v58 }
 0x1b4   :  { %1710 = vmatprep.subr.bf16.mxu0 %v1709_v61 }
 0x1b5   :  { %1712 = vmatpush3.bf16.msra.mxu0 %v1709_v61  ;;  %v519_v62 = vpop.xlane.xlu0 %518 }
 0x1b9   :  { %v522_v63 = vpop.xlane.xlu1 %521 }
 0x1ba   :  { %v1713_v0 = vpack.c.bf16 %v522_v63, %v519_v62 }
 0x1bc   :  { %1714 = vmatprep.subr.bf16.mxu0 %v1713_v0 }
 0x1bd   :  { %1716 = vmatpush3.bf16.msra.mxu0 %v1713_v0  ;;  %v525_v2 = vpop.xlane.xlu0 %524 }
 0x1c1   :  { %v528_v3 = vpop.xlane.xlu1 %527 }
 0x1c2   :  { %v1717_v4 = vpack.c.bf16 %v528_v3, %v525_v2 }
 0x1c4   :  { %1718 = vmatprep.subr.bf16.mxu0 %v1717_v4 }
 0x1c5   :  { %1720 = vmatpush3.bf16.msra.mxu0 %v1717_v4  ;;  %v531_v6 = vpop.xlane.xlu0 %530 }
 0x1c9   :  { %v534_v7 = vpop.xlane.xlu1 %533 }
 0x1ca   :  { %v1721_v8 = vpack.c.bf16 %v534_v7, %v531_v6 }
 0x1cc   :  { %1722 = vmatprep.subr.bf16.mxu0 %v1721_v8 }
 0x1cd   :  { %1724 = vmatpush3.bf16.msra.mxu0 %v1721_v8 }
 0x1d0   :  { %1550 = vmatmul.mubr.f32.vlgmr.msra.gmra.mrb[32].mxu0 %v2277_v10 }
 0x1d1   :  { %1552 = vmatprep.mubr.f32.mxu0 %v2282_v11 }
 0x1d4   :  { %1553 = vmatmul.mubr.f32.gmra.mrb[34].mxu0 %v2289_v12 }
 0x1d5   :  { %1555 = vmatprep.mubr.f32.mxu0 %v2294_v13 }
 0x1d8   :  { %1556 = vmatmul.mubr.f32.gmra.mrb[36].mxu0 %v2301_v15 }
 0x1d9   :  { %1558 = vmatprep.mubr.f32.mxu0 %v2306_v16 }
 0x1dc   :  { %1559 = vmatmul.mubr.f32.gmra.mrb[38].mxu0 %v2313_v18 }
 0x1dd   :  { %1561 = vmatprep.mubr.f32.mxu0 %v2318_v19 }
 0x1e0   :  { %1562 = vmatmul.mubr.f32.gmra.mrb[40].mxu0 %v2325_v20 }
 0x1e1   :  { %1564 = vmatprep.mubr.f32.mxu0 %v2330_v21 }
 0x1e4   :  { %1565 = vmatmul.mubr.f32.gmra.mrb[42].mxu0 %v2337_v22 }
 0x1e5   :  { %1567 = vmatprep.mubr.f32.mxu0 %v2342_v24 }
 0x1e8   :  { %1568 = vmatmul.mubr.f32.gmra.mrb[44].mxu0 %v2349_v26 }
 0x1e9   :  { %1570 = vmatprep.mubr.f32.mxu0 %v2354_v27 }
 0x1ec   :  { %1571 = vmatmul.mubr.f32.gmra.mrb[46].mxu0 %v2361_v28 }
 0x2a3   :  { %v1551_v30 = vpop.f32.mrb[32].mxu0 }
 0x2a4   :  { %v681_v31 = vmul.f32 0.0078125, %v1551_v30  ;;  %v601_v34 = vpop.f32.mrb[33].mxu0 }
 0x2a5   :  { %v680_v35 = vmul.f32 0.0078125, %v601_v34 }
 0x2a6   :  { %703 = vperm.xlu1 %1759, %v681_v31  }
 0x2a7   :  { %698 = vperm.xlu0 %1758, %v680_v35   ;;  %v1554_v36 = vpop.f32.mrb[34].mxu0 }
 0x2a8   :  { %v683_v37 = vmul.f32 0.0078125, %v1554_v36  ;;  %v611_v39 = vpop.f32.mrb[35].mxu0 }
 0x2a9   :  { %v682_v43 = vmul.f32 0.0078125, %v611_v39 }
 0x2aa   :  { %713 = vperm.xlu1 %1759, %v683_v37  }
 0x2ab   :  { %v1557_v40 = vpop.f32.mrb[36].mxu0 }
 0x2ac   :  { %v621_v44 = vpop.f32.mrb[37].mxu0  ;;  %v685_v45 = vmul.f32 0.0078125, %v1557_v40 }
 0x2ad   :  { %v684_v50 = vmul.f32 0.0078125, %v621_v44 }
 0x2ae   :  { %708 = vperm.xlu1 %1759, %v682_v43  }
 0x2af   :  { %v1560_v46 = vpop.f32.mrb[38].mxu0 }
 0x2b0   :  { %v631_v47 = vpop.f32.mrb[39].mxu0  ;;  %v687_v54 = vmul.f32 0.0078125, %v1560_v46 }
 0x2b1   :  { %v686_v61 = vmul.f32 0.0078125, %v631_v47 }
 0x2b2   :  { %723 = vperm.xlu1 %1759, %v685_v45  }
 0x2b3   :  { %v1563_v48 = vpop.f32.mrb[40].mxu0 }
 0x2b4   :  { %v689_v52 = vmul.f32 0.0078125, %v1563_v48  ;;  %v641_v53 = vpop.f32.mrb[41].mxu0 }
 0x2b5   :  { %v688_v0 = vmul.f32 0.0078125, %v641_v53 }
 0x2b6   :  { %718 = vperm.xlu1 %1759, %v684_v50   ;;  %743 = vperm.xlu0 %1758, %v689_v52  }
 0x2b7   :  { %v1566_v55 = vpop.f32.mrb[42].mxu0 }
 0x2b8   :  { %v691_v56 = vmul.f32 0.0078125, %v1566_v55  ;;  %v651_v58 = vpop.f32.mrb[43].mxu0 }
 0x2b9   :  { %v690_v6 = vmul.f32 0.0078125, %v651_v58 }
 0x2ba   :  { %733 = vperm.xlu1 %1759, %v687_v54   ;;  %753 = vperm.xlu0 %1758, %v691_v56  }
 0x2bb   :  { %v1569_v59 = vpop.f32.mrb[44].mxu0 }
 0x2bc   :  { %v693_v62 = vmul.f32 0.0078125, %v1569_v59  ;;  %v661_v63 = vpop.f32.mrb[45].mxu0 }
 0x2bd   :  { %v692_v7 = vmul.f32 0.0078125, %v661_v63 }
 0x2be   :  { %728 = vperm.xlu1 %1759, %v686_v61   ;;  %763 = vperm.xlu0 %1758, %v693_v62  }
 0x2bf   :  { %v1572_v2 = vpop.f32.mrb[46].mxu0 }
 0x2c0   :  { %v695_v3 = vmul.f32 0.0078125, %v1572_v2  ;;  %v671_v4 = vpop.f32.mrb[47].mxu0 }
 0x2c1   :  { %v694_v8 = vmul.f32 0.0078125, %v671_v4 }
 0x2c2   :  { %738 = vperm.xlu1 %1759, %v688_v0   ;;  %773 = vperm.xlu0 %1758, %v695_v3  }
 0x2c6   :  { %748 = vperm.xlu1 %1759, %v690_v6  }
 0x2ca   :  { %758 = vperm.xlu1 %1759, %v692_v7  }
 0x2ce   :  { %768 = vperm.xlu1 %1759, %v694_v8  }
 0x325   :  { %v704_v29 = vpop.permute.xlu1 %703 }
 0x326   :  { %v2365_v30 = vsub.f32 %v2211_v49, %v704_v29  ;;  %v699_v31 = vpop.permute.xlu0 %698 }
 0x327   :  { %v2368_v34 = vsub.f32 %v2207_v41, %v699_v31 }
 0x328   :  { %v793_v35 = vmul.f32 %v2365_v30, %v2365_v30 }
 0x329   :  { %v714_v36 = vpop.permute.xlu1 %713  ;;  %v792_v37 = vmul.f32 %v2368_v34, %v2368_v34 }
 0x32a   :  { %v2375_v39 = vsub.f32 %v2219_v1, %v714_v36  ;;  %v811_v40 = vsel %vm486_vm0, %v793_v35, 0.0 }
 0x32b   :  { %812 = vadd.xlane.f32.xlu0 %v811_v40  ;;  %v808_v49 = vsel %vm486_vm0, %v792_v37, 0.0 }
 0x32c   :  { %809 = vadd.xlane.f32.xlu1 %v808_v49  ;;  %v795_v41 = vmul.f32 %v2375_v39, %v2375_v39 }
 0x32d   :  { %v709_v43 = vpop.permute.xlu1 %708 }
 0x32e   :  { %v2382_v44 = vsub.f32 %v2215_v57, %v709_v43  ;;  %v817_v45 = vsel %vm486_vm0, %v795_v41, 0.0 }
 0x330   :  { %818 = vadd.xlane.f32.xlu1 %v817_v45  ;;  %v794_v1 = vmul.f32 %v2382_v44, %v2382_v44 }
 0x331   :  { %v724_v46 = vpop.permute.xlu1 %723 }
 0x332   :  { %v2388_v47 = vsub.f32 %v2227_v17, %v724_v46  ;;  %v814_v48 = vsel %vm486_vm0, %v794_v1, 0.0 }
 0x333   :  { %815 = vadd.xlane.f32.xlu0 %v814_v48 }
 0x334   :  { %v797_v50 = vmul.f32 %v2388_v47, %v2388_v47 }
 0x335   :  { %v719_v52 = vpop.permute.xlu1 %718  ;;  %v744_v53 = vpop.permute.xlu0 %743 }
 0x336   :  { %v2394_v57 = vsub.f32 %v2223_v9, %v719_v52  ;;  %v823_v54 = vsel %vm486_vm0, %v797_v50, 0.0  ;;  %v2400_v58 = vsub.f32 %v2243_v51, %v744_v53 }
 0x337   :  { %824 = vadd.xlane.f32.xlu1 %v823_v54  ;;  %v180_v54 = vld [vmem:[%s2660_s4] sm:$0xff] }
 0x338   :  { %v796_v55 = vmul.f32 %v2394_v57, %v2394_v57 }
 0x339   :  { %v734_v56 = vpop.permute.xlu1 %733  ;;  %v754_v17 = vpop.permute.xlu0 %753 }
 0x33a   :  { %v2403_v59 = vsub.f32 %v2235_v33, %v734_v56  ;;  %v820_v61 = vsel %vm486_vm0, %v796_v55, 0.0  ;;  %v2409_v62 = vsub.f32 %v2251_v5, %v754_v17  ;;  %v801_v33 = vmul.f32 %v2400_v58, %v2400_v58  ;;  %v184_v55 = vld [vmem:[%s2660_s4 + $0x20] sm:$0xff]  ;;  %v181_v56 = vld [vmem:[%s2660_s4 + $0x8] sm:$0xff]  ;;  %v186_v17 = vld [vmem:[%s2660_s4 + $0x30] sm:$0xff] }
 0x33b   :  { %821 = vadd.xlane.f32.xlu0 %v820_v61  ;;  %v183_v61 = vld [vmem:[%s2660_s4 + $0x18] sm:$0xff] }
 0x33c   :  { %v799_v9 = vmul.f32 %v2403_v59, %v2403_v59  ;;  %v803_v6 = vmul.f32 %v2409_v62, %v2409_v62  ;;  %v835_v8 = vsel %vm486_vm0, %v801_v33, 0.0  ;;  %v192_v33 = vld [vmem:[%s2660_s4 + $0x60] sm:$0xff] }
 0x33d   :  { %v729_v63 = vpop.permute.xlu1 %728  ;;  %v764_v0 = vpop.permute.xlu0 %763 }
 0x33e   :  { %v2412_v2 = vsub.f32 %v2231_v25, %v729_v63  ;;  %v829_v51 = vsel %vm486_vm0, %v799_v9, 0.0  ;;  %v2422_v5 = vsub.f32 %v2259_v23, %v764_v0  ;;  %v841_v36 = vsel %vm486_vm0, %v803_v6, 0.0  ;;  %v188_v9 = vld [vmem:[%s2660_s4 + $0x40] sm:$0xff]  ;;  %v185_v63 = vld [vmem:[%s2660_s4 + $0x28] sm:$0xff]  ;;  %v190_v0 = vld [vmem:[%s2660_s4 + $0x50] sm:$0xff] }
 0x33f   :  { %830 = vadd.xlane.f32.xlu1 %v829_v51  ;;  %v187_v51 = vld [vmem:[%s2660_s4 + $0x38] sm:$0xff]  ;;  %v193_v6 = vld [vmem:[%s2660_s4 + $0x68] sm:$0xff] }
 0x340   :  { %v798_v3 = vmul.f32 %v2412_v2, %v2412_v2  ;;  %v805_v40 = vmul.f32 %v2422_v5, %v2422_v5 }
 0x341   :  { %v739_v4 = vpop.permute.xlu1 %738  ;;  %v774_v29 = vpop.permute.xlu0 %773 }
 0x342   :  { %v2425_v7 = vsub.f32 %v2239_v42, %v739_v4  ;;  %v826_v25 = vsel %vm486_vm0, %v798_v3, 0.0  ;;  %v2433_v37 = vsub.f32 %v2267_v38, %v774_v29  ;;  %v847_v45 = vsel %vm486_vm0, %v805_v40, 0.0  ;;  %v189_v3 = vld [vmem:[%s2660_s4 + $0x48] sm:$0xff]  ;;  %v191_v4 = vld [vmem:[%s2660_s4 + $0x58] sm:$0xff] }
 0x343   :  { %827 = vadd.xlane.f32.xlu0 %v826_v25  ;;  %836 = vadd.xlane.f32.xlu1 %v835_v8 }
 0x344   :  { %v800_v31 = vmul.f32 %v2425_v7, %v2425_v7 }
 0x345   :  { %v749_v35 = vpop.permute.xlu1 %748 }
 0x346   :  { %v2436_v23 = vsub.f32 %v2247_v60, %v749_v35  ;;  %v832_v42 = vsel %vm486_vm0, %v800_v31, 0.0  ;;  %v807_v60 = vmul.f32 %v2433_v37, %v2433_v37 }
 0x347   :  { %833 = vadd.xlane.f32.xlu0 %v832_v42  ;;  %842 = vadd.xlane.f32.xlu1 %v841_v36 }
 0x348   :  { %v802_v49 = vmul.f32 %v2436_v23, %v2436_v23 }
 0x349   :  { %v759_v41 = vpop.permute.xlu1 %758 }
 0x34a   :  { %v2444_v43 = vsub.f32 %v2255_v14, %v759_v41  ;;  %v838_v38 = vsel %vm486_vm0, %v802_v49, 0.0  ;;  %v853_v14 = vsel %vm486_vm0, %v807_v60, 0.0 }
 0x34b   :  { %839 = vadd.xlane.f32.xlu0 %v838_v38  ;;  %848 = vadd.xlane.f32.xlu1 %v847_v45 }
 0x34c   :  { %v804_v1 = vmul.f32 %v2444_v43, %v2444_v43 }
 0x34d   :  { %v769_v46 = vpop.permute.xlu1 %768 }
 0x34e   :  { %v2453_v48 = vsub.f32 %v2263_v32, %v769_v46  ;;  %v844_v50 = vsel %vm486_vm0, %v804_v1, 0.0  ;;  %v182_v32 = vld [vmem:[%s2660_s4 + $0x10] sm:$0xff] }
 0x34f   :  { %845 = vadd.xlane.f32.xlu0 %v844_v50  ;;  %854 = vadd.xlane.f32.xlu1 %v853_v14 }
 0x350   :  { %v806_v52 = vmul.f32 %v2453_v48, %v2453_v48 }
 0x352   :  { %v850_v53 = vsel %vm486_vm0, %v806_v52, 0.0 }
 0x353   :  { %851 = vadd.xlane.f32.xlu0 %v850_v53 }
 0x360   :  { %1163 = vperm.xlu1 %1759, %v180_v54  }
 0x364   :  { %1173 = vperm.xlu1 %1759, %v182_v32  }
 0x368   :  { %1183 = vperm.xlu1 %1759, %v184_v55  }
 0x369   :  { %1168 = vperm.xlu0 %1758, %v181_v56  }
 0x36c   :  { %1193 = vperm.xlu1 %1759, %v186_v17  }
 0x36d   :  { %1178 = vperm.xlu0 %1758, %v183_v61  }
 0x370   :  { %1203 = vperm.xlu1 %1759, %v188_v9  }
 0x371   :  { %1188 = vperm.xlu0 %1758, %v185_v63  }
 0x374   :  { %1213 = vperm.xlu1 %1759, %v190_v0  }
 0x375   :  { %1198 = vperm.xlu0 %1758, %v187_v51  }
 0x378   :  { %1223 = vperm.xlu1 %1759, %v192_v33  }
 0x379   :  { %1208 = vperm.xlu0 %1758, %v189_v3   ;;  %v165_v3 = vld [vmem:[%s2661_s3 + $0x8] sm:$0xff] }
 0x37d   :  { %1218 = vperm.xlu0 %1758, %v191_v4  }
 0x381   :  { %1228 = vperm.xlu0 %1758, %v193_v6   ;;  %v164_v6 = vld [vmem:[%s2661_s3] sm:$0xff] }
 0x3b8   :  { %v813_v25 = vpop.xlane.xlu0 %812 }
 0x3b9   :  { %v810_v8 = vpop.xlane.xlu1 %809 }
 0x3ba   :  { %v1725_v29 = vpack.c.bf16 %v813_v25, %v810_v8 }
 0x3bc   :  { %1726 = vmatprep.subr.bf16.mxu1 %v1725_v29 }
 0x3bd   :  { %1728 = vmatpush3.bf16.msra.mxu1 %v1725_v29  ;;  %v819_v31 = vpop.xlane.xlu1 %818 }
 0x3c0   :  { %v816_v35 = vpop.xlane.xlu0 %815 }
 0x3c1   :  { %v1729_v36 = vpack.c.bf16 %v819_v31, %v816_v35 }
 0x3c3   :  { %1730 = vmatprep.subr.bf16.mxu1 %v1729_v36 }
 0x3c4   :  { %1732 = vmatpush3.bf16.msra.mxu1 %v1729_v36  ;;  %v825_v42 = vpop.xlane.xlu1 %824 }
 0x3c8   :  { %v822_v40 = vpop.xlane.xlu0 %821 }
 0x3c9   :  { %v1733_v49 = vpack.c.bf16 %v825_v42, %v822_v40 }
 0x3cb   :  { %1734 = vmatprep.subr.bf16.mxu1 %v1733_v49 }
 0x3cc   :  { %1736 = vmatpush3.bf16.msra.mxu1 %v1733_v49  ;;  %v831_v41 = vpop.xlane.xlu1 %830 }
 0x3d0   :  { %v828_v38 = vpop.xlane.xlu0 %827  ;;  %v837_v45 = vpop.xlane.xlu1 %836 }
 0x3d1   :  { %v1737_v60 = vpack.c.bf16 %v831_v41, %v828_v38  ;;  %v167_v41 = vld [vmem:[%s2661_s3 + $0x18] sm:$0xff] }
 0x3d3   :  { %1738 = vmatprep.subr.bf16.mxu1 %v1737_v60 }
 0x3d4   :  { %v834_v1 = vpop.xlane.xlu0 %833  ;;  %1740 = vmatpush3.bf16.msra.mxu1 %v1737_v60  ;;  %v843_v46 = vpop.xlane.xlu1 %842 }
 0x3d5   :  { %v1741_v50 = vpack.c.bf16 %v837_v45, %v834_v1  ;;  %v166_v45 = vld [vmem:[%s2661_s3 + $0x10] sm:$0xff] }
 0x3d7   :  { %1742 = vmatprep.subr.bf16.mxu1 %v1741_v50 }
 0x3d8   :  { %v840_v14 = vpop.xlane.xlu0 %839  ;;  %1744 = vmatpush3.bf16.msra.mxu1 %v1741_v50  ;;  %v849_v53 = vpop.xlane.xlu1 %848 }
 0x3d9   :  { %v1745_v52 = vpack.c.bf16 %v843_v46, %v840_v14 }
 0x3db   :  { %1746 = vmatprep.subr.bf16.mxu1 %v1745_v52 }
 0x3dc   :  { %v846_v54 = vpop.xlane.xlu0 %845  ;;  %1748 = vmatpush3.bf16.msra.mxu1 %v1745_v52  ;;  %v855_v55 = vpop.xlane.xlu1 %854 }
 0x3dd   :  { %v1749_v32 = vpack.c.bf16 %v849_v53, %v846_v54 }
 0x3df   :  { %1750 = vmatprep.subr.bf16.mxu1 %v1749_v32 }
 0x3e0   :  { %v852_v56 = vpop.xlane.xlu0 %851  ;;  %1752 = vmatpush3.bf16.msra.mxu1 %v1749_v32 }
 0x3e1   :  { %v1753_v17 = vpack.c.bf16 %v855_v55, %v852_v56  ;;  %v169_v55 = vld [vmem:[%s2661_s3 + $0x28] sm:$0xff] }
 0x3e3   :  { %1754 = vmatprep.subr.bf16.mxu1 %v1753_v17 }
 0x3e4   :  { %1756 = vmatpush3.bf16.msra.mxu1 %v1753_v17  ;;  %v168_v17 = vld [vmem:[%s2661_s3 + $0x20] sm:$0xff] }
 0x3e7   :  { %1606 = vmatmul.mubr.f32.vlgmr.msra.gmra.mrb[32].mxu1 %v2277_v10 }
 0x3e8   :  { %1608 = vmatprep.mubr.f32.mxu1 %v2282_v11 }
 0x3eb   :  { %1609 = vmatmul.mubr.f32.gmra.mrb[34].mxu1 %v2289_v12 }
 0x3ec   :  { %1611 = vmatprep.mubr.f32.mxu1 %v2294_v13 }
 0x3ef   :  { %1612 = vmatmul.mubr.f32.gmra.mrb[36].mxu1 %v2301_v15 }
 0x3f0   :  { %1614 = vmatprep.mubr.f32.mxu1 %v2306_v16 }
 0x3f3   :  { %1615 = vmatmul.mubr.f32.gmra.mrb[38].mxu1 %v2313_v18 }
 0x3f4   :  { %1617 = vmatprep.mubr.f32.mxu1 %v2318_v19 }
 0x3f7   :  { %1618 = vmatmul.mubr.f32.gmra.mrb[40].mxu1 %v2325_v20 }
 0x3f8   :  { %1620 = vmatprep.mubr.f32.mxu1 %v2330_v21 }
 0x3fb   :  { %1621 = vmatmul.mubr.f32.gmra.mrb[42].mxu1 %v2337_v22 }
 0x3fc   :  { %1623 = vmatprep.mubr.f32.mxu1 %v2342_v24 }
 0x3ff   :  { %1624 = vmatmul.mubr.f32.gmra.mrb[44].mxu1 %v2349_v26 }
 0x400   :  { %1626 = vmatprep.mubr.f32.mxu1 %v2354_v27 }
 0x403   :  { %1627 = vmatmul.mubr.f32.gmra.mrb[46].mxu1 %v2361_v28 }
 0x4ba   :  { %v1607_v10 = vpop.f32.mrb[32].mxu1 }
 0x4bb   :  { %v1002_v11 = vmul.f32 0.0078125, %v1607_v10  ;;  %v922_v12 = vpop.f32.mrb[33].mxu1 }
 0x4bc   :  { %v1001_v13 = vmul.f32 0.0078125, %v922_v12 }
 0x4bd   :  { %v1018_v15 = vadd.f32 1e-05, %v1002_v11 }
 0x4be   :  { %v1017_v16 = vadd.f32 1e-05, %v1001_v13  ;;  %v1610_v18 = vpop.f32.mrb[34].mxu1 }
 0x4bf   :  { %1760 = vrsqrt.f32 %v1018_v15  ;;  %v1004_v19 = vmul.f32 0.0078125, %v1610_v18  ;;  %v932_v20 = vpop.f32.mrb[35].mxu1 }
 0x4c0   :  { %1762 = vrsqrt.f32 %v1017_v16  ;;  %v1003_v21 = vmul.f32 0.0078125, %v932_v20 }
 0x4c1   :  { %v1020_v22 = vadd.f32 1e-05, %v1004_v19 }
 0x4c2   :  { %v1019_v24 = vadd.f32 1e-05, %v1003_v21  ;;  %v1613_v61 = vpop.f32.mrb[36].mxu1  ;;  %v171_v21 = vld [vmem:[%s2661_s3 + $0x38] sm:$0xff] }
 0x4c3   :  { %1764 = vrsqrt.f32 %v1020_v22  ;;  %v1006_v26 = vmul.f32 0.0078125, %v1613_v61  ;;  %v942_v27 = vpop.f32.mrb[37].mxu1 }
 0x4c4   :  { %1766 = vrsqrt.f32 %v1019_v24  ;;  %v1005_v28 = vmul.f32 0.0078125, %v942_v27  ;;  %v170_v24 = vld [vmem:[%s2661_s3 + $0x30] sm:$0xff] }
 0x4c5   :  { %v1022_v9 = vadd.f32 1e-05, %v1006_v26 }
 0x4c6   :  { %v1021_v63 = vadd.f32 1e-05, %v1005_v28  ;;  %v1616_v0 = vpop.f32.mrb[38].mxu1 }
 0x4c7   :  { %1768 = vrsqrt.f32 %v1022_v9  ;;  %v1008_v51 = vmul.f32 0.0078125, %v1616_v0  ;;  %v952_v33 = vpop.f32.mrb[39].mxu1 }
 0x4c8   :  { %1770 = vrsqrt.f32 %v1021_v63  ;;  %v1007_v4 = vmul.f32 0.0078125, %v952_v33 }
 0x4c9   :  { %v1761_v25 = vpop.eup %1760  ;;  %v1024_v8 = vadd.f32 1e-05, %v1008_v51 }
 0x4ca   :  { %v1763_v29 = vpop.eup %1762  ;;  %v1023_v31 = vadd.f32 1e-05, %v1007_v4  ;;  %v1619_v35 = vpop.f32.mrb[40].mxu1  ;;  %v1050_v36 = vmul.f32 %v1761_v25, %v165_v3  ;;  %v173_v3 = vld [vmem:[%s2661_s3 + $0x48] sm:$0xff] }
 0x4cb   :  { %1772 = vrsqrt.f32 %v1024_v8  ;;  %v1010_v42 = vmul.f32 0.0078125, %v1619_v35  ;;  %v962_v40 = vpop.f32.mrb[41].mxu1  ;;  %v1049_v49 = vmul.f32 %v1763_v29, %v164_v6  ;;  %v172_v6 = vld [vmem:[%s2661_s3 + $0x40] sm:$0xff] }
 0x4cc   :  { %1774 = vrsqrt.f32 %v1023_v31  ;;  %v1009_v38 = vmul.f32 0.0078125, %v962_v40  ;;  %1072 = vperm.xlu1 %1759, %v1050_v36   ;;  %v174_v40 = vld [vmem:[%s2661_s3 + $0x50] sm:$0xff] }
 0x4cd   :  { %v1765_v60 = vpop.eup %1764  ;;  %v1026_v1 = vadd.f32 1e-05, %v1010_v42  ;;  %1067 = vperm.xlu0 %1758, %v1049_v49   ;;  %v175_v42 = vld [vmem:[%s2661_s3 + $0x58] sm:$0xff] }
 0x4ce   :  { %v1767_v46 = vpop.eup %1766  ;;  %v1025_v50 = vadd.f32 1e-05, %v1009_v38  ;;  %v1622_v14 = vpop.f32.mrb[42].mxu1  ;;  %v1052_v52 = vmul.f32 %v1765_v60, %v167_v41  ;;  %v177_v60 = vld [vmem:[%s2661_s3 + $0x68] sm:$0xff] }
 0x4cf   :  { %1776 = vrsqrt.f32 %v1026_v1  ;;  %v1012_v53 = vmul.f32 0.0078125, %v1622_v14  ;;  %v972_v54 = vpop.f32.mrb[43].mxu1  ;;  %v1051_v32 = vmul.f32 %v1767_v46, %v166_v45  ;;  %v176_v1 = vld [vmem:[%s2661_s3 + $0x60] sm:$0xff] }
 0x4d0   :  { %1778 = vrsqrt.f32 %v1025_v50  ;;  %v1011_v56 = vmul.f32 0.0078125, %v972_v54  ;;  %v178_v54 = vld [vmem:[%s2661_s3 + $0x70] sm:$0xff] }
 0x4d1   :  { %v1769_v10 = vpop.eup %1768  ;;  %v1028_v11 = vadd.f32 1e-05, %v1012_v53  ;;  %1082 = vperm.xlu0 %1758, %v1052_v52   ;;  %1077 = vperm.xlu1 %1759, %v1051_v32   ;;  %v179_v53 = vld [vmem:[%s2661_s3 + $0x78] sm:$0xff] }
 0x4d2   :  { %v1771_v12 = vpop.eup %1770  ;;  %v1027_v13 = vadd.f32 1e-05, %v1011_v56  ;;  %v1625_v15 = vpop.f32.mrb[44].mxu1  ;;  %v1054_v16 = vmul.f32 %v1769_v10, %v169_v55  ;;  %v195_v10 = vld [vmem:[%s2660_s4 + $0x78] sm:$0xff] }
 0x4d3   :  { %1780 = vrsqrt.f32 %v1028_v11  ;;  %v1014_v18 = vmul.f32 0.0078125, %v1625_v15  ;;  %v982_v19 = vpop.f32.mrb[45].mxu1  ;;  %v1053_v20 = vmul.f32 %v1771_v12, %v168_v17  ;;  %v194_v11 = vld [vmem:[%s2660_s4 + $0x70] sm:$0xff]  ;;  %v1164_v12 = vpop.permute.xlu1 %1163 }
 0x4d4   :  { %1782 = vrsqrt.f32 %v1027_v13  ;;  %v1013_v22 = vmul.f32 0.0078125, %v982_v19  ;;  %v1169_v13 = vpop.permute.xlu0 %1168 }
 0x4d5   :  { %v1773_v61 = vpop.eup %1772  ;;  %v1030_v26 = vadd.f32 1e-05, %v1014_v18  ;;  %1092 = vperm.xlu0 %1758, %v1054_v16   ;;  %1087 = vperm.xlu1 %1759, %v1053_v20  }
 0x4d6   :  { %v1775_v27 = vpop.eup %1774  ;;  %v1029_v28 = vadd.f32 1e-05, %v1013_v22  ;;  %v1628_v9 = vpop.f32.mrb[46].mxu1  ;;  %v1056_v63 = vmul.f32 %v1773_v61, %v171_v21 }
 0x4d7   :  { %1784 = vrsqrt.f32 %v1030_v26  ;;  %v1016_v0 = vmul.f32 0.0078125, %v1628_v9  ;;  %v992_v51 = vpop.f32.mrb[47].mxu1  ;;  %v1055_v33 = vmul.f32 %v1775_v27, %v170_v24  ;;  %v1174_v15 = vpop.permute.xlu1 %1173 }
 0x4d8   :  { %1786 = vrsqrt.f32 %v1029_v28  ;;  %v1015_v4 = vmul.f32 0.0078125, %v992_v51  ;;  %v1179_v16 = vpop.permute.xlu0 %1178 }
 0x4d9   :  { %v1777_v25 = vpop.eup %1776  ;;  %v1032_v8 = vadd.f32 1e-05, %v1016_v0  ;;  %1102 = vperm.xlu0 %1758, %v1056_v63   ;;  %1097 = vperm.xlu1 %1759, %v1055_v33  }
 0x4da   :  { %v1779_v29 = vpop.eup %1778  ;;  %v1031_v31 = vadd.f32 1e-05, %v1015_v4  ;;  %v1058_v35 = vmul.f32 %v1777_v25, %v173_v3 }
 0x4db   :  { %1788 = vrsqrt.f32 %v1032_v8  ;;  %v1057_v36 = vmul.f32 %v1779_v29, %v172_v6  ;;  %v1184_v18 = vpop.permute.xlu1 %1183 }
 0x4dc   :  { %1790 = vrsqrt.f32 %v1031_v31  ;;  %v1189_v19 = vpop.permute.xlu0 %1188 }
 0x4dd   :  { %v1781_v49 = vpop.eup %1780  ;;  %1112 = vperm.xlu0 %1758, %v1058_v35   ;;  %1107 = vperm.xlu1 %1759, %v1057_v36  }
 0x4de   :  { %v1783_v41 = vpop.eup %1782  ;;  %v1060_v38 = vmul.f32 %v1781_v49, %v175_v42 }
 0x4df   :  { %v1059_v45 = vmul.f32 %v1783_v41, %v174_v40  ;;  %v1194_v20 = vpop.permute.xlu1 %1193 }
 0x4e0   :  { %v1199_v21 = vpop.permute.xlu0 %1198 }
 0x4e1   :  { %v1785_v46 = vpop.eup %1784  ;;  %1122 = vperm.xlu0 %1758, %v1060_v38   ;;  %1117 = vperm.xlu1 %1759, %v1059_v45  }
 0x4e2   :  { %v1787_v50 = vpop.eup %1786  ;;  %v1062_v14 = vmul.f32 %v1785_v46, %v177_v60 }
 0x4e3   :  { %v1061_v52 = vmul.f32 %v1787_v50, %v176_v1  ;;  %v1204_v22 = vpop.permute.xlu1 %1203 }
 0x4e4   :  { %v1209_v24 = vpop.permute.xlu0 %1208 }
 0x4e5   :  { %v1789_v32 = vpop.eup %1788  ;;  %1132 = vperm.xlu0 %1758, %v1062_v14   ;;  %1127 = vperm.xlu1 %1759, %v1061_v52  }
 0x4e6   :  { %v1791_v55 = vpop.eup %1790  ;;  %v1064_v56 = vmul.f32 %v1789_v32, %v179_v53 }
 0x4e7   :  { %v1063_v17 = vmul.f32 %v1791_v55, %v178_v54  ;;  %v1214_v61 = vpop.permute.xlu1 %1213 }
 0x4e8   :  { %v1219_v26 = vpop.permute.xlu0 %1218 }
 0x4e9   :  { %1142 = vperm.xlu0 %1758, %v1064_v56   ;;  %1137 = vperm.xlu1 %1759, %v1063_v17  }
 0x4eb   :  { %v2571_v27 = vpop.permute.xlu1 %1223 }
 0x4ec   :  { %v2573_v28 = vpop.permute.xlu0 %1228 }
 0x4ed   :  { %1238 = vperm.xlu0 %1758, %v195_v10   ;;  %1233 = vperm.xlu1 %1759, %v194_v11  }
 0x54b   :  { %v1073_v9 = vpop.permute.xlu1 %1072 }
 0x54c   :  { %v1146_v63 = vmul.f32 %v1073_v9, %v2365_v30  ;;  %v1068_v0 = vpop.permute.xlu0 %1067 }
 0x54d   :  { %v1145_v51 = vmul.f32 %v1068_v0, %v2368_v34 }
 0x54e   :  { %v1242_v33 = vadd.f32 %v1169_v13, %v1146_v63 }
 0x54f   :  { %v1241_v3 = vadd.f32 %v1164_v12, %v1145_v51 }
 0x550   :  { %v1258_v4 = vmax.f32 %v1242_v33, 0.0  ;;  %v1083_v6 = vpop.permute.xlu0 %1082  ;;  %v1078_v25 = vpop.permute.xlu1 %1077 }
 0x551   :  { %v1257_v8 = vmax.f32 %v1241_v3, 0.0  ;;  %v1148_v29 = vmul.f32 %v1083_v6, %v2375_v39  ;;  %v1147_v31 = vmul.f32 %v1078_v25, %v2382_v44 }
 0x552   :  { %1274 = vst.msk [vmem:[%s2662_s5 + $0x8] sm:$0xff] %vm486_vm0, %v1258_v4 }
 0x553   :  { %1273 = vst.msk [vmem:[%s2662_s5] sm:$0xff] %vm486_vm0, %v1257_v8  ;;  %v1244_v30 = vadd.f32 %v1179_v16, %v1148_v29  ;;  %v1243_v34 = vadd.f32 %v1174_v15, %v1147_v31 }
 0x554   :  { %v1093_v35 = vpop.permute.xlu0 %1092  ;;  %v1088_v36 = vpop.permute.xlu1 %1087 }
 0x555   :  { %v1260_v42 = vmax.f32 %v1244_v30, 0.0  ;;  %v1259_v40 = vmax.f32 %v1243_v34, 0.0  ;;  %v1150_v39 = vmul.f32 %v1093_v35, %v2388_v47  ;;  %v1149_v44 = vmul.f32 %v1088_v36, %v2394_v57 }
 0x557   :  { %1276 = vst.msk [vmem:[%s2662_s5 + $0x18] sm:$0xff] %vm486_vm0, %v1260_v42  ;;  %1275 = vst.msk [vmem:[%s2662_s5 + $0x10] sm:$0xff] %vm486_vm0, %v1259_v40  ;;  %v1246_v49 = vadd.f32 %v1189_v19, %v1150_v39  ;;  %v1245_v41 = vadd.f32 %v1184_v18, %v1149_v44 }
 0x558   :  { %v1103_v38 = vpop.permute.xlu0 %1102  ;;  %v1098_v45 = vpop.permute.xlu1 %1097 }
 0x559   :  { %v1262_v60 = vmax.f32 %v1246_v49, 0.0  ;;  %v1261_v1 = vmax.f32 %v1245_v41, 0.0  ;;  %v1152_v47 = vmul.f32 %v1103_v38, %v2403_v59  ;;  %v1151_v57 = vmul.f32 %v1098_v45, %v2412_v2 }
 0x55b   :  { %1278 = vst.msk [vmem:[%s2662_s5 + $0x28] sm:$0xff] %vm486_vm0, %v1262_v60  ;;  %1277 = vst.msk [vmem:[%s2662_s5 + $0x20] sm:$0xff] %vm486_vm0, %v1261_v1  ;;  %v1248_v46 = vadd.f32 %v1199_v21, %v1152_v47  ;;  %v1247_v50 = vadd.f32 %v1194_v20, %v1151_v57 }
 0x55c   :  { %v1113_v14 = vpop.permute.xlu0 %1112  ;;  %v1108_v52 = vpop.permute.xlu1 %1107 }
 0x55d   :  { %v1264_v53 = vmax.f32 %v1248_v46, 0.0  ;;  %v1263_v54 = vmax.f32 %v1247_v50, 0.0  ;;  %v1154_v59 = vmul.f32 %v1113_v14, %v2400_v58  ;;  %v1153_v2 = vmul.f32 %v1108_v52, %v2425_v7 }
 0x55f   :  { %1280 = vst.msk [vmem:[%s2662_s5 + $0x38] sm:$0xff] %vm486_vm0, %v1264_v53  ;;  %1279 = vst.msk [vmem:[%s2662_s5 + $0x30] sm:$0xff] %vm486_vm0, %v1263_v54  ;;  %v1250_v32 = vadd.f32 %v1209_v24, %v1154_v59  ;;  %v1249_v55 = vadd.f32 %v1204_v22, %v1153_v2 }
 0x560   :  { %v1123_v56 = vpop.permute.xlu0 %1122  ;;  %v1118_v17 = vpop.permute.xlu1 %1117 }
 0x561   :  { %v1266_v10 = vmax.f32 %v1250_v32, 0.0  ;;  %v1265_v11 = vmax.f32 %v1249_v55, 0.0  ;;  %v1156_v58 = vmul.f32 %v1123_v56, %v2409_v62  ;;  %v1155_v7 = vmul.f32 %v1118_v17, %v2436_v23 }
 0x563   :  { %1282 = vst.msk [vmem:[%s2662_s5 + $0x48] sm:$0xff] %vm486_vm0, %v1266_v10  ;;  %1281 = vst.msk [vmem:[%s2662_s5 + $0x40] sm:$0xff] %vm486_vm0, %v1265_v11  ;;  %v1252_v12 = vadd.f32 %v1219_v26, %v1156_v58  ;;  %v1251_v13 = vadd.f32 %v1214_v61, %v1155_v7 }
 0x564   :  { %v1133_v15 = vpop.permute.xlu0 %1132  ;;  %v1128_v16 = vpop.permute.xlu1 %1127 }
 0x565   :  { %v1268_v18 = vmax.f32 %v1252_v12, 0.0  ;;  %v1267_v19 = vmax.f32 %v1251_v13, 0.0  ;;  %v1158_v62 = vmul.f32 %v1133_v15, %v2422_v5  ;;  %v1157_v23 = vmul.f32 %v1128_v16, %v2444_v43 }
 0x567   :  { %1284 = vst.msk [vmem:[%s2662_s5 + $0x58] sm:$0xff] %vm486_vm0, %v1268_v18  ;;  %1283 = vst.msk [vmem:[%s2662_s5 + $0x50] sm:$0xff] %vm486_vm0, %v1267_v19  ;;  %v1254_v20 = vadd.f32 %v2573_v28, %v1158_v62  ;;  %v1253_v21 = vadd.f32 %v2571_v27, %v1157_v23 }
 0x568   :  { %v1143_v22 = vpop.permute.xlu0 %1142  ;;  %v1138_v24 = vpop.permute.xlu1 %1137 }
 0x569   :  { %v1270_v61 = vmax.f32 %v1254_v20, 0.0  ;;  %v1269_v5 = vmax.f32 %v1253_v21, 0.0  ;;  %v1160_v43 = vmul.f32 %v1143_v22, %v2433_v37  ;;  %v1159_v26 = vmul.f32 %v1138_v24, %v2453_v48 }
 0x56b   :  { %1286 = vst.msk [vmem:[%s2662_s5 + $0x68] sm:$0xff] %vm486_vm0, %v1270_v61  ;;  %1285 = vst.msk [vmem:[%s2662_s5 + $0x60] sm:$0xff] %vm486_vm0, %v1269_v5 }
 0x56c   :  { %v1239_v28 = vpop.permute.xlu0 %1238  ;;  %v1234_v27 = vpop.permute.xlu1 %1233 }
 0x56d   :  { %v1256_v9 = vadd.f32 %v1239_v28, %v1160_v43  ;;  %v1255_v63 = vadd.f32 %v1234_v27, %v1159_v26 }
 0x56f   :  { %v1272_v0 = vmax.f32 %v1256_v9, 0.0  ;;  %v1271_v51 = vmax.f32 %v1255_v63, 0.0 }
 0x571   :  { %1288 = vst.msk [vmem:[%s2662_s5 + $0x78] sm:$0xff] %vm486_vm0, %v1272_v0  ;;  %1287 = vst.msk [vmem:[%s2662_s5 + $0x70] sm:$0xff] %vm486_vm0, %v1271_v51 }

// kernel: generator_forward.16
= control target key start
LH: loop header
LB: loop body
LE: loop exit
PB: predicated region body
PF: predicated region fallthrough
CT: control target
= control target key end

     0   :  { %vm213_vm0 = vcmask 523264   ;;  %s1306_s1 = inlined_call_operand.vmem [shape: f32[256,128], index: 1, kind: input, shape index: {}]   ;;  %s1307_s0 = inlined_call_operand.vmem [shape: f32[64,256], index: 0, kind: input, shape index: {}]   ;;  %s1308_s2 = inlined_call_operand.vmem [shape: f32[64,64], index: 2, kind: input, shape index: {}]   ;;  %s1309_s4 = inlined_call_operand.vmem [shape: f32[64,1], index: 4, kind: input, shape index: {}]   ;;  %s1310_s3 = inlined_call_operand.vmem [shape: f32[64,1], index: 3, kind: input, shape index: {}]   ;;  %s1311_s5 = inlined_call_operand.vmem [shape: f32[64,128], index: 5, kind: output, shape index: {}]  }
   0x1   :  { %v52_v0 = vld [vmem:[%s1306_s1 + $0x80] sm:$0xff]  ;;  %v53_v1 = vld [vmem:[%s1306_s1 + $0x88] sm:$0xff]  ;;  %v54_v5 = vld [vmem:[%s1306_s1 + $0x90] sm:$0xff] }
   0x2   :  { %v36_v2 = vld [vmem:[%s1306_s1] sm:$0xff]  ;;  %v836_v3 = vpack.c.bf16 %v53_v1, %v52_v0  ;;  %v37_v4 = vld [vmem:[%s1306_s1 + $0x8] sm:$0xff]  ;;  %v55_v6 = vld [vmem:[%s1306_s1 + $0x98] sm:$0xff] }
   0x3   :  { %v838_v7 = vpack.c.bf16 %v37_v4, %v36_v2  ;;  %v840_v8 = vpack.c.bf16 %v55_v6, %v54_v5  ;;  %v38_v9 = vld [vmem:[%s1306_s1 + $0x10] sm:$0xff]  ;;  %v39_v10 = vld [vmem:[%s1306_s1 + $0x18] sm:$0xff]  ;;  %v56_v11 = vld [vmem:[%s1306_s1 + $0xa0] sm:$0xff] }
   0x4   :  { %837 = vmatprep.subr.bf16.mxu0 %v836_v3  ;;  %v57_v12 = vld [vmem:[%s1306_s1 + $0xa8] sm:$0xff]  ;;  %v842_v13 = vpack.c.bf16 %v39_v10, %v38_v9  ;;  %v40_v15 = vld [vmem:[%s1306_s1 + $0x20] sm:$0xff]  ;;  %v58_v17 = vld [vmem:[%s1306_s1 + $0xb0] sm:$0xff] }
   0x5   :  { %839 = vmatpush3.bf16.msra.mxu0 %v838_v7  ;;  %v844_v14 = vpack.c.bf16 %v57_v12, %v56_v11  ;;  %v41_v16 = vld [vmem:[%s1306_s1 + $0x28] sm:$0xff]  ;;  %v59_v18 = vld [vmem:[%s1306_s1 + $0xb8] sm:$0xff]  ;;  %v42_v21 = vld [vmem:[%s1306_s1 + $0x30] sm:$0xff] }
   0x6   :  { %841 = vmatprep.subr.bf16.mxu0 %v840_v8  ;;  %v846_v19 = vpack.c.bf16 %v41_v16, %v40_v15  ;;  %v848_v20 = vpack.c.bf16 %v59_v18, %v58_v17  ;;  %v43_v22 = vld [vmem:[%s1306_s1 + $0x38] sm:$0xff]  ;;  %v60_v23 = vld [vmem:[%s1306_s1 + $0xc0] sm:$0xff]  ;;  %v61_v24 = vld [vmem:[%s1306_s1 + $0xc8] sm:$0xff] }
   0x7   :  { %v21_v25 = vld [vmem:[%s1307_s0 + $0x8] sm:$0xff]  ;;  %v850_v26 = vpack.c.bf16 %v43_v22, %v42_v21  ;;  %v852_v27 = vpack.c.bf16 %v61_v24, %v60_v23  ;;  %v44_v28 = vld [vmem:[%s1306_s1 + $0x40] sm:$0xff]  ;;  %v62_v30 = vld [vmem:[%s1306_s1 + $0xd0] sm:$0xff] }
   0x8   :  { %156 = vmatprep.mubr.f32.mxu0 %v21_v25  ;;  %v45_v29 = vld [vmem:[%s1306_s1 + $0x48] sm:$0xff]  ;;  %v63_v31 = vld [vmem:[%s1306_s1 + $0xd8] sm:$0xff]  ;;  %v46_v34 = vld [vmem:[%s1306_s1 + $0x50] sm:$0xff] }
   0x9   :  { %843 = vmatpush3.bf16.msra.mxu0 %v842_v13  ;;  %v854_v32 = vpack.c.bf16 %v45_v29, %v44_v28  ;;  %v856_v33 = vpack.c.bf16 %v63_v31, %v62_v30  ;;  %v47_v35 = vld [vmem:[%s1306_s1 + $0x58] sm:$0xff]  ;;  %v64_v36 = vld [vmem:[%s1306_s1 + $0xe0] sm:$0xff]  ;;  %v65_v37 = vld [vmem:[%s1306_s1 + $0xe8] sm:$0xff] }
   0xa   :  { %845 = vmatprep.subr.bf16.mxu0 %v844_v14  ;;  %v858_v38 = vpack.c.bf16 %v47_v35, %v46_v34  ;;  %v860_v39 = vpack.c.bf16 %v65_v37, %v64_v36  ;;  %v48_v40 = vld [vmem:[%s1306_s1 + $0x60] sm:$0xff]  ;;  %v49_v41 = vld [vmem:[%s1306_s1 + $0x68] sm:$0xff]  ;;  %v66_v42 = vld [vmem:[%s1306_s1 + $0xf0] sm:$0xff] }
   0xb   :  { %v67_v43 = vld [vmem:[%s1306_s1 + $0xf8] sm:$0xff]  ;;  %v862_v44 = vpack.c.bf16 %v49_v41, %v48_v40  ;;  %v50_v46 = vld [vmem:[%s1306_s1 + $0x70] sm:$0xff]  ;;  %v20_v49 = vld [vmem:[%s1307_s0] sm:$0xff] }
   0xc   :  { %v864_v45 = vpack.c.bf16 %v67_v43, %v66_v42  ;;  %v51_v47 = vld [vmem:[%s1306_s1 + $0x78] sm:$0xff]  ;;  %v22_v51 = vld [vmem:[%s1307_s0 + $0x10] sm:$0xff]  ;;  %v25_v52 = vld [vmem:[%s1307_s0 + $0x28] sm:$0xff] }
   0xd   :  { %847 = vmatpush3.bf16.msra.mxu0 %v846_v19  ;;  %v866_v48 = vpack.c.bf16 %v51_v47, %v50_v46  ;;  %v23_v50 = vld [vmem:[%s1307_s0 + $0x18] sm:$0xff]  ;;  %v24_v53 = vld [vmem:[%s1307_s0 + $0x20] sm:$0xff]  ;;  %v26_v55 = vld [vmem:[%s1307_s0 + $0x30] sm:$0xff] }
   0xe   :  { %849 = vmatprep.subr.bf16.mxu0 %v848_v20  ;;  %v27_v54 = vld [vmem:[%s1307_s0 + $0x38] sm:$0xff]  ;;  %v29_v56 = vld [vmem:[%s1307_s0 + $0x48] sm:$0xff]  ;;  %v28_v57 = vld [vmem:[%s1307_s0 + $0x40] sm:$0xff] }
   0xf   :  { %v31_v58 = vld [vmem:[%s1307_s0 + $0x58] sm:$0xff]  ;;  %v30_v59 = vld [vmem:[%s1307_s0 + $0x50] sm:$0xff]  ;;  %v33_v60 = vld [vmem:[%s1307_s0 + $0x68] sm:$0xff] }
  0x10   :  { %v32_v61 = vld [vmem:[%s1307_s0 + $0x60] sm:$0xff]  ;;  %v35_v62 = vld [vmem:[%s1307_s0 + $0x78] sm:$0xff]  ;;  %v34_v63 = vld [vmem:[%s1307_s0 + $0x70] sm:$0xff] }
  0x11   :  { %851 = vmatpush3.bf16.msra.mxu0 %v850_v26  ;;  %v68_v24 = vld [vmem:[%s1308_s2] sm:$0xff]  ;;  %v1125_v37 = vld [vmem:[%s1308_s2 + $0x8] sm:$0xff]  ;;  %v1158_v42 = vld [vmem:[%s1308_s2 + $0x30] sm:$0xff] }
  0x12   :  { %853 = vmatprep.subr.bf16.mxu0 %v852_v27  ;;  %796 = vmatprep.mubr.msk.f32.mxu1 %vm213_vm0, %v68_v24  ;;  %v1144_v40 = vld [vmem:[%s1308_s2 + $0x20] sm:$0xff]  ;;  %v1153_v41 = vld [vmem:[%s1308_s2 + $0x28] sm:$0xff]  ;;  %v1167_v43 = vld [vmem:[%s1308_s2 + $0x38] sm:$0xff] }
  0x15   :  { %855 = vmatpush3.bf16.msra.mxu0 %v854_v32 }
  0x16   :  { %857 = vmatprep.subr.bf16.mxu0 %v856_v33 }
  0x19   :  { %859 = vmatpush3.bf16.msra.mxu0 %v858_v38  ;;  %v1130_v38 = vld [vmem:[%s1308_s2 + $0x10] sm:$0xff] }
  0x1a   :  { %861 = vmatprep.subr.bf16.mxu0 %v860_v39  ;;  %v1139_v39 = vld [vmem:[%s1308_s2 + $0x18] sm:$0xff] }
  0x1d   :  { %863 = vmatpush3.bf16.msra.mxu0 %v862_v44  ;;  %v919_v44 = vmov 0  }
  0x1e   :  { %865 = vmatprep.subr.bf16.mxu0 %v864_v45  ;;  %902 = vset.pattern.permute.xlu1 %v919_v44 }
  0x1f   :  { %901 = vset.pattern.permute.xlu0 %v919_v44 }
  0x21   :  { %867 = vmatpush3.bf16.msra.mxu0 %v866_v48 }
  0x24   :  { %157 = vmatmul.mubr.f32.vlgmr.msra.gmra.mrb[0].mxu0 %v20_v49 }
  0x25   :  { %161 = vmatprep.mubr.f32.mxu0 %v23_v50 }
  0x28   :  { %162 = vmatmul.mubr.f32.gmra.mrb[2].mxu0 %v22_v51 }
  0x29   :  { %166 = vmatprep.mubr.f32.mxu0 %v25_v52 }
  0x2c   :  { %167 = vmatmul.mubr.f32.gmra.mrb[4].mxu0 %v24_v53 }
  0x2d   :  { %171 = vmatprep.mubr.f32.mxu0 %v27_v54 }
  0x30   :  { %172 = vmatmul.mubr.f32.gmra.mrb[6].mxu0 %v26_v55 }
  0x31   :  { %176 = vmatprep.mubr.f32.mxu0 %v29_v56 }
  0x34   :  { %177 = vmatmul.mubr.f32.gmra.mrb[8].mxu0 %v28_v57 }
  0x35   :  { %181 = vmatprep.mubr.f32.mxu0 %v31_v58 }
  0x38   :  { %182 = vmatmul.mubr.f32.gmra.mrb[10].mxu0 %v30_v59 }
  0x39   :  { %186 = vmatprep.mubr.f32.mxu0 %v33_v60 }
  0x3c   :  { %187 = vmatmul.mubr.f32.gmra.mrb[12].mxu0 %v32_v61 }
  0x3d   :  { %191 = vmatprep.mubr.f32.mxu0 %v35_v62 }
  0x40   :  { %192 = vmatmul.mubr.f32.gmra.mrb[14].mxu0 %v34_v63 }
  0xf7   :  { %v724_v0 = vpop.f32.mrb[0].mxu0 }
  0xf8   :  { %v725_v1 = vpop.f32.mrb[1].mxu0 }
  0xf9   :  { %v1094_v2 = vadd.f32 %v725_v1, %v724_v0 }
  0xfb   :  { %v727_v3 = vpop.f32.mrb[2].mxu0  ;;  %197 = vadd.xlane.f32.xlu0 %v1094_v2 }
  0xfc   :  { %v728_v4 = vpop.f32.mrb[3].mxu0 }
  0xfd   :  { %v1097_v5 = vadd.f32 %v728_v4, %v727_v3 }
  0xff   :  { %v730_v6 = vpop.f32.mrb[4].mxu0  ;;  %199 = vadd.xlane.f32.xlu0 %v1097_v5 }
 0x100   :  { %v731_v7 = vpop.f32.mrb[5].mxu0 }
 0x101   :  { %v1100_v8 = vadd.f32 %v731_v7, %v730_v6 }
 0x103   :  { %v733_v9 = vpop.f32.mrb[6].mxu0  ;;  %201 = vadd.xlane.f32.xlu1 %v1100_v8 }
 0x104   :  { %v734_v10 = vpop.f32.mrb[7].mxu0 }
 0x105   :  { %v1103_v11 = vadd.f32 %v734_v10, %v733_v9 }
 0x107   :  { %v736_v12 = vpop.f32.mrb[8].mxu0  ;;  %203 = vadd.xlane.f32.xlu1 %v1103_v11 }
 0x108   :  { %v737_v13 = vpop.f32.mrb[9].mxu0 }
 0x109   :  { %v1106_v14 = vadd.f32 %v737_v13, %v736_v12 }
 0x10b   :  { %v739_v15 = vpop.f32.mrb[10].mxu0  ;;  %205 = vadd.xlane.f32.xlu0 %v1106_v14 }
 0x10c   :  { %v740_v16 = vpop.f32.mrb[11].mxu0 }
 0x10d   :  { %v1109_v17 = vadd.f32 %v740_v16, %v739_v15 }
 0x10f   :  { %v742_v18 = vpop.f32.mrb[12].mxu0  ;;  %207 = vadd.xlane.f32.xlu1 %v1109_v17 }
 0x110   :  { %v743_v19 = vpop.f32.mrb[13].mxu0 }
 0x111   :  { %v1112_v20 = vadd.f32 %v743_v19, %v742_v18 }
 0x113   :  { %v745_v21 = vpop.f32.mrb[14].mxu0  ;;  %209 = vadd.xlane.f32.xlu0 %v1112_v20 }
 0x114   :  { %v746_v22 = vpop.f32.mrb[15].mxu0 }
 0x115   :  { %v1115_v23 = vadd.f32 %v746_v22, %v745_v21  ;;  %v84_v22 = vld [vmem:[%s1309_s4] sm:$0xff] }
 0x117   :  { %211 = vadd.xlane.f32.xlu1 %v1115_v23 }
 0x188   :  { %v198_v25 = vpop.xlane.xlu0 %197 }
 0x18c   :  { %v200_v26 = vpop.xlane.xlu0 %199 }
 0x18d   :  { %v868_v27 = vpack.c.bf16 %v200_v26, %v198_v25  ;;  %v88_v25 = vld [vmem:[%s1309_s4 + $0x20] sm:$0xff]  ;;  %v89_v26 = vld [vmem:[%s1309_s4 + $0x28] sm:$0xff] }
 0x18f   :  { %869 = vmatprep.subr.bf16.mxu1 %v868_v27 }
 0x190   :  { %v202_v28 = vpop.xlane.xlu1 %201  ;;  %871 = vmatpush3.bf16.msra.mxu1 %v868_v27 }
 0x194   :  { %v204_v29 = vpop.xlane.xlu1 %203 }
 0x195   :  { %v872_v30 = vpack.c.bf16 %v204_v29, %v202_v28 }
 0x197   :  { %873 = vmatprep.subr.bf16.mxu1 %v872_v30 }
 0x198   :  { %875 = vmatpush3.bf16.msra.mxu1 %v872_v30  ;;  %v206_v31 = vpop.xlane.xlu0 %205 }
 0x19c   :  { %v208_v32 = vpop.xlane.xlu1 %207 }
 0x19d   :  { %v876_v33 = vpack.c.bf16 %v208_v32, %v206_v31 }
 0x19f   :  { %877 = vmatprep.subr.bf16.mxu1 %v876_v33 }
 0x1a0   :  { %879 = vmatpush3.bf16.msra.mxu1 %v876_v33  ;;  %v210_v34 = vpop.xlane.xlu0 %209 }
 0x1a4   :  { %v212_v35 = vpop.xlane.xlu1 %211 }
 0x1a5   :  { %v880_v36 = vpack.c.bf16 %v212_v35, %v210_v34 }
 0x1a7   :  { %881 = vmatprep.subr.bf16.mxu1 %v880_v36 }
 0x1a8   :  { %883 = vmatpush3.bf16.msra.mxu1 %v880_v36 }
 0x1ab   :  { %797 = vmatmul.mubr.msk.f32.vlgmr.msra.gmra.mrb[0].mxu1 %vm213_vm0, %v1125_v37 }
 0x1ac   :  { %799 = vmatprep.mubr.msk.f32.mxu1 %vm213_vm0, %v1130_v38 }
 0x1af   :  { %800 = vmatmul.mubr.msk.f32.gmra.mrb[2].mxu1 %vm213_vm0, %v1139_v39 }
 0x1b0   :  { %802 = vmatprep.mubr.msk.f32.mxu1 %vm213_vm0, %v1144_v40 }
 0x1b3   :  { %803 = vmatmul.mubr.msk.f32.gmra.mrb[4].mxu1 %vm213_vm0, %v1153_v41 }
 0x1b4   :  { %805 = vmatprep.mubr.msk.f32.mxu1 %vm213_vm0, %v1158_v42 }
 0x1b7   :  { %806 = vmatmul.mubr.msk.f32.gmra.mrb[6].mxu1 %vm213_vm0, %v1167_v43 }
 0x1b8   :  { %824 = vmatprep.mubr.msk.f32.mxu1 %vm213_vm0, %v68_v24  ;;  %v87_v24 = vld [vmem:[%s1309_s4 + $0x18] sm:$0xff] }
 0x27e   :  { %v798_v45 = vpop.f32.mrb[0].mxu1 }
 0x27f   :  { %v344_v46 = vmul.f32 0.001953125, %v798_v45  ;;  %v304_v47 = vpop.f32.mrb[1].mxu1 }
 0x280   :  { %v343_v48 = vmul.f32 0.001953125, %v304_v47 }
 0x281   :  { %358 = vperm.xlu1 %902, %v344_v46  }
 0x282   :  { %353 = vperm.xlu0 %901, %v343_v48   ;;  %v801_v49 = vpop.f32.mrb[2].mxu1 }
 0x283   :  { %v346_v50 = vmul.f32 0.001953125, %v801_v49  ;;  %v314_v51 = vpop.f32.mrb[3].mxu1 }
 0x284   :  { %v345_v53 = vmul.f32 0.001953125, %v314_v51 }
 0x285   :  { %368 = vperm.xlu1 %902, %v346_v50  }
 0x286   :  { %v804_v52 = vpop.f32.mrb[4].mxu1 }
 0x287   :  { %v324_v54 = vpop.f32.mrb[5].mxu1  ;;  %v348_v55 = vmul.f32 0.001953125, %v804_v52 }
 0x288   :  { %v347_v58 = vmul.f32 0.001953125, %v324_v54 }
 0x289   :  { %363 = vperm.xlu1 %902, %v345_v53  }
 0x28a   :  { %v807_v56 = vpop.f32.mrb[6].mxu1 }
 0x28b   :  { %v334_v57 = vpop.f32.mrb[7].mxu1  ;;  %v350_v60 = vmul.f32 0.001953125, %v807_v56 }
 0x28c   :  { %v349_v59 = vmul.f32 0.001953125, %v334_v57 }
 0x28d   :  { %378 = vperm.xlu1 %902, %v348_v55  }
 0x291   :  { %373 = vperm.xlu1 %902, %v347_v58  }
 0x295   :  { %383 = vperm.xlu1 %902, %v349_v59  }
 0x299   :  { %388 = vperm.xlu1 %902, %v350_v60   ;;  %v77_v60 = vld [vmem:[%s1310_s3 + $0x8] sm:$0xff] }
 0x300   :  { %v359_v61 = vpop.permute.xlu1 %358 }
 0x301   :  { %v1173_v62 = vsub.f32 %v1097_v5, %v359_v61  ;;  %v354_v63 = vpop.permute.xlu0 %353 }
 0x302   :  { %v1176_v0 = vsub.f32 %v1094_v2, %v354_v63  ;;  %v76_v63 = vld [vmem:[%s1310_s3] sm:$0xff] }
 0x303   :  { %v400_v1 = vmul.f32 %v1173_v62, %v1173_v62 }
 0x304   :  { %v369_v3 = vpop.permute.xlu1 %368  ;;  %v399_v4 = vmul.f32 %v1176_v0, %v1176_v0 }
 0x305   :  { %v1183_v6 = vsub.f32 %v1103_v11, %v369_v3  ;;  %409 = vadd.xlane.f32.xlu0 %v400_v1 }
 0x306   :  { %407 = vadd.xlane.f32.xlu1 %v399_v4 }
 0x307   :  { %v402_v5 = vmul.f32 %v1183_v6, %v1183_v6 }
 0x308   :  { %v364_v7 = vpop.permute.xlu1 %363 }
 0x309   :  { %v1188_v9 = vsub.f32 %v1100_v8, %v364_v7 }
 0x30a   :  { %413 = vadd.xlane.f32.xlu1 %v402_v5 }
 0x30b   :  { %v401_v2 = vmul.f32 %v1188_v9, %v1188_v9 }
 0x30c   :  { %v379_v10 = vpop.permute.xlu1 %378 }
 0x30d   :  { %v1193_v12 = vsub.f32 %v1109_v17, %v379_v10  ;;  %411 = vadd.xlane.f32.xlu0 %v401_v2  ;;  %v79_v10 = vld [vmem:[%s1310_s3 + $0x18] sm:$0xff] }
 0x30f   :  { %v404_v11 = vmul.f32 %v1193_v12, %v1193_v12 }
 0x310   :  { %v374_v13 = vpop.permute.xlu1 %373 }
 0x311   :  { %v1198_v15 = vsub.f32 %v1106_v14, %v374_v13  ;;  %417 = vadd.xlane.f32.xlu1 %v404_v11  ;;  %v78_v11 = vld [vmem:[%s1310_s3 + $0x10] sm:$0xff] }
 0x313   :  { %v403_v8 = vmul.f32 %v1198_v15, %v1198_v15 }
 0x314   :  { %v384_v16 = vpop.permute.xlu1 %383 }
 0x315   :  { %v1203_v18 = vsub.f32 %v1112_v20, %v384_v16  ;;  %415 = vadd.xlane.f32.xlu0 %v403_v8  ;;  %v85_v20 = vld [vmem:[%s1309_s4 + $0x8] sm:$0xff] }
 0x317   :  { %v405_v17 = vmul.f32 %v1203_v18, %v1203_v18 }
 0x318   :  { %v389_v19 = vpop.permute.xlu1 %388 }
 0x319   :  { %v1208_v21 = vsub.f32 %v1115_v23, %v389_v19  ;;  %419 = vadd.xlane.f32.xlu0 %v405_v17  ;;  %v86_v23 = vld [vmem:[%s1309_s4 + $0x10] sm:$0xff]  ;;  %v81_v19 = vld [vmem:[%s1310_s3 + $0x28] sm:$0xff] }
 0x31b   :  { %v406_v14 = vmul.f32 %v1208_v21, %v1208_v21 }
 0x31d   :  { %421 = vadd.xlane.f32.xlu1 %v406_v14  ;;  %v80_v14 = vld [vmem:[%s1310_s3 + $0x20] sm:$0xff] }
 0x32e   :  { %610 = vperm.xlu1 %902, %v84_v22  }
 0x32f   :  { %615 = vperm.xlu0 %901, %v85_v20  }
 0x332   :  { %620 = vperm.xlu1 %902, %v86_v23  }
 0x333   :  { %625 = vperm.xlu0 %901, %v87_v24  }
 0x336   :  { %630 = vperm.xlu1 %902, %v88_v25   ;;  %v83_v25 = vld [vmem:[%s1310_s3 + $0x38] sm:$0xff] }
 0x337   :  { %635 = vperm.xlu0 %901, %v89_v26   ;;  %v82_v26 = vld [vmem:[%s1310_s3 + $0x30] sm:$0xff] }
 0x392   :  { %v410_v27 = vpop.xlane.xlu0 %409 }
 0x393   :  { %v408_v28 = vpop.xlane.xlu1 %407 }
 0x394   :  { %v884_v29 = vpack.c.bf16 %v410_v27, %v408_v28 }
 0x396   :  { %885 = vmatprep.subr.bf16.mxu1 %v884_v29 }
 0x397   :  { %887 = vmatpush3.bf16.msra.mxu1 %v884_v29  ;;  %v414_v30 = vpop.xlane.xlu1 %413 }
 0x39a   :  { %v412_v31 = vpop.xlane.xlu0 %411 }
 0x39b   :  { %v888_v32 = vpack.c.bf16 %v414_v30, %v412_v31  ;;  %v91_v31 = vld [vmem:[%s1309_s4 + $0x38] sm:$0xff] }
 0x39d   :  { %889 = vmatprep.subr.bf16.mxu1 %v888_v32 }
 0x39e   :  { %891 = vmatpush3.bf16.msra.mxu1 %v888_v32  ;;  %v418_v33 = vpop.xlane.xlu1 %417  ;;  %v90_v32 = vld [vmem:[%s1309_s4 + $0x30] sm:$0xff] }
 0x3a2   :  { %v416_v34 = vpop.xlane.xlu0 %415 }
 0x3a3   :  { %v892_v35 = vpack.c.bf16 %v418_v33, %v416_v34 }
 0x3a5   :  { %893 = vmatprep.subr.bf16.mxu1 %v892_v35 }
 0x3a6   :  { %895 = vmatpush3.bf16.msra.mxu1 %v892_v35  ;;  %v420_v36 = vpop.xlane.xlu0 %419 }
 0x3aa   :  { %v422_v44 = vpop.xlane.xlu1 %421 }
 0x3ab   :  { %v896_v45 = vpack.c.bf16 %v422_v44, %v420_v36 }
 0x3ad   :  { %897 = vmatprep.subr.bf16.mxu1 %v896_v45 }
 0x3ae   :  { %899 = vmatpush3.bf16.msra.mxu1 %v896_v45  ;;  %v611_v33 = vpop.permute.xlu1 %610  ;;  %v616_v34 = vpop.permute.xlu0 %615 }
 0x3b1   :  { %825 = vmatmul.mubr.msk.f32.vlgmr.msra.gmra.mrb[8].mxu1 %vm213_vm0, %v1125_v37 }
 0x3b2   :  { %827 = vmatprep.mubr.msk.f32.mxu1 %vm213_vm0, %v1130_v38  ;;  %v621_v35 = vpop.permute.xlu1 %620  ;;  %v626_v36 = vpop.permute.xlu0 %625 }
 0x3b5   :  { %828 = vmatmul.mubr.msk.f32.gmra.mrb[10].mxu1 %vm213_vm0, %v1139_v39 }
 0x3b6   :  { %830 = vmatprep.mubr.msk.f32.mxu1 %vm213_vm0, %v1144_v40  ;;  %v631_v44 = vpop.permute.xlu1 %630  ;;  %v636_v45 = vpop.permute.xlu0 %635 }
 0x3b9   :  { %831 = vmatmul.mubr.msk.f32.gmra.mrb[12].mxu1 %vm213_vm0, %v1153_v41 }
 0x3ba   :  { %833 = vmatprep.mubr.msk.f32.mxu1 %vm213_vm0, %v1158_v42 }
 0x3bd   :  { %834 = vmatmul.mubr.msk.f32.gmra.mrb[14].mxu1 %vm213_vm0, %v1167_v43 }
 0x484   :  { %v826_v46 = vpop.f32.mrb[8].mxu1 }
 0x485   :  { %v529_v37 = vmul.f32 0.001953125, %v826_v46  ;;  %v489_v47 = vpop.f32.mrb[9].mxu1 }
 0x486   :  { %v528_v48 = vmul.f32 0.001953125, %v489_v47 }
 0x487   :  { %v537_v38 = vadd.f32 1e-05, %v529_v37 }
 0x488   :  { %v536_v49 = vadd.f32 1e-05, %v528_v48  ;;  %v829_v50 = vpop.f32.mrb[10].mxu1 }
 0x489   :  { %903 = vrsqrt.f32 %v537_v38  ;;  %v531_v39 = vmul.f32 0.001953125, %v829_v50  ;;  %v499_v51 = vpop.f32.mrb[11].mxu1 }
 0x48a   :  { %905 = vrsqrt.f32 %v536_v49  ;;  %v530_v40 = vmul.f32 0.001953125, %v499_v51 }
 0x48b   :  { %v539_v52 = vadd.f32 1e-05, %v531_v39 }
 0x48c   :  { %v538_v41 = vadd.f32 1e-05, %v530_v40  ;;  %v832_v53 = vpop.f32.mrb[12].mxu1 }
 0x48d   :  { %907 = vrsqrt.f32 %v539_v52  ;;  %v533_v42 = vmul.f32 0.001953125, %v832_v53  ;;  %v509_v54 = vpop.f32.mrb[13].mxu1 }
 0x48e   :  { %909 = vrsqrt.f32 %v538_v41  ;;  %v532_v43 = vmul.f32 0.001953125, %v509_v54 }
 0x48f   :  { %v541_v55 = vadd.f32 1e-05, %v533_v42 }
 0x490   :  { %v540_v56 = vadd.f32 1e-05, %v532_v43  ;;  %v835_v57 = vpop.f32.mrb[14].mxu1 }
 0x491   :  { %911 = vrsqrt.f32 %v541_v55  ;;  %v535_v58 = vmul.f32 0.001953125, %v835_v57  ;;  %v519_v59 = vpop.f32.mrb[15].mxu1 }
 0x492   :  { %913 = vrsqrt.f32 %v540_v56  ;;  %v534_v61 = vmul.f32 0.001953125, %v519_v59 }
 0x493   :  { %v904_v1 = vpop.eup %903  ;;  %v543_v3 = vadd.f32 1e-05, %v535_v58 }
 0x494   :  { %v906_v4 = vpop.eup %905  ;;  %v542_v5 = vadd.f32 1e-05, %v534_v61  ;;  %v553_v7 = vmul.f32 %v904_v1, %v77_v60 }
 0x495   :  { %915 = vrsqrt.f32 %v543_v3  ;;  %v552_v2 = vmul.f32 %v906_v4, %v76_v63 }
 0x496   :  { %917 = vrsqrt.f32 %v542_v5  ;;  %567 = vperm.xlu1 %902, %v553_v7  }
 0x497   :  { %v908_v13 = vpop.eup %907  ;;  %562 = vperm.xlu0 %901, %v552_v2  }
 0x498   :  { %v910_v8 = vpop.eup %909  ;;  %v555_v16 = vmul.f32 %v908_v13, %v79_v10 }
 0x499   :  { %v554_v17 = vmul.f32 %v910_v8, %v78_v11 }
 0x49b   :  { %v912_v22 = vpop.eup %911  ;;  %577 = vperm.xlu0 %901, %v555_v16   ;;  %572 = vperm.xlu1 %902, %v554_v17  }
 0x49c   :  { %v914_v20 = vpop.eup %913  ;;  %v557_v23 = vmul.f32 %v912_v22, %v81_v19 }
 0x49d   :  { %v556_v24 = vmul.f32 %v914_v20, %v80_v14 }
 0x49f   :  { %v916_v27 = vpop.eup %915  ;;  %587 = vperm.xlu0 %901, %v557_v23   ;;  %582 = vperm.xlu1 %902, %v556_v24  }
 0x4a0   :  { %v918_v28 = vpop.eup %917  ;;  %v559_v29 = vmul.f32 %v916_v27, %v83_v25 }
 0x4a1   :  { %v558_v30 = vmul.f32 %v918_v28, %v82_v26 }
 0x4a3   :  { %597 = vperm.xlu0 %901, %v559_v29   ;;  %592 = vperm.xlu1 %902, %v558_v30  }
 0x4a7   :  { %645 = vperm.xlu0 %901, %v91_v31   ;;  %640 = vperm.xlu1 %902, %v90_v32  }
 0x515   :  { %v568_v46 = vpop.permute.xlu1 %567 }
 0x516   :  { %v601_v37 = vmul.f32 %v568_v46, %v1173_v62  ;;  %v563_v47 = vpop.permute.xlu0 %562 }
 0x517   :  { %v600_v48 = vmul.f32 %v563_v47, %v1176_v0 }
 0x518   :  { %v649_v38 = vadd.f32 %v616_v34, %v601_v37 }
 0x519   :  { %v648_v49 = vadd.f32 %v611_v33, %v600_v48 }
 0x51a   :  { %v657_v50 = vmax.f32 %v649_v38, 0.0  ;;  %v578_v39 = vpop.permute.xlu0 %577  ;;  %v573_v51 = vpop.permute.xlu1 %572 }
 0x51b   :  { %v656_v40 = vmax.f32 %v648_v49, 0.0  ;;  %v603_v52 = vmul.f32 %v578_v39, %v1183_v6  ;;  %v602_v41 = vmul.f32 %v573_v51, %v1188_v9 }
 0x51c   :  { %665 = vst [vmem:[%s1311_s5 + $0x8] sm:$0xff] %v657_v50 }
 0x51d   :  { %664 = vst [vmem:[%s1311_s5] sm:$0xff] %v656_v40  ;;  %v651_v62 = vadd.f32 %v626_v36, %v603_v52  ;;  %v650_v0 = vadd.f32 %v621_v35, %v602_v41 }
 0x51e   :  { %v588_v53 = vpop.permute.xlu0 %587  ;;  %v583_v42 = vpop.permute.xlu1 %582 }
 0x51f   :  { %v659_v54 = vmax.f32 %v651_v62, 0.0  ;;  %v658_v43 = vmax.f32 %v650_v0, 0.0  ;;  %v605_v55 = vmul.f32 %v588_v53, %v1193_v12  ;;  %v604_v6 = vmul.f32 %v583_v42, %v1198_v15 }
 0x521   :  { %667 = vst [vmem:[%s1311_s5 + $0x18] sm:$0xff] %v659_v54  ;;  %666 = vst [vmem:[%s1311_s5 + $0x10] sm:$0xff] %v658_v43  ;;  %v653_v9 = vadd.f32 %v636_v45, %v605_v55  ;;  %v652_v56 = vadd.f32 %v631_v44, %v604_v6 }
 0x522   :  { %v598_v57 = vpop.permute.xlu0 %597  ;;  %v593_v58 = vpop.permute.xlu1 %592 }
 0x523   :  { %v661_v59 = vmax.f32 %v653_v9, 0.0  ;;  %v660_v60 = vmax.f32 %v652_v56, 0.0  ;;  %v607_v12 = vmul.f32 %v598_v57, %v1208_v21  ;;  %v606_v15 = vmul.f32 %v593_v58, %v1203_v18 }
 0x525   :  { %669 = vst [vmem:[%s1311_s5 + $0x28] sm:$0xff] %v661_v59  ;;  %668 = vst [vmem:[%s1311_s5 + $0x20] sm:$0xff] %v660_v60 }
 0x526   :  { %v646_v61 = vpop.permute.xlu0 %645  ;;  %v641_v63 = vpop.permute.xlu1 %640 }
 0x527   :  { %v655_v1 = vadd.f32 %v646_v61, %v607_v12  ;;  %v654_v3 = vadd.f32 %v641_v63, %v606_v15 }
 0x529   :  { %v663_v4 = vmax.f32 %v655_v1, 0.0  ;;  %v662_v5 = vmax.f32 %v654_v3, 0.0 }
 0x52b   :  { %671 = vst [vmem:[%s1311_s5 + $0x38] sm:$0xff] %v663_v4  ;;  %670 = vst [vmem:[%s1311_s5 + $0x30] sm:$0xff] %v662_v5 }

// kernel: generator_forward.17
= control target key start
LH: loop header
LB: loop body
LE: loop exit
PB: predicated region body
PF: predicated region fallthrough
CT: control target
= control target key end

     0   :  { %v587_v3 = vmov 0.0   ;;  %vm233_vm0 = vcmask 1043456   ;;  %vm588_vm1 = vmmov 0   ;;  %vm243_vm2 = vcmask 31744   ;;  %s859_s1 = inlined_call_operand.vmem [shape: f32[128,512], index: 1, kind: input, shape index: {}]   ;;  %s860_s0 = inlined_call_operand.vmem [shape: f32[4,128], index: 0, kind: input, shape index: {}]   ;;  %s861_s2 = inlined_call_operand.vmem [shape: f32[4,4], index: 2, kind: input, shape index: {}]   ;;  %s862_s3 = inlined_call_operand.vmem [shape: f32[4,1], index: 3, kind: input, shape index: {}]   ;;  %s863_s4 = inlined_call_operand.vmem [shape: f32[4,1], index: 4, kind: input, shape index: {}]   ;;  %s864_s5 = inlined_call_operand.vmem [shape: f32[4,512], index: 5, kind: input, shape index: {}]   ;;  %s865_s6 = inlined_call_operand.vmem [shape: f32[4,512], index: 6, kind: output, shape index: {}]  }
   0x1   :  { %v25_v0 = vld [vmem:[%s859_s1 + $0x8] sm:$0xff]  ;;  %v24_v2 = vld [vmem:[%s859_s1] sm:$0xff]  ;;  %155 = vmatprep.mubr.f32.mxu0 %v587_v3  ;;  %226 = vmatprep.mubr.f32.mxu1 %v587_v3  ;;  %v27_v6 = vld [vmem:[%s859_s1 + $0x18] sm:$0xff] }
   0x2   :  { %v29_v1 = vld [vmem:[%s859_s1 + $0x28] sm:$0xff]  ;;  %v28_v5 = vld [vmem:[%s859_s1 + $0x20] sm:$0xff]  ;;  %v31_v7 = vld [vmem:[%s859_s1 + $0x38] sm:$0xff] }
   0x3   :  { %v506_v4 = vpack.c.bf16 %v29_v1, %v25_v0  ;;  %v508_v8 = vpack.c.bf16 %v28_v5, %v24_v2  ;;  %v538_v9 = vpack.c.bf16 %v31_v7, %v27_v6  ;;  %v26_v10 = vld [vmem:[%s859_s1 + $0x10] sm:$0xff]  ;;  %v33_v12 = vld [vmem:[%s859_s1 + $0x48] sm:$0xff]  ;;  %v32_v15 = vld [vmem:[%s859_s1 + $0x40] sm:$0xff] }
   0x4   :  { %v30_v11 = vld [vmem:[%s859_s1 + $0x30] sm:$0xff]  ;;  %v37_v14 = vld [vmem:[%s859_s1 + $0x68] sm:$0xff]  ;;  %v36_v16 = vld [vmem:[%s859_s1 + $0x60] sm:$0xff] }
   0x5   :  { %507 = vmatprep.subr.bf16.mxu0 %v506_v4  ;;  %v540_v13 = vpack.c.bf16 %v30_v11, %v26_v10  ;;  %539 = vmatprep.subr.bf16.mxu1 %v538_v9  ;;  %v510_v17 = vpack.c.bf16 %v37_v14, %v33_v12  ;;  %v512_v18 = vpack.c.bf16 %v36_v16, %v32_v15  ;;  %v35_v19 = vld [vmem:[%s859_s1 + $0x58] sm:$0xff]  ;;  %v34_v21 = vld [vmem:[%s859_s1 + $0x50] sm:$0xff]  ;;  %v41_v24 = vld [vmem:[%s859_s1 + $0x88] sm:$0xff] }
   0x6   :  { %509 = vmatpush1.bf16.msra.mxu0 %v508_v8  ;;  %v39_v20 = vld [vmem:[%s859_s1 + $0x78] sm:$0xff]  ;;  %v38_v23 = vld [vmem:[%s859_s1 + $0x70] sm:$0xff]  ;;  %v45_v25 = vld [vmem:[%s859_s1 + $0xa8] sm:$0xff] }
   0x7   :  { %541 = vmatpush1.bf16.msra.mxu1 %v540_v13  ;;  %v542_v22 = vpack.c.bf16 %v39_v20, %v35_v19  ;;  %511 = vmatprep.subr.bf16.mxu0 %v510_v17  ;;  %v544_v26 = vpack.c.bf16 %v38_v23, %v34_v21  ;;  %v514_v27 = vpack.c.bf16 %v45_v25, %v41_v24  ;;  %v40_v28 = vld [vmem:[%s859_s1 + $0x80] sm:$0xff]  ;;  %v43_v30 = vld [vmem:[%s859_s1 + $0x98] sm:$0xff]  ;;  %v42_v32 = vld [vmem:[%s859_s1 + $0x90] sm:$0xff] }
   0x8   :  { %v44_v29 = vld [vmem:[%s859_s1 + $0xa0] sm:$0xff]  ;;  %v47_v31 = vld [vmem:[%s859_s1 + $0xb8] sm:$0xff]  ;;  %v46_v33 = vld [vmem:[%s859_s1 + $0xb0] sm:$0xff] }
   0x9   :  { %543 = vmatprep.subr.bf16.mxu1 %v542_v22  ;;  %v516_v34 = vpack.c.bf16 %v44_v29, %v40_v28  ;;  %v546_v35 = vpack.c.bf16 %v47_v31, %v43_v30  ;;  %v49_v36 = vld [vmem:[%s859_s1 + $0xc8] sm:$0xff]  ;;  %v48_v38 = vld [vmem:[%s859_s1 + $0xc0] sm:$0xff]  ;;  %v548_v39 = vpack.c.bf16 %v46_v33, %v42_v32  ;;  %v51_v42 = vld [vmem:[%s859_s1 + $0xd8] sm:$0xff] }
   0xa   :  { %513 = vmatpush1.bf16.msra.mxu0 %v512_v18  ;;  %v53_v37 = vld [vmem:[%s859_s1 + $0xe8] sm:$0xff]  ;;  %v52_v41 = vld [vmem:[%s859_s1 + $0xe0] sm:$0xff]  ;;  %v55_v43 = vld [vmem:[%s859_s1 + $0xf8] sm:$0xff] }
   0xb   :  { %545 = vmatpush1.bf16.msra.mxu1 %v544_v26  ;;  %515 = vmatprep.subr.bf16.mxu0 %v514_v27  ;;  %v518_v40 = vpack.c.bf16 %v53_v37, %v49_v36  ;;  %v550_v44 = vpack.c.bf16 %v55_v43, %v51_v42  ;;  %v50_v45 = vld [vmem:[%s859_s1 + $0xd0] sm:$0xff]  ;;  %v57_v47 = vld [vmem:[%s859_s1 + $0x108] sm:$0xff]  ;;  %v520_v49 = vpack.c.bf16 %v52_v41, %v48_v38  ;;  %v59_v50 = vld [vmem:[%s859_s1 + $0x118] sm:$0xff] }
   0xc   :  { %547 = vmatprep.subr.bf16.mxu1 %v546_v35  ;;  %v54_v46 = vld [vmem:[%s859_s1 + $0xf0] sm:$0xff]  ;;  %v61_v48 = vld [vmem:[%s859_s1 + $0x128] sm:$0xff]  ;;  %v63_v51 = vld [vmem:[%s859_s1 + $0x138] sm:$0xff] }
   0xd   :  { %v552_v52 = vpack.c.bf16 %v54_v46, %v50_v45  ;;  %v522_v53 = vpack.c.bf16 %v61_v48, %v57_v47  ;;  %v56_v54 = vld [vmem:[%s859_s1 + $0x100] sm:$0xff]  ;;  %v58_v56 = vld [vmem:[%s859_s1 + $0x110] sm:$0xff]  ;;  %v554_v57 = vpack.c.bf16 %v63_v51, %v59_v50  ;;  %v65_v59 = vld [vmem:[%s859_s1 + $0x148] sm:$0xff]  ;;  %v589_v48 = vmov 0  }
   0xe   :  { %517 = vmatpush1.bf16.msra.mxu0 %v516_v34  ;;  %v60_v55 = vld [vmem:[%s859_s1 + $0x120] sm:$0xff]  ;;  %v62_v58 = vld [vmem:[%s859_s1 + $0x130] sm:$0xff]  ;;  %v69_v60 = vld [vmem:[%s859_s1 + $0x168] sm:$0xff]  ;;  %573 = vset.pattern.permute.xlu0 %v589_v48 }
   0xf   :  { %549 = vmatpush1.bf16.msra.mxu1 %v548_v39  ;;  %519 = vmatprep.subr.bf16.mxu0 %v518_v40  ;;  %v67_v61 = vld [vmem:[%s859_s1 + $0x158] sm:$0xff]  ;;  %v524_v63 = vpack.c.bf16 %v60_v55, %v56_v54  ;;  %v556_v0 = vpack.c.bf16 %v62_v58, %v58_v56  ;;  %v526_v1 = vpack.c.bf16 %v69_v60, %v65_v59  ;;  %v64_v2 = vld [vmem:[%s859_s1 + $0x140] sm:$0xff]  ;;  %v66_v5 = vld [vmem:[%s859_s1 + $0x150] sm:$0xff] }
  0x10   :  { %551 = vmatprep.subr.bf16.mxu1 %v550_v44  ;;  %v71_v62 = vld [vmem:[%s859_s1 + $0x178] sm:$0xff]  ;;  %v68_v4 = vld [vmem:[%s859_s1 + $0x160] sm:$0xff]  ;;  %v70_v7 = vld [vmem:[%s859_s1 + $0x170] sm:$0xff]  ;;  %574 = vset.pattern.permute.xlu1 %v589_v48 }
  0x11   :  { %v558_v6 = vpack.c.bf16 %v71_v62, %v67_v61  ;;  %v73_v8 = vld [vmem:[%s859_s1 + $0x188] sm:$0xff]  ;;  %v75_v10 = vld [vmem:[%s859_s1 + $0x198] sm:$0xff]  ;;  %v528_v12 = vpack.c.bf16 %v68_v4, %v64_v2  ;;  %v560_v13 = vpack.c.bf16 %v70_v7, %v66_v5  ;;  %v72_v15 = vld [vmem:[%s859_s1 + $0x180] sm:$0xff] }
  0x12   :  { %521 = vmatpush1.bf16.msra.mxu0 %v520_v49  ;;  %v77_v9 = vld [vmem:[%s859_s1 + $0x1a8] sm:$0xff]  ;;  %v79_v11 = vld [vmem:[%s859_s1 + $0x1b8] sm:$0xff]  ;;  %v76_v16 = vld [vmem:[%s859_s1 + $0x1a0] sm:$0xff] }
  0x13   :  { %553 = vmatpush1.bf16.msra.mxu1 %v552_v52  ;;  %523 = vmatprep.subr.bf16.mxu0 %v522_v53  ;;  %v530_v14 = vpack.c.bf16 %v77_v9, %v73_v8  ;;  %v74_v17 = vld [vmem:[%s859_s1 + $0x190] sm:$0xff]  ;;  %v562_v18 = vpack.c.bf16 %v79_v11, %v75_v10  ;;  %v81_v20 = vld [vmem:[%s859_s1 + $0x1c8] sm:$0xff]  ;;  %v83_v22 = vld [vmem:[%s859_s1 + $0x1d8] sm:$0xff]  ;;  %v532_v24 = vpack.c.bf16 %v76_v16, %v72_v15 }
  0x14   :  { %555 = vmatprep.subr.bf16.mxu1 %v554_v57  ;;  %v78_v19 = vld [vmem:[%s859_s1 + $0x1b0] sm:$0xff]  ;;  %v85_v21 = vld [vmem:[%s859_s1 + $0x1e8] sm:$0xff]  ;;  %v87_v23 = vld [vmem:[%s859_s1 + $0x1f8] sm:$0xff] }
  0x15   :  { %v564_v25 = vpack.c.bf16 %v78_v19, %v74_v17  ;;  %v534_v26 = vpack.c.bf16 %v85_v21, %v81_v20  ;;  %v80_v27 = vld [vmem:[%s859_s1 + $0x1c0] sm:$0xff]  ;;  %v566_v29 = vpack.c.bf16 %v87_v23, %v83_v22  ;;  %v82_v30 = vld [vmem:[%s859_s1 + $0x1d0] sm:$0xff] }
  0x16   :  { %525 = vmatpush1.bf16.msra.mxu0 %v524_v63  ;;  %v84_v28 = vld [vmem:[%s859_s1 + $0x1e0] sm:$0xff]  ;;  %v86_v31 = vld [vmem:[%s859_s1 + $0x1f0] sm:$0xff] }
  0x17   :  { %557 = vmatpush1.bf16.msra.mxu1 %v556_v0  ;;  %527 = vmatprep.subr.bf16.mxu0 %v526_v1  ;;  %v536_v32 = vpack.c.bf16 %v84_v28, %v80_v27  ;;  %v568_v33 = vpack.c.bf16 %v86_v31, %v82_v30  ;;  %v23_v34 = vld [vmem:[%s860_s0] sm:$0xf]  ;;  %v455_v30 = vld [vmem:[%s864_s5 + $0x8] sm:$0xff] }
  0x18   :  { %559 = vmatprep.subr.bf16.mxu1 %v558_v6  ;;  %v88_v46 = vld [vmem:[%s861_s2] sm:$0xf] }
  0x19   :  { %v89_v9 = vld [vmem:[%s862_s3] sm:$0xf] }
  0x1a   :  { %529 = vmatpush1.bf16.msra.mxu0 %v528_v12  ;;  %v90_v12 = vld [vmem:[%s863_s4] sm:$0xf] }
  0x1b   :  { %561 = vmatpush1.bf16.msra.mxu1 %v560_v13  ;;  %531 = vmatprep.subr.bf16.mxu0 %v530_v14  ;;  %v454_v27 = vld [vmem:[%s864_s5] sm:$0xff] }
  0x1c   :  { %563 = vmatprep.subr.bf16.mxu1 %v562_v18 }
  0x1e   :  { %533 = vmatpush1.bf16.msra.mxu0 %v532_v24 }
  0x1f   :  { %565 = vmatpush1.bf16.msra.mxu1 %v564_v25  ;;  %535 = vmatprep.subr.bf16.mxu0 %v534_v26 }
  0x20   :  { %567 = vmatprep.subr.bf16.mxu1 %v566_v29 }
  0x22   :  { %537 = vmatpush1.bf16.msra.mxu0 %v536_v32 }
  0x23   :  { %569 = vmatpush1.bf16.msra.mxu1 %v568_v33  ;;  %496 = vmatprep.subr.mxu0 %v587_v3  ;;  %v458_v33 = vcombine.high %v454_v27, %v454_v27 }
  0x24   :  { %501 = vmatprep.subr.mxu1 %v587_v3 }
  0x25   :  { %156 = vmatmul.mubr.f32.vlgmr.msra.gmra.mrb[0].mxu0 %v23_v34 }
  0x26   :  { %227 = vmatmul.mubr.f32.vlgmr.msra.gmra.mrb[0].mxu1 %v23_v34  ;;  %498 = vmatprep.mubr.msk.f32.mxu0 %vm588_vm1, %v587_v3 }
  0x27   :  { %503 = vmatprep.mubr.msk.f32.mxu1 %vm588_vm1, %v587_v3 }
  0xf8   :  { %v157_v35 = vpop.f32.mrb[0].mxu0 }
  0xf9   :  { %v234_v36 = vsel %vm233_vm0, %v157_v35, 0.0  ;;  %v159_v37 = vpop.f32.mrb[1].mxu0  ;;  %v228_v38 = vpop.f32.mrb[0].mxu1 }
  0xfa   :  { %v235_v39 = vsel %vm233_vm0, %v159_v37, 0.0  ;;  %v237_v40 = vsel %vm233_vm0, %v228_v38, 0.0  ;;  %v230_v41 = vpop.f32.mrb[1].mxu1 }
  0xfb   :  { %v236_v42 = vadd.f32 %v235_v39, %v234_v36  ;;  %v239_v44 = vsel %vm233_vm0, %v230_v41, 0.0 }
  0xfd   :  { %v238_v43 = vadd.f32 %v237_v40, %v236_v42 }
  0xff   :  { %v240_v45 = vadd.f32 %v239_v44, %v238_v43 }
 0x101   :  { %241 = vadd.xlane.f32.xlu0 %v240_v45 }
 0x18e   :  { %v242_v47 = vpop.xlane.xlu0 %241 }
 0x18f   :  { %497 = vmatpush3.msk.msra.mxu0 %vm233_vm0, %v242_v47 }
 0x190   :  { %499 = vmatmul.mubr.msk.f32.vlgmr.msra.gmra.mrb[2].mxu0 %vm243_vm2, %v88_v46 }
 0x263   :  { %v316_v49 = vpop.f32.mrb[2].mxu0 }
 0x264   :  { %v320_v50 = vmul.f32 0.00048828125, %v316_v49  ;;  %v500_v51 = vpop.f32.mrb[3].mxu0 }
 0x266   :  { %323 = vperm.xlu0 %573, %v320_v50  }
 0x2e5   :  { %v324_v52 = vpop.permute.xlu0 %323 }
 0x2e6   :  { %v326_v53 = vsub.f32 %v157_v35, %v324_v52  ;;  %v327_v3 = vsub.f32 %v159_v37, %v324_v52  ;;  %v328_v54 = vsub.f32 %v228_v38, %v324_v52  ;;  %v329_v55 = vsub.f32 %v230_v41, %v324_v52 }
 0x2e7   :  { %v459_v38 = vcombine.high %v455_v30, %v455_v30 }
 0x2e8   :  { %v330_v56 = vmul.f32 %v326_v53, %v326_v53  ;;  %v331_v57 = vmul.f32 %v327_v3, %v327_v3  ;;  %v332_v58 = vmul.f32 %v328_v54, %v328_v54  ;;  %v333_v59 = vmul.f32 %v329_v55, %v329_v55 }
 0x2ea   :  { %v334_v60 = vsel %vm233_vm0, %v330_v56, 0.0  ;;  %v335_v61 = vsel %vm233_vm0, %v331_v57, 0.0  ;;  %v337_v63 = vsel %vm233_vm0, %v332_v58, 0.0  ;;  %v339_v1 = vsel %vm233_vm0, %v333_v59, 0.0 }
 0x2eb   :  { %v336_v62 = vadd.f32 %v335_v61, %v334_v60 }
 0x2ed   :  { %v338_v0 = vadd.f32 %v337_v63, %v336_v62 }
 0x2ef   :  { %v340_v2 = vadd.f32 %v339_v1, %v338_v0 }
 0x2f1   :  { %341 = vadd.xlane.f32.xlu1 %v340_v2 }
 0x37e   :  { %v342_v4 = vpop.xlane.xlu1 %341 }
 0x37f   :  { %502 = vmatpush3.msk.msra.mxu1 %vm233_vm0, %v342_v4 }
 0x380   :  { %504 = vmatmul.mubr.msk.f32.vlgmr.msra.gmra.mrb[2].mxu1 %vm243_vm2, %v88_v46 }
 0x453   :  { %v412_v5 = vpop.f32.mrb[2].mxu1 }
 0x454   :  { %v416_v6 = vmul.f32 0.00048828125, %v412_v5  ;;  %v505_v7 = vpop.f32.mrb[3].mxu1 }
 0x456   :  { %v417_v8 = vadd.f32 1e-05, %v416_v6 }
 0x458   :  { %577 = vrsqrt.f32 %v417_v8 }
 0x462   :  { %v578_v10 = vpop.eup %577 }
 0x463   :  { %v419_v11 = vmul.f32 %v578_v10, %v89_v9 }
 0x465   :  { %422 = vperm.xlu1 %574, %v419_v11  }
 0x469   :  { %431 = vperm.xlu1 %574, %v90_v12  }
 0x4e4   :  { %v423_v13 = vpop.permute.xlu1 %422 }
 0x4e5   :  { %v425_v14 = vmul.f32 %v423_v13, %v326_v53  ;;  %v426_v15 = vmul.f32 %v423_v13, %v327_v3  ;;  %v427_v16 = vmul.f32 %v423_v13, %v328_v54  ;;  %v428_v17 = vmul.f32 %v423_v13, %v329_v55 }
 0x4e8   :  { %v432_v18 = vpop.permute.xlu1 %431 }
 0x4e9   :  { %v434_v19 = vadd.f32 %v432_v18, %v425_v14  ;;  %v435_v20 = vadd.f32 %v432_v18, %v426_v15  ;;  %v436_v21 = vadd.f32 %v432_v18, %v427_v16  ;;  %v437_v22 = vadd.f32 %v432_v18, %v428_v17 }
 0x4eb   :  { %v438_v23 = vmax.f32 %v434_v19, 0.0  ;;  %v439_v24 = vmax.f32 %v435_v20, 0.0  ;;  %v440_v25 = vmax.f32 %v436_v21, 0.0  ;;  %v441_v26 = vmax.f32 %v437_v22, 0.0 }
 0x4ed   :  { %579 = vtanh.f32 %v438_v23 }
 0x4ee   :  { %581 = vtanh.f32 %v439_v24 }
 0x4ef   :  { %583 = vtanh.f32 %v440_v25 }
 0x4f0   :  { %585 = vtanh.f32 %v441_v26 }
 0x4f7   :  { %v580_v28 = vpop.eup %579 }
 0x4f8   :  { %v582_v29 = vpop.eup %581  ;;  %v446_v31 = vmul.f32 0.5, %v580_v28 }
 0x4f9   :  { %v584_v32 = vpop.eup %583  ;;  %v447_v34 = vmul.f32 0.5, %v582_v29 }
 0x4fa   :  { %v586_v35 = vpop.eup %585  ;;  %v448_v36 = vmul.f32 0.5, %v584_v32  ;;  %v450_v37 = vadd.f32 0.5, %v446_v31 }
 0x4fb   :  { %v449_v39 = vmul.f32 0.5, %v586_v35  ;;  %v451_v40 = vadd.f32 0.5, %v447_v34 }
 0x4fc   :  { %v452_v41 = vadd.f32 0.5, %v448_v36  ;;  %v462_v42 = vadd.f32 %v454_v27, %v450_v37 }
 0x4fd   :  { %v453_v43 = vadd.f32 0.5, %v449_v39  ;;  %v463_v44 = vadd.f32 %v458_v33, %v451_v40 }
 0x4fe   :  { %v464_v45 = vadd.f32 %v455_v30, %v452_v41  ;;  %v466_v46 = vmax.f32 %v462_v42, 0.0 }
 0x4ff   :  { %v465_v47 = vadd.f32 %v459_v38, %v453_v43  ;;  %v467_v48 = vmax.f32 %v463_v44, 0.0 }
 0x500   :  { %v468_v49 = vmax.f32 %v464_v45, 0.0  ;;  %v470_v50 = vmin.f32 %v466_v46, 1.0 }
 0x501   :  { %v469_v51 = vmax.f32 %v465_v47, 0.0  ;;  %v471_v52 = vmin.f32 %v467_v48, 1.0 }
 0x502   :  { %v472_v53 = vmin.f32 %v468_v49, 1.0 }
 0x503   :  { %v473_v3 = vmin.f32 %v469_v51, 1.0  ;;  %v478_v54 = vcombine.low %v470_v50, %v471_v52 }
 0x505   :  { %v479_v55 = vcombine.low %v472_v53, %v473_v3  ;;  %482 = vst [vmem:[%s865_s6] sm:$0xff] %v478_v54 }
 0x507   :  { %483 = vst [vmem:[%s865_s6 + $0x8] sm:$0xff] %v479_v55 }

</bundles_post_ra>
